<compile_context>
chip_gen: v6e
topology: v6e:2x2x1
jax: 0.10.0
libtpu: 0.0.40
codegen_flags: <defaults>
</compile_context>

<pallas_src>
import functools

import jax
import jax.numpy as jnp
from jax.experimental import pallas as pl
from jax.experimental.pallas import tpu as pltpu


# ----------------------------------------------------------------------------
# helpers
# ----------------------------------------------------------------------------

_SEQ_ALIGN = 128                      # lane-dense (L, L) attention scores: 77->128, 257->384
_VMEM_LIMIT = 64 * 1024 * 1024        # explicit scoped-VMEM cap (re-derived budget fits v7x)

_ROW_TILES = (512, 256, 128, 64, 32, 16, 8)        # sublane-dim tiles (multiples of 8)
_LN_ROW_TILES = (256, 128, 64, 32, 16, 8)          # whole-K x block stays resident -> moderate rows
_LANE_TILES = (512, 256, 128)                      # lane-dim tiles (multiples of 128)
_K_TILES = (1024, 512, 256, 128)


def _round_up(x, m):
    return ((x + m - 1) // m) * m


def _pick_tile(dim, candidates):
    """Largest candidate dividing `dim`, else the full dim (full-dim blocks always
    satisfy the (8,128) tiling constraint)."""
    for c in candidates:
        if dim % c == 0:
            return c
    return dim


# ----------------------------------------------------------------------------
# Kernel 1: tiled bf16 matmul (+bias, optional QuickGELU, optional fused residual add)
# ----------------------------------------------------------------------------

def _matmul_kernel(x_ref, w_ref, b_ref, *rest, activation, has_residual):
    if has_residual:
        r_ref, o_ref, acc_ref = rest
    else:
        o_ref, acc_ref = rest

    @pl.when(pl.program_id(2) == 0)
    def _init():
        acc_ref[...] = jnp.zeros_like(acc_ref)

    acc_ref[...] += jnp.dot(x_ref[...], w_ref[...],
                            preferred_element_type=jnp.float32)

    @pl.when(pl.program_id(2) == pl.num_programs(2) - 1)
    def _store():
        y = acc_ref[...] + b_ref[...]
        if activation == "quick_gelu":
            y = y * jax.nn.sigmoid(1.702 * y)          # EUP epilogue on f32 accumulator
        if has_residual:
            y = y + r_ref[...].astype(jnp.float32)     # residual add fused into epilogue
        o_ref[...] = y.astype(o_ref.dtype)


def pallas_matmul(x, w, b=None, *, residual=None, activation=None,
                  out_dtype=jnp.bfloat16):
    """y = act(x @ w + b) [+ residual]; bf16 MXU inputs, f32 accumulation, K-pipelined."""
    M, K = x.shape
    K2, N = w.shape
    assert K == K2
    bb = (jnp.zeros((1, N), jnp.float32) if b is None
          else b.reshape(1, N).astype(jnp.float32))
    tm = _pick_tile(M, _ROW_TILES)
    tn = _pick_tile(N, _LANE_TILES)
    tk = _pick_tile(K, _K_TILES)
    in_specs = [
        pl.BlockSpec((tm, tk), lambda i, j, k: (i, k)),
        pl.BlockSpec((tk, tn), lambda i, j, k: (k, j)),
        pl.BlockSpec((1, tn), lambda i, j, k: (0, j)),
    ]
    args = [x.astype(jnp.bfloat16), w.astype(jnp.bfloat16), bb]
    if residual is not None:
        in_specs.append(pl.BlockSpec((tm, tn), lambda i, j, k: (i, j)))
        args.append(residual.astype(jnp.bfloat16))
    kern = functools.partial(_matmul_kernel, activation=activation,
                             has_residual=residual is not None)
    return pl.pallas_call(
        kern,
        out_shape=jax.ShapeDtypeStruct((M, N), out_dtype),
        grid=(M // tm, N // tn, K // tk),
        in_specs=in_specs,
        out_specs=pl.BlockSpec((tm, tn), lambda i, j, k: (i, j)),
        scratch_shapes=[pltpu.VMEM((tm, tn), jnp.float32)],
        compiler_params=pltpu.CompilerParams(
            dimension_semantics=("parallel", "parallel", "arbitrary"),
            vmem_limit_bytes=_VMEM_LIMIT),
    )(*args)


# ----------------------------------------------------------------------------
# Kernel 2: LayerNorm fused into a matmul; normalized rows cached in VMEM scratch
# and reused for every N tile of the row block (LN only computed when j == 0).
# ----------------------------------------------------------------------------

def _ln_matmul_kernel(x_ref, g_ref, beta_ref, w_ref, b_ref, o_ref, xn_ref, *,
                      activation):
    @pl.when(pl.program_id(1) == 0)
    def _normalize():
        x = x_ref[...].astype(jnp.float32)             # bf16 in, LN math in f32
        mu = jnp.mean(x, axis=-1, keepdims=True)
        xc = x - mu
        var = jnp.mean(xc * xc, axis=-1, keepdims=True)
        xn_ref[...] = (xc * jax.lax.rsqrt(var + 1e-5) * g_ref[...]
                       + beta_ref[...]).astype(jnp.bfloat16)

    y = jnp.dot(xn_ref[...], w_ref[...],
                preferred_element_type=jnp.float32) + b_ref[...]
    if activation == "quick_gelu":
        y = y * jax.nn.sigmoid(1.702 * y)
    o_ref[...] = y.reshape(o_ref.shape).astype(o_ref.dtype)


def pallas_ln_matmul(x, gamma, beta, w, b=None, *, activation=None,
                     out_dtype=jnp.bfloat16):
    M, K = x.shape
    K2, N = w.shape
    assert K == K2
    bb = (jnp.zeros((1, N), jnp.float32) if b is None
          else b.reshape(1, N).astype(jnp.float32))
    tm = _pick_tile(M, _LN_ROW_TILES)
    tn = _pick_tile(N, _LANE_TILES)
    kern = functools.partial(_ln_matmul_kernel, activation=activation)
    return pl.pallas_call(
        kern,
        out_shape=jax.ShapeDtypeStruct((M, N), out_dtype),
        grid=(M // tm, N // tn),
        in_specs=[
            pl.BlockSpec((tm, K), lambda i, j: (i, 0)),
            pl.BlockSpec((1, K), lambda i, j: (0, 0)),
            pl.BlockSpec((1, K), lambda i, j: (0, 0)),
            pl.BlockSpec((K, tn), lambda i, j: (0, j)),
            pl.BlockSpec((1, tn), lambda i, j: (0, j)),
        ],
        out_specs=pl.BlockSpec((tm, tn), lambda i, j: (i, j)),
        scratch_shapes=[pltpu.VMEM((tm, K), jnp.bfloat16)],
        # j marked "arbitrary" so megacore only splits the row axis and every core's
        # N sweep starts at j == 0 (required for the LN scratch cache).
        compiler_params=pltpu.CompilerParams(
            dimension_semantics=("parallel", "arbitrary"),
            vmem_limit_bytes=_VMEM_LIMIT),
    )(x.astype(jnp.bfloat16), gamma.reshape(1, K).astype(jnp.float32),
      beta.reshape(1, K).astype(jnp.float32), w.astype(jnp.bfloat16), bb)


# ----------------------------------------------------------------------------
# Kernel 3: LayerNorm fused into the packed QKV projection, output (3, M, W)
# so the attention kernel can BlockSpec-slice q/k/v head-groups directly.
# qkv weights are stored (3, K, W) with the 1/sqrt(dh) scale pre-folded into part 0.
# ----------------------------------------------------------------------------

def _ln_qkv_kernel(x_ref, g_ref, beta_ref, w_ref, b_ref, o_ref, xn_ref):
    @pl.when(jnp.logical_and(pl.program_id(1) == 0, pl.program_id(2) == 0))
    def _normalize():
        x = x_ref[...].astype(jnp.float32)
        mu = jnp.mean(x, axis=-1, keepdims=True)
        xc = x - mu
        var = jnp.mean(xc * xc, axis=-1, keepdims=True)
        xn_ref[...] = (xc * jax.lax.rsqrt(var + 1e-5) * g_ref[...]
                       + beta_ref[...]).astype(jnp.bfloat16)

    y = jnp.dot(xn_ref[...], w_ref[0],
                preferred_element_type=jnp.float32) + b_ref[0]
    o_ref[0] = y.astype(o_ref.dtype)


def pallas_ln_qkv(x, gamma, beta, wqkv, bqkv, *, out_dtype=jnp.bfloat16):
    M, K = x.shape
    _, K2, W = wqkv.shape
    assert K == K2
    tm = _pick_tile(M, _LN_ROW_TILES)
    tn = _pick_tile(W, _LANE_TILES)
    return pl.pallas_call(
        _ln_qkv_kernel,
        out_shape=jax.ShapeDtypeStruct((3, M, W), out_dtype),
        grid=(M // tm, 3, W // tn),
        in_specs=[
            pl.BlockSpec((tm, K), lambda i, p, c: (i, 0)),
            pl.BlockSpec((1, K), lambda i, p, c: (0, 0)),
            pl.BlockSpec((1, K), lambda i, p, c: (0, 0)),
            pl.BlockSpec((1, K, tn), lambda i, p, c: (p, 0, c)),
            pl.BlockSpec((1, 1, tn), lambda i, p, c: (p, 0, c)),
        ],
        out_specs=pl.BlockSpec((1, tm, tn), lambda i, p, c: (p, i, c)),
        scratch_shapes=[pltpu.VMEM((tm, K), jnp.bfloat16)],
        compiler_params=pltpu.CompilerParams(
            dimension_semantics=("parallel", "arbitrary", "arbitrary"),
            vmem_limit_bytes=_VMEM_LIMIT),
    )(x.astype(jnp.bfloat16), gamma.reshape(1, K).astype(jnp.float32),
      beta.reshape(1, K).astype(jnp.float32),
      wqkv.astype(jnp.bfloat16), bqkv.reshape(3, 1, W).astype(jnp.float32))


# ----------------------------------------------------------------------------
# Kernel 4: standalone LayerNorm (ln_pre), bf16 in / bf16 out, LN math in f32
# ----------------------------------------------------------------------------

def _ln_kernel(x_ref, g_ref, b_ref, o_ref):
    x = x_ref[...].astype(jnp.float32)
    mu = jnp.mean(x, axis=-1, keepdims=True)
    xc = x - mu
    var = jnp.mean(xc * xc, axis=-1, keepdims=True)
    o_ref[...] = (xc * jax.lax.rsqrt(var + 1e-5) * g_ref[...]
                  + b_ref[...]).astype(o_ref.dtype)


def pallas_layernorm(x, gamma, beta, *, out_dtype=jnp.bfloat16):
    M, D = x.shape
    tm = _pick_tile(M, _ROW_TILES)
    return pl.pallas_call(
        _ln_kernel,
        out_shape=jax.ShapeDtypeStruct((M, D), out_dtype),
        grid=(M // tm,),
        in_specs=[
            pl.BlockSpec((tm, D), lambda i: (i, 0)),
            pl.BlockSpec((1, D), lambda i: (0, 0)),
            pl.BlockSpec((1, D), lambda i: (0, 0)),
        ],
        out_specs=pl.BlockSpec((tm, D), lambda i: (i, 0)),
        compiler_params=pltpu.CompilerParams(
            dimension_semantics=("parallel",), vmem_limit_bytes=_VMEM_LIMIT),
    )(x.astype(jnp.bfloat16), gamma.reshape(1, D).astype(jnp.float32),
      beta.reshape(1, D).astype(jnp.float32))


# ----------------------------------------------------------------------------
# Kernel 5: multi-head attention, grid = (batch, head_groups).
# Consumes the (3, B, Lp, W) qkv slab; each grid step DMAs only its head group.
# Padded keys (and causality, for text) are masked via iota; per-head outputs are
# written straight into the output block (no concatenate).
# ----------------------------------------------------------------------------

def _attn_kernel(qkv_ref, o_ref, *, hpg, dh, causal, valid_len):
    Lp = qkv_ref.shape[2]
    keep = None
    if causal or valid_len < Lp:
        ki = jax.lax.broadcasted_iota(jnp.int32, (Lp, Lp), 1)
        keep = ki < valid_len                              # mask padded keys
        if causal:
            qi = jax.lax.broadcasted_iota(jnp.int32, (Lp, Lp), 0)
            keep = jnp.logical_and(keep, ki <= qi)

    for h in range(hpg):                                   # <= 2 heads per group
        lo, hi = h * dh, (h + 1) * dh
        q = qkv_ref[0, 0, :, lo:hi]                        # (Lp, dh) bf16, scale pre-folded
        k = qkv_ref[1, 0, :, lo:hi]
        v = qkv_ref[2, 0, :, lo:hi]
        s = jax.lax.dot_general(q, k, (((1,), (1,)), ((), ())),
                                preferred_element_type=jnp.float32)
        if keep is not None:
            s = jnp.where(keep, s, -1e30)
        s = s - jnp.max(s, axis=-1, keepdims=True)
        p = jnp.exp(s)
        # NOTE: approx reciprocal on EUP -> tiny relative error vs exact divide.
        p = p * pl.reciprocal(jnp.sum(p, axis=-1, keepdims=True), approx=True)
        o = jnp.dot(p.astype(jnp.bfloat16), v, preferred_element_type=jnp.float32)
        o_ref[0, :, lo:hi] = o.astype(o_ref.dtype)


def pallas_attention(qkv3, *, heads, causal, valid_len):
    _, B, Lp, W = qkv3.shape
    dh = W // heads
    hpg = min(heads, max(1, 128 // dh))                    # aim for 128-lane head groups
    while heads % hpg:
        hpg -= 1
    G = hpg * dh
    kern = functools.partial(_attn_kernel, hpg=hpg, dh=dh, causal=causal,
                             valid_len=valid_len)
    return pl.pallas_call(
        kern,
        out_shape=jax.ShapeDtypeStruct((B, Lp, W), jnp.bfloat16),
        grid=(B, heads // hpg),
        in_specs=[pl.BlockSpec((3, 1, Lp, G), lambda b, g: (0, b, 0, g))],
        out_specs=pl.BlockSpec((1, Lp, G), lambda b, g: (b, 0, g)),
        compiler_params=pltpu.CompilerParams(
            dimension_semantics=("parallel", "parallel"),
            vmem_limit_bytes=_VMEM_LIMIT),
    )(qkv3)


# ----------------------------------------------------------------------------
# Kernel 6: contrastive logits (normalize + scaled img @ txt^T), logit_scale in SMEM
# ----------------------------------------------------------------------------

def _logits_kernel(s_ref, img_ref, txt_ref, o_ref):
    img = img_ref[...].astype(jnp.float32)
    txt = txt_ref[...].astype(jnp.float32)
    img = img * jax.lax.rsqrt(jnp.sum(img * img, axis=-1, keepdims=True) + 1e-12)
    txt = txt * jax.lax.rsqrt(jnp.sum(txt * txt, axis=-1, keepdims=True) + 1e-12)
    li = jax.lax.dot_general(img, txt, (((1,), (1,)), ((), ())),
                             preferred_element_type=jnp.float32)
    o_ref[...] = s_ref[0] * li


def pallas_clip_logits(img_f, txt_f, logit_scale):
    B, D = img_f.shape
    tb = _pick_tile(B, (256, 128))
    return pl.pallas_call(
        _logits_kernel,
        out_shape=jax.ShapeDtypeStruct((B, B), jnp.float32),
        grid=(B // tb, B // tb),
        in_specs=[
            pl.BlockSpec(memory_space=pltpu.MemorySpace.SMEM),     # scalar logit_scale
            pl.BlockSpec((tb, D), lambda i, j: (i, 0)),
            pl.BlockSpec((tb, D), lambda i, j: (j, 0)),
        ],
        out_specs=pl.BlockSpec((tb, tb), lambda i, j: (i, j)),
        compiler_params=pltpu.CompilerParams(
            dimension_semantics=("parallel", "parallel"),
            vmem_limit_bytes=_VMEM_LIMIT),
    )(logit_scale.reshape(1).astype(jnp.float32),
      img_f.astype(jnp.float32), txt_f.astype(jnp.float32))


# ----------------------------------------------------------------------------
# Parameter init (synthetic, deterministic). Weights are emitted already "prepared":
# bf16 weights, f32 biases / LN params, qkv stored (3, K, W) with 1/sqrt(dh) folded
# into the q projection (exact: LN precedes this matmul).
# ----------------------------------------------------------------------------

def _normal(key, shape, std):
    return std * jax.random.normal(key, shape, dtype=jnp.float32)


def _init_block(key, width, heads):
    ks = jax.random.split(key, 4)
    s = width ** -0.5
    scale = (width // heads) ** -0.5
    qkv_w = _normal(ks[0], (3, width, width), s)
    qkv_w = qkv_w.at[0].multiply(scale)                    # fold attention scale into q
    return dict(
        ln1_w=jnp.ones((width,), jnp.float32), ln1_b=jnp.zeros((width,), jnp.float32),
        ln2_w=jnp.ones((width,), jnp.float32), ln2_b=jnp.zeros((width,), jnp.float32),
        qkv_w=qkv_w.astype(jnp.bfloat16),
        qkv_b=jnp.zeros((3, width), jnp.float32),
        out_w=_normal(ks[1], (width, width), s).astype(jnp.bfloat16),
        out_b=jnp.zeros((width,), jnp.float32),
        fc_w=_normal(ks[2], (width, 4 * width), s).astype(jnp.bfloat16),
        fc_b=jnp.zeros((4 * width,), jnp.float32),
        cproj_w=_normal(ks[3], (4 * width, width), s).astype(jnp.bfloat16),
        cproj_b=jnp.zeros((width,), jnp.float32),
    )


def _init_vit(key, in_ch, width, layers, heads, patch, res, out_dim):
    n_patches = (res // patch) ** 2
    keys = jax.random.split(key, 4 + layers)
    sc = width ** -0.5
    return dict(
        conv_w=_normal(keys[0], (in_ch * patch * patch, width), sc).astype(jnp.bfloat16),
        cls=_normal(keys[1], (width,), sc).astype(jnp.bfloat16),
        pos=_normal(keys[2], (n_patches + 1, width), sc).astype(jnp.bfloat16),
        ln_pre_w=jnp.ones((width,), jnp.float32), ln_pre_b=jnp.zeros((width,), jnp.float32),
        ln_post_w=jnp.ones((width,), jnp.float32), ln_post_b=jnp.zeros((width,), jnp.float32),
        proj=_normal(keys[3], (width, out_dim), sc).astype(jnp.bfloat16),
        blocks=[_init_block(k, width, heads) for k in keys[4:]],
    )


def _init_text(key, vocab, ctx, width, layers, heads, out_dim):
    keys = jax.random.split(key, 3 + layers)
    return dict(
        tok_emb=_normal(keys[0], (vocab, width), 0.02).astype(jnp.bfloat16),
        pos=_normal(keys[1], (ctx, width), 0.01).astype(jnp.bfloat16),
        ln_final_w=jnp.ones((width,), jnp.float32),
        ln_final_b=jnp.zeros((width,), jnp.float32),
        text_proj=_normal(keys[2], (width, out_dim), width ** -0.5).astype(jnp.bfloat16),
        blocks=[_init_block(k, width, heads) for k in keys[3:]],
    )


def init_clip(key, cfg):
    kv, kd, kt = jax.random.split(key, 3)
    return dict(
        visual=_init_vit(kv, 3, cfg["v_width"], cfg["v_layers"], cfg["v_heads"],
                         cfg["patch"], cfg["res"], cfg["embed_dim"]),
        depth=_init_vit(kd, 1, cfg["v_width"], cfg["v_layers"], cfg["v_heads"],
                        cfg["patch"], cfg["res"], cfg["embed_dim"]),
        text=_init_text(kt, cfg["vocab"], cfg["ctx"], cfg["t_width"],
                        cfg["t_layers"], cfg["t_heads"], cfg["embed_dim"]),
        logit_scale=jnp.log(jnp.float32(1.0 / 0.07)),
    )


# ----------------------------------------------------------------------------
# Model glue: residual stream stays padded + bf16 for the whole encoder; all
# compute lives in the Pallas kernels above.
# ----------------------------------------------------------------------------

def _resblock(x, p, heads, causal, valid_len):
    B, Lp, W = x.shape
    M = B * Lp
    x2 = x.reshape(M, W)
    # attention path: LN1 fused into the QKV projection (q pre-scaled), packed (3,M,W)
    qkv3 = pallas_ln_qkv(x2, p["ln1_w"], p["ln1_b"], p["qkv_w"], p["qkv_b"])
    attn = pallas_attention(qkv3.reshape(3, B, Lp, W), heads=heads,
                            causal=causal, valid_len=valid_len)
    # out projection with the residual add fused into its epilogue
    x2 = pallas_matmul(attn.reshape(M, W), p["out_w"], p["out_b"], residual=x2)
    # MLP path: LN2 + fc + QuickGELU fused; cproj with fused residual add
    h = pallas_ln_matmul(x2, p["ln2_w"], p["ln2_b"], p["fc_w"], p["fc_b"],
                         activation="quick_gelu")
    x2 = pallas_matmul(h, p["cproj_w"], p["cproj_b"], residual=x2)
    return x2.reshape(B, Lp, W)


def encode_image(x, p, heads, patch):
    """x: (B, C, H, W) NCHW; conv1 (stride == kernel == patch) as a patch matmul."""
    B, C, H, Wd = x.shape
    gh, gw = H // patch, Wd // patch
    W = p["conv_w"].shape[-1]
    # TODO(synk): patch extraction kept as a one-time JAX relayout.
    patches = x.reshape(B, C, gh, patch, gw, patch).transpose(0, 2, 4, 1, 3, 5)
    patches = patches.reshape(B * gh * gw, C * patch * patch).astype(jnp.bfloat16)
    tok = pallas_matmul(patches, p["conv_w"])                      # conv bias = False
    tok = tok.reshape(B, gh * gw, W)
    cls = jnp.broadcast_to(p["cls"].reshape(1, 1, W), (B, 1, W))
    xt = jnp.concatenate([cls, tok], axis=1) + p["pos"][None]      # (B, L, W) bf16
    L = xt.shape[1]
    Lp = _round_up(L, _SEQ_ALIGN)
    xt = jnp.pad(xt, ((0, 0), (0, Lp - L), (0, 0)))                # pad ONCE, carry padded
    xres = pallas_layernorm(xt.reshape(B * Lp, W), p["ln_pre_w"], p["ln_pre_b"])
    xres = xres.reshape(B, Lp, W)
    for blk in p["blocks"]:
        xres = _resblock(xres, blk, heads, causal=False, valid_len=L)
    # ln_post + output projection fused, applied only to the (valid) CLS row
    x0 = xres[:, 0, :]
    return pallas_ln_matmul(x0, p["ln_post_w"], p["ln_post_b"], p["proj"],
                            out_dtype=jnp.float32)


def encode_text(tokens, p, heads):
    """tokens: (B, ctx) int32 token ids (pre-tokenized)."""
    B, L = tokens.shape
    W = p["tok_emb"].shape[-1]
    # TODO(synk): token-embedding gather + EOT gather stay as JAX takes.
    x = jnp.take(p["tok_emb"], tokens, axis=0) + p["pos"][None]    # (B, L, W) bf16
    Lp = _round_up(L, _SEQ_ALIGN)
    x = jnp.pad(x, ((0, 0), (0, Lp - L), (0, 0)))
    for blk in p["blocks"]:
        x = _resblock(x, blk, heads, causal=True, valid_len=L)
    eot = jnp.argmax(tokens, axis=-1)                              # CLIP EOT convention
    xe = x[jnp.arange(B), eot]                                     # (B, W) bf16
    # ln_final + text projection fused; row-wise LN == LN(all rows) then gather
    return pallas_ln_matmul(xe, p["ln_final_w"], p["ln_final_b"], p["text_proj"],
                            out_dtype=jnp.float32)


def clip_forward(params, image, tokens, depth_image, cfg):
    del depth_image
    img_f = encode_image(image, params["visual"], cfg["v_heads"], cfg["patch"])
    txt_f = encode_text(tokens, params["text"], cfg["t_heads"])
    # Reference adds `0.0 * normalized(depth_features)` which is exactly zero for any
    # finite depth embedding; the dead depth-encoder forward is dropped entirely
    # (perf feedback) instead of relying on XLA DCE.
    scale = jnp.exp(params["logit_scale"])
    logits_per_image = pallas_clip_logits(img_f, txt_f, scale)
    logits_per_text = logits_per_image.T
    return logits_per_image, logits_per_text


# ----------------------------------------------------------------------------

if __name__ == "__main__":
    cfg = dict(
        embed_dim=64,
        res=16, patch=8,
        v_width=64, v_layers=2, v_heads=64 // 64,        # vision_heads = width // 64
        ctx=8, t_width=64, t_layers=2, t_heads=2,
        vocab=512,
    )

    key = jax.random.PRNGKey(0)
    kp, ki, kd, kt = jax.random.split(key, 4)

    params = init_clip(kp, cfg)

    image = jax.random.normal(ki, (2, 3, cfg["res"], cfg["res"]), jnp.float32)
    depth_image = jax.random.normal(kd, (2, 1, cfg["res"], cfg["res"]), jnp.float32)
    tokens = jax.random.randint(kt, (2, cfg["ctx"]), 1, cfg["vocab"], dtype=jnp.int32)

    fwd = jax.jit(lambda p, im, tk, dp: clip_forward(p, im, tk, dp, cfg))
    logits_per_image, logits_per_text = fwd(params, image, tokens, depth_image)
    jax.block_until_ready((logits_per_image, logits_per_text))

    assert logits_per_image.shape == (2, 2) and logits_per_text.shape == (2, 2)
    assert bool(jnp.all(jnp.isfinite(logits_per_image)))
    print("KERNEL_OK")
</pallas_src>

<mosaic_0001>
module attributes {stable_mosaic.version = 11 : i64} {
  func.func @_matmul_kernel(%arg0: i32, %arg1: i32, %arg2: i32, %arg3: memref<8x192xbf16, #tpu.memory_space<vmem>>, %arg4: memref<192x64xbf16, #tpu.memory_space<vmem>>, %arg5: memref<1x64xf32, #tpu.memory_space<vmem>>, %arg6: memref<8x64xbf16, #tpu.memory_space<vmem>>, %arg7: memref<8x64xf32, #tpu.memory_space<vmem>>) attributes {dimension_semantics = [#tpu.dimension_semantics<parallel>, #tpu.dimension_semantics<parallel>, #tpu.dimension_semantics<arbitrary>], iteration_bounds = array<i64: 1, 1, 1>, scalar_prefetch = 0 : i64, scratch_operands = 1 : i64, tpu.core_type = #tpu.core_type<tc>, window_params = [{transform_indices = @transform_0, window_bounds = array<i64: 8, 192>}, {transform_indices = @transform_1, window_bounds = array<i64: 192, 64>}, {transform_indices = @transform_2, window_bounds = array<i64: 1, 64>}, {transform_indices = @transform_3, window_bounds = array<i64: 8, 64>}]} {
    %c0_i32 = arith.constant 0 : i32
    %0 = arith.cmpi eq, %arg2, %c0_i32 : i32
    %1 = arith.extui %0 : i1 to i32
    %c0_i32_0 = arith.constant 0 : i32
    %2 = arith.cmpi ne, %1, %c0_i32_0 : i32
    scf.if %2 {
      %cst_10 = arith.constant 0.000000e+00 : f32
      %12 = vector.broadcast %cst_10 : f32 to vector<8x64xf32>
      %c0_11 = arith.constant 0 : index
      %c0_12 = arith.constant 0 : index
      %13 = vector.load %arg7[%c0_11, %c0_12] : memref<8x64xf32, #tpu.memory_space<vmem>>, vector<8x64xf32>
      tpu.vector_store %arg7[%c0_11, %c0_12], %12 {strides = array<i32>} : memref<8x64xf32, #tpu.memory_space<vmem>>, vector<8x64xf32>,
    } else {
    }
    %c0 = arith.constant 0 : index
    %c0_1 = arith.constant 0 : index
    %3 = vector.load %arg7[%c0, %c0_1] : memref<8x64xf32, #tpu.memory_space<vmem>>, vector<8x64xf32>
    %c0_2 = arith.constant 0 : index
    %c0_3 = arith.constant 0 : index
    %4 = vector.load %arg3[%c0_2, %c0_3] : memref<8x192xbf16, #tpu.memory_space<vmem>>, vector<8x192xbf16>
    %c0_4 = arith.constant 0 : index
    %c0_5 = arith.constant 0 : index
    %5 = vector.load %arg4[%c0_4, %c0_5] : memref<192x64xbf16, #tpu.memory_space<vmem>>, vector<192x64xbf16>
    %cst = arith.constant dense<0.000000e+00> : vector<8x64xf32>
    %6 = tpu.matmul %4, %5, %cst {dimension_numbers = #tpu.dot_dimension_numbers<[1], [0], [0], [1], [0, 0, 1, 1], [], []>} : vector<8x192xbf16>, vector<192x64xbf16>, vector<8x64xf32> -> vector<8x64xf32>
    %7 = arith.addf %3, %6 : vector<8x64xf32>
    %c0_6 = arith.constant 0 : index
    %c0_7 = arith.constant 0 : index
    %8 = vector.load %arg7[%c0_6, %c0_7] : memref<8x64xf32, #tpu.memory_space<vmem>>, vector<8x64xf32>
    tpu.vector_store %arg7[%c0_6, %c0_7], %7 {strides = array<i32>} : memref<8x64xf32, #tpu.memory_space<vmem>>, vector<8x64xf32>,
    %c0_i32_8 = arith.constant 0 : i32
    %9 = arith.cmpi eq, %arg2, %c0_i32_8 : i32
    %10 = arith.extui %9 : i1 to i32
    %c0_i32_9 = arith.constant 0 : i32
    %11 = arith.cmpi ne, %10, %c0_i32_9 : i32
    scf.if %11 {
      %c0_10 = arith.constant 0 : index
      %c0_11 = arith.constant 0 : index
      %12 = vector.load %arg7[%c0_10, %c0_11] : memref<8x64xf32, #tpu.memory_space<vmem>>, vector<8x64xf32>
      %c0_12 = arith.constant 0 : index
      %c0_13 = arith.constant 0 : index
      %13 = vector.load %arg5[%c0_12, %c0_13] : memref<1x64xf32, #tpu.memory_space<vmem>>, vector<1x64xf32>
      %14 = vector.broadcast %13 : vector<1x64xf32> to vector<8x64xf32>
      %15 = arith.addf %12, %14 : vector<8x64xf32>
      %16 = arith.truncf %15 : vector<8x64xf32> to vector<8x64xbf16>
      %c0_14 = arith.constant 0 : index
      %c0_15 = arith.constant 0 : index
      %17 = vector.load %arg6[%c0_14, %c0_15] : memref<8x64xbf16, #tpu.memory_space<vmem>>, vector<8x64xbf16>
      tpu.vector_store %arg6[%c0_14, %c0_15], %16 {strides = array<i32>} : memref<8x64xbf16, #tpu.memory_space<vmem>>, vector<8x64xbf16>,
    } else {
    }
    return
  }
  func.func @transform_0(%arg0: i32, %arg1: i32, %arg2: i32) -> (i32, i32) {
    %c0_i32 = arith.constant 0 : i32
    return %arg0, %arg2 : i32, i32
  }
  func.func @transform_1(%arg0: i32, %arg1: i32, %arg2: i32) -> (i32, i32) {
    %c0_i32 = arith.constant 0 : i32
    return %arg2, %arg1 : i32, i32
  }
  func.func @transform_2(%arg0: i32, %arg1: i32, %arg2: i32) -> (i32, i32) {
    %c0_i32 = arith.constant 0 : i32
    %c0_i32_0 = arith.constant 0 : i32
    return %c0_i32, %arg1 : i32, i32
  }
  func.func @transform_3(%arg0: i32, %arg1: i32, %arg2: i32) -> (i32, i32) {
    %c0_i32 = arith.constant 0 : i32
    return %arg0, %arg1 : i32, i32
  }
}

module attributes {stable_mosaic.version = 11 : i64} {
  func.func @_ln_kernel(%arg0: i32, %arg1: memref<256x64xbf16, #tpu.memory_space<vmem>>, %arg2: memref<1x64xf32, #tpu.memory_space<vmem>>, %arg3: memref<1x64xf32, #tpu.memory_space<vmem>>, %arg4: memref<256x64xbf16, #tpu.memory_space<vmem>>) attributes {dimension_semantics = [#tpu.dimension_semantics<parallel>], iteration_bounds = array<i64: 1>, scalar_prefetch = 0 : i64, scratch_operands = 0 : i64, tpu.core_type = #tpu.core_type<tc>, window_params = [{transform_indices = @transform_0, window_bounds = array<i64: 256, 64>}, {pipeline_mode = #tpu.pipeline_mode<synchronous>, transform_indices = @transform_1, window_bounds = array<i64: 1, 64>}, {pipeline_mode = #tpu.pipeline_mode<synchronous>, transform_indices = @transform_2, window_bounds = array<i64: 1, 64>}, {transform_indices = @transform_3, window_bounds = array<i64: 256, 64>}]} {
    %c0 = arith.constant 0 : index
    %c0_0 = arith.constant 0 : index
    %0 = vector.load %arg1[%c0, %c0_0] : memref<256x64xbf16, #tpu.memory_space<vmem>>, vector<256x64xbf16>
    %1 = arith.extf %0 : vector<256x64xbf16> to vector<256x64xf32>
    %cst = arith.constant dense<0.000000e+00> : vector<256xf32>
    %2 = vector.multi_reduction <add>, %1, %cst [1] : vector<256x64xf32> to vector<256xf32>
    %3 = vector.shape_cast %2 : vector<256xf32> to vector<256x1xf32>
    %cst_1 = arith.constant 6.400000e+01 : f32
    %4 = vector.broadcast %cst_1 : f32 to vector<256x1xf32>
    %5 = arith.divf %3, %4 : vector<256x1xf32>
    %6 = vector.broadcast %5 : vector<256x1xf32> to vector<256x64xf32>
    %7 = arith.subf %1, %6 : vector<256x64xf32>
    %8 = arith.mulf %7, %7 : vector<256x64xf32>
    %cst_2 = arith.constant dense<0.000000e+00> : vector<256xf32>
    %9 = vector.multi_reduction <add>, %8, %cst_2 [1] : vector<256x64xf32> to vector<256xf32>
    %10 = vector.shape_cast %9 : vector<256xf32> to vector<256x1xf32>
    %cst_3 = arith.constant 6.400000e+01 : f32
    %11 = vector.broadcast %cst_3 : f32 to vector<256x1xf32>
    %12 = arith.divf %10, %11 : vector<256x1xf32>
    %cst_4 = arith.constant 9.99999974E-6 : f32
    %13 = vector.broadcast %cst_4 : f32 to vector<256x1xf32>
    %14 = arith.addf %12, %13 : vector<256x1xf32>
    %15 = math.rsqrt %14 : vector<256x1xf32>
    %16 = vector.broadcast %15 : vector<256x1xf32> to vector<256x64xf32>
    %17 = arith.mulf %7, %16 : vector<256x64xf32>
    %c0_5 = arith.constant 0 : index
    %c0_6 = arith.constant 0 : index
    %18 = vector.load %arg2[%c0_5, %c0_6] : memref<1x64xf32, #tpu.memory_space<vmem>>, vector<1x64xf32>
    %19 = vector.broadcast %18 : vector<1x64xf32> to vector<256x64xf32>
    %20 = arith.mulf %17, %19 : vector<256x64xf32>
    %c0_7 = arith.constant 0 : index
    %c0_8 = arith.constant 0 : index
    %21 = vector.load %arg3[%c0_7, %c0_8] : memref<1x64xf32, #tpu.memory_space<vmem>>, vector<1x64xf32>
    %22 = vector.broadcast %21 : vector<1x64xf32> to vector<256x64xf32>
    %23 = arith.addf %20, %22 : vector<256x64xf32>
    %24 = arith.truncf %23 : vector<256x64xf32> to vector<256x64xbf16>
    %c0_9 = arith.constant 0 : index
    %c0_10 = arith.constant 0 : index
    %25 = vector.load %arg4[%c0_9, %c0_10] : memref<256x64xbf16, #tpu.memory_space<vmem>>, vector<256x64xbf16>
    tpu.vector_store %arg4[%c0_9, %c0_10], %24 {strides = array<i32>} : memref<256x64xbf16, #tpu.memory_space<vmem>>, vector<256x64xbf16>,
    return
  }
  func.func @transform_0(%arg0: i32) -> (i32, i32) {
    %c0_i32 = arith.constant 0 : i32
    %c0_i32_0 = arith.constant 0 : i32
    return %arg0, %c0_i32 : i32, i32
  }
  func.func @transform_1(%arg0: i32) -> (i32, i32) {
    %c0_i32 = arith.constant 0 : i32
    %c0_i32_0 = arith.constant 0 : i32
    %c0_i32_1 = arith.constant 0 : i32
    return %c0_i32, %c0_i32_0 : i32, i32
  }
  func.func @transform_2(%arg0: i32) -> (i32, i32) {
    %c0_i32 = arith.constant 0 : i32
    %c0_i32_0 = arith.constant 0 : i32
    %c0_i32_1 = arith.constant 0 : i32
    return %c0_i32, %c0_i32_0 : i32, i32
  }
  func.func @transform_3(%arg0: i32) -> (i32, i32) {
    %c0_i32 = arith.constant 0 : i32
    %c0_i32_0 = arith.constant 0 : i32
    return %arg0, %c0_i32 : i32, i32
  }
}

module attributes {stable_mosaic.version = 11 : i64} {
  func.func @_attn_kernel(%arg0: i32, %arg1: i32, %arg2: memref<3x1x128x64xbf16, #tpu.memory_space<vmem>>, %arg3: memref<1x128x64xbf16, #tpu.memory_space<vmem>>) attributes {dimension_semantics = [#tpu.dimension_semantics<parallel>, #tpu.dimension_semantics<parallel>], iteration_bounds = array<i64: 2, 1>, scalar_prefetch = 0 : i64, scratch_operands = 0 : i64, tpu.core_type = #tpu.core_type<tc>, window_params = [{transform_indices = @transform_0, window_bounds = array<i64: 3, 1, 128, 64>}, {transform_indices = @transform_1, window_bounds = array<i64: 1, 128, 64>}]} {
    %0 = tpu.iota {dimensions = array<i32: 1>} : vector<128x128xi32>
    %c5_i32 = arith.constant 5 : i32
    %1 = vector.broadcast %c5_i32 : i32 to vector<128x128xi32>
    %2 = arith.cmpi slt, %0, %1 : vector<128x128xi32>
    %c0 = arith.constant 0 : index
    %c0_0 = arith.constant 0 : index
    %c0_1 = arith.constant 0 : index
    %c0_2 = arith.constant 0 : index
    %3 = vector.load %arg2[%c0, %c0_0, %c0_1, %c0_2] : memref<3x1x128x64xbf16, #tpu.memory_space<vmem>>, vector<1x1x128x64xbf16>
    %4 = vector.shape_cast %3 : vector<1x1x128x64xbf16> to vector<128x64xbf16>
    %c1 = arith.constant 1 : index
    %c0_3 = arith.constant 0 : index
    %c0_4 = arith.constant 0 : index
    %c0_5 = arith.constant 0 : index
    %5 = vector.load %arg2[%c1, %c0_3, %c0_4, %c0_5] : memref<3x1x128x64xbf16, #tpu.memory_space<vmem>>, vector<1x1x128x64xbf16>
    %6 = vector.shape_cast %5 : vector<1x1x128x64xbf16> to vector<128x64xbf16>
    %c2 = arith.constant 2 : index
    %c0_6 = arith.constant 0 : index
    %c0_7 = arith.constant 0 : index
    %c0_8 = arith.constant 0 : index
    %7 = vector.load %arg2[%c2, %c0_6, %c0_7, %c0_8] : memref<3x1x128x64xbf16, #tpu.memory_space<vmem>>, vector<1x1x128x64xbf16>
    %8 = vector.shape_cast %7 : vector<1x1x128x64xbf16> to vector<128x64xbf16>
    %cst = arith.constant dense<0.000000e+00> : vector<128x128xf32>
    %9 = tpu.matmul %4, %6, %cst {dimension_numbers = #tpu.dot_dimension_numbers<[1], [1], [0], [0], [0, 0, 1, 0], [], []>} : vector<128x64xbf16>, vector<128x64xbf16>, vector<128x128xf32> -> vector<128x128xf32>
    %cst_9 = arith.constant -1.000000e+30 : f32
    %10 = vector.broadcast %cst_9 : f32 to vector<128x128xf32>
    %11 = arith.select %2, %9, %10 : vector<128x128xi1>, vector<128x128xf32>
    %cst_10 = arith.constant dense<0xFF800000> : vector<128xf32>
    %12 = vector.multi_reduction <maximumf>, %11, %cst_10 [1] : vector<128x128xf32> to vector<128xf32>
    %13 = vector.shape_cast %12 : vector<128xf32> to vector<128x1xf32>
    %14 = vector.broadcast %13 : vector<128x1xf32> to vector<128x128xf32>
    %15 = arith.subf %11, %14 : vector<128x128xf32>
    %16 = math.exp %15 : vector<128x128xf32>
    %cst_11 = arith.constant dense<0.000000e+00> : vector<128xf32>
    %17 = vector.multi_reduction <add>, %16, %cst_11 [1] : vector<128x128xf32> to vector<128xf32>
    %18 = vector.shape_cast %17 : vector<128xf32> to vector<128x1xf32>
    %19 = tpu.reciprocal %18 {approx = true} : vector<128x1xf32> -> vector<128x1xf32>
    %20 = vector.broadcast %19 : vector<128x1xf32> to vector<128x128xf32>
    %21 = arith.mulf %16, %20 : vector<128x128xf32>
    %22 = arith.truncf %21 : vector<128x128xf32> to vector<128x128xbf16>
    %cst_12 = arith.constant dense<0.000000e+00> : vector<128x64xf32>
    %23 = tpu.matmul %22, %8, %cst_12 {dimension_numbers = #tpu.dot_dimension_numbers<[1], [0], [0], [1], [0, 0, 1, 1], [], []>} : vector<128x128xbf16>, vector<128x64xbf16>, vector<128x64xf32> -> vector<128x64xf32>
    %24 = arith.truncf %23 : vector<128x64xf32> to vector<128x64xbf16>
    %c0_13 = arith.constant 0 : index
    %c0_14 = arith.constant 0 : index
    %c0_15 = arith.constant 0 : index
    %25 = vector.load %arg3[%c0_13, %c0_14, %c0_15] : memref<1x128x64xbf16, #tpu.memory_space<vmem>>, vector<1x128x64xbf16>
    %26 = vector.shape_cast %25 : vector<1x128x64xbf16> to vector<128x64xbf16>
    %27 = vector.shape_cast %24 : vector<128x64xbf16> to vector<1x128x64xbf16>
    tpu.vector_store %arg3[%c0_13, %c0_14, %c0_15], %27 {strides = array<i32>} : memref<1x128x64xbf16, #tpu.memory_space<vmem>>, vector<1x128x64xbf16>,
    return
  }
  func.func @transform_0(%arg0: i32, %arg1: i32) -> (i32, i32, i32, i32) {
    %c0_i32 = arith.constant 0 : i32
    %c0_i32_0 = arith.constant 0 : i32
    %c0_i32_1 = arith.constant 0 : i32
    return %c0_i32, %arg0, %c0_i32_0, %arg1 : i32, i32, i32, i32
  }
  func.func @transform_1(%arg0: i32, %arg1: i32) -> (i32, i32, i32) {
    %c0_i32 = arith.constant 0 : i32
    %c0_i32_0 = arith.constant 0 : i32
    return %arg0, %c0_i32, %arg1 : i32, i32, i32
  }
}

module attributes {stable_mosaic.version = 11 : i64} {
  func.func @_ln_qkv_kernel(%arg0: i32, %arg1: i32, %arg2: i32, %arg3: memref<256x64xbf16, #tpu.memory_space<vmem>>, %arg4: memref<1x64xf32, #tpu.memory_space<vmem>>, %arg5: memref<1x64xf32, #tpu.memory_space<vmem>>, %arg6: memref<1x64x64xbf16, #tpu.memory_space<vmem>>, %arg7: memref<1x1x64xf32, #tpu.memory_space<vmem>>, %arg8: memref<1x256x64xbf16, #tpu.memory_space<vmem>>, %arg9: memref<256x64xbf16, #tpu.memory_space<vmem>>) attributes {dimension_semantics = [#tpu.dimension_semantics<parallel>, #tpu.dimension_semantics<arbitrary>, #tpu.dimension_semantics<arbitrary>], iteration_bounds = array<i64: 1, 3, 1>, scalar_prefetch = 0 : i64, scratch_operands = 1 : i64, tpu.core_type = #tpu.core_type<tc>, window_params = [{transform_indices = @transform_0, window_bounds = array<i64: 256, 64>}, {pipeline_mode = #tpu.pipeline_mode<synchronous>, transform_indices = @transform_1, window_bounds = array<i64: 1, 64>}, {pipeline_mode = #tpu.pipeline_mode<synchronous>, transform_indices = @transform_2, window_bounds = array<i64: 1, 64>}, {transform_indices = @transform_3, window_bounds = array<i64: 1, 64, 64>}, {transform_indices = @transform_4, window_bounds = array<i64: 1, 1, 64>}, {transform_indices = @transform_5, window_bounds = array<i64: 1, 256, 64>}]} {
    %c0_i32 = arith.constant 0 : i32
    %0 = arith.cmpi eq, %arg1, %c0_i32 : i32
    %c0_i32_0 = arith.constant 0 : i32
    %1 = arith.cmpi eq, %arg2, %c0_i32_0 : i32
    %2 = arith.andi %0, %1 : i1
    %3 = arith.extui %2 : i1 to i32
    %c0_i32_1 = arith.constant 0 : i32
    %4 = arith.cmpi ne, %3, %c0_i32_1 : i32
    scf.if %4 {
      %c0_12 = arith.constant 0 : index
      %c0_13 = arith.constant 0 : index
      %17 = vector.load %arg3[%c0_12, %c0_13] : memref<256x64xbf16, #tpu.memory_space<vmem>>, vector<256x64xbf16>
      %18 = arith.extf %17 : vector<256x64xbf16> to vector<256x64xf32>
      %cst_14 = arith.constant dense<0.000000e+00> : vector<256xf32>
      %19 = vector.multi_reduction <add>, %18, %cst_14 [1] : vector<256x64xf32> to vector<256xf32>
      %20 = vector.shape_cast %19 : vector<256xf32> to vector<256x1xf32>
      %cst_15 = arith.constant 6.400000e+01 : f32
      %21 = vector.broadcast %cst_15 : f32 to vector<256x1xf32>
      %22 = arith.divf %20, %21 : vector<256x1xf32>
      %23 = vector.broadcast %22 : vector<256x1xf32> to vector<256x64xf32>
      %24 = arith.subf %18, %23 : vector<256x64xf32>
      %25 = arith.mulf %24, %24 : vector<256x64xf32>
      %cst_16 = arith.constant dense<0.000000e+00> : vector<256xf32>
      %26 = vector.multi_reduction <add>, %25, %cst_16 [1] : vector<256x64xf32> to vector<256xf32>
      %27 = vector.shape_cast %26 : vector<256xf32> to vector<256x1xf32>
      %cst_17 = arith.constant 6.400000e+01 : f32
      %28 = vector.broadcast %cst_17 : f32 to vector<256x1xf32>
      %29 = arith.divf %27, %28 : vector<256x1xf32>
      %cst_18 = arith.constant 9.99999974E-6 : f32
      %30 = vector.broadcast %cst_18 : f32 to vector<256x1xf32>
      %31 = arith.addf %29, %30 : vector<256x1xf32>
      %32 = math.rsqrt %31 : vector<256x1xf32>
      %33 = vector.broadcast %32 : vector<256x1xf32> to vector<256x64xf32>
      %34 = arith.mulf %24, %33 : vector<256x64xf32>
      %c0_19 = arith.constant 0 : index
      %c0_20 = arith.constant 0 : index
      %35 = vector.load %arg4[%c0_19, %c0_20] : memref<1x64xf32, #tpu.memory_space<vmem>>, vector<1x64xf32>
      %36 = vector.broadcast %35 : vector<1x64xf32> to vector<256x64xf32>
      %37 = arith.mulf %34, %36 : vector<256x64xf32>
      %c0_21 = arith.constant 0 : index
      %c0_22 = arith.constant 0 : index
      %38 = vector.load %arg5[%c0_21, %c0_22] : memref<1x64xf32, #tpu.memory_space<vmem>>, vector<1x64xf32>
      %39 = vector.broadcast %38 : vector<1x64xf32> to vector<256x64xf32>
      %40 = arith.addf %37, %39 : vector<256x64xf32>
      %41 = arith.truncf %40 : vector<256x64xf32> to vector<256x64xbf16>
      %c0_23 = arith.constant 0 : index
      %c0_24 = arith.constant 0 : index
      %42 = vector.load %arg9[%c0_23, %c0_24] : memref<256x64xbf16, #tpu.memory_space<vmem>>, vector<256x64xbf16>
      tpu.vector_store %arg9[%c0_23, %c0_24], %41 {strides = array<i32>} : memref<256x64xbf16, #tpu.memory_space<vmem>>, vector<256x64xbf16>,
    } else {
    }
    %c0 = arith.constant 0 : index
    %c0_2 = arith.constant 0 : index
    %5 = vector.load %arg9[%c0, %c0_2] : memref<256x64xbf16, #tpu.memory_space<vmem>>, vector<256x64xbf16>
    %c0_3 = arith.constant 0 : index
    %c0_4 = arith.constant 0 : index
    %c0_5 = arith.constant 0 : index
    %6 = vector.load %arg6[%c0_3, %c0_4, %c0_5] : memref<1x64x64xbf16, #tpu.memory_space<vmem>>, vector<1x64x64xbf16>
    %7 = vector.shape_cast %6 : vector<1x64x64xbf16> to vector<64x64xbf16>
    %cst = arith.constant dense<0.000000e+00> : vector<256x64xf32>
    %8 = tpu.matmul %5, %7, %cst {dimension_numbers = #tpu.dot_dimension_numbers<[1], [0], [0], [1], [0, 0, 1, 1], [], []>} : vector<256x64xbf16>, vector<64x64xbf16>, vector<256x64xf32> -> vector<256x64xf32>
    %c0_6 = arith.constant 0 : index
    %c0_7 = arith.constant 0 : index
    %c0_8 = arith.constant 0 : index
    %9 = vector.load %arg7[%c0_6, %c0_7, %c0_8] : memref<1x1x64xf32, #tpu.memory_space<vmem>>, vector<1x1x64xf32>
    %10 = vector.shape_cast %9 : vector<1x1x64xf32> to vector<1x64xf32>
    %11 = vector.broadcast %10 : vector<1x64xf32> to vector<256x64xf32>
    %12 = arith.addf %8, %11 : vector<256x64xf32>
    %13 = arith.truncf %12 : vector<256x64xf32> to vector<256x64xbf16>
    %c0_9 = arith.constant 0 : index
    %c0_10 = arith.constant 0 : index
    %c0_11 = arith.constant 0 : index
    %14 = vector.load %arg8[%c0_9, %c0_10, %c0_11] : memref<1x256x64xbf16, #tpu.memory_space<vmem>>, vector<1x256x64xbf16>
    %15 = vector.shape_cast %14 : vector<1x256x64xbf16> to vector<256x64xbf16>
    %16 = vector.shape_cast %13 : vector<256x64xbf16> to vector<1x256x64xbf16>
    tpu.vector_store %arg8[%c0_9, %c0_10, %c0_11], %16 {strides = array<i32>} : memref<1x256x64xbf16, #tpu.memory_space<vmem>>, vector<1x256x64xbf16>,
    return
  }
  func.func @transform_0(%arg0: i32, %arg1: i32, %arg2: i32) -> (i32, i32) {
    %c0_i32 = arith.constant 0 : i32
    %c0_i32_0 = arith.constant 0 : i32
    return %arg0, %c0_i32 : i32, i32
  }
  func.func @transform_1(%arg0: i32, %arg1: i32, %arg2: i32) -> (i32, i32) {
    %c0_i32 = arith.constant 0 : i32
    %c0_i32_0 = arith.constant 0 : i32
    %c0_i32_1 = arith.constant 0 : i32
    return %c0_i32, %c0_i32_0 : i32, i32
  }
  func.func @transform_2(%arg0: i32, %arg1: i32, %arg2: i32) -> (i32, i32) {
    %c0_i32 = arith.constant 0 : i32
    %c0_i32_0 = arith.constant 0 : i32
    %c0_i32_1 = arith.constant 0 : i32
    return %c0_i32, %c0_i32_0 : i32, i32
  }
  func.func @transform_3(%arg0: i32, %arg1: i32, %arg2: i32) -> (i32, i32, i32) {
    %c0_i32 = arith.constant 0 : i32
    %c0_i32_0 = arith.constant 0 : i32
    return %arg1, %c0_i32, %arg2 : i32, i32, i32
  }
  func.func @transform_4(%arg0: i32, %arg1: i32, %arg2: i32) -> (i32, i32, i32) {
    %c0_i32 = arith.constant 0 : i32
    %c0_i32_0 = arith.constant 0 : i32
    return %arg1, %c0_i32, %arg2 : i32, i32, i32
  }
  func.func @transform_5(%arg0: i32, %arg1: i32, %arg2: i32) -> (i32, i32, i32) {
    %c0_i32 = arith.constant 0 : i32
    return %arg1, %arg0, %arg2 : i32, i32, i32
  }
}

module attributes {stable_mosaic.version = 11 : i64} {
  func.func @_matmul_kernel(%arg0: i32, %arg1: i32, %arg2: i32, %arg3: memref<256x64xbf16, #tpu.memory_space<vmem>>, %arg4: memref<64x64xbf16, #tpu.memory_space<vmem>>, %arg5: memref<1x64xf32, #tpu.memory_space<vmem>>, %arg6: memref<256x64xbf16, #tpu.memory_space<vmem>>, %arg7: memref<256x64xbf16, #tpu.memory_space<vmem>>, %arg8: memref<256x64xf32, #tpu.memory_space<vmem>>) attributes {dimension_semantics = [#tpu.dimension_semantics<parallel>, #tpu.dimension_semantics<parallel>, #tpu.dimension_semantics<arbitrary>], iteration_bounds = array<i64: 1, 1, 1>, scalar_prefetch = 0 : i64, scratch_operands = 1 : i64, tpu.core_type = #tpu.core_type<tc>, window_params = [{transform_indices = @transform_0, window_bounds = array<i64: 256, 64>}, {transform_indices = @transform_1, window_bounds = array<i64: 64, 64>}, {transform_indices = @transform_2, window_bounds = array<i64: 1, 64>}, {transform_indices = @transform_3, window_bounds = array<i64: 256, 64>}, {transform_indices = @transform_4, window_bounds = array<i64: 256, 64>}]} {
    %c0_i32 = arith.constant 0 : i32
    %0 = arith.cmpi eq, %arg2, %c0_i32 : i32
    %1 = arith.extui %0 : i1 to i32
    %c0_i32_0 = arith.constant 0 : i32
    %2 = arith.cmpi ne, %1, %c0_i32_0 : i32
    scf.if %2 {
      %cst_10 = arith.constant 0.000000e+00 : f32
      %12 = vector.broadcast %cst_10 : f32 to vector<256x64xf32>
      %c0_11 = arith.constant 0 : index
      %c0_12 = arith.constant 0 : index
      %13 = vector.load %arg8[%c0_11, %c0_12] : memref<256x64xf32, #tpu.memory_space<vmem>>, vector<256x64xf32>
      tpu.vector_store %arg8[%c0_11, %c0_12], %12 {strides = array<i32>} : memref<256x64xf32, #tpu.memory_space<vmem>>, vector<256x64xf32>,
    } else {
    }
    %c0 = arith.constant 0 : index
    %c0_1 = arith.constant 0 : index
    %3 = vector.load %arg8[%c0, %c0_1] : memref<256x64xf32, #tpu.memory_space<vmem>>, vector<256x64xf32>
    %c0_2 = arith.constant 0 : index
    %c0_3 = arith.constant 0 : index
    %4 = vector.load %arg3[%c0_2, %c0_3] : memref<256x64xbf16, #tpu.memory_space<vmem>>, vector<256x64xbf16>
    %c0_4 = arith.constant 0 : index
    %c0_5 = arith.constant 0 : index
    %5 = vector.load %arg4[%c0_4, %c0_5] : memref<64x64xbf16, #tpu.memory_space<vmem>>, vector<64x64xbf16>
    %cst = arith.constant dense<0.000000e+00> : vector<256x64xf32>
    %6 = tpu.matmul %4, %5, %cst {dimension_numbers = #tpu.dot_dimension_numbers<[1], [0], [0], [1], [0, 0, 1, 1], [], []>} : vector<256x64xbf16>, vector<64x64xbf16>, vector<256x64xf32> -> vector<256x64xf32>
    %7 = arith.addf %3, %6 : vector<256x64xf32>
    %c0_6 = arith.constant 0 : index
    %c0_7 = arith.constant 0 : index
    %8 = vector.load %arg8[%c0_6, %c0_7] : memref<256x64xf32, #tpu.memory_space<vmem>>, vector<256x64xf32>
    tpu.vector_store %arg8[%c0_6, %c0_7], %7 {strides = array<i32>} : memref<256x64xf32, #tpu.memory_space<vmem>>, vector<256x64xf32>,
    %c0_i32_8 = arith.constant 0 : i32
    %9 = arith.cmpi eq, %arg2, %c0_i32_8 : i32
    %10 = arith.extui %9 : i1 to i32
    %c0_i32_9 = arith.constant 0 : i32
    %11 = arith.cmpi ne, %10, %c0_i32_9 : i32
    scf.if %11 {
      %c0_10 = arith.constant 0 : index
      %c0_11 = arith.constant 0 : index
      %12 = vector.load %arg8[%c0_10, %c0_11] : memref<256x64xf32, #tpu.memory_space<vmem>>, vector<256x64xf32>
      %c0_12 = arith.constant 0 : index
      %c0_13 = arith.constant 0 : index
      %13 = vector.load %arg5[%c0_12, %c0_13] : memref<1x64xf32, #tpu.memory_space<vmem>>, vector<1x64xf32>
      %14 = vector.broadcast %13 : vector<1x64xf32> to vector<256x64xf32>
      %15 = arith.addf %12, %14 : vector<256x64xf32>
      %c0_14 = arith.constant 0 : index
      %c0_15 = arith.constant 0 : index
      %16 = vector.load %arg6[%c0_14, %c0_15] : memref<256x64xbf16, #tpu.memory_space<vmem>>, vector<256x64xbf16>
      %17 = arith.extf %16 : vector<256x64xbf16> to vector<256x64xf32>
      %18 = arith.addf %15, %17 : vector<256x64xf32>
      %19 = arith.truncf %18 : vector<256x64xf32> to vector<256x64xbf16>
      %c0_16 = arith.constant 0 : index
      %c0_17 = arith.constant 0 : index
      %20 = vector.load %arg7[%c0_16, %c0_17] : memref<256x64xbf16, #tpu.memory_space<vmem>>, vector<256x64xbf16>
      tpu.vector_store %arg7[%c0_16, %c0_17], %19 {strides = array<i32>} : memref<256x64xbf16, #tpu.memory_space<vmem>>, vector<256x64xbf16>,
    } else {
    }
    return
  }
  func.func @transform_0(%arg0: i32, %arg1: i32, %arg2: i32) -> (i32, i32) {
    %c0_i32 = arith.constant 0 : i32
    return %arg0, %arg2 : i32, i32
  }
  func.func @transform_1(%arg0: i32, %arg1: i32, %arg2: i32) -> (i32, i32) {
    %c0_i32 = arith.constant 0 : i32
    return %arg2, %arg1 : i32, i32
  }
  func.func @transform_2(%arg0: i32, %arg1: i32, %arg2: i32) -> (i32, i32) {
    %c0_i32 = arith.constant 0 : i32
    %c0_i32_0 = arith.constant 0 : i32
    return %c0_i32, %arg1 : i32, i32
  }
  func.func @transform_3(%arg0: i32, %arg1: i32, %arg2: i32) -> (i32, i32) {
    %c0_i32 = arith.constant 0 : i32
    return %arg0, %arg1 : i32, i32
  }
  func.func @transform_4(%arg0: i32, %arg1: i32, %arg2: i32) -> (i32, i32) {
    %c0_i32 = arith.constant 0 : i32
    return %arg0, %arg1 : i32, i32
  }
}

module attributes {stable_mosaic.version = 11 : i64} {
  func.func @_ln_matmul_kernel(%arg0: i32, %arg1: i32, %arg2: memref<256x64xbf16, #tpu.memory_space<vmem>>, %arg3: memref<1x64xf32, #tpu.memory_space<vmem>>, %arg4: memref<1x64xf32, #tpu.memory_space<vmem>>, %arg5: memref<64x256xbf16, #tpu.memory_space<vmem>>, %arg6: memref<1x256xf32, #tpu.memory_space<vmem>>, %arg7: memref<256x256xbf16, #tpu.memory_space<vmem>>, %arg8: memref<256x64xbf16, #tpu.memory_space<vmem>>) attributes {dimension_semantics = [#tpu.dimension_semantics<parallel>, #tpu.dimension_semantics<arbitrary>], iteration_bounds = array<i64: 1, 1>, scalar_prefetch = 0 : i64, scratch_operands = 1 : i64, tpu.core_type = #tpu.core_type<tc>, window_params = [{transform_indices = @transform_0, window_bounds = array<i64: 256, 64>}, {pipeline_mode = #tpu.pipeline_mode<synchronous>, transform_indices = @transform_1, window_bounds = array<i64: 1, 64>}, {pipeline_mode = #tpu.pipeline_mode<synchronous>, transform_indices = @transform_2, window_bounds = array<i64: 1, 64>}, {transform_indices = @transform_3, window_bounds = array<i64: 64, 256>}, {transform_indices = @transform_4, window_bounds = array<i64: 1, 256>}, {transform_indices = @transform_5, window_bounds = array<i64: 256, 256>}]} {
    %c0_i32 = arith.constant 0 : i32
    %0 = arith.cmpi eq, %arg1, %c0_i32 : i32
    %1 = arith.extui %0 : i1 to i32
    %c0_i32_0 = arith.constant 0 : i32
    %2 = arith.cmpi ne, %1, %c0_i32_0 : i32
    scf.if %2 {
      %c0_10 = arith.constant 0 : index
      %c0_11 = arith.constant 0 : index
      %19 = vector.load %arg2[%c0_10, %c0_11] : memref<256x64xbf16, #tpu.memory_space<vmem>>, vector<256x64xbf16>
      %20 = arith.extf %19 : vector<256x64xbf16> to vector<256x64xf32>
      %cst_12 = arith.constant dense<0.000000e+00> : vector<256xf32>
      %21 = vector.multi_reduction <add>, %20, %cst_12 [1] : vector<256x64xf32> to vector<256xf32>
      %22 = vector.shape_cast %21 : vector<256xf32> to vector<256x1xf32>
      %cst_13 = arith.constant 6.400000e+01 : f32
      %23 = vector.broadcast %cst_13 : f32 to vector<256x1xf32>
      %24 = arith.divf %22, %23 : vector<256x1xf32>
      %25 = vector.broadcast %24 : vector<256x1xf32> to vector<256x64xf32>
      %26 = arith.subf %20, %25 : vector<256x64xf32>
      %27 = arith.mulf %26, %26 : vector<256x64xf32>
      %cst_14 = arith.constant dense<0.000000e+00> : vector<256xf32>
      %28 = vector.multi_reduction <add>, %27, %cst_14 [1] : vector<256x64xf32> to vector<256xf32>
      %29 = vector.shape_cast %28 : vector<256xf32> to vector<256x1xf32>
      %cst_15 = arith.constant 6.400000e+01 : f32
      %30 = vector.broadcast %cst_15 : f32 to vector<256x1xf32>
      %31 = arith.divf %29, %30 : vector<256x1xf32>
      %cst_16 = arith.constant 9.99999974E-6 : f32
      %32 = vector.broadcast %cst_16 : f32 to vector<256x1xf32>
      %33 = arith.addf %31, %32 : vector<256x1xf32>
      %34 = math.rsqrt %33 : vector<256x1xf32>
      %35 = vector.broadcast %34 : vector<256x1xf32> to vector<256x64xf32>
      %36 = arith.mulf %26, %35 : vector<256x64xf32>
      %c0_17 = arith.constant 0 : index
      %c0_18 = arith.constant 0 : index
      %37 = vector.load %arg3[%c0_17, %c0_18] : memref<1x64xf32, #tpu.memory_space<vmem>>, vector<1x64xf32>
      %38 = vector.broadcast %37 : vector<1x64xf32> to vector<256x64xf32>
      %39 = arith.mulf %36, %38 : vector<256x64xf32>
      %c0_19 = arith.constant 0 : index
      %c0_20 = arith.constant 0 : index
      %40 = vector.load %arg4[%c0_19, %c0_20] : memref<1x64xf32, #tpu.memory_space<vmem>>, vector<1x64xf32>
      %41 = vector.broadcast %40 : vector<1x64xf32> to vector<256x64xf32>
      %42 = arith.addf %39, %41 : vector<256x64xf32>
      %43 = arith.truncf %42 : vector<256x64xf32> to vector<256x64xbf16>
      %c0_21 = arith.constant 0 : index
      %c0_22 = arith.constant 0 : index
      %44 = vector.load %arg8[%c0_21, %c0_22] : memref<256x64xbf16, #tpu.memory_space<vmem>>, vector<256x64xbf16>
      tpu.vector_store %arg8[%c0_21, %c0_22], %43 {strides = array<i32>} : memref<256x64xbf16, #tpu.memory_space<vmem>>, vector<256x64xbf16>,
    } else {
    }
    %c0 = arith.constant 0 : index
    %c0_1 = arith.constant 0 : index
    %3 = vector.load %arg8[%c0, %c0_1] : memref<256x64xbf16, #tpu.memory_space<vmem>>, vector<256x64xbf16>
    %c0_2 = arith.constant 0 : index
    %c0_3 = arith.constant 0 : index
    %4 = vector.load %arg5[%c0_2, %c0_3] : memref<64x256xbf16, #tpu.memory_space<vmem>>, vector<64x256xbf16>
    %cst = arith.constant dense<0.000000e+00> : vector<256x256xf32>
    %5 = tpu.matmul %3, %4, %cst {dimension_numbers = #tpu.dot_dimension_numbers<[1], [0], [0], [1], [0, 0, 1, 1], [], []>} : vector<256x64xbf16>, vector<64x256xbf16>, vector<256x256xf32> -> vector<256x256xf32>
    %c0_4 = arith.constant 0 : index
    %c0_5 = arith.constant 0 : index
    %6 = vector.load %arg6[%c0_4, %c0_5] : memref<1x256xf32, #tpu.memory_space<vmem>>, vector<1x256xf32>
    %7 = vector.broadcast %6 : vector<1x256xf32> to vector<256x256xf32>
    %8 = arith.addf %5, %7 : vector<256x256xf32>
    %cst_6 = arith.constant 1.702000e+00 : f32
    %9 = vector.broadcast %cst_6 : f32 to vector<256x256xf32>
    %10 = arith.mulf %9, %8 : vector<256x256xf32>
    %11 = arith.negf %10 : vector<256x256xf32>
    %12 = math.exp %11 : vector<256x256xf32>
    %cst_7 = arith.constant 1.000000e+00 : f32
    %13 = vector.broadcast %cst_7 : f32 to vector<256x256xf32>
    %14 = arith.addf %13, %12 : vector<256x256xf32>
    %15 = arith.divf %13, %14 : vector<256x256xf32>
    %16 = arith.mulf %8, %15 : vector<256x256xf32>
    %17 = arith.truncf %16 : vector<256x256xf32> to vector<256x256xbf16>
    %c0_8 = arith.constant 0 : index
    %c0_9 = arith.constant 0 : index
    %18 = vector.load %arg7[%c0_8, %c0_9] : memref<256x256xbf16, #tpu.memory_space<vmem>>, vector<256x256xbf16>
    tpu.vector_store %arg7[%c0_8, %c0_9], %17 {strides = array<i32>} : memref<256x256xbf16, #tpu.memory_space<vmem>>, vector<256x256xbf16>,
    return
  }
  func.func @transform_0(%arg0: i32, %arg1: i32) -> (i32, i32) {
    %c0_i32 = arith.constant 0 : i32
    %c0_i32_0 = arith.constant 0 : i32
    return %arg0, %c0_i32 : i32, i32
  }
  func.func @transform_1(%arg0: i32, %arg1: i32) -> (i32, i32) {
    %c0_i32 = arith.constant 0 : i32
    %c0_i32_0 = arith.constant 0 : i32
    %c0_i32_1 = arith.constant 0 : i32
    return %c0_i32, %c0_i32_0 : i32, i32
  }
  func.func @transform_2(%arg0: i32, %arg1: i32) -> (i32, i32) {
    %c0_i32 = arith.constant 0 : i32
    %c0_i32_0 = arith.constant 0 : i32
    %c0_i32_1 = arith.constant 0 : i32
    return %c0_i32, %c0_i32_0 : i32, i32
  }
  func.func @transform_3(%arg0: i32, %arg1: i32) -> (i32, i32) {
    %c0_i32 = arith.constant 0 : i32
    %c0_i32_0 = arith.constant 0 : i32
    return %c0_i32, %arg1 : i32, i32
  }
  func.func @transform_4(%arg0: i32, %arg1: i32) -> (i32, i32) {
    %c0_i32 = arith.constant 0 : i32
    %c0_i32_0 = arith.constant 0 : i32
    return %c0_i32, %arg1 : i32, i32
  }
  func.func @transform_5(%arg0: i32, %arg1: i32) -> (i32, i32) {
    %c0_i32 = arith.constant 0 : i32
    return %arg0, %arg1 : i32, i32
  }
}

module attributes {stable_mosaic.version = 11 : i64} {
  func.func @_matmul_kernel(%arg0: i32, %arg1: i32, %arg2: i32, %arg3: memref<256x256xbf16, #tpu.memory_space<vmem>>, %arg4: memref<256x64xbf16, #tpu.memory_space<vmem>>, %arg5: memref<1x64xf32, #tpu.memory_space<vmem>>, %arg6: memref<256x64xbf16, #tpu.memory_space<vmem>>, %arg7: memref<256x64xbf16, #tpu.memory_space<vmem>>, %arg8: memref<256x64xf32, #tpu.memory_space<vmem>>) attributes {dimension_semantics = [#tpu.dimension_semantics<parallel>, #tpu.dimension_semantics<parallel>, #tpu.dimension_semantics<arbitrary>], iteration_bounds = array<i64: 1, 1, 1>, scalar_prefetch = 0 : i64, scratch_operands = 1 : i64, tpu.core_type = #tpu.core_type<tc>, window_params = [{transform_indices = @transform_0, window_bounds = array<i64: 256, 256>}, {transform_indices = @transform_1, window_bounds = array<i64: 256, 64>}, {transform_indices = @transform_2, window_bounds = array<i64: 1, 64>}, {transform_indices = @transform_3, window_bounds = array<i64: 256, 64>}, {transform_indices = @transform_4, window_bounds = array<i64: 256, 64>}]} {
    %c0_i32 = arith.constant 0 : i32
    %0 = arith.cmpi eq, %arg2, %c0_i32 : i32
    %1 = arith.extui %0 : i1 to i32
    %c0_i32_0 = arith.constant 0 : i32
    %2 = arith.cmpi ne, %1, %c0_i32_0 : i32
    scf.if %2 {
      %cst_10 = arith.constant 0.000000e+00 : f32
      %12 = vector.broadcast %cst_10 : f32 to vector<256x64xf32>
      %c0_11 = arith.constant 0 : index
      %c0_12 = arith.constant 0 : index
      %13 = vector.load %arg8[%c0_11, %c0_12] : memref<256x64xf32, #tpu.memory_space<vmem>>, vector<256x64xf32>
      tpu.vector_store %arg8[%c0_11, %c0_12], %12 {strides = array<i32>} : memref<256x64xf32, #tpu.memory_space<vmem>>, vector<256x64xf32>,
    } else {
    }
    %c0 = arith.constant 0 : index
    %c0_1 = arith.constant 0 : index
    %3 = vector.load %arg8[%c0, %c0_1] : memref<256x64xf32, #tpu.memory_space<vmem>>, vector<256x64xf32>
    %c0_2 = arith.constant 0 : index
    %c0_3 = arith.constant 0 : index
    %4 = vector.load %arg3[%c0_2, %c0_3] : memref<256x256xbf16, #tpu.memory_space<vmem>>, vector<256x256xbf16>
    %c0_4 = arith.constant 0 : index
    %c0_5 = arith.constant 0 : index
    %5 = vector.load %arg4[%c0_4, %c0_5] : memref<256x64xbf16, #tpu.memory_space<vmem>>, vector<256x64xbf16>
    %cst = arith.constant dense<0.000000e+00> : vector<256x64xf32>
    %6 = tpu.matmul %4, %5, %cst {dimension_numbers = #tpu.dot_dimension_numbers<[1], [0], [0], [1], [0, 0, 1, 1], [], []>} : vector<256x256xbf16>, vector<256x64xbf16>, vector<256x64xf32> -> vector<256x64xf32>
    %7 = arith.addf %3, %6 : vector<256x64xf32>
    %c0_6 = arith.constant 0 : index
    %c0_7 = arith.constant 0 : index
    %8 = vector.load %arg8[%c0_6, %c0_7] : memref<256x64xf32, #tpu.memory_space<vmem>>, vector<256x64xf32>
    tpu.vector_store %arg8[%c0_6, %c0_7], %7 {strides = array<i32>} : memref<256x64xf32, #tpu.memory_space<vmem>>, vector<256x64xf32>,
    %c0_i32_8 = arith.constant 0 : i32
    %9 = arith.cmpi eq, %arg2, %c0_i32_8 : i32
    %10 = arith.extui %9 : i1 to i32
    %c0_i32_9 = arith.constant 0 : i32
    %11 = arith.cmpi ne, %10, %c0_i32_9 : i32
    scf.if %11 {
      %c0_10 = arith.constant 0 : index
      %c0_11 = arith.constant 0 : index
      %12 = vector.load %arg8[%c0_10, %c0_11] : memref<256x64xf32, #tpu.memory_space<vmem>>, vector<256x64xf32>
      %c0_12 = arith.constant 0 : index
      %c0_13 = arith.constant 0 : index
      %13 = vector.load %arg5[%c0_12, %c0_13] : memref<1x64xf32, #tpu.memory_space<vmem>>, vector<1x64xf32>
      %14 = vector.broadcast %13 : vector<1x64xf32> to vector<256x64xf32>
      %15 = arith.addf %12, %14 : vector<256x64xf32>
      %c0_14 = arith.constant 0 : index
      %c0_15 = arith.constant 0 : index
      %16 = vector.load %arg6[%c0_14, %c0_15] : memref<256x64xbf16, #tpu.memory_space<vmem>>, vector<256x64xbf16>
      %17 = arith.extf %16 : vector<256x64xbf16> to vector<256x64xf32>
      %18 = arith.addf %15, %17 : vector<256x64xf32>
      %19 = arith.truncf %18 : vector<256x64xf32> to vector<256x64xbf16>
      %c0_16 = arith.constant 0 : index
      %c0_17 = arith.constant 0 : index
      %20 = vector.load %arg7[%c0_16, %c0_17] : memref<256x64xbf16, #tpu.memory_space<vmem>>, vector<256x64xbf16>
      tpu.vector_store %arg7[%c0_16, %c0_17], %19 {strides = array<i32>} : memref<256x64xbf16, #tpu.memory_space<vmem>>, vector<256x64xbf16>,
    } else {
    }
    return
  }
  func.func @transform_0(%arg0: i32, %arg1: i32, %arg2: i32) -> (i32, i32) {
    %c0_i32 = arith.constant 0 : i32
    return %arg0, %arg2 : i32, i32
  }
  func.func @transform_1(%arg0: i32, %arg1: i32, %arg2: i32) -> (i32, i32) {
    %c0_i32 = arith.constant 0 : i32
    return %arg2, %arg1 : i32, i32
  }
  func.func @transform_2(%arg0: i32, %arg1: i32, %arg2: i32) -> (i32, i32) {
    %c0_i32 = arith.constant 0 : i32
    %c0_i32_0 = arith.constant 0 : i32
    return %c0_i32, %arg1 : i32, i32
  }
  func.func @transform_3(%arg0: i32, %arg1: i32, %arg2: i32) -> (i32, i32) {
    %c0_i32 = arith.constant 0 : i32
    return %arg0, %arg1 : i32, i32
  }
  func.func @transform_4(%arg0: i32, %arg1: i32, %arg2: i32) -> (i32, i32) {
    %c0_i32 = arith.constant 0 : i32
    return %arg0, %arg1 : i32, i32
  }
}

module attributes {stable_mosaic.version = 11 : i64} {
  func.func @_ln_matmul_kernel(%arg0: i32, %arg1: i32, %arg2: memref<2x64xbf16, #tpu.memory_space<vmem>>, %arg3: memref<1x64xf32, #tpu.memory_space<vmem>>, %arg4: memref<1x64xf32, #tpu.memory_space<vmem>>, %arg5: memref<64x64xbf16, #tpu.memory_space<vmem>>, %arg6: memref<1x64xf32, #tpu.memory_space<vmem>>, %arg7: memref<2x64xf32, #tpu.memory_space<vmem>>, %arg8: memref<2x64xbf16, #tpu.memory_space<vmem>>) attributes {dimension_semantics = [#tpu.dimension_semantics<parallel>, #tpu.dimension_semantics<arbitrary>], iteration_bounds = array<i64: 1, 1>, scalar_prefetch = 0 : i64, scratch_operands = 1 : i64, tpu.core_type = #tpu.core_type<tc>, window_params = [{transform_indices = @transform_0, window_bounds = array<i64: 2, 64>}, {pipeline_mode = #tpu.pipeline_mode<synchronous>, transform_indices = @transform_1, window_bounds = array<i64: 1, 64>}, {pipeline_mode = #tpu.pipeline_mode<synchronous>, transform_indices = @transform_2, window_bounds = array<i64: 1, 64>}, {transform_indices = @transform_3, window_bounds = array<i64: 64, 64>}, {transform_indices = @transform_4, window_bounds = array<i64: 1, 64>}, {transform_indices = @transform_5, window_bounds = array<i64: 2, 64>}]} {
    %c0_i32 = arith.constant 0 : i32
    %0 = arith.cmpi eq, %arg1, %c0_i32 : i32
    %1 = arith.extui %0 : i1 to i32
    %c0_i32_0 = arith.constant 0 : i32
    %2 = arith.cmpi ne, %1, %c0_i32_0 : i32
    scf.if %2 {
      %c0_8 = arith.constant 0 : index
      %c0_9 = arith.constant 0 : index
      %10 = vector.load %arg2[%c0_8, %c0_9] : memref<2x64xbf16, #tpu.memory_space<vmem>>, vector<2x64xbf16>
      %11 = arith.extf %10 : vector<2x64xbf16> to vector<2x64xf32>
      %cst_10 = arith.constant dense<0.000000e+00> : vector<2xf32>
      %12 = vector.multi_reduction <add>, %11, %cst_10 [1] : vector<2x64xf32> to vector<2xf32>
      %13 = vector.shape_cast %12 : vector<2xf32> to vector<2x1xf32>
      %cst_11 = arith.constant 6.400000e+01 : f32
      %14 = vector.broadcast %cst_11 : f32 to vector<2x1xf32>
      %15 = arith.divf %13, %14 : vector<2x1xf32>
      %16 = vector.broadcast %15 : vector<2x1xf32> to vector<2x64xf32>
      %17 = arith.subf %11, %16 : vector<2x64xf32>
      %18 = arith.mulf %17, %17 : vector<2x64xf32>
      %cst_12 = arith.constant dense<0.000000e+00> : vector<2xf32>
      %19 = vector.multi_reduction <add>, %18, %cst_12 [1] : vector<2x64xf32> to vector<2xf32>
      %20 = vector.shape_cast %19 : vector<2xf32> to vector<2x1xf32>
      %cst_13 = arith.constant 6.400000e+01 : f32
      %21 = vector.broadcast %cst_13 : f32 to vector<2x1xf32>
      %22 = arith.divf %20, %21 : vector<2x1xf32>
      %cst_14 = arith.constant 9.99999974E-6 : f32
      %23 = vector.broadcast %cst_14 : f32 to vector<2x1xf32>
      %24 = arith.addf %22, %23 : vector<2x1xf32>
      %25 = math.rsqrt %24 : vector<2x1xf32>
      %26 = vector.broadcast %25 : vector<2x1xf32> to vector<2x64xf32>
      %27 = arith.mulf %17, %26 : vector<2x64xf32>
      %c0_15 = arith.constant 0 : index
      %c0_16 = arith.constant 0 : index
      %28 = vector.load %arg3[%c0_15, %c0_16] : memref<1x64xf32, #tpu.memory_space<vmem>>, vector<1x64xf32>
      %29 = vector.broadcast %28 : vector<1x64xf32> to vector<2x64xf32>
      %30 = arith.mulf %27, %29 : vector<2x64xf32>
      %c0_17 = arith.constant 0 : index
      %c0_18 = arith.constant 0 : index
      %31 = vector.load %arg4[%c0_17, %c0_18] : memref<1x64xf32, #tpu.memory_space<vmem>>, vector<1x64xf32>
      %32 = vector.broadcast %31 : vector<1x64xf32> to vector<2x64xf32>
      %33 = arith.addf %30, %32 : vector<2x64xf32>
      %34 = arith.truncf %33 : vector<2x64xf32> to vector<2x64xbf16>
      %c0_19 = arith.constant 0 : index
      %c0_20 = arith.constant 0 : index
      %35 = vector.load %arg8[%c0_19, %c0_20] : memref<2x64xbf16, #tpu.memory_space<vmem>>, vector<2x64xbf16>
      tpu.vector_store %arg8[%c0_19, %c0_20], %34 {strides = array<i32>} : memref<2x64xbf16, #tpu.memory_space<vmem>>, vector<2x64xbf16>,
    } else {
    }
    %c0 = arith.constant 0 : index
    %c0_1 = arith.constant 0 : index
    %3 = vector.load %arg8[%c0, %c0_1] : memref<2x64xbf16, #tpu.memory_space<vmem>>, vector<2x64xbf16>
    %c0_2 = arith.constant 0 : index
    %c0_3 = arith.constant 0 : index
    %4 = vector.load %arg5[%c0_2, %c0_3] : memref<64x64xbf16, #tpu.memory_space<vmem>>, vector<64x64xbf16>
    %cst = arith.constant dense<0.000000e+00> : vector<2x64xf32>
    %5 = tpu.matmul %3, %4, %cst {dimension_numbers = #tpu.dot_dimension_numbers<[1], [0], [0], [1], [0, 0, 1, 1], [], []>} : vector<2x64xbf16>, vector<64x64xbf16>, vector<2x64xf32> -> vector<2x64xf32>
    %c0_4 = arith.constant 0 : index
    %c0_5 = arith.constant 0 : index
    %6 = vector.load %arg6[%c0_4, %c0_5] : memref<1x64xf32, #tpu.memory_space<vmem>>, vector<1x64xf32>
    %7 = vector.broadcast %6 : vector<1x64xf32> to vector<2x64xf32>
    %8 = arith.addf %5, %7 : vector<2x64xf32>
    %c0_6 = arith.constant 0 : index
    %c0_7 = arith.constant 0 : index
    %9 = vector.load %arg7[%c0_6, %c0_7] : memref<2x64xf32, #tpu.memory_space<vmem>>, vector<2x64xf32>
    tpu.vector_store %arg7[%c0_6, %c0_7], %8 {strides = array<i32>} : memref<2x64xf32, #tpu.memory_space<vmem>>, vector<2x64xf32>,
    return
  }
  func.func @transform_0(%arg0: i32, %arg1: i32) -> (i32, i32) {
    %c0_i32 = arith.constant 0 : i32
    %c0_i32_0 = arith.constant 0 : i32
    return %arg0, %c0_i32 : i32, i32
  }
  func.func @transform_1(%arg0: i32, %arg1: i32) -> (i32, i32) {
    %c0_i32 = arith.constant 0 : i32
    %c0_i32_0 = arith.constant 0 : i32
    %c0_i32_1 = arith.constant 0 : i32
    return %c0_i32, %c0_i32_0 : i32, i32
  }
  func.func @transform_2(%arg0: i32, %arg1: i32) -> (i32, i32) {
    %c0_i32 = arith.constant 0 : i32
    %c0_i32_0 = arith.constant 0 : i32
    %c0_i32_1 = arith.constant 0 : i32
    return %c0_i32, %c0_i32_0 : i32, i32
  }
  func.func @transform_3(%arg0: i32, %arg1: i32) -> (i32, i32) {
    %c0_i32 = arith.constant 0 : i32
    %c0_i32_0 = arith.constant 0 : i32
    return %c0_i32, %arg1 : i32, i32
  }
  func.func @transform_4(%arg0: i32, %arg1: i32) -> (i32, i32) {
    %c0_i32 = arith.constant 0 : i32
    %c0_i32_0 = arith.constant 0 : i32
    return %c0_i32, %arg1 : i32, i32
  }
  func.func @transform_5(%arg0: i32, %arg1: i32) -> (i32, i32) {
    %c0_i32 = arith.constant 0 : i32
    return %arg0, %arg1 : i32, i32
  }
}

module attributes {stable_mosaic.version = 11 : i64} {
  func.func @_attn_kernel(%arg0: i32, %arg1: i32, %arg2: memref<3x1x128x64xbf16, #tpu.memory_space<vmem>>, %arg3: memref<1x128x64xbf16, #tpu.memory_space<vmem>>) attributes {dimension_semantics = [#tpu.dimension_semantics<parallel>, #tpu.dimension_semantics<parallel>], iteration_bounds = array<i64: 2, 1>, scalar_prefetch = 0 : i64, scratch_operands = 0 : i64, tpu.core_type = #tpu.core_type<tc>, window_params = [{transform_indices = @transform_0, window_bounds = array<i64: 3, 1, 128, 64>}, {transform_indices = @transform_1, window_bounds = array<i64: 1, 128, 64>}]} {
    %0 = tpu.iota {dimensions = array<i32: 1>} : vector<128x128xi32>
    %c8_i32 = arith.constant 8 : i32
    %1 = vector.broadcast %c8_i32 : i32 to vector<128x128xi32>
    %2 = arith.cmpi slt, %0, %1 : vector<128x128xi32>
    %3 = tpu.iota {dimensions = array<i32: 0>} : vector<128x128xi32>
    %4 = arith.cmpi sle, %0, %3 : vector<128x128xi32>
    %5 = arith.andi %2, %4 : vector<128x128xi1>
    %c0 = arith.constant 0 : index
    %c0_0 = arith.constant 0 : index
    %c0_1 = arith.constant 0 : index
    %c0_2 = arith.constant 0 : index
    %6 = vector.load %arg2[%c0, %c0_0, %c0_1, %c0_2] : memref<3x1x128x64xbf16, #tpu.memory_space<vmem>>, vector<1x1x128x32xbf16>
    %7 = vector.shape_cast %6 : vector<1x1x128x32xbf16> to vector<128x32xbf16>
    %c1 = arith.constant 1 : index
    %c0_3 = arith.constant 0 : index
    %c0_4 = arith.constant 0 : index
    %c0_5 = arith.constant 0 : index
    %8 = vector.load %arg2[%c1, %c0_3, %c0_4, %c0_5] : memref<3x1x128x64xbf16, #tpu.memory_space<vmem>>, vector<1x1x128x32xbf16>
    %9 = vector.shape_cast %8 : vector<1x1x128x32xbf16> to vector<128x32xbf16>
    %c2 = arith.constant 2 : index
    %c0_6 = arith.constant 0 : index
    %c0_7 = arith.constant 0 : index
    %c0_8 = arith.constant 0 : index
    %10 = vector.load %arg2[%c2, %c0_6, %c0_7, %c0_8] : memref<3x1x128x64xbf16, #tpu.memory_space<vmem>>, vector<1x1x128x32xbf16>
    %11 = vector.shape_cast %10 : vector<1x1x128x32xbf16> to vector<128x32xbf16>
    %cst = arith.constant dense<0.000000e+00> : vector<128x128xf32>
    %12 = tpu.matmul %7, %9, %cst {dimension_numbers = #tpu.dot_dimension_numbers<[1], [1], [0], [0], [0, 0, 1, 0], [], []>} : vector<128x32xbf16>, vector<128x32xbf16>, vector<128x128xf32> -> vector<128x128xf32>
    %cst_9 = arith.constant -1.000000e+30 : f32
    %13 = vector.broadcast %cst_9 : f32 to vector<128x128xf32>
    %14 = arith.select %5, %12, %13 : vector<128x128xi1>, vector<128x128xf32>
    %cst_10 = arith.constant dense<0xFF800000> : vector<128xf32>
    %15 = vector.multi_reduction <maximumf>, %14, %cst_10 [1] : vector<128x128xf32> to vector<128xf32>
    %16 = vector.shape_cast %15 : vector<128xf32> to vector<128x1xf32>
    %17 = vector.broadcast %16 : vector<128x1xf32> to vector<128x128xf32>
    %18 = arith.subf %14, %17 : vector<128x128xf32>
    %19 = math.exp %18 : vector<128x128xf32>
    %cst_11 = arith.constant dense<0.000000e+00> : vector<128xf32>
    %20 = vector.multi_reduction <add>, %19, %cst_11 [1] : vector<128x128xf32> to vector<128xf32>
    %21 = vector.shape_cast %20 : vector<128xf32> to vector<128x1xf32>
    %22 = tpu.reciprocal %21 {approx = true} : vector<128x1xf32> -> vector<128x1xf32>
    %23 = vector.broadcast %22 : vector<128x1xf32> to vector<128x128xf32>
    %24 = arith.mulf %19, %23 : vector<128x128xf32>
    %25 = arith.truncf %24 : vector<128x128xf32> to vector<128x128xbf16>
    %cst_12 = arith.constant dense<0.000000e+00> : vector<128x32xf32>
    %26 = tpu.matmul %25, %11, %cst_12 {dimension_numbers = #tpu.dot_dimension_numbers<[1], [0], [0], [1], [0, 0, 1, 1], [], []>} : vector<128x128xbf16>, vector<128x32xbf16>, vector<128x32xf32> -> vector<128x32xf32>
    %27 = arith.truncf %26 : vector<128x32xf32> to vector<128x32xbf16>
    %c0_13 = arith.constant 0 : index
    %c0_14 = arith.constant 0 : index
    %c0_15 = arith.constant 0 : index
    %28 = vector.load %arg3[%c0_13, %c0_14, %c0_15] : memref<1x128x64xbf16, #tpu.memory_space<vmem>>, vector<1x128x32xbf16>
    %29 = vector.shape_cast %28 : vector<1x128x32xbf16> to vector<128x32xbf16>
    %30 = vector.shape_cast %27 : vector<128x32xbf16> to vector<1x128x32xbf16>
    tpu.vector_store %arg3[%c0_13, %c0_14, %c0_15], %30 {strides = array<i32>} : memref<1x128x64xbf16, #tpu.memory_space<vmem>>, vector<1x128x32xbf16>,
    %c0_16 = arith.constant 0 : index
    %c0_17 = arith.constant 0 : index
    %c0_18 = arith.constant 0 : index
    %c32 = arith.constant 32 : index
    %31 = vector.load %arg2[%c0_16, %c0_17, %c0_18, %c32] : memref<3x1x128x64xbf16, #tpu.memory_space<vmem>>, vector<1x1x128x32xbf16>
    %32 = vector.shape_cast %31 : vector<1x1x128x32xbf16> to vector<128x32xbf16>
    %c1_19 = arith.constant 1 : index
    %c0_20 = arith.constant 0 : index
    %c0_21 = arith.constant 0 : index
    %c32_22 = arith.constant 32 : index
    %33 = vector.load %arg2[%c1_19, %c0_20, %c0_21, %c32_22] : memref<3x1x128x64xbf16, #tpu.memory_space<vmem>>, vector<1x1x128x32xbf16>
    %34 = vector.shape_cast %33 : vector<1x1x128x32xbf16> to vector<128x32xbf16>
    %c2_23 = arith.constant 2 : index
    %c0_24 = arith.constant 0 : index
    %c0_25 = arith.constant 0 : index
    %c32_26 = arith.constant 32 : index
    %35 = vector.load %arg2[%c2_23, %c0_24, %c0_25, %c32_26] : memref<3x1x128x64xbf16, #tpu.memory_space<vmem>>, vector<1x1x128x32xbf16>
    %36 = vector.shape_cast %35 : vector<1x1x128x32xbf16> to vector<128x32xbf16>
    %cst_27 = arith.constant dense<0.000000e+00> : vector<128x128xf32>
    %37 = tpu.matmul %32, %34, %cst_27 {dimension_numbers = #tpu.dot_dimension_numbers<[1], [1], [0], [0], [0, 0, 1, 0], [], []>} : vector<128x32xbf16>, vector<128x32xbf16>, vector<128x128xf32> -> vector<128x128xf32>
    %cst_28 = arith.constant -1.000000e+30 : f32
    %38 = vector.broadcast %cst_28 : f32 to vector<128x128xf32>
    %39 = arith.select %5, %37, %38 : vector<128x128xi1>, vector<128x128xf32>
    %cst_29 = arith.constant dense<0xFF800000> : vector<128xf32>
    %40 = vector.multi_reduction <maximumf>, %39, %cst_29 [1] : vector<128x128xf32> to vector<128xf32>
    %41 = vector.shape_cast %40 : vector<128xf32> to vector<128x1xf32>
    %42 = vector.broadcast %41 : vector<128x1xf32> to vector<128x128xf32>
    %43 = arith.subf %39, %42 : vector<128x128xf32>
    %44 = math.exp %43 : vector<128x128xf32>
    %cst_30 = arith.constant dense<0.000000e+00> : vector<128xf32>
    %45 = vector.multi_reduction <add>, %44, %cst_30 [1] : vector<128x128xf32> to vector<128xf32>
    %46 = vector.shape_cast %45 : vector<128xf32> to vector<128x1xf32>
    %47 = tpu.reciprocal %46 {approx = true} : vector<128x1xf32> -> vector<128x1xf32>
    %48 = vector.broadcast %47 : vector<128x1xf32> to vector<128x128xf32>
    %49 = arith.mulf %44, %48 : vector<128x128xf32>
    %50 = arith.truncf %49 : vector<128x128xf32> to vector<128x128xbf16>
    %cst_31 = arith.constant dense<0.000000e+00> : vector<128x32xf32>
    %51 = tpu.matmul %50, %36, %cst_31 {dimension_numbers = #tpu.dot_dimension_numbers<[1], [0], [0], [1], [0, 0, 1, 1], [], []>} : vector<128x128xbf16>, vector<128x32xbf16>, vector<128x32xf32> -> vector<128x32xf32>
    %52 = arith.truncf %51 : vector<128x32xf32> to vector<128x32xbf16>
    %c0_32 = arith.constant 0 : index
    %c0_33 = arith.constant 0 : index
    %c32_34 = arith.constant 32 : index
    %53 = vector.load %arg3[%c0_32, %c0_33, %c32_34] : memref<1x128x64xbf16, #tpu.memory_space<vmem>>, vector<1x128x32xbf16>
    %54 = vector.shape_cast %53 : vector<1x128x32xbf16> to vector<128x32xbf16>
    %55 = vector.shape_cast %52 : vector<128x32xbf16> to vector<1x128x32xbf16>
    tpu.vector_store %arg3[%c0_32, %c0_33, %c32_34], %55 {strides = array<i32>} : memref<1x128x64xbf16, #tpu.memory_space<vmem>>, vector<1x128x32xbf16>,
    return
  }
  func.func @transform_0(%arg0: i32, %arg1: i32) -> (i32, i32, i32, i32) {
    %c0_i32 = arith.constant 0 : i32
    %c0_i32_0 = arith.constant 0 : i32
    %c0_i32_1 = arith.constant 0 : i32
    return %c0_i32, %arg0, %c0_i32_0, %arg1 : i32, i32, i32, i32
  }
  func.func @transform_1(%arg0: i32, %arg1: i32) -> (i32, i32, i32) {
    %c0_i32 = arith.constant 0 : i32
    %c0_i32_0 = arith.constant 0 : i32
    return %arg0, %c0_i32, %arg1 : i32, i32, i32
  }
}

module attributes {stable_mosaic.version = 11 : i64} {
  func.func @_logits_kernel(%arg0: i32, %arg1: i32, %arg2: memref<1xf32, #tpu.memory_space<smem>>, %arg3: memref<2x64xf32, #tpu.memory_space<vmem>>, %arg4: memref<2x64xf32, #tpu.memory_space<vmem>>, %arg5: memref<2x2xf32, #tpu.memory_space<vmem>>) attributes {dimension_semantics = [#tpu.dimension_semantics<parallel>, #tpu.dimension_semantics<parallel>], iteration_bounds = array<i64: 1, 1>, scalar_prefetch = 0 : i64, scratch_operands = 0 : i64, tpu.core_type = #tpu.core_type<tc>, window_params = [{transform_indices = @transform_0, window_bounds = array<i64: 1>}, {transform_indices = @transform_1, window_bounds = array<i64: 2, 64>}, {transform_indices = @transform_2, window_bounds = array<i64: 2, 64>}, {transform_indices = @transform_3, window_bounds = array<i64: 2, 2>}]} {
    %c0 = arith.constant 0 : index
    %c0_0 = arith.constant 0 : index
    %0 = vector.load %arg3[%c0, %c0_0] : memref<2x64xf32, #tpu.memory_space<vmem>>, vector<2x64xf32>
    %c0_1 = arith.constant 0 : index
    %c0_2 = arith.constant 0 : index
    %1 = vector.load %arg4[%c0_1, %c0_2] : memref<2x64xf32, #tpu.memory_space<vmem>>, vector<2x64xf32>
    %2 = arith.mulf %0, %0 : vector<2x64xf32>
    %cst = arith.constant dense<0.000000e+00> : vector<2xf32>
    %3 = vector.multi_reduction <add>, %2, %cst [1] : vector<2x64xf32> to vector<2xf32>
    %4 = vector.shape_cast %3 : vector<2xf32> to vector<2x1xf32>
    %cst_3 = arith.constant 9.99999996E-13 : f32
    %5 = vector.broadcast %cst_3 : f32 to vector<2x1xf32>
    %6 = arith.addf %4, %5 : vector<2x1xf32>
    %7 = math.rsqrt %6 : vector<2x1xf32>
    %8 = vector.broadcast %7 : vector<2x1xf32> to vector<2x64xf32>
    %9 = arith.mulf %0, %8 : vector<2x64xf32>
    %10 = arith.mulf %1, %1 : vector<2x64xf32>
    %cst_4 = arith.constant dense<0.000000e+00> : vector<2xf32>
    %11 = vector.multi_reduction <add>, %10, %cst_4 [1] : vector<2x64xf32> to vector<2xf32>
    %12 = vector.shape_cast %11 : vector<2xf32> to vector<2x1xf32>
    %cst_5 = arith.constant 9.99999996E-13 : f32
    %13 = vector.broadcast %cst_5 : f32 to vector<2x1xf32>
    %14 = arith.addf %12, %13 : vector<2x1xf32>
    %15 = math.rsqrt %14 : vector<2x1xf32>
    %16 = vector.broadcast %15 : vector<2x1xf32> to vector<2x64xf32>
    %17 = arith.mulf %1, %16 : vector<2x64xf32>
    %cst_6 = arith.constant dense<0.000000e+00> : vector<2x2xf32>
    %18 = tpu.matmul %9, %17, %cst_6 {dimension_numbers = #tpu.dot_dimension_numbers<[1], [1], [0], [0], [0, 0, 1, 0], [], []>} : vector<2x64xf32>, vector<2x64xf32>, vector<2x2xf32> -> vector<2x2xf32>
    %c0_7 = arith.constant 0 : index
    %19 = memref.load %arg2[%c0_7] : memref<1xf32, #tpu.memory_space<smem>>
    %20 = vector.broadcast %19 : f32 to vector<2x2xf32>
    %21 = arith.mulf %20, %18 : vector<2x2xf32>
    %c0_8 = arith.constant 0 : index
    %c0_9 = arith.constant 0 : index
    %22 = vector.load %arg5[%c0_8, %c0_9] : memref<2x2xf32, #tpu.memory_space<vmem>>, vector<2x2xf32>
    tpu.vector_store %arg5[%c0_8, %c0_9], %21 {strides = array<i32>} : memref<2x2xf32, #tpu.memory_space<vmem>>, vector<2x2xf32>,
    return
  }
  func.func @transform_0(%arg0: i32, %arg1: i32) -> i32 {
    %c0_i32 = arith.constant 0 : i32
    %c0_i32_0 = arith.constant 0 : i32
    return %c0_i32 : i32
  }
  func.func @transform_1(%arg0: i32, %arg1: i32) -> (i32, i32) {
    %c0_i32 = arith.constant 0 : i32
    %c0_i32_0 = arith.constant 0 : i32
    return %arg0, %c0_i32 : i32, i32
  }
  func.func @transform_2(%arg0: i32, %arg1: i32) -> (i32, i32) {
    %c0_i32 = arith.constant 0 : i32
    %c0_i32_0 = arith.constant 0 : i32
    return %arg1, %c0_i32 : i32, i32
  }
  func.func @transform_3(%arg0: i32, %arg1: i32) -> (i32, i32) {
    %c0_i32 = arith.constant 0 : i32
    return %arg0, %arg1 : i32, i32
  }
}

</mosaic_0001>

<bundles_post_ra>
// kernel: _lambda_.25
= control target key start
LH: loop header
LB: loop body
LE: loop exit
PB: predicated region body
PF: predicated region fallthrough
CT: control target
= control target key end

     0   :  { %vm19_vm0 = vcmask 523264   ;;  %v222_v0 = vmov 0   ;;  %v223_v2 = vmov 0.0   ;;  %vm184_vm1 = vcmask 519168   ;;  %s292_s1 = inlined_call_operand.vmem [shape: bf16[192,64], index: 1, kind: input, shape index: {}]   ;;  %s293_s0 = inlined_call_operand.vmem [shape: bf16[8,192], index: 0, kind: input, shape index: {}]   ;;  %s294_s2 = inlined_call_operand.vmem [shape: f32[1,64], index: 2, kind: input, shape index: {}]   ;;  %s295_s3 = inlined_call_operand.vmem [shape: bf16[8,64], index: 3, kind: output, shape index: {}]  }
   0x1   :  { %129 = vmatprep.subr.bf16.mxu0 %v222_v0  ;;  %v208_v1 = vld [vmem:[%s292_s1 + $0x38] sm:$0xff]   ;;  %20 = vst.msk [vmem:[#allocation2] sm:$0xff] %vm19_vm0, %v223_v2  ;;  %v209_v3 = vld [vmem:[%s292_s1 + $0x30] sm:$0xff]   ;;  %v210_v4 = vld [vmem:[%s292_s1 + $0x28] sm:$0xff]  }
   0x2   :  { %130 = vmatpush1.bf16.msra.mxu0 %v208_v1  ;;  %v211_v5 = vld [vmem:[%s292_s1 + $0x20] sm:$0xff]   ;;  %v212_v8 = vld [vmem:[%s292_s1 + $0x18] sm:$0xff]   ;;  %v213_v9 = vld [vmem:[%s292_s1 + $0x10] sm:$0xff]  }
   0x3   :  { %131 = vmatprep.subr.bf16.mxu0 %v222_v0  ;;  %v22_v6 = vld [vmem:[%s293_s0] sm:$0xff]  ;;  %v214_v10 = vld [vmem:[%s292_s1 + $0x8] sm:$0xff]   ;;  %v216_v12 = vld [vmem:[%s292_s1 + $0x58] sm:$0xff]  }
   0x4   :  { %v191_v7 = vcombine.high %v22_v6, %v22_v6  ;;  %v215_v11 = vld [vmem:[%s292_s1] sm:$0xff]   ;;  %v217_v13 = vld [vmem:[%s292_s1 + $0x50] sm:$0xff]   ;;  %v218_v14 = vld [vmem:[%s292_s1 + $0x48] sm:$0xff]   ;;  %v190_v16 = vcombine.low %v22_v6, %v22_v6 }
   0x5   :  { %v219_v15 = vld [vmem:[%s292_s1 + $0x40] sm:$0xff]  }
   0x6   :  { %132 = vmatpush1.bf16.msra.mxu0 %v209_v3  ;;  %204 = vmatprep.mubr.msk.bf16.mxu0 %vm19_vm0, %v191_v7  ;;  %v205_v23 = vld [vmem:[%s294_s2] ss:$0 sm:$0xff] }
   0x7   :  { %133 = vmatprep.subr.bf16.mxu0 %v222_v0 }
   0x8   :  { %v21_v17 = vld [vmem:[#allocation2] sm:$0xff] }
   0xa   :  { %134 = vmatpush1.bf16.msra.mxu0 %v210_v4 }
   0xb   :  { %135 = vmatprep.subr.bf16.mxu0 %v222_v0 }
   0xe   :  { %136 = vmatpush1.bf16.msra.mxu0 %v211_v5 }
   0xf   :  { %137 = vmatprep.subr.bf16.mxu0 %v222_v0 }
  0x12   :  { %138 = vmatpush1.bf16.msra.mxu0 %v212_v8 }
  0x13   :  { %139 = vmatprep.subr.bf16.mxu0 %v222_v0 }
  0x16   :  { %140 = vmatpush1.bf16.msra.mxu0 %v213_v9 }
  0x17   :  { %141 = vmatprep.subr.bf16.mxu0 %v222_v0 }
  0x1a   :  { %142 = vmatpush1.bf16.msra.mxu0 %v214_v10 }
  0x1b   :  { %143 = vmatprep.subr.bf16.mxu0 %v222_v0 }
  0x1e   :  { %144 = vmatpush1.bf16.msra.mxu0 %v215_v11 }
  0x1f   :  { %153 = vmatprep.subr.bf16.mxu0 %v222_v0 }
  0x22   :  { %154 = vmatpush2.bf16.msra.mxu0 %v216_v12 }
  0x23   :  { %155 = vmatprep.subr.bf16.mxu0 %v222_v0 }
  0x26   :  { %156 = vmatpush2.bf16.msra.mxu0 %v217_v13 }
  0x27   :  { %157 = vmatprep.subr.bf16.mxu0 %v222_v0 }
  0x2a   :  { %158 = vmatpush2.bf16.msra.mxu0 %v218_v14 }
  0x2b   :  { %159 = vmatprep.subr.bf16.mxu0 %v222_v0 }
  0x2e   :  { %160 = vmatpush2.bf16.msra.mxu0 %v219_v15 }
  0x31   :  { %162 = vmatmul.mubr.bf16.vlgmr.msra.gmra.mxu0 %v190_v16 }
  0xf1   :  { %v163_v18 = vpop.f32.mrf.mxu0 }
  0xf2   :  { %v169_v19 = vadd.f32 %v163_v18, %v21_v17 }
  0xf3   :  { %v165_v20 = vpop.f32.mrf.mxu0 }
  0xf4   :  { %170 = vst.msk [vmem:[#allocation2] sm:$0xff] %vm19_vm0, %v169_v19 }
  0xf5   :  { %v166_v21 = vpop.f32.mrf.mxu0 }
  0xf7   :  { %v167_v22 = vpop.f32.mrf.mxu0 }
  0xfb   :  { %v174_v24 = vld [vmem:[#allocation2] sm:$0xff] }
  0xfc   :  { %v182_v25 = vadd.f32 %v205_v23, %v174_v24 }
  0xfe   :  { %v183_v26 = vpack.c.bf16 %v182_v25, %v182_v25 }
 0x100   :  { %185 = vst.msk [vmem:[%s295_s3] sm:$0xf] %vm184_vm1, %v183_v26 }

// kernel: _lambda_.26
= control target key start
LH: loop header
LB: loop body
LE: loop exit
PB: predicated region body
PF: predicated region fallthrough
CT: control target
= control target key end

     0   :  { %vm78_vm0 = vcmask 523264   ;;  %vm702_vm1 = vcmask 519168   ;;  %s1634_s0 = inlined_call_operand.vmem [shape: bf16[256,64], index: 0, kind: input, shape index: {}]   ;;  %s1635_s1 = inlined_call_operand.vmem [shape: f32[1,64], index: 1, kind: input, shape index: {}]   ;;  %s1636_s2 = inlined_call_operand.vmem [shape: f32[1,64], index: 2, kind: input, shape index: {}]   ;;  %s1637_s3 = inlined_call_operand.vmem [shape: bf16[256,64], index: 3, kind: output, shape index: {}]  }
   0x1   :  { %v971_v0 = vld [vmem:[%s1634_s0] sm:$0xff]   ;;  %v976_v1 = vld [vmem:[%s1634_s0 + $0x8] sm:$0xff]   ;;  %v985_v6 = vld [vmem:[%s1634_s0 + $0x10] sm:$0xff]  }
   0x2   :  { %v807_v2 = vunpack.c.l.bf16 %v971_v0  ;;  %v811_v3 = vunpack.c.l.bf16 %v976_v1  ;;  %v808_v4 = vunpack.c.h.bf16 %v971_v0  ;;  %v812_v5 = vunpack.c.h.bf16 %v976_v1  ;;  %v1004_v13 = vld [vmem:[%s1634_s0 + $0x18] sm:$0xff]   ;;  %v1017_v18 = vld [vmem:[%s1634_s0 + $0x20] sm:$0xff]   ;;  %v1030_v23 = vld [vmem:[%s1634_s0 + $0x28] sm:$0xff]  }
   0x3   :  { %v815_v11 = vunpack.c.l.bf16 %v985_v6  ;;  %v816_v12 = vunpack.c.h.bf16 %v985_v6  ;;  %v819_v16 = vunpack.c.l.bf16 %v1004_v13  ;;  %v820_v17 = vunpack.c.h.bf16 %v1004_v13  ;;  %v1043_v28 = vld [vmem:[%s1634_s0 + $0x30] sm:$0xff]   ;;  %v1056_v33 = vld [vmem:[%s1634_s0 + $0x38] sm:$0xff]   ;;  %v1069_v38 = vld [vmem:[%s1634_s0 + $0x40] sm:$0xff]  }
   0x4   :  { %v79_v7 = vsel %vm78_vm0, %v807_v2, 0.0  ;;  %v85_v8 = vsel %vm78_vm0, %v811_v3, 0.0  ;;  %v82_v9 = vsel %vm78_vm0, %v808_v4, 0.0  ;;  %v88_v10 = vsel %vm78_vm0, %v812_v5, 0.0  ;;  %v1082_v43 = vld [vmem:[%s1634_s0 + $0x48] sm:$0xff]   ;;  %v1095_v48 = vld [vmem:[%s1634_s0 + $0x50] sm:$0xff]  }
   0x5   :  { %80 = vadd.xlane.f32.xlu0 %v79_v7  ;;  %86 = vadd.xlane.f32.xlu1 %v85_v8  ;;  %v91_v14 = vsel %vm78_vm0, %v815_v11, 0.0  ;;  %v94_v15 = vsel %vm78_vm0, %v816_v12, 0.0  ;;  %v97_v19 = vsel %vm78_vm0, %v819_v16, 0.0  ;;  %v100_v20 = vsel %vm78_vm0, %v820_v17, 0.0  ;;  %v1108_v53 = vld [vmem:[%s1634_s0 + $0x58] sm:$0xff]   ;;  %v1121_v58 = vld [vmem:[%s1634_s0 + $0x60] sm:$0xff]  }
   0x6   :  { %v823_v21 = vunpack.c.l.bf16 %v1017_v18  ;;  %v824_v22 = vunpack.c.h.bf16 %v1017_v18  ;;  %v827_v26 = vunpack.c.l.bf16 %v1030_v23  ;;  %v828_v27 = vunpack.c.h.bf16 %v1030_v23  ;;  %v1134_v63 = vld [vmem:[%s1634_s0 + $0x68] sm:$0xff]  }
   0x7   :  { %v831_v31 = vunpack.c.l.bf16 %v1043_v28  ;;  %v832_v32 = vunpack.c.h.bf16 %v1043_v28  ;;  %v835_v36 = vunpack.c.l.bf16 %v1056_v33  ;;  %v836_v37 = vunpack.c.h.bf16 %v1056_v33 }
   0x8   :  { %v103_v24 = vsel %vm78_vm0, %v823_v21, 0.0  ;;  %v106_v25 = vsel %vm78_vm0, %v824_v22, 0.0  ;;  %v109_v29 = vsel %vm78_vm0, %v827_v26, 0.0  ;;  %v112_v30 = vsel %vm78_vm0, %v828_v27, 0.0 }
   0x9   :  { %83 = vadd.xlane.f32.xlu0 %v82_v9  ;;  %89 = vadd.xlane.f32.xlu1 %v88_v10  ;;  %v115_v34 = vsel %vm78_vm0, %v831_v31, 0.0  ;;  %v118_v35 = vsel %vm78_vm0, %v832_v32, 0.0  ;;  %v121_v39 = vsel %vm78_vm0, %v835_v36, 0.0  ;;  %v124_v40 = vsel %vm78_vm0, %v836_v37, 0.0 }
   0xa   :  { %v839_v41 = vunpack.c.l.bf16 %v1069_v38  ;;  %v840_v42 = vunpack.c.h.bf16 %v1069_v38  ;;  %v843_v46 = vunpack.c.l.bf16 %v1082_v43  ;;  %v844_v47 = vunpack.c.h.bf16 %v1082_v43 }
   0xb   :  { %v847_v51 = vunpack.c.l.bf16 %v1095_v48  ;;  %v848_v52 = vunpack.c.h.bf16 %v1095_v48  ;;  %v851_v56 = vunpack.c.l.bf16 %v1108_v53  ;;  %v852_v57 = vunpack.c.h.bf16 %v1108_v53 }
   0xc   :  { %v127_v44 = vsel %vm78_vm0, %v839_v41, 0.0  ;;  %v130_v45 = vsel %vm78_vm0, %v840_v42, 0.0  ;;  %v133_v49 = vsel %vm78_vm0, %v843_v46, 0.0  ;;  %v136_v50 = vsel %vm78_vm0, %v844_v47, 0.0 }
   0xd   :  { %92 = vadd.xlane.f32.xlu0 %v91_v14  ;;  %95 = vadd.xlane.f32.xlu1 %v94_v15  ;;  %v139_v54 = vsel %vm78_vm0, %v847_v51, 0.0  ;;  %v142_v55 = vsel %vm78_vm0, %v848_v52, 0.0  ;;  %v145_v59 = vsel %vm78_vm0, %v851_v56, 0.0  ;;  %v148_v60 = vsel %vm78_vm0, %v852_v57, 0.0  ;;  %v1147_v14 = vld [vmem:[%s1634_s0 + $0x70] sm:$0xff]  }
   0xe   :  { %v855_v61 = vunpack.c.l.bf16 %v1121_v58  ;;  %v856_v62 = vunpack.c.h.bf16 %v1121_v58  ;;  %v859_v9 = vunpack.c.l.bf16 %v1134_v63  ;;  %v860_v10 = vunpack.c.h.bf16 %v1134_v63 }
  0x10   :  { %v151_v7 = vsel %vm78_vm0, %v855_v61, 0.0  ;;  %v154_v8 = vsel %vm78_vm0, %v856_v62, 0.0  ;;  %v157_v15 = vsel %vm78_vm0, %v859_v9, 0.0 }
  0x11   :  { %98 = vadd.xlane.f32.xlu0 %v97_v19  ;;  %101 = vadd.xlane.f32.xlu1 %v100_v20  ;;  %v160_v19 = vsel %vm78_vm0, %v860_v10, 0.0  ;;  %v863_v20 = vunpack.c.l.bf16 %v1147_v14 }
  0x15   :  { %104 = vadd.xlane.f32.xlu0 %v103_v24  ;;  %107 = vadd.xlane.f32.xlu1 %v106_v25  ;;  %v864_v24 = vunpack.c.h.bf16 %v1147_v14  ;;  %v1160_v25 = vld [vmem:[%s1634_s0 + $0x78] sm:$0xff]  }
  0x19   :  { %110 = vadd.xlane.f32.xlu0 %v109_v29  ;;  %113 = vadd.xlane.f32.xlu1 %v112_v30  ;;  %v163_v29 = vsel %vm78_vm0, %v863_v20, 0.0  ;;  %v166_v30 = vsel %vm78_vm0, %v864_v24, 0.0 }
  0x1d   :  { %116 = vadd.xlane.f32.xlu0 %v115_v34  ;;  %119 = vadd.xlane.f32.xlu1 %v118_v35  ;;  %v867_v34 = vunpack.c.l.bf16 %v1160_v25  ;;  %v868_v35 = vunpack.c.h.bf16 %v1160_v25 }
  0x21   :  { %122 = vadd.xlane.f32.xlu0 %v121_v39  ;;  %125 = vadd.xlane.f32.xlu1 %v124_v40  ;;  %v169_v39 = vsel %vm78_vm0, %v867_v34, 0.0  ;;  %v172_v40 = vsel %vm78_vm0, %v868_v35, 0.0 }
  0x25   :  { %128 = vadd.xlane.f32.xlu0 %v127_v44  ;;  %131 = vadd.xlane.f32.xlu1 %v130_v45 }
  0x29   :  { %134 = vadd.xlane.f32.xlu0 %v133_v49  ;;  %137 = vadd.xlane.f32.xlu1 %v136_v50 }
  0x2d   :  { %140 = vadd.xlane.f32.xlu0 %v139_v54  ;;  %143 = vadd.xlane.f32.xlu1 %v142_v55 }
  0x31   :  { %146 = vadd.xlane.f32.xlu0 %v145_v59  ;;  %149 = vadd.xlane.f32.xlu1 %v148_v60 }
  0x35   :  { %152 = vadd.xlane.f32.xlu0 %v151_v7  ;;  %155 = vadd.xlane.f32.xlu1 %v154_v8 }
  0x39   :  { %158 = vadd.xlane.f32.xlu0 %v157_v15  ;;  %161 = vadd.xlane.f32.xlu1 %v160_v19 }
  0x3d   :  { %164 = vadd.xlane.f32.xlu0 %v163_v29  ;;  %167 = vadd.xlane.f32.xlu1 %v166_v30 }
  0x41   :  { %170 = vadd.xlane.f32.xlu0 %v169_v39  ;;  %173 = vadd.xlane.f32.xlu1 %v172_v40 }
  0x8e   :  { %v81_v44 = vpop.xlane.xlu0 %80  ;;  %v87_v45 = vpop.xlane.xlu1 %86 }
  0x8f   :  { %v176_v49 = vmul.f32 0.015625, %v81_v44  ;;  %v178_v50 = vmul.f32 0.015625, %v87_v45 }
  0x91   :  { %v1178_v54 = vsub.f32 %v807_v2, %v176_v49  ;;  %v1182_v55 = vsub.f32 %v811_v3, %v178_v50 }
  0x92   :  { %v84_v59 = vpop.xlane.xlu0 %83  ;;  %v90_v60 = vpop.xlane.xlu1 %89 }
  0x93   :  { %v177_v7 = vmul.f32 0.015625, %v84_v59  ;;  %v179_v8 = vmul.f32 0.015625, %v90_v60  ;;  %v240_v15 = vmul.f32 %v1178_v54, %v1178_v54  ;;  %v242_v19 = vmul.f32 %v1182_v55, %v1182_v55 }
  0x95   :  { %v1190_v29 = vsub.f32 %v808_v4, %v177_v7  ;;  %v1194_v2 = vsub.f32 %v812_v5, %v179_v8  ;;  %v272_v3 = vsel %vm78_vm0, %v240_v15, 0.0  ;;  %v278_v40 = vsel %vm78_vm0, %v242_v19, 0.0 }
  0x96   :  { %273 = vadd.xlane.f32.xlu0 %v272_v3  ;;  %v93_v30 = vpop.xlane.xlu0 %92  ;;  %v96_v39 = vpop.xlane.xlu1 %95 }
  0x97   :  { %v180_v44 = vmul.f32 0.015625, %v93_v30  ;;  %v181_v45 = vmul.f32 0.015625, %v96_v39  ;;  %v241_v49 = vmul.f32 %v1190_v29, %v1190_v29  ;;  %v243_v0 = vmul.f32 %v1194_v2, %v1194_v2 }
  0x99   :  { %v1204_v1 = vsub.f32 %v815_v11, %v180_v44  ;;  %v1208_v4 = vsub.f32 %v816_v12, %v181_v45  ;;  %v275_v5 = vsel %vm78_vm0, %v241_v49, 0.0  ;;  %v281_v60 = vsel %vm78_vm0, %v243_v0, 0.0 }
  0x9a   :  { %279 = vadd.xlane.f32.xlu0 %v278_v40  ;;  %276 = vadd.xlane.f32.xlu1 %v275_v5  ;;  %v99_v50 = vpop.xlane.xlu0 %98  ;;  %v102_v59 = vpop.xlane.xlu1 %101 }
  0x9b   :  { %v182_v7 = vmul.f32 0.015625, %v99_v50  ;;  %v183_v8 = vmul.f32 0.015625, %v102_v59  ;;  %v244_v15 = vmul.f32 %v1204_v1, %v1204_v1  ;;  %v245_v11 = vmul.f32 %v1208_v4, %v1208_v4 }
  0x9d   :  { %v1218_v6 = vsub.f32 %v819_v16, %v182_v7  ;;  %v1222_v12 = vsub.f32 %v820_v17, %v183_v8  ;;  %v284_v19 = vsel %vm78_vm0, %v244_v15, 0.0  ;;  %v287_v39 = vsel %vm78_vm0, %v245_v11, 0.0 }
  0x9e   :  { %282 = vadd.xlane.f32.xlu1 %v281_v60  ;;  %285 = vadd.xlane.f32.xlu0 %v284_v19  ;;  %v105_v3 = vpop.xlane.xlu0 %104  ;;  %v108_v30 = vpop.xlane.xlu1 %107 }
  0x9f   :  { %v184_v40 = vmul.f32 0.015625, %v105_v3  ;;  %v185_v44 = vmul.f32 0.015625, %v108_v30  ;;  %v246_v45 = vmul.f32 %v1218_v6, %v1218_v6  ;;  %v247_v16 = vmul.f32 %v1222_v12, %v1222_v12 }
  0xa1   :  { %v1232_v13 = vsub.f32 %v823_v21, %v184_v40  ;;  %v1236_v17 = vsub.f32 %v824_v22, %v185_v44  ;;  %v290_v49 = vsel %vm78_vm0, %v246_v45, 0.0  ;;  %v293_v50 = vsel %vm78_vm0, %v247_v16, 0.0 }
  0xa2   :  { %288 = vadd.xlane.f32.xlu1 %v287_v39  ;;  %291 = vadd.xlane.f32.xlu0 %v290_v49  ;;  %v111_v0 = vpop.xlane.xlu0 %110  ;;  %v114_v5 = vpop.xlane.xlu1 %113 }
  0xa3   :  { %v186_v59 = vmul.f32 0.015625, %v111_v0  ;;  %v187_v60 = vmul.f32 0.015625, %v114_v5  ;;  %v248_v7 = vmul.f32 %v1232_v13, %v1232_v13  ;;  %v249_v21 = vmul.f32 %v1236_v17, %v1236_v17 }
  0xa5   :  { %v1246_v18 = vsub.f32 %v827_v26, %v186_v59  ;;  %v1250_v22 = vsub.f32 %v828_v27, %v187_v60  ;;  %v296_v8 = vsel %vm78_vm0, %v248_v7, 0.0  ;;  %v299_v19 = vsel %vm78_vm0, %v249_v21, 0.0 }
  0xa6   :  { %294 = vadd.xlane.f32.xlu1 %v293_v50  ;;  %297 = vadd.xlane.f32.xlu0 %v296_v8  ;;  %v117_v15 = vpop.xlane.xlu0 %116  ;;  %v120_v11 = vpop.xlane.xlu1 %119 }
  0xa7   :  { %v188_v3 = vmul.f32 0.015625, %v117_v15  ;;  %v189_v30 = vmul.f32 0.015625, %v120_v11  ;;  %v250_v39 = vmul.f32 %v1246_v18, %v1246_v18  ;;  %v251_v26 = vmul.f32 %v1250_v22, %v1250_v22 }
  0xa9   :  { %v1260_v23 = vsub.f32 %v831_v31, %v188_v3  ;;  %v1264_v27 = vsub.f32 %v832_v32, %v189_v30  ;;  %v302_v40 = vsel %vm78_vm0, %v250_v39, 0.0  ;;  %v305_v16 = vsel %vm78_vm0, %v251_v26, 0.0 }
  0xaa   :  { %300 = vadd.xlane.f32.xlu1 %v299_v19  ;;  %303 = vadd.xlane.f32.xlu0 %v302_v40  ;;  %v123_v44 = vpop.xlane.xlu0 %122  ;;  %v126_v45 = vpop.xlane.xlu1 %125 }
  0xab   :  { %v190_v49 = vmul.f32 0.015625, %v123_v44  ;;  %v191_v0 = vmul.f32 0.015625, %v126_v45  ;;  %v252_v5 = vmul.f32 %v1260_v23, %v1260_v23  ;;  %v253_v31 = vmul.f32 %v1264_v27, %v1264_v27 }
  0xad   :  { %v1274_v28 = vsub.f32 %v835_v36, %v190_v49  ;;  %v1278_v32 = vsub.f32 %v836_v37, %v191_v0  ;;  %v308_v50 = vsel %vm78_vm0, %v252_v5, 0.0  ;;  %v311_v7 = vsel %vm78_vm0, %v253_v31, 0.0 }
  0xae   :  { %306 = vadd.xlane.f32.xlu1 %v305_v16  ;;  %309 = vadd.xlane.f32.xlu0 %v308_v50  ;;  %v129_v59 = vpop.xlane.xlu0 %128  ;;  %v132_v60 = vpop.xlane.xlu1 %131 }
  0xaf   :  { %v192_v21 = vmul.f32 0.015625, %v129_v59  ;;  %v193_v8 = vmul.f32 0.015625, %v132_v60  ;;  %v254_v15 = vmul.f32 %v1274_v28, %v1274_v28  ;;  %v255_v36 = vmul.f32 %v1278_v32, %v1278_v32 }
  0xb1   :  { %v1288_v33 = vsub.f32 %v839_v41, %v192_v21  ;;  %v1292_v37 = vsub.f32 %v840_v42, %v193_v8  ;;  %v314_v11 = vsel %vm78_vm0, %v254_v15, 0.0  ;;  %v317_v30 = vsel %vm78_vm0, %v255_v36, 0.0 }
  0xb2   :  { %312 = vadd.xlane.f32.xlu1 %v311_v7  ;;  %315 = vadd.xlane.f32.xlu0 %v314_v11  ;;  %v135_v19 = vpop.xlane.xlu0 %134  ;;  %v138_v3 = vpop.xlane.xlu1 %137 }
  0xb3   :  { %v194_v39 = vmul.f32 0.015625, %v135_v19  ;;  %v195_v26 = vmul.f32 0.015625, %v138_v3  ;;  %v256_v40 = vmul.f32 %v1288_v33, %v1288_v33  ;;  %v257_v41 = vmul.f32 %v1292_v37, %v1292_v37 }
  0xb5   :  { %v1302_v38 = vsub.f32 %v843_v46, %v194_v39  ;;  %v1306_v42 = vsub.f32 %v844_v47, %v195_v26  ;;  %v320_v44 = vsel %vm78_vm0, %v256_v40, 0.0  ;;  %v323_v49 = vsel %vm78_vm0, %v257_v41, 0.0 }
  0xb6   :  { %318 = vadd.xlane.f32.xlu1 %v317_v30  ;;  %321 = vadd.xlane.f32.xlu0 %v320_v44  ;;  %v141_v45 = vpop.xlane.xlu0 %140  ;;  %v144_v16 = vpop.xlane.xlu1 %143 }
  0xb7   :  { %v196_v0 = vmul.f32 0.015625, %v141_v45  ;;  %v197_v5 = vmul.f32 0.015625, %v144_v16  ;;  %v258_v31 = vmul.f32 %v1302_v38, %v1302_v38  ;;  %v259_v46 = vmul.f32 %v1306_v42, %v1306_v42 }
  0xb9   :  { %v1316_v43 = vsub.f32 %v847_v51, %v196_v0  ;;  %v1320_v47 = vsub.f32 %v848_v52, %v197_v5  ;;  %v326_v50 = vsel %vm78_vm0, %v258_v31, 0.0  ;;  %v329_v7 = vsel %vm78_vm0, %v259_v46, 0.0 }
  0xba   :  { %324 = vadd.xlane.f32.xlu1 %v323_v49  ;;  %327 = vadd.xlane.f32.xlu0 %v326_v50  ;;  %v147_v59 = vpop.xlane.xlu0 %146  ;;  %v150_v60 = vpop.xlane.xlu1 %149 }
  0xbb   :  { %v198_v21 = vmul.f32 0.015625, %v147_v59  ;;  %v199_v8 = vmul.f32 0.015625, %v150_v60  ;;  %v260_v15 = vmul.f32 %v1316_v43, %v1316_v43  ;;  %v261_v51 = vmul.f32 %v1320_v47, %v1320_v47 }
  0xbd   :  { %v1330_v48 = vsub.f32 %v851_v56, %v198_v21  ;;  %v1334_v52 = vsub.f32 %v852_v57, %v199_v8  ;;  %v332_v36 = vsel %vm78_vm0, %v260_v15, 0.0  ;;  %v335_v3 = vsel %vm78_vm0, %v261_v51, 0.0 }
  0xbe   :  { %330 = vadd.xlane.f32.xlu1 %v329_v7  ;;  %333 = vadd.xlane.f32.xlu0 %v332_v36  ;;  %v153_v11 = vpop.xlane.xlu0 %152  ;;  %v156_v19 = vpop.xlane.xlu1 %155 }
  0xbf   :  { %v200_v30 = vmul.f32 0.015625, %v153_v11  ;;  %v201_v39 = vmul.f32 0.015625, %v156_v19  ;;  %v262_v26 = vmul.f32 %v1330_v48, %v1330_v48  ;;  %v263_v56 = vmul.f32 %v1334_v52, %v1334_v52 }
  0xc1   :  { %v1344_v53 = vsub.f32 %v855_v61, %v200_v30  ;;  %v1348_v57 = vsub.f32 %v856_v62, %v201_v39  ;;  %v338_v40 = vsel %vm78_vm0, %v262_v26, 0.0  ;;  %v341_v45 = vsel %vm78_vm0, %v263_v56, 0.0 }
  0xc2   :  { %336 = vadd.xlane.f32.xlu1 %v335_v3  ;;  %339 = vadd.xlane.f32.xlu0 %v338_v40  ;;  %v159_v41 = vpop.xlane.xlu0 %158  ;;  %v162_v44 = vpop.xlane.xlu1 %161 }
  0xc3   :  { %v202_v16 = vmul.f32 0.015625, %v159_v41  ;;  %v203_v49 = vmul.f32 0.015625, %v162_v44  ;;  %v264_v0 = vmul.f32 %v1344_v53, %v1344_v53  ;;  %v265_v61 = vmul.f32 %v1348_v57, %v1348_v57 }
  0xc5   :  { %v1358_v58 = vsub.f32 %v859_v9, %v202_v16  ;;  %v1362_v62 = vsub.f32 %v860_v10, %v203_v49  ;;  %v344_v5 = vsel %vm78_vm0, %v264_v0, 0.0  ;;  %v347_v50 = vsel %vm78_vm0, %v265_v61, 0.0 }
  0xc6   :  { %342 = vadd.xlane.f32.xlu1 %v341_v45  ;;  %345 = vadd.xlane.f32.xlu0 %v344_v5  ;;  %v165_v31 = vpop.xlane.xlu0 %164  ;;  %v168_v46 = vpop.xlane.xlu1 %167 }
  0xc7   :  { %v204_v59 = vmul.f32 0.015625, %v165_v31  ;;  %v205_v60 = vmul.f32 0.015625, %v168_v46  ;;  %v266_v7 = vmul.f32 %v1358_v58, %v1358_v58  ;;  %v267_v9 = vmul.f32 %v1362_v62, %v1362_v62 }
  0xc9   :  { %v1372_v63 = vsub.f32 %v863_v20, %v204_v59  ;;  %v1376_v10 = vsub.f32 %v864_v24, %v205_v60  ;;  %v350_v21 = vsel %vm78_vm0, %v266_v7, 0.0  ;;  %v353_v51 = vsel %vm78_vm0, %v267_v9, 0.0 }
  0xca   :  { %348 = vadd.xlane.f32.xlu1 %v347_v50  ;;  %351 = vadd.xlane.f32.xlu0 %v350_v21  ;;  %v171_v8 = vpop.xlane.xlu0 %170  ;;  %v174_v15 = vpop.xlane.xlu1 %173 }
  0xcb   :  { %v206_v36 = vmul.f32 0.015625, %v171_v8  ;;  %v207_v11 = vmul.f32 0.015625, %v174_v15  ;;  %v268_v19 = vmul.f32 %v1372_v63, %v1372_v63  ;;  %v269_v20 = vmul.f32 %v1376_v10, %v1376_v10 }
  0xcd   :  { %v1386_v14 = vsub.f32 %v867_v34, %v206_v36  ;;  %v1390_v24 = vsub.f32 %v868_v35, %v207_v11  ;;  %v356_v3 = vsel %vm78_vm0, %v268_v19, 0.0  ;;  %v359_v30 = vsel %vm78_vm0, %v269_v20, 0.0 }
  0xce   :  { %354 = vadd.xlane.f32.xlu1 %v353_v51  ;;  %357 = vadd.xlane.f32.xlu0 %v356_v3  ;;  %v1403_v3 = vld [vmem:[%s1635_s1] ss:$0 sm:$0xff] }
  0xcf   :  { %v270_v39 = vmul.f32 %v1386_v14, %v1386_v14  ;;  %v271_v26 = vmul.f32 %v1390_v24, %v1390_v24 }
  0xd1   :  { %v362_v56 = vsel %vm78_vm0, %v270_v39, 0.0  ;;  %v365_v25 = vsel %vm78_vm0, %v271_v26, 0.0 }
  0xd2   :  { %360 = vadd.xlane.f32.xlu1 %v359_v30  ;;  %363 = vadd.xlane.f32.xlu0 %v362_v56  ;;  %v1409_v56 = vld [vmem:[%s1636_s2] ss:$0 sm:$0xff] }
  0xd6   :  { %366 = vadd.xlane.f32.xlu1 %v365_v25 }
 0x11f   :  { %v274_v34 = vpop.xlane.xlu0 %273 }
 0x120   :  { %v368_v35 = vmul.f32 0.015625, %v274_v34 }
 0x122   :  { %v400_v40 = vadd.f32 1e-05, %v368_v35 }
 0x123   :  { %v277_v41 = vpop.xlane.xlu1 %276  ;;  %v280_v44 = vpop.xlane.xlu0 %279 }
 0x124   :  { %884 = vrsqrt.f32 %v400_v40  ;;  %v369_v45 = vmul.f32 0.015625, %v277_v41  ;;  %v370_v16 = vmul.f32 0.015625, %v280_v44 }
 0x126   :  { %v401_v49 = vadd.f32 1e-05, %v369_v45  ;;  %v402_v0 = vadd.f32 1e-05, %v370_v16 }
 0x127   :  { %v283_v61 = vpop.xlane.xlu1 %282  ;;  %v286_v5 = vpop.xlane.xlu0 %285 }
 0x128   :  { %886 = vrsqrt.f32 %v401_v49  ;;  %v371_v31 = vmul.f32 0.015625, %v283_v61  ;;  %v372_v46 = vmul.f32 0.015625, %v286_v5 }
 0x129   :  { %888 = vrsqrt.f32 %v402_v0 }
 0x12a   :  { %v403_v50 = vadd.f32 1e-05, %v371_v31  ;;  %v404_v59 = vadd.f32 1e-05, %v372_v46 }
 0x12b   :  { %v289_v60 = vpop.xlane.xlu1 %288  ;;  %v292_v7 = vpop.xlane.xlu0 %291 }
 0x12c   :  { %890 = vrsqrt.f32 %v403_v50  ;;  %v373_v9 = vmul.f32 0.015625, %v289_v60  ;;  %v374_v21 = vmul.f32 0.015625, %v292_v7 }
 0x12d   :  { %892 = vrsqrt.f32 %v404_v59 }
 0x12e   :  { %v405_v8 = vadd.f32 1e-05, %v373_v9  ;;  %v406_v15 = vadd.f32 1e-05, %v374_v21 }
 0x12f   :  { %v295_v51 = vpop.xlane.xlu1 %294  ;;  %v298_v36 = vpop.xlane.xlu0 %297 }
 0x130   :  { %894 = vrsqrt.f32 %v405_v8  ;;  %v375_v11 = vmul.f32 0.015625, %v295_v51  ;;  %v376_v19 = vmul.f32 0.015625, %v298_v36 }
 0x131   :  { %v885_v20 = vpop.eup %884  ;;  %896 = vrsqrt.f32 %v406_v15 }
 0x132   :  { %v464_v30 = vmul.f32 %v885_v20, %v1178_v54  ;;  %v407_v39 = vadd.f32 1e-05, %v375_v11  ;;  %v408_v26 = vadd.f32 1e-05, %v376_v19 }
 0x133   :  { %v301_v25 = vpop.xlane.xlu1 %300  ;;  %v304_v34 = vpop.xlane.xlu0 %303 }
 0x134   :  { %v503_v35 = vmul.f32 %v1403_v3, %v464_v30  ;;  %898 = vrsqrt.f32 %v407_v39  ;;  %v377_v40 = vmul.f32 0.015625, %v301_v25  ;;  %v378_v41 = vmul.f32 0.015625, %v304_v34 }
 0x135   :  { %v887_v44 = vpop.eup %886  ;;  %900 = vrsqrt.f32 %v408_v26 }
 0x136   :  { %v889_v45 = vpop.eup %888  ;;  %v542_v16 = vadd.f32 %v1409_v56, %v503_v35  ;;  %v465_v54 = vmul.f32 %v887_v44, %v1190_v29  ;;  %v409_v49 = vadd.f32 1e-05, %v377_v40  ;;  %v410_v0 = vadd.f32 1e-05, %v378_v41 }
 0x137   :  { %v466_v61 = vmul.f32 %v889_v45, %v1182_v55  ;;  %v307_v5 = vpop.xlane.xlu1 %306  ;;  %v310_v31 = vpop.xlane.xlu0 %309 }
 0x138   :  { %v773_v46 = vpack.c.bf16 %v542_v16, %v542_v16  ;;  %v504_v50 = vmul.f32 %v1403_v3, %v465_v54  ;;  %902 = vrsqrt.f32 %v409_v49  ;;  %v379_v59 = vmul.f32 0.015625, %v307_v5 }
 0x139   :  { %v891_v60 = vpop.eup %890  ;;  %v505_v7 = vmul.f32 %v1403_v3, %v466_v61  ;;  %904 = vrsqrt.f32 %v410_v0  ;;  %v380_v9 = vmul.f32 0.015625, %v310_v31 }
 0x13a   :  { %v893_v21 = vpop.eup %892  ;;  %703 = vst.msk [vmem:[%s1637_s3] sm:$0xf] %vm702_vm1, %v773_v46  ;;  %v543_v55 = vadd.f32 %v1409_v56, %v504_v50  ;;  %v467_v29 = vmul.f32 %v891_v60, %v1194_v2  ;;  %v411_v8 = vadd.f32 1e-05, %v379_v59 }
 0x13b   :  { %v544_v15 = vadd.f32 %v1409_v56, %v505_v7  ;;  %v468_v51 = vmul.f32 %v893_v21, %v1204_v1  ;;  %v412_v36 = vadd.f32 1e-05, %v380_v9  ;;  %v313_v11 = vpop.xlane.xlu1 %312  ;;  %v316_v19 = vpop.xlane.xlu0 %315 }
 0x13c   :  { %v774_v20 = vpack.c.bf16 %v543_v55, %v543_v55  ;;  %v506_v30 = vmul.f32 %v1403_v3, %v467_v29  ;;  %906 = vrsqrt.f32 %v411_v8  ;;  %v381_v39 = vmul.f32 0.015625, %v313_v11 }
 0x13d   :  { %v895_v26 = vpop.eup %894  ;;  %v775_v25 = vpack.c.bf16 %v544_v15, %v544_v15  ;;  %v507_v34 = vmul.f32 %v1403_v3, %v468_v51  ;;  %908 = vrsqrt.f32 %v412_v36  ;;  %v382_v35 = vmul.f32 0.015625, %v316_v19 }
 0x13e   :  { %v897_v2 = vpop.eup %896  ;;  %704 = vst.msk [vmem:[%s1637_s3 + $0x4] sm:$0xf] %vm702_vm1, %v774_v20  ;;  %v545_v1 = vadd.f32 %v1409_v56, %v506_v30  ;;  %v469_v40 = vmul.f32 %v895_v26, %v1208_v4  ;;  %v413_v41 = vadd.f32 1e-05, %v381_v39 }
 0x13f   :  { %705 = vst.msk [vmem:[%s1637_s3 + $0x8] sm:$0xf] %vm702_vm1, %v775_v25  ;;  %v546_v44 = vadd.f32 %v1409_v56, %v507_v34  ;;  %v470_v45 = vmul.f32 %v897_v2, %v1218_v6  ;;  %v414_v16 = vadd.f32 1e-05, %v382_v35  ;;  %v319_v54 = vpop.xlane.xlu1 %318  ;;  %v322_v49 = vpop.xlane.xlu0 %321 }
 0x140   :  { %v776_v0 = vpack.c.bf16 %v545_v1, %v545_v1  ;;  %v508_v61 = vmul.f32 %v1403_v3, %v469_v40  ;;  %910 = vrsqrt.f32 %v413_v41  ;;  %v383_v5 = vmul.f32 0.015625, %v319_v54 }
 0x141   :  { %v899_v31 = vpop.eup %898  ;;  %v777_v4 = vpack.c.bf16 %v546_v44, %v546_v44  ;;  %v509_v46 = vmul.f32 %v1403_v3, %v470_v45  ;;  %912 = vrsqrt.f32 %v414_v16  ;;  %v384_v50 = vmul.f32 0.015625, %v322_v49 }
 0x142   :  { %v901_v59 = vpop.eup %900  ;;  %706 = vst.msk [vmem:[%s1637_s3 + $0xc] sm:$0xf] %vm702_vm1, %v776_v0  ;;  %v547_v6 = vadd.f32 %v1409_v56, %v508_v61  ;;  %v471_v60 = vmul.f32 %v899_v31, %v1222_v12  ;;  %v415_v7 = vadd.f32 1e-05, %v383_v5 }
 0x143   :  { %707 = vst.msk [vmem:[%s1637_s3 + $0x10] sm:$0xf] %vm702_vm1, %v777_v4  ;;  %v548_v9 = vadd.f32 %v1409_v56, %v509_v46  ;;  %v472_v21 = vmul.f32 %v901_v59, %v1232_v13  ;;  %v416_v55 = vadd.f32 1e-05, %v384_v50  ;;  %v325_v29 = vpop.xlane.xlu1 %324  ;;  %v328_v8 = vpop.xlane.xlu0 %327 }
 0x144   :  { %v778_v15 = vpack.c.bf16 %v547_v6, %v547_v6  ;;  %v510_v51 = vmul.f32 %v1403_v3, %v471_v60  ;;  %914 = vrsqrt.f32 %v415_v7  ;;  %v385_v36 = vmul.f32 0.015625, %v325_v29 }
 0x145   :  { %v903_v11 = vpop.eup %902  ;;  %v779_v12 = vpack.c.bf16 %v548_v9, %v548_v9  ;;  %v511_v19 = vmul.f32 %v1403_v3, %v472_v21  ;;  %916 = vrsqrt.f32 %v416_v55  ;;  %v386_v20 = vmul.f32 0.015625, %v328_v8 }
 0x146   :  { %v905_v30 = vpop.eup %904  ;;  %708 = vst.msk [vmem:[%s1637_s3 + $0x14] sm:$0xf] %vm702_vm1, %v778_v15  ;;  %v549_v13 = vadd.f32 %v1409_v56, %v510_v51  ;;  %v473_v39 = vmul.f32 %v903_v11, %v1236_v17  ;;  %v417_v26 = vadd.f32 1e-05, %v385_v36 }
 0x147   :  { %709 = vst.msk [vmem:[%s1637_s3 + $0x18] sm:$0xf] %vm702_vm1, %v779_v12  ;;  %v550_v25 = vadd.f32 %v1409_v56, %v511_v19  ;;  %v474_v34 = vmul.f32 %v905_v30, %v1246_v18  ;;  %v418_v35 = vadd.f32 1e-05, %v386_v20  ;;  %v331_v2 = vpop.xlane.xlu1 %330  ;;  %v334_v1 = vpop.xlane.xlu0 %333 }
 0x148   :  { %v780_v40 = vpack.c.bf16 %v549_v13, %v549_v13  ;;  %v512_v41 = vmul.f32 %v1403_v3, %v473_v39  ;;  %918 = vrsqrt.f32 %v417_v26  ;;  %v387_v44 = vmul.f32 0.015625, %v331_v2 }
 0x149   :  { %v907_v45 = vpop.eup %906  ;;  %v781_v17 = vpack.c.bf16 %v550_v25, %v550_v25  ;;  %v513_v16 = vmul.f32 %v1403_v3, %v474_v34  ;;  %920 = vrsqrt.f32 %v418_v35  ;;  %v388_v54 = vmul.f32 0.015625, %v334_v1 }
 0x14a   :  { %v909_v49 = vpop.eup %908  ;;  %710 = vst.msk [vmem:[%s1637_s3 + $0x1c] sm:$0xf] %vm702_vm1, %v780_v40  ;;  %v551_v18 = vadd.f32 %v1409_v56, %v512_v41  ;;  %v475_v0 = vmul.f32 %v907_v45, %v1250_v22  ;;  %v419_v61 = vadd.f32 1e-05, %v387_v44 }
 0x14b   :  { %711 = vst.msk [vmem:[%s1637_s3 + $0x20] sm:$0xf] %vm702_vm1, %v781_v17  ;;  %v552_v5 = vadd.f32 %v1409_v56, %v513_v16  ;;  %v476_v31 = vmul.f32 %v909_v49, %v1260_v23  ;;  %v420_v4 = vadd.f32 1e-05, %v388_v54  ;;  %v337_v46 = vpop.xlane.xlu1 %336  ;;  %v340_v50 = vpop.xlane.xlu0 %339 }
 0x14c   :  { %v782_v59 = vpack.c.bf16 %v551_v18, %v551_v18  ;;  %v514_v6 = vmul.f32 %v1403_v3, %v475_v0  ;;  %922 = vrsqrt.f32 %v419_v61  ;;  %v389_v60 = vmul.f32 0.015625, %v337_v46 }
 0x14d   :  { %v911_v7 = vpop.eup %910  ;;  %v783_v22 = vpack.c.bf16 %v552_v5, %v552_v5  ;;  %v515_v9 = vmul.f32 %v1403_v3, %v476_v31  ;;  %924 = vrsqrt.f32 %v420_v4  ;;  %v390_v21 = vmul.f32 0.015625, %v340_v50 }
 0x14e   :  { %v913_v55 = vpop.eup %912  ;;  %712 = vst.msk [vmem:[%s1637_s3 + $0x24] sm:$0xf] %vm702_vm1, %v782_v59  ;;  %v553_v23 = vadd.f32 %v1409_v56, %v514_v6  ;;  %v477_v29 = vmul.f32 %v911_v7, %v1264_v27  ;;  %v421_v8 = vadd.f32 1e-05, %v389_v60 }
 0x14f   :  { %713 = vst.msk [vmem:[%s1637_s3 + $0x28] sm:$0xf] %vm702_vm1, %v783_v22  ;;  %v554_v15 = vadd.f32 %v1409_v56, %v515_v9  ;;  %v478_v51 = vmul.f32 %v913_v55, %v1274_v28  ;;  %v422_v36 = vadd.f32 1e-05, %v390_v21  ;;  %v343_v11 = vpop.xlane.xlu1 %342  ;;  %v346_v12 = vpop.xlane.xlu0 %345 }
 0x150   :  { %v784_v19 = vpack.c.bf16 %v553_v23, %v553_v23  ;;  %v516_v20 = vmul.f32 %v1403_v3, %v477_v29  ;;  %926 = vrsqrt.f32 %v421_v8  ;;  %v391_v30 = vmul.f32 0.015625, %v343_v11 }
 0x151   :  { %v915_v13 = vpop.eup %914  ;;  %v785_v27 = vpack.c.bf16 %v554_v15, %v554_v15  ;;  %v517_v39 = vmul.f32 %v1403_v3, %v478_v51  ;;  %928 = vrsqrt.f32 %v422_v36  ;;  %v392_v26 = vmul.f32 0.015625, %v346_v12 }
 0x152   :  { %v917_v25 = vpop.eup %916  ;;  %714 = vst.msk [vmem:[%s1637_s3 + $0x2c] sm:$0xf] %vm702_vm1, %v784_v19  ;;  %v555_v28 = vadd.f32 %v1409_v56, %v516_v20  ;;  %v479_v34 = vmul.f32 %v915_v13, %v1278_v32  ;;  %v423_v35 = vadd.f32 1e-05, %v391_v30 }
 0x153   :  { %715 = vst.msk [vmem:[%s1637_s3 + $0x30] sm:$0xf] %vm702_vm1, %v785_v27  ;;  %v556_v2 = vadd.f32 %v1409_v56, %v517_v39  ;;  %v480_v1 = vmul.f32 %v917_v25, %v1288_v33  ;;  %v424_v40 = vadd.f32 1e-05, %v392_v26  ;;  %v349_v41 = vpop.xlane.xlu1 %348  ;;  %v352_v44 = vpop.xlane.xlu0 %351 }
 0x154   :  { %v786_v45 = vpack.c.bf16 %v555_v28, %v555_v28  ;;  %v518_v17 = vmul.f32 %v1403_v3, %v479_v34  ;;  %930 = vrsqrt.f32 %v423_v35  ;;  %v393_v16 = vmul.f32 0.015625, %v349_v41 }
 0x155   :  { %v919_v54 = vpop.eup %918  ;;  %v787_v32 = vpack.c.bf16 %v556_v2, %v556_v2  ;;  %v519_v49 = vmul.f32 %v1403_v3, %v480_v1  ;;  %932 = vrsqrt.f32 %v424_v40  ;;  %v394_v18 = vmul.f32 0.015625, %v352_v44 }
 0x156   :  { %v921_v0 = vpop.eup %920  ;;  %716 = vst.msk [vmem:[%s1637_s3 + $0x34] sm:$0xf] %vm702_vm1, %v786_v45  ;;  %v557_v33 = vadd.f32 %v1409_v56, %v518_v17  ;;  %v481_v61 = vmul.f32 %v919_v54, %v1292_v37  ;;  %v425_v5 = vadd.f32 1e-05, %v393_v16 }
 0x157   :  { %717 = vst.msk [vmem:[%s1637_s3 + $0x38] sm:$0xf] %vm702_vm1, %v787_v32  ;;  %v558_v31 = vadd.f32 %v1409_v56, %v519_v49  ;;  %v482_v4 = vmul.f32 %v921_v0, %v1302_v38  ;;  %v426_v46 = vadd.f32 1e-05, %v394_v18  ;;  %v355_v50 = vpop.xlane.xlu1 %354  ;;  %v358_v59 = vpop.xlane.xlu0 %357 }
 0x158   :  { %v788_v6 = vpack.c.bf16 %v557_v33, %v557_v33  ;;  %v520_v60 = vmul.f32 %v1403_v3, %v481_v61  ;;  %934 = vrsqrt.f32 %v425_v5  ;;  %v395_v7 = vmul.f32 0.015625, %v355_v50 }
 0x159   :  { %v923_v22 = vpop.eup %922  ;;  %v789_v37 = vpack.c.bf16 %v558_v31, %v558_v31  ;;  %v521_v9 = vmul.f32 %v1403_v3, %v482_v4  ;;  %936 = vrsqrt.f32 %v426_v46  ;;  %v396_v21 = vmul.f32 0.015625, %v358_v59 }
 0x15a   :  { %v925_v55 = vpop.eup %924  ;;  %718 = vst.msk [vmem:[%s1637_s3 + $0x3c] sm:$0xf] %vm702_vm1, %v788_v6  ;;  %v559_v38 = vadd.f32 %v1409_v56, %v520_v60  ;;  %v483_v23 = vmul.f32 %v923_v22, %v1306_v42  ;;  %v427_v29 = vadd.f32 1e-05, %v395_v7 }
 0x15b   :  { %719 = vst.msk [vmem:[%s1637_s3 + $0x40] sm:$0xf] %vm702_vm1, %v789_v37  ;;  %v560_v8 = vadd.f32 %v1409_v56, %v521_v9  ;;  %v484_v15 = vmul.f32 %v925_v55, %v1316_v43  ;;  %v428_v51 = vadd.f32 1e-05, %v396_v21  ;;  %v361_v36 = vpop.xlane.xlu1 %360  ;;  %v364_v11 = vpop.xlane.xlu0 %363 }
 0x15c   :  { %v790_v12 = vpack.c.bf16 %v559_v38, %v559_v38  ;;  %v522_v19 = vmul.f32 %v1403_v3, %v483_v23  ;;  %938 = vrsqrt.f32 %v427_v29  ;;  %v397_v20 = vmul.f32 0.015625, %v361_v36 }
 0x15d   :  { %v927_v30 = vpop.eup %926  ;;  %v791_v42 = vpack.c.bf16 %v560_v8, %v560_v8  ;;  %v523_v13 = vmul.f32 %v1403_v3, %v484_v15  ;;  %940 = vrsqrt.f32 %v428_v51  ;;  %v398_v27 = vmul.f32 0.015625, %v364_v11 }
 0x15e   :  { %v929_v39 = vpop.eup %928  ;;  %720 = vst.msk [vmem:[%s1637_s3 + $0x44] sm:$0xf] %vm702_vm1, %v790_v12  ;;  %v561_v43 = vadd.f32 %v1409_v56, %v522_v19  ;;  %v485_v26 = vmul.f32 %v927_v30, %v1320_v47  ;;  %v429_v25 = vadd.f32 1e-05, %v397_v20 }
 0x15f   :  { %721 = vst.msk [vmem:[%s1637_s3 + $0x48] sm:$0xf] %vm702_vm1, %v791_v42  ;;  %v562_v28 = vadd.f32 %v1409_v56, %v523_v13  ;;  %v486_v34 = vmul.f32 %v929_v39, %v1330_v48  ;;  %v430_v35 = vadd.f32 1e-05, %v398_v27  ;;  %v367_v2 = vpop.xlane.xlu1 %366 }
 0x160   :  { %v792_v1 = vpack.c.bf16 %v561_v43, %v561_v43  ;;  %v524_v40 = vmul.f32 %v1403_v3, %v485_v26  ;;  %942 = vrsqrt.f32 %v429_v25  ;;  %v399_v41 = vmul.f32 0.015625, %v367_v2 }
 0x161   :  { %v931_v44 = vpop.eup %930  ;;  %v793_v45 = vpack.c.bf16 %v562_v28, %v562_v28  ;;  %v525_v47 = vmul.f32 %v1403_v3, %v486_v34  ;;  %944 = vrsqrt.f32 %v430_v35 }
 0x162   :  { %v933_v17 = vpop.eup %932  ;;  %722 = vst.msk [vmem:[%s1637_s3 + $0x4c] sm:$0xf] %vm702_vm1, %v792_v1  ;;  %v563_v48 = vadd.f32 %v1409_v56, %v524_v40  ;;  %v487_v16 = vmul.f32 %v931_v44, %v1334_v52  ;;  %v431_v54 = vadd.f32 1e-05, %v399_v41 }
 0x163   :  { %723 = vst.msk [vmem:[%s1637_s3 + $0x50] sm:$0xf] %vm702_vm1, %v793_v45  ;;  %v564_v32 = vadd.f32 %v1409_v56, %v525_v47  ;;  %v488_v49 = vmul.f32 %v933_v17, %v1344_v53 }
 0x164   :  { %v794_v18 = vpack.c.bf16 %v563_v48, %v563_v48  ;;  %v526_v0 = vmul.f32 %v1403_v3, %v487_v16  ;;  %946 = vrsqrt.f32 %v431_v54 }
 0x165   :  { %v935_v33 = vpop.eup %934  ;;  %v795_v61 = vpack.c.bf16 %v564_v32, %v564_v32  ;;  %v527_v5 = vmul.f32 %v1403_v3, %v488_v49 }
 0x166   :  { %v937_v31 = vpop.eup %936  ;;  %724 = vst.msk [vmem:[%s1637_s3 + $0x54] sm:$0xf] %vm702_vm1, %v794_v18  ;;  %v565_v52 = vadd.f32 %v1409_v56, %v526_v0  ;;  %v489_v4 = vmul.f32 %v935_v33, %v1348_v57 }
 0x167   :  { %725 = vst.msk [vmem:[%s1637_s3 + $0x58] sm:$0xf] %vm702_vm1, %v795_v61  ;;  %v566_v53 = vadd.f32 %v1409_v56, %v527_v5  ;;  %v490_v46 = vmul.f32 %v937_v31, %v1358_v58 }
 0x168   :  { %v796_v50 = vpack.c.bf16 %v565_v52, %v565_v52  ;;  %v528_v59 = vmul.f32 %v1403_v3, %v489_v4 }
 0x169   :  { %v939_v6 = vpop.eup %938  ;;  %v797_v60 = vpack.c.bf16 %v566_v53, %v566_v53  ;;  %v529_v7 = vmul.f32 %v1403_v3, %v490_v46 }
 0x16a   :  { %v941_v22 = vpop.eup %940  ;;  %726 = vst.msk [vmem:[%s1637_s3 + $0x5c] sm:$0xf] %vm702_vm1, %v796_v50  ;;  %v567_v57 = vadd.f32 %v1409_v56, %v528_v59  ;;  %v491_v37 = vmul.f32 %v939_v6, %v1362_v62 }
 0x16b   :  { %727 = vst.msk [vmem:[%s1637_s3 + $0x60] sm:$0xf] %vm702_vm1, %v797_v60  ;;  %v568_v58 = vadd.f32 %v1409_v56, %v529_v7  ;;  %v492_v9 = vmul.f32 %v941_v22, %v1372_v63 }
 0x16c   :  { %v798_v21 = vpack.c.bf16 %v567_v57, %v567_v57  ;;  %v530_v55 = vmul.f32 %v1403_v3, %v491_v37 }
 0x16d   :  { %v943_v38 = vpop.eup %942  ;;  %v799_v23 = vpack.c.bf16 %v568_v58, %v568_v58  ;;  %v531_v29 = vmul.f32 %v1403_v3, %v492_v9 }
 0x16e   :  { %v945_v8 = vpop.eup %944  ;;  %728 = vst.msk [vmem:[%s1637_s3 + $0x64] sm:$0xf] %vm702_vm1, %v798_v21  ;;  %v569_v62 = vadd.f32 %v1409_v56, %v530_v55  ;;  %v493_v15 = vmul.f32 %v943_v38, %v1376_v10 }
 0x16f   :  { %729 = vst.msk [vmem:[%s1637_s3 + $0x68] sm:$0xf] %vm702_vm1, %v799_v23  ;;  %v570_v63 = vadd.f32 %v1409_v56, %v531_v29  ;;  %v494_v51 = vmul.f32 %v945_v8, %v1386_v14 }
 0x170   :  { %v800_v36 = vpack.c.bf16 %v569_v62, %v569_v62  ;;  %v532_v11 = vmul.f32 %v1403_v3, %v493_v15 }
 0x171   :  { %v947_v12 = vpop.eup %946  ;;  %v801_v19 = vpack.c.bf16 %v570_v63, %v570_v63  ;;  %v533_v20 = vmul.f32 %v1403_v3, %v494_v51 }
 0x172   :  { %730 = vst.msk [vmem:[%s1637_s3 + $0x6c] sm:$0xf] %vm702_vm1, %v800_v36  ;;  %v571_v10 = vadd.f32 %v1409_v56, %v532_v11  ;;  %v495_v30 = vmul.f32 %v947_v12, %v1390_v24 }
 0x173   :  { %731 = vst.msk [vmem:[%s1637_s3 + $0x70] sm:$0xf] %vm702_vm1, %v801_v19  ;;  %v572_v14 = vadd.f32 %v1409_v56, %v533_v20 }
 0x174   :  { %v802_v42 = vpack.c.bf16 %v571_v10, %v571_v10  ;;  %v534_v13 = vmul.f32 %v1403_v3, %v495_v30 }
 0x175   :  { %v803_v27 = vpack.c.bf16 %v572_v14, %v572_v14 }
 0x176   :  { %732 = vst.msk [vmem:[%s1637_s3 + $0x74] sm:$0xf] %vm702_vm1, %v802_v42  ;;  %v573_v39 = vadd.f32 %v1409_v56, %v534_v13 }
 0x177   :  { %733 = vst.msk [vmem:[%s1637_s3 + $0x78] sm:$0xf] %vm702_vm1, %v803_v27 }
 0x178   :  { %v804_v24 = vpack.c.bf16 %v573_v39, %v573_v39 }
 0x17a   :  { %734 = vst.msk [vmem:[%s1637_s3 + $0x7c] sm:$0xf] %vm702_vm1, %v804_v24 }

// kernel: _lambda_.28
= control target key start
LH: loop header
LB: loop body
LE: loop exit
PB: predicated region body
PF: predicated region fallthrough
CT: control target
= control target key end

     0   :  { %s1524_s6 = smov 0   ;;  %s1526_s7 = smov 0   ;;  %s1842_s0 = inlined_call_operand.vmem [shape: bf16[3,2,128,64], index: 0, kind: input, shape index: {}]   ;;  %s1843_s1 = inlined_call_operand.vmem [shape: bf16[2,128,64], index: 1, kind: output, shape index: {}]  }
   0x1   :  { %s1528_s8 = smov 0   ;;  %s1530_s9 = smov 0  }
   0x2   :  { %s1532_s10 = smov 0  }
   0x3 LB: > { %s23_s11 = sadd.s32 1, %s1508_s9  ;;  %p39_p1 = scmp.ne.s32.totalorder %s1500_s7, %s1496_s6  ;;  %s1512_s10 = sphi %s1532_s10, %s11_s10   ;;  %s1508_s9 = sphi %s1530_s9, %s1847_s9   ;;  %s1504_s8 = sphi %s1528_s8, %s1846_s8   ;;  %s1500_s7 = sphi %s1526_s7, %s1845_s7   ;;  %s1496_s6 = sphi %s1524_s6, %s1844_s6  }
   0x4   : > { %p25_p0 = scmp.ge.s32.totalorder %s23_s11, 2  ;;  %p40_p2 = scmp.eq.s32.totalorder %s1512_s10, 0 }
   0x5   : > { %s32_s13 = sadd.s32 1, %s1500_s7  ;;  %p1134_p5 = scmp.ge.s32.totalorder %s1512_s10, 2 }
   0x6   : > { %s1849_s11 = smov (%p25_p0, %s23_s11), 0  ;;  %p41_p3 = por %p40_p2, %p39_p1 }
   0x7   : > { %s27_s12 = ssub.s32 %s1508_s9, %s1849_s11  ;;  %93 = sbr.rel (%p1134_p5) target bundleno = 29 (0x1d), region = 16 }
   0x8   : > { %p30_p4 = scmp.eq.s32.totalorder %s27_s12, 0 }
   0xa   : > { %s1559_s14 = scalar_select %p30_p4, %s1500_s7, %s32_s13  }
   0xc   : > { %96 = sbr.rel (!%p41_p3) target bundleno = 29 (0x1d), region = 20  ;;  %s98_s15 = sand.u32 (%p41_p3), 1, %s1500_s7  }
   0xd   : > { %s1222_s16 = sshll.u32 (%p41_p3), %s1508_s9, 6  ;;  %s1344_s17 = smul.u32 (%p41_p3), 192, %s98_s15 }
   0xe   : > { %s1567_s20 = scalar_lea.vmem (%p41_p3), %s1842_s0, %s1222_s16 }
   0xf   : > { %v121_v0 = vld [vmem:[%s1567_s20] sm:$0xff] (%p41_p3)   ;;  %v125_v1 = vld [vmem:[%s1567_s20 + $0x8] sm:$0xff] (%p41_p3)   ;;  %v129_v2 = vld [vmem:[%s1567_s20 + $0x10] sm:$0xff] (%p41_p3)   ;;  %s1575_s21 = scalar_lea.vmem (%p41_p3), [#allocation2], %s1344_s17 }
  0x10   : > { %v133_v3 = vld [vmem:[%s1567_s20 + $0x18] sm:$0xff] (%p41_p3)   ;;  %v137_v4 = vld [vmem:[%s1567_s20 + $0x20] sm:$0xff] (%p41_p3)   ;;  %v141_v5 = vld [vmem:[%s1567_s20 + $0x28] sm:$0xff] (%p41_p3)   ;;  %122 = vst [vmem:[%s1575_s21] sm:$0xff] (%p41_p3), %v121_v0  }
  0x11   : > { %126 = vst [vmem:[%s1575_s21 + $0x8] sm:$0xff] %v125_v1   ;;  %130 = vst [vmem:[%s1575_s21 + $0x10] sm:$0xff] %v129_v2   ;;  %v145_v6 = vld [vmem:[%s1567_s20 + $0x30] sm:$0xff]   ;;  %v149_v7 = vld [vmem:[%s1567_s20 + $0x38] sm:$0xff]  }
  0x12   : > { %134 = vst [vmem:[%s1575_s21 + $0x18] sm:$0xff] %v133_v3   ;;  %138 = vst [vmem:[%s1575_s21 + $0x20] sm:$0xff] %v137_v4   ;;  %v153_v8 = vld [vmem:[%s1567_s20 + $0x80] sm:$0xff]   ;;  %v157_v9 = vld [vmem:[%s1567_s20 + $0x88] sm:$0xff]  }
  0x13   : > { %142 = vst [vmem:[%s1575_s21 + $0x28] sm:$0xff] %v141_v5   ;;  %146 = vst [vmem:[%s1575_s21 + $0x30] sm:$0xff] %v145_v6   ;;  %v161_v10 = vld [vmem:[%s1567_s20 + $0x90] sm:$0xff]   ;;  %v165_v11 = vld [vmem:[%s1567_s20 + $0x98] sm:$0xff]  }
  0x14   : > { %150 = vst [vmem:[%s1575_s21 + $0x38] sm:$0xff] %v149_v7   ;;  %154 = vst [vmem:[%s1575_s21 + $0x40] sm:$0xff] %v153_v8   ;;  %v169_v12 = vld [vmem:[%s1567_s20 + $0xa0] sm:$0xff]   ;;  %v173_v13 = vld [vmem:[%s1567_s20 + $0xa8] sm:$0xff]  }
  0x15   : > { %158 = vst [vmem:[%s1575_s21 + $0x48] sm:$0xff] %v157_v9   ;;  %162 = vst [vmem:[%s1575_s21 + $0x50] sm:$0xff] %v161_v10   ;;  %v177_v14 = vld [vmem:[%s1567_s20 + $0xb0] sm:$0xff]   ;;  %v181_v15 = vld [vmem:[%s1567_s20 + $0xb8] sm:$0xff]  }
  0x16   : > { %166 = vst [vmem:[%s1575_s21 + $0x58] sm:$0xff] %v165_v11   ;;  %170 = vst [vmem:[%s1575_s21 + $0x60] sm:$0xff] %v169_v12   ;;  %v185_v16 = vld [vmem:[%s1567_s20 + $0x100] sm:$0xff]   ;;  %v189_v17 = vld [vmem:[%s1567_s20 + $0x108] sm:$0xff]  }
  0x17   : > { %174 = vst [vmem:[%s1575_s21 + $0x68] sm:$0xff] %v173_v13   ;;  %178 = vst [vmem:[%s1575_s21 + $0x70] sm:$0xff] %v177_v14   ;;  %v193_v18 = vld [vmem:[%s1567_s20 + $0x110] sm:$0xff]   ;;  %v197_v19 = vld [vmem:[%s1567_s20 + $0x118] sm:$0xff]  }
  0x18   : > { %182 = vst [vmem:[%s1575_s21 + $0x78] sm:$0xff] %v181_v15   ;;  %186 = vst [vmem:[%s1575_s21 + $0x80] sm:$0xff] %v185_v16   ;;  %v201_v20 = vld [vmem:[%s1567_s20 + $0x120] sm:$0xff]   ;;  %v205_v21 = vld [vmem:[%s1567_s20 + $0x128] sm:$0xff]  }
  0x19   : > { %190 = vst [vmem:[%s1575_s21 + $0x88] sm:$0xff] %v189_v17   ;;  %194 = vst [vmem:[%s1575_s21 + $0x90] sm:$0xff] %v193_v18   ;;  %v209_v22 = vld [vmem:[%s1567_s20 + $0x130] sm:$0xff]   ;;  %v213_v23 = vld [vmem:[%s1567_s20 + $0x138] sm:$0xff]  }
  0x1a   : > { %198 = vst [vmem:[%s1575_s21 + $0x98] sm:$0xff] %v197_v19   ;;  %202 = vst [vmem:[%s1575_s21 + $0xa0] sm:$0xff] %v201_v20  }
  0x1b   : > { %206 = vst [vmem:[%s1575_s21 + $0xa8] sm:$0xff] %v205_v21   ;;  %210 = vst [vmem:[%s1575_s21 + $0xb0] sm:$0xff] %v209_v22  }
  0x1c   : > { %214 = vst [vmem:[%s1575_s21 + $0xb8] sm:$0xff] %v213_v23  }
  0x1d PF: > { %p1137_p6 = scmp.ge.s32.totalorder %s1512_s10, 1  ;;  %p335_p7 = scmp.lt.s32.totalorder %s1512_s10, 3 }
  0x1f   : > { %p336_p8 = pnand %p1137_p6, %p335_p7 }
  0x20   : > { %s342_s22 = sand.u32 (!%p336_p8), 1, %s1496_s6   ;;  %p364_p9 = scmp.lt.s32.totalorder (!%p336_p8), %s1504_s8, 1 }
  0x21   : > { %339 = sbr.rel (%p336_p8) target bundleno = 846 (0x34e), region = 61 }
  0x22   : > { %s1345_s23 = smul.u32 (!%p336_p8), 192, %s342_s22 }
  0x24   : > { %s1622_s24 = scalar_lea.vmem (!%p336_p8), [#allocation2], %s1345_s23 }
  0x26   : > { %vm506_vm0 = vcmask 523264   ;;  %v1386_v24 = vld [vmem:[%s1622_s24 + $0x78] sm:$0xff]   ;;  %v1387_v25 = vld [vmem:[%s1622_s24 + $0x70] sm:$0xff]   ;;  %v1388_v27 = vld [vmem:[%s1622_s24 + $0x68] sm:$0xff]   ;;  %v373_v48 = vlaneseq  ;;  %s1851_s8 = smov (!%p364_p9, %s1504_s8), 1  ;;  %vm1029_vm2 = vcmask 519168  }
  0x27   : > { %1336 = vmatprep.subr.msk.bf16.mxu0 %vm506_vm0, %v1386_v24  ;;  %v553_v26 = vsel %vm506_vm0, %v1386_v24, 0  ;;  %v550_v28 = vsel %vm506_vm0, %v1387_v25, 0  ;;  %v1394_v29 = vld [vmem:[%s1622_s24] sm:$0xff]   ;;  %v547_v30 = vsel %vm506_vm0, %v1388_v27, 0  ;;  %v1390_v33 = vld [vmem:[%s1622_s24 + $0x58] sm:$0xff]   ;;  %v1391_v35 = vld [vmem:[%s1622_s24 + $0x50] sm:$0xff]  }
  0x28   : > { %1273 = vmatpush3.bf16.xpose.msra.mxu0 %v553_v26  ;;  %1288 = vmatprep.mubr.msk.bf16.mxu0 %vm506_vm0, %v1394_v29  ;;  %v1389_v31 = vld [vmem:[%s1622_s24 + $0x60] sm:$0xff]   ;;  %v541_v34 = vsel %vm506_vm0, %v1390_v33, 0  ;;  %v538_v36 = vsel %vm506_vm0, %v1391_v35, 0  ;;  %v1392_v37 = vld [vmem:[%s1622_s24 + $0x48] sm:$0xff]   ;;  %v1396_v42 = vld [vmem:[%s1622_s24 + $0x10] sm:$0xff]   ;;  %v374_v49 = vand.u32 127, %v373_v48 }
  0x29   : > { %1337 = vmatprep.subr.msk.bf16.mxu0 %vm506_vm0, %v1387_v25  ;;  %v544_v32 = vsel %vm506_vm0, %v1389_v31, 0  ;;  %v535_v38 = vsel %vm506_vm0, %v1392_v37, 0  ;;  %v1393_v39 = vld [vmem:[%s1622_s24 + $0x40] sm:$0xff]   ;;  %v1395_v41 = vld [vmem:[%s1622_s24 + $0x8] sm:$0xff]   ;;  %v1397_v43 = vld [vmem:[%s1622_s24 + $0x18] sm:$0xff]   ;;  %s1223_s25 = sshll.u32 %s1851_s8, 6 }
  0x2a   : > { %v532_v40 = vsel %vm506_vm0, %v1393_v39, 0  ;;  %v1398_v44 = vld [vmem:[%s1622_s24 + $0x20] sm:$0xff]   ;;  %v1399_v45 = vld [vmem:[%s1622_s24 + $0x28] sm:$0xff]   ;;  %v1400_v46 = vld [vmem:[%s1622_s24 + $0x30] sm:$0xff]   ;;  %vm375_vm1 = vcmp.lt.s32.totalorder %v374_v49, 5  ;;  %s1793_s28 = scalar_lea.vmem %s1843_s1, %s1223_s25 }
  0x2b   : > { %v1401_v47 = vld [vmem:[%s1622_s24 + $0x38] sm:$0xff]   ;;  %v1403_v19 = vld [vmem:[%s1622_s24 + $0xb0] sm:$0xff]  }
  0x2c   : > { %v1402_v18 = vld [vmem:[%s1622_s24 + $0xb8] sm:$0xff]  }
  0x2d   : > { %1304 = vmatprep.subr.bf16.mxu1 %v1402_v18 }
  0x2e   : > { %1305 = vmatpush3.bf16.msra.mxu1 %v1402_v18 }
  0x2f   : > { %1306 = vmatprep.subr.bf16.mxu1 %v1403_v19 }
  0x30   : > { %1275 = vmatpush3.bf16.xpose.msra.mxu0 %v550_v28 }
  0x31   : > { %1338 = vmatprep.subr.msk.bf16.mxu0 %vm506_vm0, %v1388_v27 }
  0x32   : > { %1307 = vmatpush3.bf16.msra.mxu1 %v1403_v19  ;;  %v1407_v19 = vld [vmem:[%s1622_s24 + $0x90] sm:$0xff]  }
  0x38   : > { %1277 = vmatpush3.bf16.xpose.msra.mxu0 %v547_v30 }
  0x39   : > { %1339 = vmatprep.subr.msk.bf16.mxu0 %vm506_vm0, %v1389_v31 }
  0x40   : > { %1279 = vmatpush3.bf16.xpose.msra.mxu0 %v544_v32 }
  0x41   : > { %1340 = vmatprep.subr.msk.bf16.mxu0 %vm506_vm0, %v1390_v33 }
  0x48   : > { %1281 = vmatpush3.bf16.xpose.msra.mxu0 %v541_v34 }
  0x49   : > { %1341 = vmatprep.subr.msk.bf16.mxu0 %vm506_vm0, %v1391_v35 }
  0x50   : > { %1283 = vmatpush3.bf16.xpose.msra.mxu0 %v538_v36 }
  0x51   : > { %1342 = vmatprep.subr.msk.bf16.mxu0 %vm506_vm0, %v1392_v37 }
  0x58   : > { %1285 = vmatpush3.bf16.xpose.msra.mxu0 %v535_v38 }
  0x59   : > { %1343 = vmatprep.subr.msk.bf16.mxu0 %vm506_vm0, %v1393_v39 }
  0x60   : > { %1287 = vmatpush3.bf16.xpose.msra.mxu0 %v532_v40 }
  0x67   : > { %1289 = vmatmul.mubr.msk.bf16.vlgmr.msra.gmra.mxu0 %vm506_vm0, %v1395_v41 }
  0x68   : > { %1292 = vmatprep.mubr.msk.bf16.mxu0 %vm506_vm0, %v1396_v42 }
  0x6f   : > { %1293 = vmatmul.mubr.msk.bf16.gmra.mxu0 %vm506_vm0, %v1397_v43 }
  0x70   : > { %1296 = vmatprep.mubr.msk.bf16.mxu0 %vm506_vm0, %v1398_v44 }
  0x77   : > { %1297 = vmatmul.mubr.msk.bf16.gmra.mxu0 %vm506_vm0, %v1399_v45 }
  0x78   : > { %1300 = vmatprep.mubr.msk.bf16.mxu0 %vm506_vm0, %v1400_v46 }
  0x7f   : > { %1301 = vmatmul.mubr.msk.bf16.gmra.mxu0 %vm506_vm0, %v1401_v47 }
 0x127   : > { %v1290_v50 = vpop.f32.mrf.mxu0 }
 0x128   : > { %v654_v51 = vsel %vm375_vm1, %v1290_v50, -1e+30 }
 0x129   : > { %672 = vmax.xlane.f32.xlu1 %v654_v51  ;;  %v589_v52 = vpop.f32.mrf.mxu0 }
 0x12a   : > { %v652_v53 = vsel %vm375_vm1, %v589_v52, -1e+30 }
 0x12b   : > { %668 = vmax.xlane.f32.xlu0 %v652_v53  ;;  %v1291_v54 = vpop.f32.mrf.mxu0 }
 0x12c   : > { %v655_v55 = vsel %vm375_vm1, %v1291_v54, -1e+30 }
 0x12d   : > { %674 = vmax.xlane.f32.xlu1 %v655_v55  ;;  %v592_v56 = vpop.f32.mrf.mxu0 }
 0x12e   : > { %v653_v57 = vsel %vm375_vm1, %v592_v56, -1e+30 }
 0x12f   : > { %670 = vmax.xlane.f32.xlu0 %v653_v57  ;;  %v1294_v58 = vpop.f32.mrf.mxu0 }
 0x130   : > { %v658_v63 = vsel %vm375_vm1, %v1294_v58, -1e+30 }
 0x131   : > { %v605_v59 = vpop.f32.mrf.mxu0 }
 0x132   : > { %v656_v60 = vsel %vm375_vm1, %v605_v59, -1e+30 }
 0x133   : > { %676 = vmax.xlane.f32.xlu0 %v656_v60  ;;  %v1295_v61 = vpop.f32.mrf.mxu0 }
 0x134   : > { %v1672_v3 = vsel %vm375_vm1, %v1295_v61, -1e+30 }
 0x135   : > { %v608_v62 = vpop.f32.mrf.mxu0 }
 0x136   : > { %v657_v0 = vsel %vm375_vm1, %v608_v62, -1e+30 }
 0x137   : > { %680 = vmax.xlane.f32.xlu0 %v658_v63  ;;  %678 = vmax.xlane.f32.xlu1 %v657_v0  ;;  %v1298_v1 = vpop.f32.mrf.mxu0 }
 0x138   : > { %v1680_v7 = vsel %vm375_vm1, %v1298_v1, -1e+30 }
 0x139   : > { %v621_v2 = vpop.f32.mrf.mxu0 }
 0x13a   : > { %v1675_v4 = vsel %vm375_vm1, %v621_v2, -1e+30 }
 0x13b   : > { %682 = vmax.xlane.f32.xlu1 %v1672_v3  ;;  %684 = vmax.xlane.f32.xlu0 %v1675_v4  ;;  %v1299_v5 = vpop.f32.mrf.mxu0 }
 0x13c   : > { %v1688_v11 = vsel %vm375_vm1, %v1299_v5, -1e+30 }
 0x13d   : > { %v624_v6 = vpop.f32.mrf.mxu0 }
 0x13e   : > { %v1683_v8 = vsel %vm375_vm1, %v624_v6, -1e+30 }
 0x13f   : > { %688 = vmax.xlane.f32.xlu0 %v1680_v7  ;;  %686 = vmax.xlane.f32.xlu1 %v1683_v8  ;;  %v1302_v9 = vpop.f32.mrf.mxu0 }
 0x140   : > { %v1696_v15 = vsel %vm375_vm1, %v1302_v9, -1e+30 }
 0x141   : > { %v637_v10 = vpop.f32.mrf.mxu0 }
 0x142   : > { %v1691_v12 = vsel %vm375_vm1, %v637_v10, -1e+30 }
 0x143   : > { %690 = vmax.xlane.f32.xlu1 %v1688_v11  ;;  %692 = vmax.xlane.f32.xlu0 %v1691_v12  ;;  %v1303_v13 = vpop.f32.mrf.mxu0 }
 0x144   : > { %v1704_v17 = vsel %vm375_vm1, %v1303_v13, -1e+30 }
 0x145   : > { %v640_v14 = vpop.f32.mrf.mxu0 }
 0x146   : > { %v1699_v16 = vsel %vm375_vm1, %v640_v14, -1e+30 }
 0x147   : > { %696 = vmax.xlane.f32.xlu0 %v1696_v15  ;;  %694 = vmax.xlane.f32.xlu1 %v1699_v16 }
 0x14b   : > { %698 = vmax.xlane.f32.xlu1 %v1704_v17 }
 0x1b2   : > { %v673_v20 = vpop.xlane.xlu1 %672 }
 0x1b3   : > { %v702_v21 = vsub.f32 %v654_v51, %v673_v20 }
 0x1b4   : > { %v669_v22 = vpop.xlane.xlu0 %668 }
 0x1b5   : > { %v700_v23 = vsub.f32 %v652_v53, %v669_v22  ;;  %v720_v26 = vmul.f32 1.442695, %v702_v21 }
 0x1b6   : > { %v675_v24 = vpop.xlane.xlu1 %674 }
 0x1b7   : > { %v716_v25 = vmul.f32 1.442695, %v700_v23  ;;  %v703_v27 = vsub.f32 %v655_v55, %v675_v24  ;;  %v1408_v23 = vld [vmem:[%s1622_s24 + $0x88] sm:$0xff]  }
 0x1b8   : > { %v671_v28 = vpop.xlane.xlu0 %670 }
 0x1b9   : > { %1410 = vpow2.f32 %v716_v25  ;;  %v701_v29 = vsub.f32 %v653_v57, %v671_v28  ;;  %v722_v31 = vmul.f32 1.442695, %v703_v27  ;;  %v1409_v25 = vld [vmem:[%s1622_s24 + $0x80] sm:$0xff]  }
 0x1ba   : > { %1412 = vpow2.f32 %v720_v26 }
 0x1bb   : > { %v718_v30 = vmul.f32 1.442695, %v701_v29 }
 0x1bc   : > { %v677_v32 = vpop.xlane.xlu0 %676 }
 0x1bd   : > { %1414 = vpow2.f32 %v718_v30  ;;  %v704_v33 = vsub.f32 %v656_v60, %v677_v32 }
 0x1be   : > { %1416 = vpow2.f32 %v722_v31 }
 0x1bf   : > { %v724_v34 = vmul.f32 1.442695, %v704_v33 }
 0x1c0   : > { %v681_v35 = vpop.xlane.xlu0 %680  ;;  %v679_v36 = vpop.xlane.xlu1 %678 }
 0x1c1   : > { %1418 = vpow2.f32 %v724_v34  ;;  %v706_v37 = vsub.f32 %v658_v63, %v681_v35  ;;  %v705_v38 = vsub.f32 %v657_v0, %v679_v36 }
 0x1c3   : > { %v728_v39 = vmul.f32 1.442695, %v706_v37  ;;  %v726_v40 = vmul.f32 1.442695, %v705_v38 }
 0x1c4   : > { %v683_v41 = vpop.xlane.xlu1 %682  ;;  %v685_v42 = vpop.xlane.xlu0 %684 }
 0x1c5   : > { %1420 = vpow2.f32 %v728_v39  ;;  %v707_v43 = vsub.f32 %v1672_v3, %v683_v41  ;;  %v708_v44 = vsub.f32 %v1675_v4, %v685_v42  ;;  %v1404_v4 = vld [vmem:[%s1622_s24 + $0xa8] sm:$0xff]  }
 0x1c6   : > { %v1711_v45 = vpop.eup %1410  ;;  %1422 = vpow2.f32 %v726_v40  ;;  %1308 = vmatprep.subr.bf16.mxu1 %v1404_v4 }
 0x1c7   : > { %v730_v46 = vmul.f32 1.442695, %v707_v43  ;;  %v732_v47 = vmul.f32 1.442695, %v708_v44  ;;  %748 = vadd.xlane.f32.xlu0 %v1711_v45  ;;  %v1714_v50 = vpop.eup %1412  ;;  %1309 = vmatpush3.bf16.msra.mxu1 %v1404_v4 }
 0x1c8   : > { %v689_v48 = vpop.xlane.xlu0 %688  ;;  %v687_v49 = vpop.xlane.xlu1 %686 }
 0x1c9   : > { %1424 = vpow2.f32 %v730_v46  ;;  %v710_v51 = vsub.f32 %v1680_v7, %v689_v48  ;;  %v709_v52 = vsub.f32 %v1683_v8, %v687_v49 }
 0x1ca   : > { %v1718_v53 = vpop.eup %1414  ;;  %1426 = vpow2.f32 %v732_v47 }
 0x1cb   : > { %v736_v54 = vmul.f32 1.442695, %v710_v51  ;;  %v734_v55 = vmul.f32 1.442695, %v709_v52  ;;  %752 = vadd.xlane.f32.xlu0 %v1714_v50  ;;  %750 = vadd.xlane.f32.xlu1 %v1718_v53  ;;  %v1722_v58 = vpop.eup %1416 }
 0x1cc   : > { %v691_v56 = vpop.xlane.xlu1 %690  ;;  %v693_v57 = vpop.xlane.xlu0 %692 }
 0x1cd   : > { %1428 = vpow2.f32 %v736_v54  ;;  %v711_v59 = vsub.f32 %v1688_v11, %v691_v56  ;;  %v712_v60 = vsub.f32 %v1691_v12, %v693_v57  ;;  %v1405_v12 = vld [vmem:[%s1622_s24 + $0xa0] sm:$0xff]  }
 0x1ce   : > { %v1726_v61 = vpop.eup %1418  ;;  %1430 = vpow2.f32 %v734_v55  ;;  %1310 = vmatprep.subr.bf16.mxu1 %v1405_v12 }
 0x1cf   : > { %v738_v62 = vmul.f32 1.442695, %v711_v59  ;;  %v740_v63 = vmul.f32 1.442695, %v712_v60  ;;  %756 = vadd.xlane.f32.xlu0 %v1726_v61  ;;  %754 = vadd.xlane.f32.xlu1 %v1722_v58 }
 0x1d0   : > { %v697_v0 = vpop.xlane.xlu0 %696  ;;  %v695_v1 = vpop.xlane.xlu1 %694  ;;  %1311 = vmatpush3.bf16.msra.mxu1 %v1405_v12 }
 0x1d1   : > { %1432 = vpow2.f32 %v738_v62  ;;  %v714_v2 = vsub.f32 %v1696_v15, %v697_v0  ;;  %v713_v3 = vsub.f32 %v1699_v16, %v695_v1  ;;  %v1406_v16 = vld [vmem:[%s1622_s24 + $0x98] sm:$0xff]  }
 0x1d2   : > { %v1733_v5 = vpop.eup %1420  ;;  %1434 = vpow2.f32 %v740_v63  ;;  %1312 = vmatprep.subr.bf16.mxu1 %v1406_v16 }
 0x1d3   : > { %v1735_v6 = vpop.eup %1422  ;;  %v744_v7 = vmul.f32 1.442695, %v714_v2  ;;  %v742_v8 = vmul.f32 1.442695, %v713_v3  ;;  %760 = vadd.xlane.f32.xlu0 %v1733_v5 }
 0x1d4   : > { %758 = vadd.xlane.f32.xlu1 %v1735_v6  ;;  %v699_v9 = vpop.xlane.xlu1 %698  ;;  %1313 = vmatpush3.bf16.msra.mxu1 %v1406_v16 }
 0x1d5   : > { %1436 = vpow2.f32 %v744_v7  ;;  %v715_v10 = vsub.f32 %v1704_v17, %v699_v9  ;;  %1314 = vmatprep.subr.bf16.mxu1 %v1407_v19 }
 0x1d6   : > { %v1740_v11 = vpop.eup %1424  ;;  %1438 = vpow2.f32 %v742_v8 }
 0x1d7   : > { %v1743_v13 = vpop.eup %1426  ;;  %v746_v14 = vmul.f32 1.442695, %v715_v10 }
 0x1d8   : > { %764 = vadd.xlane.f32.xlu0 %v1743_v13  ;;  %762 = vadd.xlane.f32.xlu1 %v1740_v11 }
 0x1d9   : > { %1440 = vpow2.f32 %v746_v14  ;;  %1315 = vmatpush3.bf16.msra.mxu1 %v1407_v19 }
 0x1da   : > { %v1747_v15 = vpop.eup %1428  ;;  %1316 = vmatprep.subr.bf16.mxu1 %v1408_v23 }
 0x1db   : > { %v1750_v17 = vpop.eup %1430 }
 0x1dc   : > { %768 = vadd.xlane.f32.xlu0 %v1747_v15  ;;  %766 = vadd.xlane.f32.xlu1 %v1750_v17 }
 0x1dd   : > { %1317 = vmatpush3.bf16.msra.mxu1 %v1408_v23 }
 0x1de   : > { %v1754_v18 = vpop.eup %1432  ;;  %1318 = vmatprep.subr.bf16.mxu1 %v1409_v25 }
 0x1df   : > { %v1757_v20 = vpop.eup %1434 }
 0x1e0   : > { %772 = vadd.xlane.f32.xlu0 %v1757_v20  ;;  %770 = vadd.xlane.f32.xlu1 %v1754_v18 }
 0x1e1   : > { %1319 = vmatpush3.bf16.msra.mxu1 %v1409_v25 }
 0x1e2   : > { %v1761_v21 = vpop.eup %1436 }
 0x1e3   : > { %v1763_v22 = vpop.eup %1438 }
 0x1e4   : > { %776 = vadd.xlane.f32.xlu0 %v1761_v21  ;;  %774 = vadd.xlane.f32.xlu1 %v1763_v22 }
 0x1e6   : > { %v1768_v24 = vpop.eup %1440 }
 0x1e8   : > { %778 = vadd.xlane.f32.xlu1 %v1768_v24 }
 0x250   : > { %v749_v26 = vpop.xlane.xlu0 %748 }
 0x251   : > { %1442 = vrcp.f32 %v749_v26 }
 0x254   : > { %v753_v27 = vpop.xlane.xlu0 %752  ;;  %v751_v28 = vpop.xlane.xlu1 %750 }
 0x255   : > { %1444 = vrcp.f32 %v751_v28 }
 0x256   : > { %1446 = vrcp.f32 %v753_v27 }
 0x258   : > { %v757_v29 = vpop.xlane.xlu0 %756  ;;  %v755_v30 = vpop.xlane.xlu1 %754 }
 0x259   : > { %1448 = vrcp.f32 %v755_v30 }
 0x25a   : > { %1450 = vrcp.f32 %v757_v29 }
 0x25c   : > { %v761_v31 = vpop.xlane.xlu0 %760 }
 0x25d   : > { %v759_v32 = vpop.xlane.xlu1 %758 }
 0x25e   : > { %1452 = vrcp.f32 %v759_v32  ;;  %v1443_v33 = vpop.eup %1442 }
 0x25f   : > { %1454 = vrcp.f32 %v761_v31  ;;  %v796_v37 = vmul.f32 %v1443_v33, %v1711_v45 }
 0x261   : > { %v765_v34 = vpop.xlane.xlu0 %764  ;;  %v763_v35 = vpop.xlane.xlu1 %762 }
 0x262   : > { %v1445_v36 = vpop.eup %1444  ;;  %1456 = vrcp.f32 %v763_v35 }
 0x263   : > { %v797_v38 = vmul.f32 %v1445_v36, %v1718_v53  ;;  %v1447_v39 = vpop.eup %1446  ;;  %1458 = vrcp.f32 %v765_v34 }
 0x264   : > { %v798_v44 = vmul.f32 %v1447_v39, %v1714_v50 }
 0x265   : > { %v769_v40 = vpop.xlane.xlu0 %768  ;;  %v767_v41 = vpop.xlane.xlu1 %766  ;;  %v812_v42 = vpack.c.bf16 %v797_v38, %v796_v37 }
 0x266   : > { %v1449_v43 = vpop.eup %1448  ;;  %1460 = vrcp.f32 %v767_v41 }
 0x267   : > { %1320 = vmatprep.mubr.bf16.mxu1 %v812_v42  ;;  %v799_v46 = vmul.f32 %v1449_v43, %v1722_v58  ;;  %v1451_v47 = vpop.eup %1450  ;;  %1462 = vrcp.f32 %v769_v40 }
 0x268   : > { %v800_v52 = vmul.f32 %v1451_v47, %v1726_v61 }
 0x269   : > { %v773_v48 = vpop.xlane.xlu0 %772  ;;  %v771_v49 = vpop.xlane.xlu1 %770  ;;  %v813_v51 = vpack.c.bf16 %v799_v46, %v798_v44 }
 0x26a   : > { %1464 = vrcp.f32 %v771_v49 }
 0x26b   : > { %v1453_v45 = vpop.eup %1452  ;;  %1321 = vmatmul.mubr.bf16.vlgmr.msra.gmra.mxu1 %v813_v51  ;;  %1466 = vrcp.f32 %v773_v48 }
 0x26c   : > { %v801_v53 = vmul.f32 %v1453_v45, %v1735_v6  ;;  %v1455_v56 = vpop.eup %1454 }
 0x26d   : > { %v777_v54 = vpop.xlane.xlu0 %776  ;;  %v775_v55 = vpop.xlane.xlu1 %774  ;;  %v802_v59 = vmul.f32 %v1455_v56, %v1733_v5 }
 0x26e   : > { %v814_v57 = vpack.c.bf16 %v801_v53, %v800_v52  ;;  %1468 = vrcp.f32 %v775_v55 }
 0x26f   : > { %v1457_v50 = vpop.eup %1456  ;;  %1470 = vrcp.f32 %v777_v54 }
 0x270   : > { %1324 = vmatprep.mubr.bf16.mxu1 %v814_v57  ;;  %v803_v60 = vmul.f32 %v1457_v50, %v1740_v11  ;;  %v1459_v62 = vpop.eup %1458 }
 0x271   : > { %v779_v58 = vpop.xlane.xlu1 %778  ;;  %v804_v0 = vmul.f32 %v1459_v62, %v1743_v13 }
 0x272   : > { %1472 = vrcp.f32 %v779_v58  ;;  %v815_v63 = vpack.c.bf16 %v803_v60, %v802_v59 }
 0x273   : > { %v1461_v61 = vpop.eup %1460 }
 0x274   : > { %1325 = vmatmul.mubr.bf16.gmra.mxu1 %v815_v63  ;;  %v805_v1 = vmul.f32 %v1461_v61, %v1750_v17  ;;  %v1463_v2 = vpop.eup %1462 }
 0x275   : > { %v806_v6 = vmul.f32 %v1463_v2, %v1747_v15 }
 0x276   : > { %v816_v3 = vpack.c.bf16 %v805_v1, %v804_v0 }
 0x277   : > { %v1465_v4 = vpop.eup %1464 }
 0x278   : > { %1328 = vmatprep.mubr.bf16.mxu1 %v816_v3  ;;  %v807_v5 = vmul.f32 %v1465_v4, %v1754_v18  ;;  %v1467_v7 = vpop.eup %1466 }
 0x279   : > { %v808_v11 = vmul.f32 %v1467_v7, %v1757_v20 }
 0x27a   : > { %v817_v8 = vpack.c.bf16 %v807_v5, %v806_v6 }
 0x27b   : > { %v1469_v9 = vpop.eup %1468 }
 0x27c   : > { %v1471_v10 = vpop.eup %1470  ;;  %1329 = vmatmul.mubr.bf16.gmra.mxu1 %v817_v8  ;;  %v809_v12 = vmul.f32 %v1469_v9, %v1763_v22 }
 0x27d   : > { %v810_v16 = vmul.f32 %v1471_v10, %v1761_v21 }
 0x27e   : > { %v818_v14 = vpack.c.bf16 %v809_v12, %v808_v11 }
 0x27f   : > { %v1473_v13 = vpop.eup %1472 }
 0x280   : > { %v811_v17 = vmul.f32 %v1473_v13, %v1768_v24  ;;  %1332 = vmatprep.mubr.bf16.mxu1 %v818_v14 }
 0x282   : > { %v819_v15 = vpack.c.bf16 %v811_v17, %v810_v16 }
 0x284   : > { %1333 = vmatmul.mubr.bf16.gmra.mxu1 %v819_v15 }
 0x32b   : > { %v1322_v18 = vpop.f32.mrf.mxu1 }
 0x32c   : > { %v1226_v19 = vpack.c.bf16 %v1322_v18, %v1322_v18 }
 0x32d   : > { %v902_v20 = vpop.f32.mrf.mxu1 }
 0x32e   : > { %1032 = vst.msk [vmem:[%s1793_s28 + $0x8] sm:$0xf] %vm1029_vm2, %v1226_v19  ;;  %v1224_v21 = vpack.c.bf16 %v902_v20, %v902_v20 }
 0x32f   : > { %v1323_v22 = vpop.f32.mrf.mxu1 }
 0x330   : > { %1030 = vst.msk [vmem:[%s1793_s28] sm:$0xf] %vm1029_vm2, %v1224_v21  ;;  %v1227_v23 = vpack.c.bf16 %v1323_v22, %v1323_v22 }
 0x331   : > { %v905_v24 = vpop.f32.mrf.mxu1 }
 0x332   : > { %1033 = vst.msk [vmem:[%s1793_s28 + $0xc] sm:$0xf] %vm1029_vm2, %v1227_v23  ;;  %v1225_v25 = vpack.c.bf16 %v905_v24, %v905_v24 }
 0x334   : > { %1031 = vst.msk [vmem:[%s1793_s28 + $0x4] sm:$0xf] %vm1029_vm2, %v1225_v25  ;;  %v1326_v26 = vpop.f32.mrf.mxu1 }
 0x335   : > { %v1230_v27 = vpack.c.bf16 %v1326_v26, %v1326_v26 }
 0x336   : > { %v918_v28 = vpop.f32.mrf.mxu1 }
 0x337   : > { %1036 = vst.msk [vmem:[%s1793_s28 + $0x18] sm:$0xf] %vm1029_vm2, %v1230_v27  ;;  %v1228_v29 = vpack.c.bf16 %v918_v28, %v918_v28 }
 0x338   : > { %v1327_v30 = vpop.f32.mrf.mxu1 }
 0x339   : > { %1034 = vst.msk [vmem:[%s1793_s28 + $0x10] sm:$0xf] %vm1029_vm2, %v1228_v29  ;;  %v1231_v31 = vpack.c.bf16 %v1327_v30, %v1327_v30 }
 0x33a   : > { %v921_v32 = vpop.f32.mrf.mxu1 }
 0x33b   : > { %1037 = vst.msk [vmem:[%s1793_s28 + $0x1c] sm:$0xf] %vm1029_vm2, %v1231_v31  ;;  %v1229_v33 = vpack.c.bf16 %v921_v32, %v921_v32 }
 0x33c   : > { %v1330_v34 = vpop.f32.mrf.mxu1 }
 0x33d   : > { %1035 = vst.msk [vmem:[%s1793_s28 + $0x14] sm:$0xf] %vm1029_vm2, %v1229_v33  ;;  %v1234_v35 = vpack.c.bf16 %v1330_v34, %v1330_v34 }
 0x33e   : > { %v934_v36 = vpop.f32.mrf.mxu1 }
 0x33f   : > { %1040 = vst.msk [vmem:[%s1793_s28 + $0x28] sm:$0xf] %vm1029_vm2, %v1234_v35  ;;  %v1232_v37 = vpack.c.bf16 %v934_v36, %v934_v36 }
 0x340   : > { %v1331_v38 = vpop.f32.mrf.mxu1 }
 0x341   : > { %1038 = vst.msk [vmem:[%s1793_s28 + $0x20] sm:$0xf] %vm1029_vm2, %v1232_v37  ;;  %v1235_v39 = vpack.c.bf16 %v1331_v38, %v1331_v38 }
 0x342   : > { %v937_v40 = vpop.f32.mrf.mxu1 }
 0x343   : > { %1041 = vst.msk [vmem:[%s1793_s28 + $0x2c] sm:$0xf] %vm1029_vm2, %v1235_v39  ;;  %v1233_v41 = vpack.c.bf16 %v937_v40, %v937_v40 }
 0x344   : > { %v1334_v42 = vpop.f32.mrf.mxu1 }
 0x345   : > { %1039 = vst.msk [vmem:[%s1793_s28 + $0x24] sm:$0xf] %vm1029_vm2, %v1233_v41  ;;  %v1238_v43 = vpack.c.bf16 %v1334_v42, %v1334_v42 }
 0x346   : > { %v950_v44 = vpop.f32.mrf.mxu1 }
 0x347   : > { %1044 = vst.msk [vmem:[%s1793_s28 + $0x38] sm:$0xf] %vm1029_vm2, %v1238_v43  ;;  %v1236_v46 = vpack.c.bf16 %v950_v44, %v950_v44 }
 0x348   : > { %v1335_v47 = vpop.f32.mrf.mxu1 }
 0x349   : > { %1042 = vst.msk [vmem:[%s1793_s28 + $0x30] sm:$0xf] %vm1029_vm2, %v1236_v46  ;;  %v1239_v48 = vpack.c.bf16 %v1335_v47, %v1335_v47 }
 0x34a   : > { %v953_v49 = vpop.f32.mrf.mxu1 }
 0x34b   : > { %1045 = vst.msk [vmem:[%s1793_s28 + $0x3c] sm:$0xf] %vm1029_vm2, %v1239_v48  ;;  %v1237_v51 = vpack.c.bf16 %v953_v49, %v953_v49 }
 0x34d   : > { %1043 = vst.msk [vmem:[%s1793_s28 + $0x34] sm:$0xf] %vm1029_vm2, %v1237_v51 }
 0x34e PF: > { %s11_s10 = sadd.s32 1, %s1512_s10   ;;  %s1844_s6 = smov %s1500_s7 }
 0x34f   : > { %p8_p10 = scmp.ge.s32.totalorder %s11_s10, 4   ;;  %s1845_s7 = smov %s1559_s14 }
 0x350   : > { %s1846_s8 = smov %s1508_s9  ;;  %s1847_s9 = smov %s1849_s11 }
 0x351   :  { %10 = sbr.rel (!%p8_p10) target bundleno = 3 (0x3), region = 102 }

// kernel: _lambda_.27
= control target key start
LH: loop header
LB: loop body
LE: loop exit
PB: predicated region body
PF: predicated region fallthrough
CT: control target
= control target key end

     0   :  { %s2190_s18 = smov 0   ;;  %s2192_s19 = smov 0   ;;  %s2928_s0 = inlined_call_operand.vmem [shape: bf16[256,64], index: 0, kind: input, shape index: {}]   ;;  %s2929_s1 = inlined_call_operand.vmem [shape: f32[1,64], index: 1, kind: input, shape index: {}]   ;;  %s2930_s2 = inlined_call_operand.vmem [shape: f32[1,64], index: 2, kind: input, shape index: {}]   ;;  %s2931_s3 = inlined_call_operand.vmem [shape: bf16[3,64,64], index: 3, kind: input, shape index: {}]   ;;  %s2932_s4 = inlined_call_operand.vmem [shape: f32[3,1,64], index: 4, kind: input, shape index: {}]   ;;  %s2933_s5 = inlined_call_operand.vmem [shape: bf16[3,256,64], index: 5, kind: output, shape index: {}]  }
   0x1   :  { %s2194_s20 = smov 0  }
   0x2 LB: > { %s30_s21 = sadd.s32 1, %s2154_s19  ;;  %p1703_p0 = scmp.ge.s32.totalorder %s2158_s20, 1  ;;  %s2158_s20 = sphi %s2194_s20, %s15_s20   ;;  %s2154_s19 = sphi %s2192_s19, %s2935_s19   ;;  %s2150_s18 = sphi %s2190_s18, %s2934_s18  }
   0x3   : > { %p32_p1 = scmp.ge.s32.totalorder %s30_s21, 3  ;;  %p239_p2 = scmp.lt.s32.totalorder %s2158_s20, 4 }
   0x5   : > { %s2937_s21 = smov (%p32_p1, %s30_s21), 0  ;;  %p240_p3 = pnand %p1703_p0, %p239_p2 }
   0x6   : > { %p294_p4 = scmp.lt.s32.totalorder (!%p240_p3), %s2150_s18, 2  ;;  %p322_p5 = scmp.eq.s32.totalorder (!%p240_p3), %s2150_s18, 0 }
   0x7   : > { %243 = sbr.rel (%p240_p3) target bundleno = 635 (0x27b), region = 40 }
   0xc   : > { %s2939_s18 = smov (!%p294_p4, %s2150_s18), 2  ;;  %327 = sbr.rel (!%p322_p5) target bundleno = 390 (0x186), region = 44  ;;  %v2229_v0 = vld [vmem:[%s2928_s0] sm:$0xff] (%p322_p5)   ;;  %vm392_vm0 = vcmask (%p322_p5), 523264   ;;  %v2234_v1 = vld [vmem:[%s2928_s0 + $0x8] sm:$0xff] (%p322_p5)   ;;  %v2243_v6 = vld [vmem:[%s2928_s0 + $0x10] sm:$0xff] (%p322_p5)  }
   0xd   : > { %s1814_s22 = sshll.u32 %s2939_s18, 5  ;;  %s307_s25 = scalar_lea.vmem %s2932_s4, %s2939_s18  ;;  %v1883_v2 = vunpack.c.l.bf16 (%p322_p5), %v2229_v0  ;;  %v1887_v3 = vunpack.c.l.bf16 (%p322_p5), %v2234_v1  ;;  %v1884_v4 = vunpack.c.h.bf16 (%p322_p5), %v2229_v0  ;;  %v1888_v5 = vunpack.c.h.bf16 (%p322_p5), %v2234_v1  ;;  %v2262_v13 = vld [vmem:[%s2928_s0 + $0x18] sm:$0xff] (%p322_p5)   ;;  %v2275_v18 = vld [vmem:[%s2928_s0 + $0x20] sm:$0xff] (%p322_p5)   ;;  %v2288_v23 = vld [vmem:[%s2928_s0 + $0x28] sm:$0xff] (%p322_p5)  }
   0xe   : > { %s2218_s28 = scalar_lea.vmem %s2931_s3, %s1814_s22  ;;  %s1815_s29 = sshll.u32 %s2939_s18, 7  ;;  %v1891_v11 = vunpack.c.l.bf16 (%p322_p5), %v2243_v6  ;;  %v1892_v12 = vunpack.c.h.bf16 (%p322_p5), %v2243_v6  ;;  %v1895_v16 = vunpack.c.l.bf16 (%p322_p5), %v2262_v13  ;;  %v1896_v17 = vunpack.c.h.bf16 (%p322_p5), %v2262_v13  ;;  %v2301_v28 = vld [vmem:[%s2928_s0 + $0x30] sm:$0xff] (%p322_p5)   ;;  %v2314_v33 = vld [vmem:[%s2928_s0 + $0x38] sm:$0xff] (%p322_p5)   ;;  %v2327_v38 = vld [vmem:[%s2928_s0 + $0x40] sm:$0xff] (%p322_p5)  }
   0xf   : > { %s2224_s7 = scalar_lea.vmem %s2933_s5, %s1815_s29  ;;  %v393_v7 = vsel (%p322_p5), %vm392_vm0, %v1883_v2, 0.0  ;;  %v399_v8 = vsel (%p322_p5), %vm392_vm0, %v1887_v3, 0.0  ;;  %v396_v9 = vsel (%p322_p5), %vm392_vm0, %v1884_v4, 0.0  ;;  %v402_v10 = vsel (%p322_p5), %vm392_vm0, %v1888_v5, 0.0  ;;  %v2340_v43 = vld [vmem:[%s2928_s0 + $0x48] sm:$0xff] (%p322_p5)   ;;  %v2353_v48 = vld [vmem:[%s2928_s0 + $0x50] sm:$0xff] (%p322_p5)  }
  0x10   : > { %394 = vadd.xlane.f32.xlu0 (%p322_p5), %v393_v7  ;;  %400 = vadd.xlane.f32.xlu1 (%p322_p5), %v399_v8  ;;  %v405_v14 = vsel (%p322_p5), %vm392_vm0, %v1891_v11, 0.0  ;;  %v408_v15 = vsel (%p322_p5), %vm392_vm0, %v1892_v12, 0.0  ;;  %v411_v19 = vsel (%p322_p5), %vm392_vm0, %v1895_v16, 0.0  ;;  %v414_v20 = vsel (%p322_p5), %vm392_vm0, %v1896_v17, 0.0  ;;  %v2366_v53 = vld [vmem:[%s2928_s0 + $0x58] sm:$0xff] (%p322_p5)   ;;  %v2379_v58 = vld [vmem:[%s2928_s0 + $0x60] sm:$0xff] (%p322_p5)  }
  0x11   : > { %v1899_v21 = vunpack.c.l.bf16 %v2275_v18  ;;  %v1900_v22 = vunpack.c.h.bf16 %v2275_v18  ;;  %v1903_v26 = vunpack.c.l.bf16 %v2288_v23  ;;  %v1904_v27 = vunpack.c.h.bf16 %v2288_v23  ;;  %v2392_v63 = vld [vmem:[%s2928_s0 + $0x68] sm:$0xff]  }
  0x12   : > { %v1907_v31 = vunpack.c.l.bf16 %v2301_v28  ;;  %v1908_v32 = vunpack.c.h.bf16 %v2301_v28  ;;  %v1911_v36 = vunpack.c.l.bf16 %v2314_v33  ;;  %v1912_v37 = vunpack.c.h.bf16 %v2314_v33 }
  0x13   : > { %v417_v24 = vsel %vm392_vm0, %v1899_v21, 0.0  ;;  %v420_v25 = vsel %vm392_vm0, %v1900_v22, 0.0  ;;  %v423_v29 = vsel %vm392_vm0, %v1903_v26, 0.0  ;;  %v426_v30 = vsel %vm392_vm0, %v1904_v27, 0.0 }
  0x14   : > { %397 = vadd.xlane.f32.xlu0 %v396_v9  ;;  %403 = vadd.xlane.f32.xlu1 %v402_v10  ;;  %v429_v34 = vsel %vm392_vm0, %v1907_v31, 0.0  ;;  %v432_v35 = vsel %vm392_vm0, %v1908_v32, 0.0  ;;  %v435_v39 = vsel %vm392_vm0, %v1911_v36, 0.0  ;;  %v438_v40 = vsel %vm392_vm0, %v1912_v37, 0.0 }
  0x15   : > { %v1915_v41 = vunpack.c.l.bf16 %v2327_v38  ;;  %v1916_v42 = vunpack.c.h.bf16 %v2327_v38  ;;  %v1919_v46 = vunpack.c.l.bf16 %v2340_v43  ;;  %v1920_v47 = vunpack.c.h.bf16 %v2340_v43 }
  0x16   : > { %v1923_v51 = vunpack.c.l.bf16 %v2353_v48  ;;  %v1924_v52 = vunpack.c.h.bf16 %v2353_v48  ;;  %v1927_v56 = vunpack.c.l.bf16 %v2366_v53  ;;  %v1928_v57 = vunpack.c.h.bf16 %v2366_v53 }
  0x17   : > { %v441_v44 = vsel %vm392_vm0, %v1915_v41, 0.0  ;;  %v444_v45 = vsel %vm392_vm0, %v1916_v42, 0.0  ;;  %v447_v49 = vsel %vm392_vm0, %v1919_v46, 0.0  ;;  %v450_v50 = vsel %vm392_vm0, %v1920_v47, 0.0 }
  0x18   : > { %406 = vadd.xlane.f32.xlu0 %v405_v14  ;;  %409 = vadd.xlane.f32.xlu1 %v408_v15  ;;  %v453_v54 = vsel %vm392_vm0, %v1923_v51, 0.0  ;;  %v456_v55 = vsel %vm392_vm0, %v1924_v52, 0.0  ;;  %v459_v59 = vsel %vm392_vm0, %v1927_v56, 0.0  ;;  %v462_v60 = vsel %vm392_vm0, %v1928_v57, 0.0  ;;  %v2405_v14 = vld [vmem:[%s2928_s0 + $0x70] sm:$0xff]  }
  0x19   : > { %v1931_v61 = vunpack.c.l.bf16 %v2379_v58  ;;  %v1932_v62 = vunpack.c.h.bf16 %v2379_v58  ;;  %v1935_v9 = vunpack.c.l.bf16 %v2392_v63  ;;  %v1936_v10 = vunpack.c.h.bf16 %v2392_v63 }
  0x1a   : > { %vm1016_vm1 = vcmask 519168  }
  0x1b   : > { %v465_v7 = vsel %vm392_vm0, %v1931_v61, 0.0  ;;  %v468_v8 = vsel %vm392_vm0, %v1932_v62, 0.0  ;;  %v471_v15 = vsel %vm392_vm0, %v1935_v9, 0.0 }
  0x1c   : > { %412 = vadd.xlane.f32.xlu0 %v411_v19  ;;  %415 = vadd.xlane.f32.xlu1 %v414_v20  ;;  %v474_v19 = vsel %vm392_vm0, %v1936_v10, 0.0  ;;  %v1939_v20 = vunpack.c.l.bf16 %v2405_v14 }
  0x20   : > { %418 = vadd.xlane.f32.xlu0 %v417_v24  ;;  %421 = vadd.xlane.f32.xlu1 %v420_v25  ;;  %v1940_v24 = vunpack.c.h.bf16 %v2405_v14  ;;  %v2418_v25 = vld [vmem:[%s2928_s0 + $0x78] sm:$0xff]  }
  0x24   : > { %424 = vadd.xlane.f32.xlu0 %v423_v29  ;;  %427 = vadd.xlane.f32.xlu1 %v426_v30  ;;  %v477_v29 = vsel %vm392_vm0, %v1939_v20, 0.0  ;;  %v480_v30 = vsel %vm392_vm0, %v1940_v24, 0.0 }
  0x28   : > { %430 = vadd.xlane.f32.xlu0 %v429_v34  ;;  %433 = vadd.xlane.f32.xlu1 %v432_v35  ;;  %v1943_v34 = vunpack.c.l.bf16 %v2418_v25  ;;  %v1944_v35 = vunpack.c.h.bf16 %v2418_v25 }
  0x2c   : > { %436 = vadd.xlane.f32.xlu0 %v435_v39  ;;  %439 = vadd.xlane.f32.xlu1 %v438_v40  ;;  %v483_v39 = vsel %vm392_vm0, %v1943_v34, 0.0  ;;  %v486_v40 = vsel %vm392_vm0, %v1944_v35, 0.0 }
  0x30   : > { %442 = vadd.xlane.f32.xlu0 %v441_v44  ;;  %445 = vadd.xlane.f32.xlu1 %v444_v45 }
  0x34   : > { %448 = vadd.xlane.f32.xlu0 %v447_v49  ;;  %451 = vadd.xlane.f32.xlu1 %v450_v50 }
  0x38   : > { %454 = vadd.xlane.f32.xlu0 %v453_v54  ;;  %457 = vadd.xlane.f32.xlu1 %v456_v55 }
  0x3c   : > { %460 = vadd.xlane.f32.xlu0 %v459_v59  ;;  %463 = vadd.xlane.f32.xlu1 %v462_v60 }
  0x40   : > { %466 = vadd.xlane.f32.xlu0 %v465_v7  ;;  %469 = vadd.xlane.f32.xlu1 %v468_v8 }
  0x44   : > { %472 = vadd.xlane.f32.xlu0 %v471_v15  ;;  %475 = vadd.xlane.f32.xlu1 %v474_v19 }
  0x48   : > { %478 = vadd.xlane.f32.xlu0 %v477_v29  ;;  %481 = vadd.xlane.f32.xlu1 %v480_v30 }
  0x4c   : > { %484 = vadd.xlane.f32.xlu0 %v483_v39  ;;  %487 = vadd.xlane.f32.xlu1 %v486_v40 }
  0x99   : > { %v395_v44 = vpop.xlane.xlu0 %394  ;;  %v401_v45 = vpop.xlane.xlu1 %400 }
  0x9a   : > { %v490_v49 = vmul.f32 0.015625, %v395_v44  ;;  %v492_v50 = vmul.f32 0.015625, %v401_v45 }
  0x9c   : > { %v2436_v54 = vsub.f32 %v1883_v2, %v490_v49  ;;  %v2440_v55 = vsub.f32 %v1887_v3, %v492_v50 }
  0x9d   : > { %v398_v59 = vpop.xlane.xlu0 %397  ;;  %v404_v60 = vpop.xlane.xlu1 %403 }
  0x9e   : > { %v491_v7 = vmul.f32 0.015625, %v398_v59  ;;  %v493_v8 = vmul.f32 0.015625, %v404_v60  ;;  %v554_v15 = vmul.f32 %v2436_v54, %v2436_v54  ;;  %v556_v19 = vmul.f32 %v2440_v55, %v2440_v55 }
  0xa0   : > { %v2448_v29 = vsub.f32 %v1884_v4, %v491_v7  ;;  %v2452_v2 = vsub.f32 %v1888_v5, %v493_v8  ;;  %v586_v3 = vsel %vm392_vm0, %v554_v15, 0.0  ;;  %v592_v40 = vsel %vm392_vm0, %v556_v19, 0.0 }
  0xa1   : > { %587 = vadd.xlane.f32.xlu0 %v586_v3  ;;  %v407_v30 = vpop.xlane.xlu0 %406  ;;  %v410_v39 = vpop.xlane.xlu1 %409 }
  0xa2   : > { %v494_v44 = vmul.f32 0.015625, %v407_v30  ;;  %v495_v45 = vmul.f32 0.015625, %v410_v39  ;;  %v555_v49 = vmul.f32 %v2448_v29, %v2448_v29  ;;  %v557_v0 = vmul.f32 %v2452_v2, %v2452_v2 }
  0xa4   : > { %v2462_v1 = vsub.f32 %v1891_v11, %v494_v44  ;;  %v2466_v4 = vsub.f32 %v1892_v12, %v495_v45  ;;  %v589_v5 = vsel %vm392_vm0, %v555_v49, 0.0  ;;  %v595_v60 = vsel %vm392_vm0, %v557_v0, 0.0 }
  0xa5   : > { %593 = vadd.xlane.f32.xlu0 %v592_v40  ;;  %590 = vadd.xlane.f32.xlu1 %v589_v5  ;;  %v413_v50 = vpop.xlane.xlu0 %412  ;;  %v416_v59 = vpop.xlane.xlu1 %415 }
  0xa6   : > { %v496_v7 = vmul.f32 0.015625, %v413_v50  ;;  %v497_v8 = vmul.f32 0.015625, %v416_v59  ;;  %v558_v15 = vmul.f32 %v2462_v1, %v2462_v1  ;;  %v559_v11 = vmul.f32 %v2466_v4, %v2466_v4 }
  0xa8   : > { %v2476_v6 = vsub.f32 %v1895_v16, %v496_v7  ;;  %v2480_v12 = vsub.f32 %v1896_v17, %v497_v8  ;;  %v598_v19 = vsel %vm392_vm0, %v558_v15, 0.0  ;;  %v601_v39 = vsel %vm392_vm0, %v559_v11, 0.0 }
  0xa9   : > { %596 = vadd.xlane.f32.xlu1 %v595_v60  ;;  %599 = vadd.xlane.f32.xlu0 %v598_v19  ;;  %v419_v3 = vpop.xlane.xlu0 %418  ;;  %v422_v30 = vpop.xlane.xlu1 %421 }
  0xaa   : > { %v498_v40 = vmul.f32 0.015625, %v419_v3  ;;  %v499_v44 = vmul.f32 0.015625, %v422_v30  ;;  %v560_v45 = vmul.f32 %v2476_v6, %v2476_v6  ;;  %v561_v16 = vmul.f32 %v2480_v12, %v2480_v12 }
  0xac   : > { %v2490_v13 = vsub.f32 %v1899_v21, %v498_v40  ;;  %v2494_v17 = vsub.f32 %v1900_v22, %v499_v44  ;;  %v604_v49 = vsel %vm392_vm0, %v560_v45, 0.0  ;;  %v607_v50 = vsel %vm392_vm0, %v561_v16, 0.0 }
  0xad   : > { %602 = vadd.xlane.f32.xlu1 %v601_v39  ;;  %605 = vadd.xlane.f32.xlu0 %v604_v49  ;;  %v425_v0 = vpop.xlane.xlu0 %424  ;;  %v428_v5 = vpop.xlane.xlu1 %427 }
  0xae   : > { %v500_v59 = vmul.f32 0.015625, %v425_v0  ;;  %v501_v60 = vmul.f32 0.015625, %v428_v5  ;;  %v562_v7 = vmul.f32 %v2490_v13, %v2490_v13  ;;  %v563_v21 = vmul.f32 %v2494_v17, %v2494_v17 }
  0xb0   : > { %v2504_v18 = vsub.f32 %v1903_v26, %v500_v59  ;;  %v2508_v22 = vsub.f32 %v1904_v27, %v501_v60  ;;  %v610_v8 = vsel %vm392_vm0, %v562_v7, 0.0  ;;  %v613_v19 = vsel %vm392_vm0, %v563_v21, 0.0 }
  0xb1   : > { %608 = vadd.xlane.f32.xlu1 %v607_v50  ;;  %611 = vadd.xlane.f32.xlu0 %v610_v8  ;;  %v431_v15 = vpop.xlane.xlu0 %430  ;;  %v434_v11 = vpop.xlane.xlu1 %433 }
  0xb2   : > { %v502_v3 = vmul.f32 0.015625, %v431_v15  ;;  %v503_v30 = vmul.f32 0.015625, %v434_v11  ;;  %v564_v39 = vmul.f32 %v2504_v18, %v2504_v18  ;;  %v565_v26 = vmul.f32 %v2508_v22, %v2508_v22 }
  0xb4   : > { %v2518_v23 = vsub.f32 %v1907_v31, %v502_v3  ;;  %v2522_v27 = vsub.f32 %v1908_v32, %v503_v30  ;;  %v616_v40 = vsel %vm392_vm0, %v564_v39, 0.0  ;;  %v619_v16 = vsel %vm392_vm0, %v565_v26, 0.0 }
  0xb5   : > { %614 = vadd.xlane.f32.xlu1 %v613_v19  ;;  %617 = vadd.xlane.f32.xlu0 %v616_v40  ;;  %v437_v44 = vpop.xlane.xlu0 %436  ;;  %v440_v45 = vpop.xlane.xlu1 %439 }
  0xb6   : > { %v504_v49 = vmul.f32 0.015625, %v437_v44  ;;  %v505_v0 = vmul.f32 0.015625, %v440_v45  ;;  %v566_v5 = vmul.f32 %v2518_v23, %v2518_v23  ;;  %v567_v31 = vmul.f32 %v2522_v27, %v2522_v27 }
  0xb8   : > { %v2532_v28 = vsub.f32 %v1911_v36, %v504_v49  ;;  %v2536_v32 = vsub.f32 %v1912_v37, %v505_v0  ;;  %v622_v50 = vsel %vm392_vm0, %v566_v5, 0.0  ;;  %v625_v7 = vsel %vm392_vm0, %v567_v31, 0.0 }
  0xb9   : > { %620 = vadd.xlane.f32.xlu1 %v619_v16  ;;  %623 = vadd.xlane.f32.xlu0 %v622_v50  ;;  %v443_v59 = vpop.xlane.xlu0 %442  ;;  %v446_v60 = vpop.xlane.xlu1 %445 }
  0xba   : > { %v506_v21 = vmul.f32 0.015625, %v443_v59  ;;  %v507_v8 = vmul.f32 0.015625, %v446_v60  ;;  %v568_v15 = vmul.f32 %v2532_v28, %v2532_v28  ;;  %v569_v36 = vmul.f32 %v2536_v32, %v2536_v32 }
  0xbc   : > { %v2546_v33 = vsub.f32 %v1915_v41, %v506_v21  ;;  %v2550_v37 = vsub.f32 %v1916_v42, %v507_v8  ;;  %v628_v11 = vsel %vm392_vm0, %v568_v15, 0.0  ;;  %v631_v30 = vsel %vm392_vm0, %v569_v36, 0.0 }
  0xbd   : > { %626 = vadd.xlane.f32.xlu1 %v625_v7  ;;  %629 = vadd.xlane.f32.xlu0 %v628_v11  ;;  %v449_v19 = vpop.xlane.xlu0 %448  ;;  %v452_v3 = vpop.xlane.xlu1 %451 }
  0xbe   : > { %v508_v39 = vmul.f32 0.015625, %v449_v19  ;;  %v509_v26 = vmul.f32 0.015625, %v452_v3  ;;  %v570_v40 = vmul.f32 %v2546_v33, %v2546_v33  ;;  %v571_v41 = vmul.f32 %v2550_v37, %v2550_v37 }
  0xc0   : > { %v2560_v38 = vsub.f32 %v1919_v46, %v508_v39  ;;  %v2564_v42 = vsub.f32 %v1920_v47, %v509_v26  ;;  %v634_v44 = vsel %vm392_vm0, %v570_v40, 0.0  ;;  %v637_v49 = vsel %vm392_vm0, %v571_v41, 0.0 }
  0xc1   : > { %632 = vadd.xlane.f32.xlu1 %v631_v30  ;;  %635 = vadd.xlane.f32.xlu0 %v634_v44  ;;  %v455_v45 = vpop.xlane.xlu0 %454  ;;  %v458_v16 = vpop.xlane.xlu1 %457 }
  0xc2   : > { %v510_v0 = vmul.f32 0.015625, %v455_v45  ;;  %v511_v5 = vmul.f32 0.015625, %v458_v16  ;;  %v572_v31 = vmul.f32 %v2560_v38, %v2560_v38  ;;  %v573_v46 = vmul.f32 %v2564_v42, %v2564_v42 }
  0xc4   : > { %v2574_v43 = vsub.f32 %v1923_v51, %v510_v0  ;;  %v2578_v47 = vsub.f32 %v1924_v52, %v511_v5  ;;  %v640_v50 = vsel %vm392_vm0, %v572_v31, 0.0  ;;  %v643_v7 = vsel %vm392_vm0, %v573_v46, 0.0 }
  0xc5   : > { %638 = vadd.xlane.f32.xlu1 %v637_v49  ;;  %641 = vadd.xlane.f32.xlu0 %v640_v50  ;;  %v461_v59 = vpop.xlane.xlu0 %460  ;;  %v464_v60 = vpop.xlane.xlu1 %463 }
  0xc6   : > { %v512_v21 = vmul.f32 0.015625, %v461_v59  ;;  %v513_v8 = vmul.f32 0.015625, %v464_v60  ;;  %v574_v15 = vmul.f32 %v2574_v43, %v2574_v43  ;;  %v575_v51 = vmul.f32 %v2578_v47, %v2578_v47 }
  0xc8   : > { %v2588_v48 = vsub.f32 %v1927_v56, %v512_v21  ;;  %v2592_v52 = vsub.f32 %v1928_v57, %v513_v8  ;;  %v646_v36 = vsel %vm392_vm0, %v574_v15, 0.0  ;;  %v649_v3 = vsel %vm392_vm0, %v575_v51, 0.0 }
  0xc9   : > { %644 = vadd.xlane.f32.xlu1 %v643_v7  ;;  %647 = vadd.xlane.f32.xlu0 %v646_v36  ;;  %v467_v11 = vpop.xlane.xlu0 %466  ;;  %v470_v19 = vpop.xlane.xlu1 %469 }
  0xca   : > { %v514_v30 = vmul.f32 0.015625, %v467_v11  ;;  %v515_v39 = vmul.f32 0.015625, %v470_v19  ;;  %v576_v26 = vmul.f32 %v2588_v48, %v2588_v48  ;;  %v577_v56 = vmul.f32 %v2592_v52, %v2592_v52 }
  0xcc   : > { %v2602_v53 = vsub.f32 %v1931_v61, %v514_v30  ;;  %v2606_v57 = vsub.f32 %v1932_v62, %v515_v39  ;;  %v652_v40 = vsel %vm392_vm0, %v576_v26, 0.0  ;;  %v655_v45 = vsel %vm392_vm0, %v577_v56, 0.0 }
  0xcd   : > { %650 = vadd.xlane.f32.xlu1 %v649_v3  ;;  %653 = vadd.xlane.f32.xlu0 %v652_v40  ;;  %v473_v41 = vpop.xlane.xlu0 %472  ;;  %v476_v44 = vpop.xlane.xlu1 %475 }
  0xce   : > { %v516_v16 = vmul.f32 0.015625, %v473_v41  ;;  %v517_v49 = vmul.f32 0.015625, %v476_v44  ;;  %v578_v0 = vmul.f32 %v2602_v53, %v2602_v53  ;;  %v579_v61 = vmul.f32 %v2606_v57, %v2606_v57 }
  0xd0   : > { %v2616_v58 = vsub.f32 %v1935_v9, %v516_v16  ;;  %v2620_v62 = vsub.f32 %v1936_v10, %v517_v49  ;;  %v658_v5 = vsel %vm392_vm0, %v578_v0, 0.0  ;;  %v661_v50 = vsel %vm392_vm0, %v579_v61, 0.0 }
  0xd1   : > { %656 = vadd.xlane.f32.xlu1 %v655_v45  ;;  %659 = vadd.xlane.f32.xlu0 %v658_v5  ;;  %v479_v31 = vpop.xlane.xlu0 %478  ;;  %v482_v46 = vpop.xlane.xlu1 %481 }
  0xd2   : > { %v518_v59 = vmul.f32 0.015625, %v479_v31  ;;  %v519_v60 = vmul.f32 0.015625, %v482_v46  ;;  %v580_v7 = vmul.f32 %v2616_v58, %v2616_v58  ;;  %v581_v9 = vmul.f32 %v2620_v62, %v2620_v62 }
  0xd4   : > { %v2630_v63 = vsub.f32 %v1939_v20, %v518_v59  ;;  %v2634_v10 = vsub.f32 %v1940_v24, %v519_v60  ;;  %v664_v21 = vsel %vm392_vm0, %v580_v7, 0.0  ;;  %v667_v51 = vsel %vm392_vm0, %v581_v9, 0.0 }
  0xd5   : > { %662 = vadd.xlane.f32.xlu1 %v661_v50  ;;  %665 = vadd.xlane.f32.xlu0 %v664_v21  ;;  %v485_v8 = vpop.xlane.xlu0 %484  ;;  %v488_v15 = vpop.xlane.xlu1 %487 }
  0xd6   : > { %v520_v36 = vmul.f32 0.015625, %v485_v8  ;;  %v521_v11 = vmul.f32 0.015625, %v488_v15  ;;  %v582_v19 = vmul.f32 %v2630_v63, %v2630_v63  ;;  %v583_v20 = vmul.f32 %v2634_v10, %v2634_v10 }
  0xd8   : > { %v2644_v14 = vsub.f32 %v1943_v34, %v520_v36  ;;  %v2648_v24 = vsub.f32 %v1944_v35, %v521_v11  ;;  %v670_v3 = vsel %vm392_vm0, %v582_v19, 0.0  ;;  %v673_v30 = vsel %vm392_vm0, %v583_v20, 0.0 }
  0xd9   : > { %668 = vadd.xlane.f32.xlu1 %v667_v51  ;;  %671 = vadd.xlane.f32.xlu0 %v670_v3  ;;  %v2661_v3 = vld [vmem:[%s2929_s1] ss:$0 sm:$0xff] }
  0xda   : > { %v584_v39 = vmul.f32 %v2644_v14, %v2644_v14  ;;  %v585_v26 = vmul.f32 %v2648_v24, %v2648_v24 }
  0xdc   : > { %v676_v56 = vsel %vm392_vm0, %v584_v39, 0.0  ;;  %v679_v25 = vsel %vm392_vm0, %v585_v26, 0.0 }
  0xdd   : > { %674 = vadd.xlane.f32.xlu1 %v673_v30  ;;  %677 = vadd.xlane.f32.xlu0 %v676_v56  ;;  %v2667_v56 = vld [vmem:[%s2930_s2] ss:$0 sm:$0xff] }
  0xe1   : > { %680 = vadd.xlane.f32.xlu1 %v679_v25 }
 0x12a   : > { %v588_v34 = vpop.xlane.xlu0 %587 }
 0x12b   : > { %v682_v35 = vmul.f32 0.015625, %v588_v34 }
 0x12d   : > { %v714_v40 = vadd.f32 1e-05, %v682_v35 }
 0x12e   : > { %v591_v41 = vpop.xlane.xlu1 %590  ;;  %v594_v44 = vpop.xlane.xlu0 %593 }
 0x12f   : > { %2052 = vrsqrt.f32 %v714_v40  ;;  %v683_v45 = vmul.f32 0.015625, %v591_v41  ;;  %v684_v16 = vmul.f32 0.015625, %v594_v44 }
 0x131   : > { %v715_v49 = vadd.f32 1e-05, %v683_v45  ;;  %v716_v0 = vadd.f32 1e-05, %v684_v16 }
 0x132   : > { %v597_v61 = vpop.xlane.xlu1 %596  ;;  %v600_v5 = vpop.xlane.xlu0 %599 }
 0x133   : > { %2054 = vrsqrt.f32 %v715_v49  ;;  %v685_v31 = vmul.f32 0.015625, %v597_v61  ;;  %v686_v46 = vmul.f32 0.015625, %v600_v5 }
 0x134   : > { %2056 = vrsqrt.f32 %v716_v0 }
 0x135   : > { %v717_v50 = vadd.f32 1e-05, %v685_v31  ;;  %v718_v59 = vadd.f32 1e-05, %v686_v46 }
 0x136   : > { %v603_v60 = vpop.xlane.xlu1 %602  ;;  %v606_v7 = vpop.xlane.xlu0 %605 }
 0x137   : > { %2058 = vrsqrt.f32 %v717_v50  ;;  %v687_v9 = vmul.f32 0.015625, %v603_v60  ;;  %v688_v21 = vmul.f32 0.015625, %v606_v7 }
 0x138   : > { %2060 = vrsqrt.f32 %v718_v59 }
 0x139   : > { %v719_v8 = vadd.f32 1e-05, %v687_v9  ;;  %v720_v15 = vadd.f32 1e-05, %v688_v21 }
 0x13a   : > { %v609_v51 = vpop.xlane.xlu1 %608  ;;  %v612_v36 = vpop.xlane.xlu0 %611 }
 0x13b   : > { %2062 = vrsqrt.f32 %v719_v8  ;;  %v689_v11 = vmul.f32 0.015625, %v609_v51  ;;  %v690_v19 = vmul.f32 0.015625, %v612_v36 }
 0x13c   : > { %v2053_v20 = vpop.eup %2052  ;;  %2064 = vrsqrt.f32 %v720_v15 }
 0x13d   : > { %v778_v30 = vmul.f32 %v2053_v20, %v2436_v54  ;;  %v721_v39 = vadd.f32 1e-05, %v689_v11  ;;  %v722_v26 = vadd.f32 1e-05, %v690_v19 }
 0x13e   : > { %v615_v25 = vpop.xlane.xlu1 %614  ;;  %v618_v34 = vpop.xlane.xlu0 %617 }
 0x13f   : > { %v817_v35 = vmul.f32 %v2661_v3, %v778_v30  ;;  %2066 = vrsqrt.f32 %v721_v39  ;;  %v691_v40 = vmul.f32 0.015625, %v615_v25  ;;  %v692_v41 = vmul.f32 0.015625, %v618_v34 }
 0x140   : > { %v2055_v44 = vpop.eup %2054  ;;  %2068 = vrsqrt.f32 %v722_v26 }
 0x141   : > { %v2057_v45 = vpop.eup %2056  ;;  %v856_v16 = vadd.f32 %v2667_v56, %v817_v35  ;;  %v779_v54 = vmul.f32 %v2055_v44, %v2448_v29  ;;  %v723_v49 = vadd.f32 1e-05, %v691_v40  ;;  %v724_v0 = vadd.f32 1e-05, %v692_v41 }
 0x142   : > { %v780_v61 = vmul.f32 %v2057_v45, %v2440_v55  ;;  %v621_v5 = vpop.xlane.xlu1 %620  ;;  %v624_v31 = vpop.xlane.xlu0 %623 }
 0x143   : > { %v1817_v46 = vpack.c.bf16 %v856_v16, %v856_v16  ;;  %v818_v50 = vmul.f32 %v2661_v3, %v779_v54  ;;  %2070 = vrsqrt.f32 %v723_v49  ;;  %v693_v59 = vmul.f32 0.015625, %v621_v5 }
 0x144   : > { %v2059_v60 = vpop.eup %2058  ;;  %v819_v7 = vmul.f32 %v2661_v3, %v780_v61  ;;  %2072 = vrsqrt.f32 %v724_v0  ;;  %v694_v9 = vmul.f32 0.015625, %v624_v31 }
 0x145   : > { %v2061_v21 = vpop.eup %2060  ;;  %1017 = vst.msk [vmem:[#allocation2] sm:$0xf] %vm1016_vm1, %v1817_v46  ;;  %v857_v29 = vadd.f32 %v2667_v56, %v818_v50  ;;  %v781_v8 = vmul.f32 %v2059_v60, %v2452_v2  ;;  %v725_v55 = vadd.f32 1e-05, %v693_v59 }
 0x146   : > { %v858_v15 = vadd.f32 %v2667_v56, %v819_v7  ;;  %v782_v51 = vmul.f32 %v2061_v21, %v2462_v1  ;;  %v726_v36 = vadd.f32 1e-05, %v694_v9  ;;  %v627_v11 = vpop.xlane.xlu1 %626  ;;  %v630_v19 = vpop.xlane.xlu0 %629 }
 0x147   : > { %v1818_v20 = vpack.c.bf16 %v857_v29, %v857_v29  ;;  %v820_v30 = vmul.f32 %v2661_v3, %v781_v8  ;;  %2074 = vrsqrt.f32 %v725_v55  ;;  %v695_v39 = vmul.f32 0.015625, %v627_v11 }
 0x148   : > { %v2063_v26 = vpop.eup %2062  ;;  %v1819_v25 = vpack.c.bf16 %v858_v15, %v858_v15  ;;  %v821_v34 = vmul.f32 %v2661_v3, %v782_v51  ;;  %2076 = vrsqrt.f32 %v726_v36  ;;  %v696_v35 = vmul.f32 0.015625, %v630_v19 }
 0x149   : > { %v2065_v2 = vpop.eup %2064  ;;  %1018 = vst.msk [vmem:[#allocation2 + $0x4] sm:$0xf] %vm1016_vm1, %v1818_v20  ;;  %v859_v40 = vadd.f32 %v2667_v56, %v820_v30  ;;  %v783_v1 = vmul.f32 %v2063_v26, %v2466_v4  ;;  %v727_v41 = vadd.f32 1e-05, %v695_v39 }
 0x14a   : > { %1019 = vst.msk [vmem:[#allocation2 + $0x8] sm:$0xf] %vm1016_vm1, %v1819_v25  ;;  %v860_v44 = vadd.f32 %v2667_v56, %v821_v34  ;;  %v784_v45 = vmul.f32 %v2065_v2, %v2476_v6  ;;  %v728_v16 = vadd.f32 1e-05, %v696_v35  ;;  %v633_v54 = vpop.xlane.xlu1 %632  ;;  %v636_v49 = vpop.xlane.xlu0 %635 }
 0x14b   : > { %v1820_v0 = vpack.c.bf16 %v859_v40, %v859_v40  ;;  %v822_v61 = vmul.f32 %v2661_v3, %v783_v1  ;;  %2078 = vrsqrt.f32 %v727_v41  ;;  %v697_v5 = vmul.f32 0.015625, %v633_v54 }
 0x14c   : > { %v2067_v31 = vpop.eup %2066  ;;  %v1821_v46 = vpack.c.bf16 %v860_v44, %v860_v44  ;;  %v823_v50 = vmul.f32 %v2661_v3, %v784_v45  ;;  %2080 = vrsqrt.f32 %v728_v16  ;;  %v698_v4 = vmul.f32 0.015625, %v636_v49 }
 0x14d   : > { %v2069_v59 = vpop.eup %2068  ;;  %1020 = vst.msk [vmem:[#allocation2 + $0xc] sm:$0xf] %vm1016_vm1, %v1820_v0  ;;  %v861_v60 = vadd.f32 %v2667_v56, %v822_v61  ;;  %v785_v6 = vmul.f32 %v2067_v31, %v2480_v12  ;;  %v729_v7 = vadd.f32 1e-05, %v697_v5 }
 0x14e   : > { %1021 = vst.msk [vmem:[#allocation2 + $0x10] sm:$0xf] %vm1016_vm1, %v1821_v46  ;;  %v862_v9 = vadd.f32 %v2667_v56, %v823_v50  ;;  %v786_v21 = vmul.f32 %v2069_v59, %v2490_v13  ;;  %v730_v29 = vadd.f32 1e-05, %v698_v4  ;;  %v639_v8 = vpop.xlane.xlu1 %638  ;;  %v642_v55 = vpop.xlane.xlu0 %641 }
 0x14f   : > { %v1822_v15 = vpack.c.bf16 %v861_v60, %v861_v60  ;;  %v824_v51 = vmul.f32 %v2661_v3, %v785_v6  ;;  %2082 = vrsqrt.f32 %v729_v7  ;;  %v699_v36 = vmul.f32 0.015625, %v639_v8 }
 0x150   : > { %v2071_v11 = vpop.eup %2070  ;;  %v1823_v19 = vpack.c.bf16 %v862_v9, %v862_v9  ;;  %v825_v20 = vmul.f32 %v2661_v3, %v786_v21  ;;  %2084 = vrsqrt.f32 %v730_v29  ;;  %v700_v12 = vmul.f32 0.015625, %v642_v55 }
 0x151   : > { %v2073_v30 = vpop.eup %2072  ;;  %1022 = vst.msk [vmem:[#allocation2 + $0x14] sm:$0xf] %vm1016_vm1, %v1822_v15  ;;  %v863_v39 = vadd.f32 %v2667_v56, %v824_v51  ;;  %v787_v13 = vmul.f32 %v2071_v11, %v2494_v17  ;;  %v731_v26 = vadd.f32 1e-05, %v699_v36 }
 0x152   : > { %1023 = vst.msk [vmem:[#allocation2 + $0x18] sm:$0xf] %vm1016_vm1, %v1823_v19  ;;  %v864_v25 = vadd.f32 %v2667_v56, %v825_v20  ;;  %v788_v34 = vmul.f32 %v2073_v30, %v2504_v18  ;;  %v732_v35 = vadd.f32 1e-05, %v700_v12  ;;  %v645_v2 = vpop.xlane.xlu1 %644  ;;  %v648_v40 = vpop.xlane.xlu0 %647 }
 0x153   : > { %v1824_v1 = vpack.c.bf16 %v863_v39, %v863_v39  ;;  %v826_v41 = vmul.f32 %v2661_v3, %v787_v13  ;;  %2086 = vrsqrt.f32 %v731_v26  ;;  %v701_v44 = vmul.f32 0.015625, %v645_v2 }
 0x154   : > { %v2075_v45 = vpop.eup %2074  ;;  %v1825_v16 = vpack.c.bf16 %v864_v25, %v864_v25  ;;  %v827_v54 = vmul.f32 %v2661_v3, %v788_v34  ;;  %2088 = vrsqrt.f32 %v732_v35  ;;  %v702_v17 = vmul.f32 0.015625, %v648_v40 }
 0x155   : > { %v2077_v49 = vpop.eup %2076  ;;  %1024 = vst.msk [vmem:[#allocation2 + $0x1c] sm:$0xf] %vm1016_vm1, %v1824_v1  ;;  %v865_v0 = vadd.f32 %v2667_v56, %v826_v41  ;;  %v789_v18 = vmul.f32 %v2075_v45, %v2508_v22  ;;  %v733_v61 = vadd.f32 1e-05, %v701_v44 }
 0x156   : > { %1025 = vst.msk [vmem:[#allocation2 + $0x20] sm:$0xf] %vm1016_vm1, %v1825_v16  ;;  %v866_v5 = vadd.f32 %v2667_v56, %v827_v54  ;;  %v790_v31 = vmul.f32 %v2077_v49, %v2518_v23  ;;  %v734_v46 = vadd.f32 1e-05, %v702_v17  ;;  %v651_v50 = vpop.xlane.xlu1 %650  ;;  %v654_v4 = vpop.xlane.xlu0 %653 }
 0x157   : > { %v1826_v59 = vpack.c.bf16 %v865_v0, %v865_v0  ;;  %v828_v60 = vmul.f32 %v2661_v3, %v789_v18  ;;  %2090 = vrsqrt.f32 %v733_v61  ;;  %v703_v6 = vmul.f32 0.015625, %v651_v50 }
 0x158   : > { %v2079_v7 = vpop.eup %2078  ;;  %v1827_v9 = vpack.c.bf16 %v866_v5, %v866_v5  ;;  %v829_v21 = vmul.f32 %v2661_v3, %v790_v31  ;;  %2092 = vrsqrt.f32 %v734_v46  ;;  %v704_v22 = vmul.f32 0.015625, %v654_v4 }
 0x159   : > { %v2081_v29 = vpop.eup %2080  ;;  %1026 = vst.msk [vmem:[#allocation2 + $0x24] sm:$0xf] %vm1016_vm1, %v1826_v59  ;;  %v867_v8 = vadd.f32 %v2667_v56, %v828_v60  ;;  %v791_v23 = vmul.f32 %v2079_v7, %v2522_v27  ;;  %v735_v55 = vadd.f32 1e-05, %v703_v6 }
 0x15a   : > { %1027 = vst.msk [vmem:[#allocation2 + $0x28] sm:$0xf] %vm1016_vm1, %v1827_v9  ;;  %v868_v15 = vadd.f32 %v2667_v56, %v829_v21  ;;  %v792_v51 = vmul.f32 %v2081_v29, %v2532_v28  ;;  %v736_v36 = vadd.f32 1e-05, %v704_v22  ;;  %v657_v11 = vpop.xlane.xlu1 %656  ;;  %v660_v19 = vpop.xlane.xlu0 %659 }
 0x15b   : > { %v1828_v20 = vpack.c.bf16 %v867_v8, %v867_v8  ;;  %v830_v12 = vmul.f32 %v2661_v3, %v791_v23  ;;  %2094 = vrsqrt.f32 %v735_v55  ;;  %v705_v30 = vmul.f32 0.015625, %v657_v11 }
 0x15c   : > { %v2083_v39 = vpop.eup %2082  ;;  %v1829_v13 = vpack.c.bf16 %v868_v15, %v868_v15  ;;  %v831_v26 = vmul.f32 %v2661_v3, %v792_v51  ;;  %2096 = vrsqrt.f32 %v736_v36  ;;  %v706_v27 = vmul.f32 0.015625, %v660_v19 }
 0x15d   : > { %v2085_v25 = vpop.eup %2084  ;;  %1028 = vst.msk [vmem:[#allocation2 + $0x2c] sm:$0xf] %vm1016_vm1, %v1828_v20  ;;  %v869_v34 = vadd.f32 %v2667_v56, %v830_v12  ;;  %v793_v28 = vmul.f32 %v2083_v39, %v2536_v32  ;;  %v737_v35 = vadd.f32 1e-05, %v705_v30 }
 0x15e   : > { %1029 = vst.msk [vmem:[#allocation2 + $0x30] sm:$0xf] %vm1016_vm1, %v1829_v13  ;;  %v870_v2 = vadd.f32 %v2667_v56, %v831_v26  ;;  %v794_v40 = vmul.f32 %v2085_v25, %v2546_v33  ;;  %v738_v1 = vadd.f32 1e-05, %v706_v27  ;;  %v663_v41 = vpop.xlane.xlu1 %662  ;;  %v666_v44 = vpop.xlane.xlu0 %665 }
 0x15f   : > { %v1830_v45 = vpack.c.bf16 %v869_v34, %v869_v34  ;;  %v832_v16 = vmul.f32 %v2661_v3, %v793_v28  ;;  %2098 = vrsqrt.f32 %v737_v35  ;;  %v707_v54 = vmul.f32 0.015625, %v663_v41 }
 0x160   : > { %v2087_v17 = vpop.eup %2086  ;;  %v1831_v49 = vpack.c.bf16 %v870_v2, %v870_v2  ;;  %v833_v0 = vmul.f32 %v2661_v3, %v794_v40  ;;  %2100 = vrsqrt.f32 %v738_v1  ;;  %v708_v32 = vmul.f32 0.015625, %v666_v44 }
 0x161   : > { %v2089_v18 = vpop.eup %2088  ;;  %1030 = vst.msk [vmem:[#allocation2 + $0x34] sm:$0xf] %vm1016_vm1, %v1830_v45  ;;  %v871_v61 = vadd.f32 %v2667_v56, %v832_v16  ;;  %v795_v33 = vmul.f32 %v2087_v17, %v2550_v37  ;;  %v739_v5 = vadd.f32 1e-05, %v707_v54 }
 0x162   : > { %1031 = vst.msk [vmem:[#allocation2 + $0x38] sm:$0xf] %vm1016_vm1, %v1831_v49  ;;  %v872_v31 = vadd.f32 %v2667_v56, %v833_v0  ;;  %v796_v46 = vmul.f32 %v2089_v18, %v2560_v38  ;;  %v740_v50 = vadd.f32 1e-05, %v708_v32  ;;  %v669_v4 = vpop.xlane.xlu1 %668  ;;  %v672_v59 = vpop.xlane.xlu0 %671 }
 0x163   : > { %v1832_v60 = vpack.c.bf16 %v871_v61, %v871_v61  ;;  %v834_v6 = vmul.f32 %v2661_v3, %v795_v33  ;;  %2102 = vrsqrt.f32 %v739_v5  ;;  %v709_v7 = vmul.f32 0.015625, %v669_v4 }
 0x164   : > { %v2091_v9 = vpop.eup %2090  ;;  %v1833_v21 = vpack.c.bf16 %v872_v31, %v872_v31  ;;  %v835_v22 = vmul.f32 %v2661_v3, %v796_v46  ;;  %2104 = vrsqrt.f32 %v740_v50  ;;  %v710_v37 = vmul.f32 0.015625, %v672_v59 }
 0x165   : > { %v2093_v29 = vpop.eup %2092  ;;  %1032 = vst.msk [vmem:[#allocation2 + $0x3c] sm:$0xf] %vm1016_vm1, %v1832_v60  ;;  %v873_v8 = vadd.f32 %v2667_v56, %v834_v6  ;;  %v797_v38 = vmul.f32 %v2091_v9, %v2564_v42  ;;  %v741_v23 = vadd.f32 1e-05, %v709_v7 }
 0x166   : > { %1033 = vst.msk [vmem:[#allocation2 + $0x40] sm:$0xf] %vm1016_vm1, %v1833_v21  ;;  %v874_v55 = vadd.f32 %v2667_v56, %v835_v22  ;;  %v798_v15 = vmul.f32 %v2093_v29, %v2574_v43  ;;  %v742_v51 = vadd.f32 1e-05, %v710_v37  ;;  %v675_v36 = vpop.xlane.xlu1 %674  ;;  %v678_v11 = vpop.xlane.xlu0 %677 }
 0x167   : > { %v1834_v19 = vpack.c.bf16 %v873_v8, %v873_v8  ;;  %v836_v20 = vmul.f32 %v2661_v3, %v797_v38  ;;  %2106 = vrsqrt.f32 %v741_v23  ;;  %v711_v12 = vmul.f32 0.015625, %v675_v36 }
 0x168   : > { %v2095_v30 = vpop.eup %2094  ;;  %v1835_v39 = vpack.c.bf16 %v874_v55, %v874_v55  ;;  %v837_v13 = vmul.f32 %v2661_v3, %v798_v15  ;;  %2108 = vrsqrt.f32 %v742_v51  ;;  %v712_v42 = vmul.f32 0.015625, %v678_v11 }
 0x169   : > { %v2097_v26 = vpop.eup %2096  ;;  %1034 = vst.msk [vmem:[#allocation2 + $0x44] sm:$0xf] %vm1016_vm1, %v1834_v19  ;;  %v875_v27 = vadd.f32 %v2667_v56, %v836_v20  ;;  %v799_v43 = vmul.f32 %v2095_v30, %v2578_v47  ;;  %v743_v25 = vadd.f32 1e-05, %v711_v12 }
 0x16a   : > { %1035 = vst.msk [vmem:[#allocation2 + $0x48] sm:$0xf] %vm1016_vm1, %v1835_v39  ;;  %v876_v34 = vadd.f32 %v2667_v56, %v837_v13  ;;  %v800_v28 = vmul.f32 %v2097_v26, %v2588_v48  ;;  %v744_v35 = vadd.f32 1e-05, %v712_v42  ;;  %v681_v2 = vpop.xlane.xlu1 %680 }
 0x16b   : > { %v1836_v40 = vpack.c.bf16 %v875_v27, %v875_v27  ;;  %v838_v1 = vmul.f32 %v2661_v3, %v799_v43  ;;  %2110 = vrsqrt.f32 %v743_v25  ;;  %v713_v41 = vmul.f32 0.015625, %v681_v2 }
 0x16c   : > { %v2099_v44 = vpop.eup %2098  ;;  %v1837_v45 = vpack.c.bf16 %v876_v34, %v876_v34  ;;  %v839_v16 = vmul.f32 %v2661_v3, %v800_v28  ;;  %2112 = vrsqrt.f32 %v744_v35 }
 0x16d   : > { %v2101_v47 = vpop.eup %2100  ;;  %1036 = vst.msk [vmem:[#allocation2 + $0x4c] sm:$0xf] %vm1016_vm1, %v1836_v40  ;;  %v877_v54 = vadd.f32 %v2667_v56, %v838_v1  ;;  %v801_v17 = vmul.f32 %v2099_v44, %v2592_v52  ;;  %v745_v48 = vadd.f32 1e-05, %v713_v41 }
 0x16e   : > { %1037 = vst.msk [vmem:[#allocation2 + $0x50] sm:$0xf] %vm1016_vm1, %v1837_v45  ;;  %v878_v49 = vadd.f32 %v2667_v56, %v839_v16  ;;  %v802_v0 = vmul.f32 %v2101_v47, %v2602_v53 }
 0x16f   : > { %v1838_v32 = vpack.c.bf16 %v877_v54, %v877_v54  ;;  %v840_v18 = vmul.f32 %v2661_v3, %v801_v17  ;;  %2114 = vrsqrt.f32 %v745_v48 }
 0x170   : > { %v2103_v61 = vpop.eup %2102  ;;  %v1839_v33 = vpack.c.bf16 %v878_v49, %v878_v49  ;;  %v841_v5 = vmul.f32 %v2661_v3, %v802_v0 }
 0x171   : > { %v2105_v31 = vpop.eup %2104  ;;  %1038 = vst.msk [vmem:[#allocation2 + $0x54] sm:$0xf] %vm1016_vm1, %v1838_v32  ;;  %v879_v52 = vadd.f32 %v2667_v56, %v840_v18  ;;  %v803_v46 = vmul.f32 %v2103_v61, %v2606_v57 }
 0x172   : > { %1039 = vst.msk [vmem:[#allocation2 + $0x58] sm:$0xf] %vm1016_vm1, %v1839_v33  ;;  %v880_v50 = vadd.f32 %v2667_v56, %v841_v5  ;;  %v804_v53 = vmul.f32 %v2105_v31, %v2616_v58 }
 0x173   : > { %v1840_v4 = vpack.c.bf16 %v879_v52, %v879_v52  ;;  %v842_v59 = vmul.f32 %v2661_v3, %v803_v46 }
 0x174   : > { %v2107_v60 = vpop.eup %2106  ;;  %v1841_v6 = vpack.c.bf16 %v880_v50, %v880_v50  ;;  %v843_v7 = vmul.f32 %v2661_v3, %v804_v53 }
 0x175   : > { %v2109_v9 = vpop.eup %2108  ;;  %1040 = vst.msk [vmem:[#allocation2 + $0x5c] sm:$0xf] %vm1016_vm1, %v1840_v4  ;;  %v881_v21 = vadd.f32 %v2667_v56, %v842_v59  ;;  %v805_v57 = vmul.f32 %v2107_v60, %v2620_v62 }
 0x176   : > { %1041 = vst.msk [vmem:[#allocation2 + $0x60] sm:$0xf] %vm1016_vm1, %v1841_v6  ;;  %v882_v22 = vadd.f32 %v2667_v56, %v843_v7  ;;  %v806_v58 = vmul.f32 %v2109_v9, %v2630_v63 }
 0x177   : > { %v1842_v37 = vpack.c.bf16 %v881_v21, %v881_v21  ;;  %v844_v29 = vmul.f32 %v2661_v3, %v805_v57 }
 0x178   : > { %v2111_v8 = vpop.eup %2110  ;;  %v1843_v38 = vpack.c.bf16 %v882_v22, %v882_v22  ;;  %v845_v23 = vmul.f32 %v2661_v3, %v806_v58 }
 0x179   : > { %v2113_v55 = vpop.eup %2112  ;;  %1042 = vst.msk [vmem:[#allocation2 + $0x64] sm:$0xf] %vm1016_vm1, %v1842_v37  ;;  %v883_v15 = vadd.f32 %v2667_v56, %v844_v29  ;;  %v807_v62 = vmul.f32 %v2111_v8, %v2634_v10 }
 0x17a   : > { %1043 = vst.msk [vmem:[#allocation2 + $0x68] sm:$0xf] %vm1016_vm1, %v1843_v38  ;;  %v884_v51 = vadd.f32 %v2667_v56, %v845_v23  ;;  %v808_v63 = vmul.f32 %v2113_v55, %v2644_v14 }
 0x17b   : > { %v1844_v36 = vpack.c.bf16 %v883_v15, %v883_v15  ;;  %v846_v11 = vmul.f32 %v2661_v3, %v807_v62 }
 0x17c   : > { %v2115_v19 = vpop.eup %2114  ;;  %v1845_v20 = vpack.c.bf16 %v884_v51, %v884_v51  ;;  %v847_v12 = vmul.f32 %v2661_v3, %v808_v63 }
 0x17d   : > { %1044 = vst.msk [vmem:[#allocation2 + $0x6c] sm:$0xf] %vm1016_vm1, %v1844_v36  ;;  %v885_v30 = vadd.f32 %v2667_v56, %v846_v11  ;;  %v809_v39 = vmul.f32 %v2115_v19, %v2648_v24 }
 0x17e   : > { %1045 = vst.msk [vmem:[#allocation2 + $0x70] sm:$0xf] %vm1016_vm1, %v1845_v20  ;;  %v886_v10 = vadd.f32 %v2667_v56, %v847_v12 }
 0x17f   : > { %v1846_v13 = vpack.c.bf16 %v885_v30, %v885_v30  ;;  %v848_v14 = vmul.f32 %v2661_v3, %v809_v39 }
 0x180   : > { %v1847_v42 = vpack.c.bf16 %v886_v10, %v886_v10 }
 0x181   : > { %1046 = vst.msk [vmem:[#allocation2 + $0x74] sm:$0xf] %vm1016_vm1, %v1846_v13  ;;  %v887_v26 = vadd.f32 %v2667_v56, %v848_v14 }
 0x182   : > { %1047 = vst.msk [vmem:[#allocation2 + $0x78] sm:$0xf] %vm1016_vm1, %v1847_v42 }
 0x183   : > { %v1848_v27 = vpack.c.bf16 %v887_v26, %v887_v26 }
 0x185   : > { %1048 = vst.msk [vmem:[#allocation2 + $0x7c] sm:$0xf] %vm1016_vm1, %v1848_v27 }
 0x186 PF: > { %v2116_v24 = vld [vmem:[%s2218_s28 + $0x18] sm:$0xff]   ;;  %v2117_v43 = vld [vmem:[%s2218_s28 + $0x10] sm:$0xff]   ;;  %v2118_v3 = vld [vmem:[%s2218_s28 + $0x8] sm:$0xff]   ;;  %vm1200_vm2 = vcmask 523264   ;;  %vm1538_vm3 = vcmask 519168  }
 0x187   : > { %1980 = vmatprep.subr.bf16.mxu0 %v2116_v24  ;;  %2020 = vmatprep.subr.bf16.mxu1 %v2116_v24  ;;  %v2120_v56 = vld [vmem:[#allocation2] sm:$0xff]   ;;  %v2122_v28 = vld [vmem:[#allocation2 + $0x8] sm:$0xff]   ;;  %v2124_v2 = vld [vmem:[#allocation2 + $0x10] sm:$0xff]  }
 0x188   : > { %1981 = vmatpush3.bf16.msra.mxu0 %v2116_v24  ;;  %2024 = vmatpush3.bf16.msra.mxu1 %v2116_v24  ;;  %v2121_v25 = vld [vmem:[#allocation2 + $0x40] sm:$0xff]   ;;  %v2123_v35 = vld [vmem:[#allocation2 + $0x48] sm:$0xff]   ;;  %v2125_v40 = vld [vmem:[#allocation2 + $0x50] sm:$0xff]  }
 0x189   : > { %1982 = vmatprep.subr.bf16.mxu0 %v2117_v43  ;;  %2021 = vmatprep.subr.bf16.mxu1 %v2117_v43  ;;  %v2119_v34 = vld [vmem:[%s2218_s28] sm:$0xff]   ;;  %v2126_v1 = vld [vmem:[#allocation2 + $0x18] sm:$0xff]   ;;  %v2130_v16 = vld [vmem:[#allocation2 + $0x28] sm:$0xff]  }
 0x18a   : > { %1988 = vmatprep.mubr.msk.bf16.mxu0 %vm1200_vm2, %v2120_v56  ;;  %2004 = vmatprep.mubr.msk.bf16.mxu1 %vm1200_vm2, %v2121_v25  ;;  %v2127_v41 = vld [vmem:[#allocation2 + $0x58] sm:$0xff]   ;;  %v2128_v44 = vld [vmem:[#allocation2 + $0x20] sm:$0xff]   ;;  %v2131_v47 = vld [vmem:[#allocation2 + $0x68] sm:$0xff]  }
 0x18b   : > { %v2129_v45 = vld [vmem:[#allocation2 + $0x60] sm:$0xff]   ;;  %v2132_v54 = vld [vmem:[#allocation2 + $0x30] sm:$0xff]   ;;  %v2134_v48 = vld [vmem:[#allocation2 + $0x38] sm:$0xff]  }
 0x18c   : > { %1983 = vmatpush3.bf16.msra.mxu0 %v2117_v43  ;;  %2025 = vmatpush3.bf16.msra.mxu1 %v2117_v43  ;;  %v2133_v17 = vld [vmem:[#allocation2 + $0x70] sm:$0xff]   ;;  %v2135_v49 = vld [vmem:[#allocation2 + $0x78] sm:$0xff]   ;;  %v2821_v0 = vld [vmem:[%s307_s25] ss:$0 sm:$0xff] }
 0x18d   : > { %1984 = vmatprep.subr.bf16.mxu0 %v2118_v3  ;;  %2022 = vmatprep.subr.bf16.mxu1 %v2118_v3 }
 0x190   : > { %1985 = vmatpush3.bf16.msra.mxu0 %v2118_v3  ;;  %2026 = vmatpush3.bf16.msra.mxu1 %v2118_v3 }
 0x191   : > { %1986 = vmatprep.subr.bf16.mxu0 %v2119_v34  ;;  %2023 = vmatprep.subr.bf16.mxu1 %v2119_v34 }
 0x194   : > { %1987 = vmatpush3.bf16.msra.mxu0 %v2119_v34  ;;  %2027 = vmatpush3.bf16.msra.mxu1 %v2119_v34 }
 0x197   : > { %1989 = vmatmul.mubr.msk.bf16.vlgmr.msra.gmra.mxu0 %vm1200_vm2, %v2122_v28  ;;  %2005 = vmatmul.mubr.msk.bf16.vlgmr.msra.gmra.mxu1 %vm1200_vm2, %v2123_v35 }
 0x198   : > { %1992 = vmatprep.mubr.msk.bf16.mxu0 %vm1200_vm2, %v2124_v2  ;;  %2008 = vmatprep.mubr.msk.bf16.mxu1 %vm1200_vm2, %v2125_v40 }
 0x19f   : > { %1993 = vmatmul.mubr.msk.bf16.gmra.mxu0 %vm1200_vm2, %v2126_v1  ;;  %2009 = vmatmul.mubr.msk.bf16.gmra.mxu1 %vm1200_vm2, %v2127_v41 }
 0x1a0   : > { %1996 = vmatprep.mubr.msk.bf16.mxu0 %vm1200_vm2, %v2128_v44  ;;  %2012 = vmatprep.mubr.msk.bf16.mxu1 %vm1200_vm2, %v2129_v45 }
 0x1a7   : > { %1997 = vmatmul.mubr.msk.bf16.gmra.mxu0 %vm1200_vm2, %v2130_v16  ;;  %2013 = vmatmul.mubr.msk.bf16.gmra.mxu1 %vm1200_vm2, %v2131_v47 }
 0x1a8   : > { %2000 = vmatprep.mubr.msk.bf16.mxu0 %vm1200_vm2, %v2132_v54  ;;  %2016 = vmatprep.mubr.msk.bf16.mxu1 %vm1200_vm2, %v2133_v17 }
 0x1af   : > { %2001 = vmatmul.mubr.msk.bf16.gmra.mxu0 %vm1200_vm2, %v2134_v48  ;;  %2017 = vmatmul.mubr.msk.bf16.gmra.mxu1 %vm1200_vm2, %v2135_v49 }
 0x257   : > { %v1990_v32 = vpop.f32.mrf.mxu0  ;;  %v2006_v18 = vpop.f32.mrf.mxu1 }
 0x258   : > { %v1292_v61 = vadd.f32 %v1990_v32, %v2821_v0  ;;  %v1356_v33 = vadd.f32 %v2006_v18, %v2821_v0 }
 0x259   : > { %v1283_v5 = vpop.f32.mrf.mxu0  ;;  %v1347_v31 = vpop.f32.mrf.mxu1 }
 0x25a   : > { %v1851_v52 = vpack.c.bf16 %v1292_v61, %v1292_v61  ;;  %v1867_v46 = vpack.c.bf16 %v1356_v33, %v1356_v33  ;;  %v1284_v50 = vadd.f32 %v2821_v0, %v1283_v5  ;;  %v1348_v53 = vadd.f32 %v2821_v0, %v1347_v31 }
 0x25b   : > { %v1991_v4 = vpop.f32.mrf.mxu0  ;;  %v2007_v59 = vpop.f32.mrf.mxu1 }
 0x25c   : > { %1541 = vst.msk [vmem:[%s2224_s7 + $0x8] sm:$0xf] %vm1538_vm3, %v1851_v52  ;;  %1557 = vst.msk [vmem:[%s2224_s7 + $0x48] sm:$0xf] %vm1538_vm3, %v1867_v46  ;;  %v1849_v60 = vpack.c.bf16 %v1284_v50, %v1284_v50  ;;  %v1865_v6 = vpack.c.bf16 %v1348_v53, %v1348_v53  ;;  %v1295_v7 = vadd.f32 %v1991_v4, %v2821_v0 }
 0x25d   : > { %v1359_v9 = vadd.f32 %v2007_v59, %v2821_v0  ;;  %v1286_v21 = vpop.f32.mrf.mxu0  ;;  %v1350_v57 = vpop.f32.mrf.mxu1 }
 0x25e   : > { %1539 = vst.msk [vmem:[%s2224_s7] sm:$0xf] %vm1538_vm3, %v1849_v60  ;;  %1555 = vst.msk [vmem:[%s2224_s7 + $0x40] sm:$0xf] %vm1538_vm3, %v1865_v6  ;;  %v1852_v22 = vpack.c.bf16 %v1295_v7, %v1295_v7  ;;  %v1287_v37 = vadd.f32 %v2821_v0, %v1286_v21  ;;  %v1351_v29 = vadd.f32 %v2821_v0, %v1350_v57 }
 0x25f   : > { %v1868_v58 = vpack.c.bf16 %v1359_v9, %v1359_v9  ;;  %v1994_v8 = vpop.f32.mrf.mxu0  ;;  %v2010_v38 = vpop.f32.mrf.mxu1 }
 0x260   : > { %1542 = vst.msk [vmem:[%s2224_s7 + $0xc] sm:$0xf] %vm1538_vm3, %v1852_v22  ;;  %v1850_v23 = vpack.c.bf16 %v1287_v37, %v1287_v37  ;;  %v1866_v55 = vpack.c.bf16 %v1351_v29, %v1351_v29  ;;  %v1308_v15 = vadd.f32 %v1994_v8, %v2821_v0  ;;  %v1372_v62 = vadd.f32 %v2010_v38, %v2821_v0 }
 0x261   : > { %1558 = vst.msk [vmem:[%s2224_s7 + $0x4c] sm:$0xf] %vm1538_vm3, %v1868_v58  ;;  %v1299_v51 = vpop.f32.mrf.mxu0  ;;  %v1363_v63 = vpop.f32.mrf.mxu1 }
 0x262   : > { %1540 = vst.msk [vmem:[%s2224_s7 + $0x4] sm:$0xf] %vm1538_vm3, %v1850_v23  ;;  %1556 = vst.msk [vmem:[%s2224_s7 + $0x44] sm:$0xf] %vm1538_vm3, %v1866_v55  ;;  %v1855_v36 = vpack.c.bf16 %v1308_v15, %v1308_v15  ;;  %v1871_v11 = vpack.c.bf16 %v1372_v62, %v1372_v62  ;;  %v1300_v19 = vadd.f32 %v2821_v0, %v1299_v51 }
 0x263   : > { %v1364_v20 = vadd.f32 %v2821_v0, %v1363_v63  ;;  %v1995_v12 = vpop.f32.mrf.mxu0  ;;  %v2011_v30 = vpop.f32.mrf.mxu1 }
 0x264   : > { %1545 = vst.msk [vmem:[%s2224_s7 + $0x18] sm:$0xf] %vm1538_vm3, %v1855_v36  ;;  %1561 = vst.msk [vmem:[%s2224_s7 + $0x58] sm:$0xf] %vm1538_vm3, %v1871_v11  ;;  %v1853_v39 = vpack.c.bf16 %v1300_v19, %v1300_v19  ;;  %v1311_v13 = vadd.f32 %v1995_v12, %v2821_v0  ;;  %v1375_v14 = vadd.f32 %v2011_v30, %v2821_v0 }
 0x265   : > { %v1869_v10 = vpack.c.bf16 %v1364_v20, %v1364_v20  ;;  %v1302_v42 = vpop.f32.mrf.mxu0  ;;  %v1366_v26 = vpop.f32.mrf.mxu1 }
 0x266   : > { %1543 = vst.msk [vmem:[%s2224_s7 + $0x10] sm:$0xf] %vm1538_vm3, %v1853_v39  ;;  %v1856_v27 = vpack.c.bf16 %v1311_v13, %v1311_v13  ;;  %v1872_v24 = vpack.c.bf16 %v1375_v14, %v1375_v14  ;;  %v1303_v43 = vadd.f32 %v2821_v0, %v1302_v42  ;;  %v1367_v3 = vadd.f32 %v2821_v0, %v1366_v26 }
 0x267   : > { %1559 = vst.msk [vmem:[%s2224_s7 + $0x50] sm:$0xf] %vm1538_vm3, %v1869_v10  ;;  %v1998_v56 = vpop.f32.mrf.mxu0  ;;  %v2014_v25 = vpop.f32.mrf.mxu1 }
 0x268   : > { %1546 = vst.msk [vmem:[%s2224_s7 + $0x1c] sm:$0xf] %vm1538_vm3, %v1856_v27  ;;  %1562 = vst.msk [vmem:[%s2224_s7 + $0x5c] sm:$0xf] %vm1538_vm3, %v1872_v24  ;;  %v1854_v34 = vpack.c.bf16 %v1303_v43, %v1303_v43  ;;  %v1870_v28 = vpack.c.bf16 %v1367_v3, %v1367_v3  ;;  %v1324_v35 = vadd.f32 %v1998_v56, %v2821_v0 }
 0x269   : > { %v1388_v2 = vadd.f32 %v2014_v25, %v2821_v0  ;;  %v1315_v40 = vpop.f32.mrf.mxu0  ;;  %v1379_v1 = vpop.f32.mrf.mxu1 }
 0x26a   : > { %1544 = vst.msk [vmem:[%s2224_s7 + $0x14] sm:$0xf] %vm1538_vm3, %v1854_v34  ;;  %1560 = vst.msk [vmem:[%s2224_s7 + $0x54] sm:$0xf] %vm1538_vm3, %v1870_v28  ;;  %v1859_v41 = vpack.c.bf16 %v1324_v35, %v1324_v35  ;;  %v1316_v45 = vadd.f32 %v2821_v0, %v1315_v40  ;;  %v1380_v16 = vadd.f32 %v2821_v0, %v1379_v1 }
 0x26b   : > { %v1875_v44 = vpack.c.bf16 %v1388_v2, %v1388_v2  ;;  %v1999_v47 = vpop.f32.mrf.mxu0  ;;  %v2015_v54 = vpop.f32.mrf.mxu1 }
 0x26c   : > { %1549 = vst.msk [vmem:[%s2224_s7 + $0x28] sm:$0xf] %vm1538_vm3, %v1859_v41  ;;  %v1857_v17 = vpack.c.bf16 %v1316_v45, %v1316_v45  ;;  %v1873_v48 = vpack.c.bf16 %v1380_v16, %v1380_v16  ;;  %v1327_v49 = vadd.f32 %v1999_v47, %v2821_v0  ;;  %v1391_v32 = vadd.f32 %v2015_v54, %v2821_v0 }
 0x26d   : > { %1565 = vst.msk [vmem:[%s2224_s7 + $0x68] sm:$0xf] %vm1538_vm3, %v1875_v44  ;;  %v1318_v18 = vpop.f32.mrf.mxu0  ;;  %v1382_v61 = vpop.f32.mrf.mxu1 }
 0x26e   : > { %1547 = vst.msk [vmem:[%s2224_s7 + $0x20] sm:$0xf] %vm1538_vm3, %v1857_v17  ;;  %1563 = vst.msk [vmem:[%s2224_s7 + $0x60] sm:$0xf] %vm1538_vm3, %v1873_v48  ;;  %v1860_v33 = vpack.c.bf16 %v1327_v49, %v1327_v49  ;;  %v1876_v5 = vpack.c.bf16 %v1391_v32, %v1391_v32  ;;  %v1319_v31 = vadd.f32 %v2821_v0, %v1318_v18 }
 0x26f   : > { %v1383_v52 = vadd.f32 %v2821_v0, %v1382_v61  ;;  %v2002_v46 = vpop.f32.mrf.mxu0  ;;  %v2018_v50 = vpop.f32.mrf.mxu1 }
 0x270   : > { %1550 = vst.msk [vmem:[%s2224_s7 + $0x2c] sm:$0xf] %vm1538_vm3, %v1860_v33  ;;  %1566 = vst.msk [vmem:[%s2224_s7 + $0x6c] sm:$0xf] %vm1538_vm3, %v1876_v5  ;;  %v1858_v53 = vpack.c.bf16 %v1319_v31, %v1319_v31  ;;  %v1340_v59 = vadd.f32 %v2002_v46, %v2821_v0  ;;  %v1404_v60 = vadd.f32 %v2018_v50, %v2821_v0 }
 0x271   : > { %v1874_v4 = vpack.c.bf16 %v1383_v52, %v1383_v52  ;;  %v1331_v6 = vpop.f32.mrf.mxu0  ;;  %v1395_v7 = vpop.f32.mrf.mxu1 }
 0x272   : > { %1548 = vst.msk [vmem:[%s2224_s7 + $0x24] sm:$0xf] %vm1538_vm3, %v1858_v53  ;;  %v1863_v9 = vpack.c.bf16 %v1340_v59, %v1340_v59  ;;  %v1879_v21 = vpack.c.bf16 %v1404_v60, %v1404_v60  ;;  %v1332_v57 = vadd.f32 %v2821_v0, %v1331_v6  ;;  %v1396_v22 = vadd.f32 %v2821_v0, %v1395_v7 }
 0x273   : > { %1564 = vst.msk [vmem:[%s2224_s7 + $0x64] sm:$0xf] %vm1538_vm3, %v1874_v4  ;;  %v2003_v58 = vpop.f32.mrf.mxu0  ;;  %v2019_v37 = vpop.f32.mrf.mxu1 }
 0x274   : > { %1553 = vst.msk [vmem:[%s2224_s7 + $0x38] sm:$0xf] %vm1538_vm3, %v1863_v9  ;;  %1569 = vst.msk [vmem:[%s2224_s7 + $0x78] sm:$0xf] %vm1538_vm3, %v1879_v21  ;;  %v1861_v29 = vpack.c.bf16 %v1332_v57, %v1332_v57  ;;  %v1877_v8 = vpack.c.bf16 %v1396_v22, %v1396_v22  ;;  %v1343_v38 = vadd.f32 %v2003_v58, %v2821_v0 }
 0x275   : > { %v1407_v23 = vadd.f32 %v2019_v37, %v2821_v0  ;;  %v1334_v55 = vpop.f32.mrf.mxu0  ;;  %v1398_v15 = vpop.f32.mrf.mxu1 }
 0x276   : > { %1551 = vst.msk [vmem:[%s2224_s7 + $0x30] sm:$0xf] %vm1538_vm3, %v1861_v29  ;;  %1567 = vst.msk [vmem:[%s2224_s7 + $0x70] sm:$0xf] %vm1538_vm3, %v1877_v8  ;;  %v1864_v62 = vpack.c.bf16 %v1343_v38, %v1343_v38  ;;  %v1335_v63 = vadd.f32 %v2821_v0, %v1334_v55  ;;  %v1399_v36 = vadd.f32 %v2821_v0, %v1398_v15 }
 0x277   : > { %v1880_v51 = vpack.c.bf16 %v1407_v23, %v1407_v23 }
 0x278   : > { %1554 = vst.msk [vmem:[%s2224_s7 + $0x3c] sm:$0xf] %vm1538_vm3, %v1864_v62  ;;  %v1862_v11 = vpack.c.bf16 %v1335_v63, %v1335_v63  ;;  %v1878_v19 = vpack.c.bf16 %v1399_v36, %v1399_v36 }
 0x279   : > { %1570 = vst.msk [vmem:[%s2224_s7 + $0x7c] sm:$0xf] %vm1538_vm3, %v1880_v51 }
 0x27a   : > { %1552 = vst.msk [vmem:[%s2224_s7 + $0x34] sm:$0xf] %vm1538_vm3, %v1862_v11  ;;  %1568 = vst.msk [vmem:[%s2224_s7 + $0x74] sm:$0xf] %vm1538_vm3, %v1878_v19 }
 0x27b PF: > { %s15_s20 = sadd.s32 1, %s2158_s20   ;;  %s2934_s18 = smov %s2154_s19 }
 0x27c   : > { %p12_p6 = scmp.ge.s32.totalorder %s15_s20, 5   ;;  %s2935_s19 = smov %s2937_s21 }
 0x27e   :  { %14 = sbr.rel (!%p12_p6) target bundleno = 2 (0x2), region = 80 }

// kernel: _lambda_.29
= control target key start
LH: loop header
LB: loop body
LE: loop exit
PB: predicated region body
PF: predicated region fallthrough
CT: control target
= control target key end

     0   :  { %vm22_vm0 = vcmask 523264   ;;  %v1109_v1 = vmov 0.0   ;;  %vm803_vm1 = vcmask 519168   ;;  %s1604_s1 = inlined_call_operand.vmem [shape: bf16[64,64], index: 1, kind: input, shape index: {}]   ;;  %s1605_s0 = inlined_call_operand.vmem [shape: bf16[256,64], index: 0, kind: input, shape index: {}]   ;;  %s1606_s3 = inlined_call_operand.vmem [shape: bf16[256,64], index: 3, kind: input, shape index: {}]   ;;  %s1607_s2 = inlined_call_operand.vmem [shape: f32[1,64], index: 2, kind: input, shape index: {}]   ;;  %s1608_s4 = inlined_call_operand.vmem [shape: bf16[256,64], index: 4, kind: output, shape index: {}]  }
   0x1   :  { %v1089_v0 = vld [vmem:[%s1604_s1 + $0x18] sm:$0xff]   ;;  %25 = vst.msk [vmem:[#allocation2 + $0x10] sm:$0xff] %vm22_vm0, %v1109_v1  ;;  %23 = vst.msk [vmem:[#allocation2] sm:$0xff] %vm22_vm0, %v1109_v1  ;;  %v1090_v2 = vld [vmem:[%s1604_s1 + $0x10] sm:$0xff]  }
   0x2   :  { %24 = vst.msk [vmem:[#allocation2 + $0x8] sm:$0xff] %vm22_vm0, %v1109_v1  ;;  %26 = vst.msk [vmem:[#allocation2 + $0x18] sm:$0xff] %vm22_vm0, %v1109_v1  ;;  %1040 = vmatprep.subr.bf16.mxu0 %v1089_v0  ;;  %1080 = vmatprep.subr.bf16.mxu1 %v1089_v0  ;;  %v1091_v3 = vld [vmem:[%s1604_s1 + $0x8] sm:$0xff]   ;;  %v1093_v4 = vld [vmem:[%s1605_s0] sm:$0xff]  }
   0x3   :  { %27 = vst.msk [vmem:[#allocation2 + $0x20] sm:$0xff] %vm22_vm0, %v1109_v1  ;;  %28 = vst.msk [vmem:[#allocation2 + $0x28] sm:$0xff] %vm22_vm0, %v1109_v1  ;;  %1041 = vmatpush3.bf16.msra.mxu0 %v1089_v0  ;;  %1084 = vmatpush3.bf16.msra.mxu1 %v1089_v0  ;;  %v1094_v5 = vld [vmem:[%s1605_s0 + $0x40] sm:$0xff]   ;;  %v1095_v7 = vld [vmem:[%s1605_s0 + $0x8] sm:$0xff]  }
   0x4   :  { %29 = vst.msk [vmem:[#allocation2 + $0x30] sm:$0xff] %vm22_vm0, %v1109_v1  ;;  %30 = vst.msk [vmem:[#allocation2 + $0x38] sm:$0xff] %vm22_vm0, %v1109_v1  ;;  %1042 = vmatprep.subr.bf16.mxu0 %v1090_v2  ;;  %1081 = vmatprep.subr.bf16.mxu1 %v1090_v2  ;;  %v1092_v6 = vld [vmem:[%s1604_s1] sm:$0xff]   ;;  %v1096_v8 = vld [vmem:[%s1605_s0 + $0x48] sm:$0xff]  }
   0x5   :  { %31 = vst.msk [vmem:[#allocation2 + $0x40] sm:$0xff] %vm22_vm0, %v1109_v1  ;;  %32 = vst.msk [vmem:[#allocation2 + $0x48] sm:$0xff] %vm22_vm0, %v1109_v1  ;;  %1048 = vmatprep.mubr.msk.bf16.mxu0 %vm22_vm0, %v1093_v4  ;;  %1064 = vmatprep.mubr.msk.bf16.mxu1 %vm22_vm0, %v1094_v5  ;;  %v1097_v9 = vld [vmem:[%s1605_s0 + $0x10] sm:$0xff]   ;;  %v1099_v11 = vld [vmem:[%s1605_s0 + $0x18] sm:$0xff]  }
   0x6   :  { %33 = vst.msk [vmem:[#allocation2 + $0x50] sm:$0xff] %vm22_vm0, %v1109_v1  ;;  %34 = vst.msk [vmem:[#allocation2 + $0x58] sm:$0xff] %vm22_vm0, %v1109_v1  ;;  %v1098_v10 = vld [vmem:[%s1605_s0 + $0x50] sm:$0xff]   ;;  %v1100_v12 = vld [vmem:[%s1605_s0 + $0x58] sm:$0xff]  }
   0x7   :  { %35 = vst.msk [vmem:[#allocation2 + $0x60] sm:$0xff] %vm22_vm0, %v1109_v1  ;;  %36 = vst.msk [vmem:[#allocation2 + $0x68] sm:$0xff] %vm22_vm0, %v1109_v1  ;;  %1043 = vmatpush3.bf16.msra.mxu0 %v1090_v2  ;;  %1085 = vmatpush3.bf16.msra.mxu1 %v1090_v2  ;;  %v1101_v13 = vld [vmem:[%s1605_s0 + $0x20] sm:$0xff]   ;;  %v1103_v15 = vld [vmem:[%s1605_s0 + $0x28] sm:$0xff]  }
   0x8   :  { %37 = vst.msk [vmem:[#allocation2 + $0x70] sm:$0xff] %vm22_vm0, %v1109_v1  ;;  %38 = vst.msk [vmem:[#allocation2 + $0x78] sm:$0xff] %vm22_vm0, %v1109_v1  ;;  %1044 = vmatprep.subr.bf16.mxu0 %v1091_v3  ;;  %1082 = vmatprep.subr.bf16.mxu1 %v1091_v3  ;;  %v1102_v14 = vld [vmem:[%s1605_s0 + $0x60] sm:$0xff]   ;;  %v1104_v16 = vld [vmem:[%s1605_s0 + $0x68] sm:$0xff]  }
   0x9   :  { %39 = vst.msk [vmem:[#allocation2 + $0x80] sm:$0xff] %vm22_vm0, %v1109_v1  ;;  %40 = vst.msk [vmem:[#allocation2 + $0x88] sm:$0xff] %vm22_vm0, %v1109_v1  ;;  %v1105_v17 = vld [vmem:[%s1605_s0 + $0x30] sm:$0xff]   ;;  %v1107_v19 = vld [vmem:[%s1605_s0 + $0x38] sm:$0xff]  }
   0xa   :  { %41 = vst.msk [vmem:[#allocation2 + $0x90] sm:$0xff] %vm22_vm0, %v1109_v1  ;;  %42 = vst.msk [vmem:[#allocation2 + $0x98] sm:$0xff] %vm22_vm0, %v1109_v1  ;;  %v1106_v18 = vld [vmem:[%s1605_s0 + $0x70] sm:$0xff]   ;;  %v1108_v20 = vld [vmem:[%s1605_s0 + $0x78] sm:$0xff]  }
   0xb   :  { %43 = vst.msk [vmem:[#allocation2 + $0xa0] sm:$0xff] %vm22_vm0, %v1109_v1  ;;  %44 = vst.msk [vmem:[#allocation2 + $0xa8] sm:$0xff] %vm22_vm0, %v1109_v1  ;;  %1045 = vmatpush3.bf16.msra.mxu0 %v1091_v3  ;;  %1086 = vmatpush3.bf16.msra.mxu1 %v1091_v3  ;;  %v57_v21 = vld [vmem:[#allocation2 + $0x10] sm:$0xff]  ;;  %v55_v25 = vld [vmem:[#allocation2] sm:$0xff] }
   0xc   :  { %45 = vst.msk [vmem:[#allocation2 + $0xb0] sm:$0xff] %vm22_vm0, %v1109_v1  ;;  %46 = vst.msk [vmem:[#allocation2 + $0xb8] sm:$0xff] %vm22_vm0, %v1109_v1  ;;  %1046 = vmatprep.subr.bf16.mxu0 %v1092_v6  ;;  %1083 = vmatprep.subr.bf16.mxu1 %v1092_v6  ;;  %v1246_v28 = vld [vmem:[%s1606_s3 + $0x8] sm:$0xff]   ;;  %v58_v30 = vld [vmem:[#allocation2 + $0x18] sm:$0xff] }
   0xd   :  { %47 = vst.msk [vmem:[#allocation2 + $0xc0] sm:$0xff] %vm22_vm0, %v1109_v1  ;;  %48 = vst.msk [vmem:[#allocation2 + $0xc8] sm:$0xff] %vm22_vm0, %v1109_v1  ;;  %v1251_v31 = vld [vmem:[%s1606_s3 + $0x48] sm:$0xff]   ;;  %v1256_v33 = vld [vmem:[%s1606_s3] sm:$0xff]   ;;  %v947_v39 = vunpack.c.l.bf16 %v1246_v28  ;;  %v948_v53 = vunpack.c.h.bf16 %v1246_v28 }
   0xe   :  { %49 = vst.msk [vmem:[#allocation2 + $0xd0] sm:$0xff] %vm22_vm0, %v1109_v1  ;;  %50 = vst.msk [vmem:[#allocation2 + $0xd8] sm:$0xff] %vm22_vm0, %v1109_v1  ;;  %v1263_v38 = vld [vmem:[%s1606_s3 + $0x40] sm:$0xff]   ;;  %v56_v42 = vld [vmem:[#allocation2 + $0x8] sm:$0xff]  ;;  %v979_v45 = vunpack.c.l.bf16 %v1251_v31  ;;  %v943_v46 = vunpack.c.l.bf16 %v1256_v33  ;;  %v980_v54 = vunpack.c.h.bf16 %v1251_v31  ;;  %v944_v60 = vunpack.c.h.bf16 %v1256_v33 }
   0xf   :  { %51 = vst.msk [vmem:[#allocation2 + $0xe0] sm:$0xff] %vm22_vm0, %v1109_v1  ;;  %52 = vst.msk [vmem:[#allocation2 + $0xe8] sm:$0xff] %vm22_vm0, %v1109_v1  ;;  %1047 = vmatpush3.bf16.msra.mxu0 %v1092_v6  ;;  %1087 = vmatpush3.bf16.msra.mxu1 %v1092_v6  ;;  %v1269_v44 = vld [vmem:[%s1606_s3 + $0x18] sm:$0xff]   ;;  %v1283_v50 = vld [vmem:[%s1606_s3 + $0x10] sm:$0xff]   ;;  %v975_v52 = vunpack.c.l.bf16 %v1263_v38  ;;  %v976_v62 = vunpack.c.h.bf16 %v1263_v38 }
  0x10   :  { %53 = vst.msk [vmem:[#allocation2 + $0xf0] sm:$0xff] %vm22_vm0, %v1109_v1  ;;  %54 = vst.msk [vmem:[#allocation2 + $0xf8] sm:$0xff] %vm22_vm0, %v1109_v1  ;;  %v71_v26 = vld [vmem:[#allocation2 + $0x80] sm:$0xff]  ;;  %v72_v43 = vld [vmem:[#allocation2 + $0x88] sm:$0xff]  ;;  %v955_v3 = vunpack.c.l.bf16 %v1269_v44 }
  0x11   :  { %v73_v22 = vld [vmem:[#allocation2 + $0x90] sm:$0xff]  ;;  %v74_v35 = vld [vmem:[#allocation2 + $0x98] sm:$0xff]  ;;  %v1300_v63 = vld [vmem:[%s1606_s3 + $0x28] sm:$0xff]  }
  0x12   :  { %1049 = vmatmul.mubr.msk.bf16.vlgmr.msra.gmra.mxu0 %vm22_vm0, %v1095_v7  ;;  %1065 = vmatmul.mubr.msk.bf16.vlgmr.msra.gmra.mxu1 %vm22_vm0, %v1096_v8  ;;  %v1278_v49 = vld [vmem:[%s1606_s3 + $0x58] sm:$0xff]   ;;  %v1288_v51 = vld [vmem:[%s1606_s3 + $0x50] sm:$0xff]   ;;  %v1305_v0 = vld [vmem:[%s1606_s3 + $0x68] sm:$0xff]   ;;  %v951_v7 = vunpack.c.l.bf16 %v1283_v50 }
  0x13   :  { %1052 = vmatprep.mubr.msk.bf16.mxu0 %vm22_vm0, %v1097_v9  ;;  %1068 = vmatprep.mubr.msk.bf16.mxu1 %vm22_vm0, %v1098_v10  ;;  %v61_v57 = vld [vmem:[#allocation2 + $0x30] sm:$0xff]  ;;  %v1310_v1 = vld [vmem:[%s1607_s2] ss:$0 sm:$0xff]  ;;  %v987_v5 = vunpack.c.l.bf16 %v1278_v49  ;;  %v983_v9 = vunpack.c.l.bf16 %v1288_v51 }
  0x14   :  { %v77_v58 = vld [vmem:[#allocation2 + $0xb0] sm:$0xff]  ;;  %v59_v6 = vld [vmem:[#allocation2 + $0x20] sm:$0xff] }
  0x15   :  { %v75_v8 = vld [vmem:[#allocation2 + $0xa0] sm:$0xff] }
  0x1a   :  { %1053 = vmatmul.mubr.msk.bf16.gmra.mxu0 %vm22_vm0, %v1099_v11  ;;  %1069 = vmatmul.mubr.msk.bf16.gmra.mxu1 %vm22_vm0, %v1100_v12  ;;  %v956_v12 = vunpack.c.h.bf16 %v1269_v44 }
  0x1b   :  { %1056 = vmatprep.mubr.msk.bf16.mxu0 %vm22_vm0, %v1101_v13  ;;  %1072 = vmatprep.mubr.msk.bf16.mxu1 %vm22_vm0, %v1102_v14  ;;  %v988_v13 = vunpack.c.h.bf16 %v1278_v49  ;;  %v1323_v14 = vld [vmem:[%s1606_s3 + $0x20] sm:$0xff]  }
  0x22   :  { %1057 = vmatmul.mubr.msk.bf16.gmra.mxu0 %vm22_vm0, %v1103_v15  ;;  %1073 = vmatmul.mubr.msk.bf16.gmra.mxu1 %vm22_vm0, %v1104_v16  ;;  %v1328_v15 = vld [vmem:[%s1606_s3 + $0x60] sm:$0xff]  }
  0x23   :  { %1060 = vmatprep.mubr.msk.bf16.mxu0 %vm22_vm0, %v1105_v17  ;;  %1076 = vmatprep.mubr.msk.bf16.mxu1 %vm22_vm0, %v1106_v18 }
  0x2a   :  { %1061 = vmatmul.mubr.msk.bf16.gmra.mxu0 %vm22_vm0, %v1107_v19  ;;  %1077 = vmatmul.mubr.msk.bf16.gmra.mxu1 %vm22_vm0, %v1108_v20  ;;  %v952_v20 = vunpack.c.h.bf16 %v1283_v50 }
  0xd2   :  { %v1050_v23 = vpop.f32.mrf.mxu0  ;;  %v1066_v24 = vpop.f32.mrf.mxu1 }
  0xd3   :  { %v443_v27 = vadd.f32 %v1050_v23, %v57_v21  ;;  %v459_v29 = vadd.f32 %v1066_v24, %v73_v22  ;;  %v984_v21 = vunpack.c.h.bf16 %v1288_v51  ;;  %v963_v22 = vunpack.c.l.bf16 %v1300_v63 }
  0xd4   :  { %v314_v32 = vpop.f32.mrf.mxu0  ;;  %v378_v34 = vpop.f32.mrf.mxu1  ;;  %v995_v23 = vunpack.c.l.bf16 %v1305_v0 }
  0xd5   :  { %475 = vst.msk [vmem:[#allocation2 + $0x10] sm:$0xff] %vm22_vm0, %v443_v27  ;;  %491 = vst.msk [vmem:[#allocation2 + $0x90] sm:$0xff] %vm22_vm0, %v459_v29  ;;  %v441_v36 = vadd.f32 %v314_v32, %v55_v25  ;;  %v457_v37 = vadd.f32 %v378_v34, %v71_v26  ;;  %v62_v29 = vld [vmem:[#allocation2 + $0x38] sm:$0xff] }
  0xd6   :  { %v1051_v40 = vpop.f32.mrf.mxu0  ;;  %v1067_v41 = vpop.f32.mrf.mxu1 }
  0xd7   :  { %473 = vst.msk [vmem:[#allocation2] sm:$0xff] %vm22_vm0, %v441_v36  ;;  %489 = vst.msk [vmem:[#allocation2 + $0x80] sm:$0xff] %vm22_vm0, %v457_v37  ;;  %v444_v47 = vadd.f32 %v1051_v40, %v58_v30  ;;  %v460_v48 = vadd.f32 %v1067_v41, %v74_v35  ;;  %v78_v30 = vld [vmem:[#allocation2 + $0xb8] sm:$0xff]  ;;  %v959_v37 = vunpack.c.l.bf16 %v1323_v14  ;;  %v991_v40 = vunpack.c.l.bf16 %v1328_v15 }
  0xd8   :  { %v317_v55 = vpop.f32.mrf.mxu0  ;;  %v381_v56 = vpop.f32.mrf.mxu1  ;;  %v964_v41 = vunpack.c.h.bf16 %v1300_v63 }
  0xd9   :  { %476 = vst.msk [vmem:[#allocation2 + $0x18] sm:$0xff] %vm22_vm0, %v444_v47  ;;  %492 = vst.msk [vmem:[#allocation2 + $0x98] sm:$0xff] %vm22_vm0, %v460_v48  ;;  %v442_v59 = vadd.f32 %v317_v55, %v56_v42  ;;  %v458_v61 = vadd.f32 %v381_v56, %v72_v43  ;;  %v996_v42 = vunpack.c.h.bf16 %v1305_v0  ;;  %v60_v56 = vld [vmem:[#allocation2 + $0x28] sm:$0xff] }
  0xda   :  { %v1054_v2 = vpop.f32.mrf.mxu0  ;;  %v1070_v4 = vpop.f32.mrf.mxu1 }
  0xdb   :  { %474 = vst.msk [vmem:[#allocation2 + $0x8] sm:$0xff] %vm22_vm0, %v442_v59  ;;  %490 = vst.msk [vmem:[#allocation2 + $0x88] sm:$0xff] %vm22_vm0, %v458_v61  ;;  %v447_v10 = vadd.f32 %v1054_v2, %v61_v57  ;;  %v463_v11 = vadd.f32 %v1070_v4, %v77_v58  ;;  %v76_v57 = vld [vmem:[#allocation2 + $0xa8] sm:$0xff] }
  0xdc   :  { %v510_v16 = vld [vmem:[#allocation2 + $0x10] sm:$0xff]  ;;  %v330_v18 = vpop.f32.mrf.mxu0  ;;  %v394_v19 = vpop.f32.mrf.mxu1 }
  0xdd   :  { %v526_v17 = vld [vmem:[#allocation2 + $0x90] sm:$0xff]  ;;  %v549_v24 = vadd.f32 %v1310_v1, %v510_v16  ;;  %479 = vst.msk [vmem:[#allocation2 + $0x30] sm:$0xff] %vm22_vm0, %v447_v10  ;;  %495 = vst.msk [vmem:[#allocation2 + $0xb0] sm:$0xff] %vm22_vm0, %v463_v11  ;;  %v445_v26 = vadd.f32 %v330_v18, %v59_v6  ;;  %v461_v27 = vadd.f32 %v394_v19, %v75_v8 }
  0xde   :  { %v565_v25 = vadd.f32 %v1310_v1, %v526_v17  ;;  %v508_v32 = vld [vmem:[#allocation2] sm:$0xff]  ;;  %v1055_v35 = vpop.f32.mrf.mxu0  ;;  %v1071_v36 = vpop.f32.mrf.mxu1  ;;  %v65_v17 = vld [vmem:[#allocation2 + $0x50] sm:$0xff] }
  0xdf   :  { %v524_v34 = vld [vmem:[#allocation2 + $0x80] sm:$0xff]  ;;  %v645_v43 = vadd.f32 %v947_v39, %v549_v24  ;;  %v547_v48 = vadd.f32 %v1310_v1, %v508_v32  ;;  %477 = vst.msk [vmem:[#allocation2 + $0x20] sm:$0xff] %vm22_vm0, %v445_v26  ;;  %493 = vst.msk [vmem:[#allocation2 + $0xa0] sm:$0xff] %vm22_vm0, %v461_v27  ;;  %v448_v61 = vadd.f32 %v1055_v35, %v62_v29  ;;  %v960_v39 = vunpack.c.h.bf16 %v1323_v14  ;;  %v81_v18 = vld [vmem:[#allocation2 + $0xd0] sm:$0xff] }
  0xe0   :  { %v661_v47 = vadd.f32 %v979_v45, %v565_v25  ;;  %v563_v55 = vadd.f32 %v1310_v1, %v524_v34  ;;  %v511_v58 = vld [vmem:[#allocation2 + $0x18] sm:$0xff]  ;;  %v464_v2 = vadd.f32 %v1071_v36, %v78_v30  ;;  %v333_v4 = vpop.f32.mrf.mxu0  ;;  %v397_v6 = vpop.f32.mrf.mxu1  ;;  %v992_v45 = vunpack.c.h.bf16 %v1328_v15  ;;  %v63_v36 = vld [vmem:[#allocation2 + $0x40] sm:$0xff] }
  0xe1   :  { %v527_v59 = vld [vmem:[#allocation2 + $0x98] sm:$0xff]  ;;  %v911_v8 = vpack.c.bf16 %v645_v43, %v645_v43  ;;  %v643_v11 = vadd.f32 %v943_v46, %v547_v48  ;;  %v550_v19 = vadd.f32 %v1310_v1, %v511_v58  ;;  %480 = vst.msk [vmem:[#allocation2 + $0x38] sm:$0xff] %vm22_vm0, %v448_v61  ;;  %v446_v27 = vadd.f32 %v333_v4, %v60_v56  ;;  %v79_v43 = vld [vmem:[#allocation2 + $0xc0] sm:$0xff] }
  0xe2   :  { %v927_v10 = vpack.c.bf16 %v661_v47, %v661_v47  ;;  %v659_v16 = vadd.f32 %v975_v52, %v563_v55  ;;  %v566_v24 = vadd.f32 %v1310_v1, %v527_v59  ;;  %v509_v25 = vld [vmem:[#allocation2 + $0x8] sm:$0xff]  ;;  %496 = vst.msk [vmem:[#allocation2 + $0xb8] sm:$0xff] %vm22_vm0, %v464_v2  ;;  %v462_v29 = vadd.f32 %v397_v6, %v76_v57  ;;  %v1058_v30 = vpop.f32.mrf.mxu0  ;;  %v1074_v32 = vpop.f32.mrf.mxu1  ;;  %v66_v2 = vld [vmem:[#allocation2 + $0x58] sm:$0xff] }
  0xe3   :  { %v525_v26 = vld [vmem:[#allocation2 + $0x88] sm:$0xff]  ;;  %806 = vst.msk [vmem:[%s1608_s4 + $0x8] sm:$0xf] %vm803_vm1, %v911_v8  ;;  %v909_v46 = vpack.c.bf16 %v643_v11, %v643_v11  ;;  %v548_v34 = vadd.f32 %v1310_v1, %v509_v25  ;;  %v646_v47 = vadd.f32 %v948_v53, %v550_v19  ;;  %v451_v57 = vadd.f32 %v1058_v30, %v65_v17  ;;  %v82_v4 = vld [vmem:[#allocation2 + $0xd8] sm:$0xff] }
  0xe4   :  { %822 = vst.msk [vmem:[%s1608_s4 + $0x48] sm:$0xf] %vm803_vm1, %v927_v10  ;;  %v925_v52 = vpack.c.bf16 %v659_v16, %v659_v16  ;;  %v564_v35 = vadd.f32 %v1310_v1, %v525_v26  ;;  %v662_v48 = vadd.f32 %v980_v54, %v566_v24  ;;  %v514_v55 = vld [vmem:[#allocation2 + $0x30] sm:$0xff]  ;;  %v467_v58 = vadd.f32 %v1074_v32, %v81_v18  ;;  %v346_v59 = vpop.f32.mrf.mxu0  ;;  %v410_v61 = vpop.f32.mrf.mxu1  ;;  %v64_v6 = vld [vmem:[#allocation2 + $0x48] sm:$0xff] }
  0xe5   :  { %v530_v56 = vld [vmem:[#allocation2 + $0xb0] sm:$0xff]  ;;  %478 = vst.msk [vmem:[#allocation2 + $0x28] sm:$0xff] %vm22_vm0, %v446_v27  ;;  %494 = vst.msk [vmem:[#allocation2 + $0xa8] sm:$0xff] %vm22_vm0, %v462_v29  ;;  %v644_v28 = vadd.f32 %v944_v60, %v548_v34  ;;  %v553_v53 = vadd.f32 %v1310_v1, %v514_v55  ;;  %v912_v8 = vpack.c.bf16 %v646_v47, %v646_v47  ;;  %v1416_v34 = vld [vmem:[%s1606_s3 + $0x78] sm:$0xff]  }
  0xe6   :  { %804 = vst.msk [vmem:[%s1608_s4] sm:$0xf] %vm803_vm1, %v909_v46  ;;  %820 = vst.msk [vmem:[%s1608_s4 + $0x40] sm:$0xf] %vm803_vm1, %v925_v52  ;;  %v660_v31 = vadd.f32 %v976_v62, %v564_v35  ;;  %v569_v54 = vadd.f32 %v1310_v1, %v530_v56  ;;  %v928_v10 = vpack.c.bf16 %v662_v48, %v662_v48  ;;  %v512_v11 = vld [vmem:[#allocation2 + $0x20] sm:$0xff]  ;;  %v1059_v17 = vpop.f32.mrf.mxu0  ;;  %v1075_v38 = vpop.f32.mrf.mxu1  ;;  %v80_v62 = vld [vmem:[#allocation2 + $0xc8] sm:$0xff]  ;;  %v1004_v15 = vunpack.c.h.bf16 %v1416_v34 }
  0xe7   :  { %v528_v16 = vld [vmem:[#allocation2 + $0xa0] sm:$0xff]  ;;  %483 = vst.msk [vmem:[#allocation2 + $0x50] sm:$0xff] %vm22_vm0, %v451_v57  ;;  %499 = vst.msk [vmem:[#allocation2 + $0xd0] sm:$0xff] %vm22_vm0, %v467_v58  ;;  %v449_v33 = vadd.f32 %v346_v59, %v63_v36  ;;  %v465_v60 = vadd.f32 %v410_v61, %v79_v43  ;;  %v910_v18 = vpack.c.bf16 %v644_v28, %v644_v28  ;;  %v69_v26 = vld [vmem:[#allocation2 + $0x70] sm:$0xff] }
  0xe8   :  { %v926_v19 = vpack.c.bf16 %v660_v31, %v660_v31  ;;  %v649_v24 = vadd.f32 %v955_v3, %v553_v53  ;;  %v665_v25 = vadd.f32 %v987_v5, %v569_v54  ;;  %807 = vst.msk [vmem:[%s1608_s4 + $0xc] sm:$0xf] %vm803_vm1, %v912_v8  ;;  %823 = vst.msk [vmem:[%s1608_s4 + $0x4c] sm:$0xf] %vm803_vm1, %v928_v10  ;;  %v349_v30 = vpop.f32.mrf.mxu0  ;;  %v413_v32 = vpop.f32.mrf.mxu1  ;;  %v1411_v46 = vld [vmem:[%s1606_s3 + $0x38] sm:$0xff]   ;;  %v85_v52 = vld [vmem:[#allocation2 + $0xf0] sm:$0xff] }
  0xe9   :  { %v551_v27 = vadd.f32 %v1310_v1, %v512_v11  ;;  %v567_v29 = vadd.f32 %v1310_v1, %v528_v16  ;;  %481 = vst.msk [vmem:[#allocation2 + $0x40] sm:$0xff] %vm22_vm0, %v449_v33  ;;  %497 = vst.msk [vmem:[#allocation2 + $0xc0] sm:$0xff] %vm22_vm0, %v465_v60  ;;  %v452_v3 = vadd.f32 %v1059_v17, %v66_v2  ;;  %v515_v43 = vld [vmem:[#allocation2 + $0x38] sm:$0xff]  ;;  %v67_v31 = vld [vmem:[#allocation2 + $0x60] sm:$0xff]  ;;  %v971_v2 = vunpack.c.l.bf16 %v1411_v46 }
  0xea   :  { %v468_v5 = vadd.f32 %v1075_v38, %v82_v4  ;;  %805 = vst.msk [vmem:[%s1608_s4 + $0x4] sm:$0xf] %vm803_vm1, %v910_v18  ;;  %821 = vst.msk [vmem:[%s1608_s4 + $0x44] sm:$0xf] %vm803_vm1, %v926_v19  ;;  %v915_v35 = vpack.c.bf16 %v649_v24, %v649_v24  ;;  %v931_v36 = vpack.c.bf16 %v665_v25, %v665_v25  ;;  %v531_v47 = vld [vmem:[#allocation2 + $0xb8] sm:$0xff]  ;;  %v1062_v61 = vpop.f32.mrf.mxu0  ;;  %v1078_v28 = vpop.f32.mrf.mxu1  ;;  %v83_v53 = vld [vmem:[#allocation2 + $0xe0] sm:$0xff] }
  0xeb   :  { %v450_v48 = vadd.f32 %v349_v30, %v64_v6  ;;  %v466_v55 = vadd.f32 %v413_v32, %v80_v62  ;;  %v647_v56 = vadd.f32 %v951_v7, %v551_v27  ;;  %v663_v57 = vadd.f32 %v983_v9, %v567_v29  ;;  %484 = vst.msk [vmem:[#allocation2 + $0x58] sm:$0xff] %vm22_vm0, %v452_v3  ;;  %v70_v17 = vld [vmem:[#allocation2 + $0x78] sm:$0xff]  ;;  %v68_v3 = vld [vmem:[#allocation2 + $0x68] sm:$0xff] }
  0xec   :  { %v554_v58 = vadd.f32 %v1310_v1, %v515_v43  ;;  %v570_v59 = vadd.f32 %v1310_v1, %v531_v47  ;;  %500 = vst.msk [vmem:[#allocation2 + $0xd8] sm:$0xff] %vm22_vm0, %v468_v5  ;;  %v513_v7 = vld [vmem:[#allocation2 + $0x28] sm:$0xff]  ;;  %v455_v54 = vadd.f32 %v1062_v61, %v69_v26  ;;  %v471_v4 = vadd.f32 %v1078_v28, %v85_v52  ;;  %v362_v33 = vpop.f32.mrf.mxu0  ;;  %v426_v60 = vpop.f32.mrf.mxu1  ;;  %v86_v38 = vld [vmem:[#allocation2 + $0xf8] sm:$0xff]  ;;  %v1487_v47 = vld [vmem:[%s1606_s3 + $0x30] sm:$0xff]  }
  0xed   :  { %810 = vst.msk [vmem:[%s1608_s4 + $0x18] sm:$0xf] %vm803_vm1, %v915_v35  ;;  %826 = vst.msk [vmem:[%s1608_s4 + $0x58] sm:$0xf] %vm803_vm1, %v931_v36  ;;  %v529_v9 = vld [vmem:[#allocation2 + $0xa8] sm:$0xff]  ;;  %v1003_v6 = vunpack.c.l.bf16 %v1416_v34  ;;  %v913_v8 = vpack.c.bf16 %v647_v56, %v647_v56  ;;  %v929_v10 = vpack.c.bf16 %v663_v57, %v663_v57  ;;  %v552_v62 = vadd.f32 %v1310_v1, %v513_v7 }
  0xee   :  { %482 = vst.msk [vmem:[#allocation2 + $0x48] sm:$0xff] %vm22_vm0, %v450_v48  ;;  %498 = vst.msk [vmem:[#allocation2 + $0xc8] sm:$0xff] %vm22_vm0, %v466_v55  ;;  %v650_v11 = vadd.f32 %v956_v12, %v554_v58  ;;  %v666_v16 = vadd.f32 %v988_v13, %v570_v59  ;;  %v568_v18 = vadd.f32 %v1310_v1, %v529_v9  ;;  %v518_v19 = vld [vmem:[#allocation2 + $0x50] sm:$0xff]  ;;  %v1063_v27 = vpop.f32.mrf.mxu0  ;;  %v1079_v29 = vpop.f32.mrf.mxu1  ;;  %v84_v5 = vld [vmem:[#allocation2 + $0xe8] sm:$0xff] }
  0xef   :  { %v534_v24 = vld [vmem:[#allocation2 + $0xd0] sm:$0xff]  ;;  %487 = vst.msk [vmem:[#allocation2 + $0x70] sm:$0xff] %vm22_vm0, %v455_v54  ;;  %503 = vst.msk [vmem:[#allocation2 + $0xf0] sm:$0xff] %vm22_vm0, %v471_v4  ;;  %v453_v25 = vadd.f32 %v362_v33, %v67_v31  ;;  %v469_v44 = vadd.f32 %v426_v60, %v83_v53  ;;  %v557_v13 = vadd.f32 %v1310_v1, %v518_v19  ;;  %v967_v60 = vunpack.c.l.bf16 %v1487_v47 }
  0xf0   :  { %808 = vst.msk [vmem:[%s1608_s4 + $0x10] sm:$0xf] %vm803_vm1, %v913_v8  ;;  %824 = vst.msk [vmem:[%s1608_s4 + $0x50] sm:$0xf] %vm803_vm1, %v929_v10  ;;  %v916_v49 = vpack.c.bf16 %v650_v11, %v650_v11  ;;  %v932_v12 = vpack.c.bf16 %v666_v16, %v666_v16  ;;  %v573_v26 = vadd.f32 %v1310_v1, %v534_v24  ;;  %v516_v52 = vld [vmem:[#allocation2 + $0x40] sm:$0xff]  ;;  %v365_v48 = vpop.f32.mrf.mxu0  ;;  %v429_v55 = vpop.f32.mrf.mxu1 }
  0xf1   :  { %v648_v30 = vadd.f32 %v952_v20, %v552_v62  ;;  %v664_v32 = vadd.f32 %v984_v21, %v568_v18  ;;  %v532_v35 = vld [vmem:[#allocation2 + $0xc0] sm:$0xff]  ;;  %485 = vst.msk [vmem:[#allocation2 + $0x60] sm:$0xff] %vm22_vm0, %v453_v25  ;;  %501 = vst.msk [vmem:[#allocation2 + $0xe0] sm:$0xff] %vm22_vm0, %v469_v44  ;;  %v456_v36 = vadd.f32 %v1063_v27, %v70_v17 }
  0xf2   :  { %v472_v43 = vadd.f32 %v1079_v29, %v86_v38  ;;  %811 = vst.msk [vmem:[%s1608_s4 + $0x1c] sm:$0xf] %vm803_vm1, %v916_v49  ;;  %827 = vst.msk [vmem:[%s1608_s4 + $0x5c] sm:$0xf] %vm803_vm1, %v932_v12  ;;  %v653_v50 = vadd.f32 %v963_v22, %v557_v13  ;;  %v669_v51 = vadd.f32 %v995_v23, %v573_v26  ;;  %v519_v58 = vld [vmem:[#allocation2 + $0x58] sm:$0xff]  ;;  %v1492_v22 = vld [vmem:[%s1606_s3 + $0x70] sm:$0xff]  }
  0xf3   :  { %v555_v20 = vadd.f32 %v1310_v1, %v516_v52  ;;  %v571_v21 = vadd.f32 %v1310_v1, %v532_v35  ;;  %v914_v56 = vpack.c.bf16 %v648_v30, %v648_v30  ;;  %v930_v57 = vpack.c.bf16 %v664_v32, %v664_v32  ;;  %v535_v59 = vld [vmem:[#allocation2 + $0xd8] sm:$0xff]  ;;  %488 = vst.msk [vmem:[#allocation2 + $0x78] sm:$0xff] %vm22_vm0, %v456_v36 }
  0xf4   :  { %504 = vst.msk [vmem:[#allocation2 + $0xf8] sm:$0xff] %vm22_vm0, %v472_v43  ;;  %v454_v23 = vadd.f32 %v365_v48, %v68_v3  ;;  %v470_v61 = vadd.f32 %v429_v55, %v84_v5  ;;  %v919_v28 = vpack.c.bf16 %v653_v50, %v653_v50  ;;  %v935_v31 = vpack.c.bf16 %v669_v51, %v669_v51 }
  0xf5   :  { %v651_v53 = vadd.f32 %v959_v37, %v555_v20  ;;  %v667_v7 = vadd.f32 %v991_v40, %v571_v21  ;;  %v517_v9 = vld [vmem:[#allocation2 + $0x48] sm:$0xff]  ;;  %809 = vst.msk [vmem:[%s1608_s4 + $0x14] sm:$0xf] %vm803_vm1, %v914_v56  ;;  %825 = vst.msk [vmem:[%s1608_s4 + $0x54] sm:$0xf] %vm803_vm1, %v930_v57  ;;  %v558_v4 = vadd.f32 %v1310_v1, %v519_v58  ;;  %v999_v17 = vunpack.c.l.bf16 %v1492_v22 }
  0xf6   :  { %v533_v54 = vld [vmem:[#allocation2 + $0xc8] sm:$0xff]  ;;  %v574_v8 = vadd.f32 %v1310_v1, %v535_v59  ;;  %v556_v37 = vadd.f32 %v1310_v1, %v517_v9  ;;  %486 = vst.msk [vmem:[#allocation2 + $0x68] sm:$0xff] %vm22_vm0, %v454_v23  ;;  %502 = vst.msk [vmem:[#allocation2 + $0xe8] sm:$0xff] %vm22_vm0, %v470_v61  ;;  %v522_v16 = vld [vmem:[#allocation2 + $0x70] sm:$0xff] }
  0xf7   :  { %v572_v40 = vadd.f32 %v1310_v1, %v533_v54  ;;  %814 = vst.msk [vmem:[%s1608_s4 + $0x28] sm:$0xf] %vm803_vm1, %v919_v28  ;;  %830 = vst.msk [vmem:[%s1608_s4 + $0x68] sm:$0xf] %vm803_vm1, %v935_v31  ;;  %v917_v10 = vpack.c.bf16 %v651_v53, %v651_v53  ;;  %v933_v11 = vpack.c.bf16 %v667_v7, %v667_v7  ;;  %v538_v33 = vld [vmem:[#allocation2 + $0xf0] sm:$0xff] }
  0xf8   :  { %v654_v38 = vadd.f32 %v964_v41, %v558_v4  ;;  %v670_v62 = vadd.f32 %v996_v42, %v574_v8  ;;  %v652_v18 = vadd.f32 %v960_v39, %v556_v37  ;;  %v561_v63 = vadd.f32 %v1310_v1, %v522_v16  ;;  %v520_v41 = vld [vmem:[#allocation2 + $0x60] sm:$0xff] }
  0xf9   :  { %v668_v19 = vadd.f32 %v992_v45, %v572_v40  ;;  %812 = vst.msk [vmem:[%s1608_s4 + $0x20] sm:$0xf] %vm803_vm1, %v917_v10  ;;  %828 = vst.msk [vmem:[%s1608_s4 + $0x60] sm:$0xf] %vm803_vm1, %v933_v11  ;;  %v577_v0 = vadd.f32 %v1310_v1, %v538_v33  ;;  %v536_v14 = vld [vmem:[#allocation2 + $0xe0] sm:$0xff]  ;;  %v972_v42 = vunpack.c.h.bf16 %v1411_v46  ;;  %v559_v12 = vadd.f32 %v1310_v1, %v520_v41 }
  0xfa   :  { %v920_v39 = vpack.c.bf16 %v654_v38, %v654_v38  ;;  %v936_v45 = vpack.c.bf16 %v670_v62, %v670_v62  ;;  %v918_v24 = vpack.c.bf16 %v652_v18, %v652_v18  ;;  %v657_v44 = vadd.f32 %v971_v2, %v561_v63  ;;  %v523_v26 = vld [vmem:[#allocation2 + $0x78] sm:$0xff] }
  0xfb   :  { %v934_v25 = vpack.c.bf16 %v668_v19, %v668_v19  ;;  %v673_v49 = vadd.f32 %v1003_v6, %v577_v0  ;;  %v575_v13 = vadd.f32 %v1310_v1, %v536_v14  ;;  %v539_v27 = vld [vmem:[#allocation2 + $0xf8] sm:$0xff]  ;;  %v562_v46 = vadd.f32 %v1310_v1, %v523_v26 }
  0xfc   :  { %815 = vst.msk [vmem:[%s1608_s4 + $0x2c] sm:$0xf] %vm803_vm1, %v920_v39  ;;  %831 = vst.msk [vmem:[%s1608_s4 + $0x6c] sm:$0xf] %vm803_vm1, %v936_v45  ;;  %v578_v34 = vadd.f32 %v1310_v1, %v539_v27  ;;  %v968_v2 = vunpack.c.h.bf16 %v1487_v47  ;;  %v1000_v6 = vunpack.c.h.bf16 %v1492_v22  ;;  %v923_v29 = vpack.c.bf16 %v657_v44, %v657_v44 }
  0xfd   :  { %813 = vst.msk [vmem:[%s1608_s4 + $0x24] sm:$0xf] %vm803_vm1, %v918_v24  ;;  %829 = vst.msk [vmem:[%s1608_s4 + $0x64] sm:$0xf] %vm803_vm1, %v934_v25  ;;  %v939_v3 = vpack.c.bf16 %v673_v49, %v673_v49  ;;  %v655_v5 = vadd.f32 %v967_v60, %v559_v12  ;;  %v671_v30 = vadd.f32 %v999_v17, %v575_v13  ;;  %v521_v32 = vld [vmem:[#allocation2 + $0x68] sm:$0xff] }
  0xfe   :  { %v537_v52 = vld [vmem:[#allocation2 + $0xe8] sm:$0xff]  ;;  %v658_v35 = vadd.f32 %v972_v42, %v562_v46  ;;  %v674_v36 = vadd.f32 %v1004_v15, %v578_v34  ;;  %v560_v43 = vadd.f32 %v1310_v1, %v521_v32  ;;  %818 = vst.msk [vmem:[%s1608_s4 + $0x38] sm:$0xf] %vm803_vm1, %v923_v29 }
  0xff   :  { %v576_v50 = vadd.f32 %v1310_v1, %v537_v52  ;;  %834 = vst.msk [vmem:[%s1608_s4 + $0x78] sm:$0xf] %vm803_vm1, %v939_v3  ;;  %v921_v51 = vpack.c.bf16 %v655_v5, %v655_v5  ;;  %v937_v20 = vpack.c.bf16 %v671_v30, %v671_v30 }
 0x100   :  { %v924_v21 = vpack.c.bf16 %v658_v35, %v658_v35  ;;  %v940_v47 = vpack.c.bf16 %v674_v36, %v674_v36  ;;  %v656_v48 = vadd.f32 %v968_v2, %v560_v43 }
 0x101   :  { %v672_v55 = vadd.f32 %v1000_v6, %v576_v50  ;;  %816 = vst.msk [vmem:[%s1608_s4 + $0x30] sm:$0xf] %vm803_vm1, %v921_v51  ;;  %832 = vst.msk [vmem:[%s1608_s4 + $0x70] sm:$0xf] %vm803_vm1, %v937_v20 }
 0x102   :  { %819 = vst.msk [vmem:[%s1608_s4 + $0x3c] sm:$0xf] %vm803_vm1, %v924_v21  ;;  %835 = vst.msk [vmem:[%s1608_s4 + $0x7c] sm:$0xf] %vm803_vm1, %v940_v47  ;;  %v922_v1 = vpack.c.bf16 %v656_v48, %v656_v48 }
 0x103   :  { %v938_v56 = vpack.c.bf16 %v672_v55, %v672_v55 }
 0x104   :  { %817 = vst.msk [vmem:[%s1608_s4 + $0x34] sm:$0xf] %vm803_vm1, %v922_v1 }
 0x105   :  { %833 = vst.msk [vmem:[%s1608_s4 + $0x74] sm:$0xf] %vm803_vm1, %v938_v56 }

// kernel: _lambda_.30
= control target key start
LH: loop header
LB: loop body
LE: loop exit
PB: predicated region body
PF: predicated region fallthrough
CT: control target
= control target key end

     0   :  { %vm89_vm0 = vcmask 523264   ;;  %vm713_vm1 = vcmask 519168   ;;  %s3665_s0 = inlined_call_operand.vmem [shape: bf16[256,64], index: 0, kind: input, shape index: {}]   ;;  %s3666_s3 = inlined_call_operand.vmem [shape: bf16[64,256], index: 3, kind: input, shape index: {}]   ;;  %s3667_s1 = inlined_call_operand.vmem [shape: f32[1,64], index: 1, kind: input, shape index: {}]   ;;  %s3668_s2 = inlined_call_operand.vmem [shape: f32[1,64], index: 2, kind: input, shape index: {}]   ;;  %s3669_s4 = inlined_call_operand.vmem [shape: f32[1,256], index: 4, kind: input, shape index: {}]   ;;  %s3670_s5 = inlined_call_operand.vmem [shape: bf16[256,256], index: 5, kind: output, shape index: {}]  }
   0x1   :  { %v2604_v0 = vld [vmem:[%s3665_s0] sm:$0xff]   ;;  %v2618_v6 = vld [vmem:[%s3665_s0 + $0x8] sm:$0xff]   ;;  %v2650_v18 = vld [vmem:[%s3665_s0 + $0x10] sm:$0xff]  }
   0x2   :  { %v2609_v1 = vld [vmem:[%s3665_s0 + $0x40] sm:$0xff]   ;;  %v2136_v2 = vunpack.c.l.bf16 %v2604_v0  ;;  %v2137_v4 = vunpack.c.h.bf16 %v2604_v0  ;;  %v2140_v11 = vunpack.c.l.bf16 %v2618_v6  ;;  %v2141_v12 = vunpack.c.h.bf16 %v2618_v6  ;;  %v2637_v13 = vld [vmem:[%s3665_s0 + $0x48] sm:$0xff]   ;;  %v2663_v23 = vld [vmem:[%s3665_s0 + $0x50] sm:$0xff]  }
   0x3   :  { %v2168_v3 = vunpack.c.l.bf16 %v2609_v1  ;;  %v2169_v5 = vunpack.c.h.bf16 %v2609_v1  ;;  %v2172_v16 = vunpack.c.l.bf16 %v2637_v13  ;;  %v2173_v17 = vunpack.c.h.bf16 %v2637_v13  ;;  %v2676_v28 = vld [vmem:[%s3665_s0 + $0x18] sm:$0xff]   ;;  %v2702_v38 = vld [vmem:[%s3665_s0 + $0x20] sm:$0xff]   ;;  %v2728_v48 = vld [vmem:[%s3665_s0 + $0x28] sm:$0xff]  }
   0x4   :  { %v90_v7 = vsel %vm89_vm0, %v2136_v2, 0.0  ;;  %v93_v9 = vsel %vm89_vm0, %v2137_v4, 0.0  ;;  %v96_v14 = vsel %vm89_vm0, %v2140_v11, 0.0  ;;  %v99_v15 = vsel %vm89_vm0, %v2141_v12, 0.0  ;;  %v2689_v33 = vld [vmem:[%s3665_s0 + $0x58] sm:$0xff]   ;;  %v2715_v43 = vld [vmem:[%s3665_s0 + $0x60] sm:$0xff]  }
   0x5   :  { %v138_v8 = vsel %vm89_vm0, %v2168_v3, 0.0  ;;  %91 = vadd.xlane.f32.xlu0 %v90_v7  ;;  %v141_v10 = vsel %vm89_vm0, %v2169_v5, 0.0  ;;  %v144_v19 = vsel %vm89_vm0, %v2172_v16, 0.0  ;;  %v147_v20 = vsel %vm89_vm0, %v2173_v17, 0.0  ;;  %v2741_v53 = vld [vmem:[%s3665_s0 + $0x68] sm:$0xff]   ;;  %v2754_v58 = vld [vmem:[%s3665_s0 + $0x30] sm:$0xff]  }
   0x6   :  { %139 = vadd.xlane.f32.xlu1 %v138_v8  ;;  %v2144_v21 = vunpack.c.l.bf16 %v2650_v18  ;;  %v2145_v22 = vunpack.c.h.bf16 %v2650_v18  ;;  %v2176_v26 = vunpack.c.l.bf16 %v2663_v23  ;;  %v2177_v27 = vunpack.c.h.bf16 %v2663_v23  ;;  %v2767_v63 = vld [vmem:[%s3665_s0 + $0x70] sm:$0xff]  }
   0x7   :  { %v2148_v31 = vunpack.c.l.bf16 %v2676_v28  ;;  %v2149_v32 = vunpack.c.h.bf16 %v2676_v28  ;;  %v2180_v36 = vunpack.c.l.bf16 %v2689_v33  ;;  %v2181_v37 = vunpack.c.h.bf16 %v2689_v33 }
   0x8   :  { %v102_v24 = vsel %vm89_vm0, %v2144_v21, 0.0  ;;  %v105_v25 = vsel %vm89_vm0, %v2145_v22, 0.0  ;;  %v150_v29 = vsel %vm89_vm0, %v2176_v26, 0.0  ;;  %v153_v30 = vsel %vm89_vm0, %v2177_v27, 0.0 }
   0x9   :  { %94 = vadd.xlane.f32.xlu0 %v93_v9  ;;  %v108_v34 = vsel %vm89_vm0, %v2148_v31, 0.0  ;;  %v111_v35 = vsel %vm89_vm0, %v2149_v32, 0.0  ;;  %v156_v39 = vsel %vm89_vm0, %v2180_v36, 0.0  ;;  %v159_v40 = vsel %vm89_vm0, %v2181_v37, 0.0 }
   0xa   :  { %142 = vadd.xlane.f32.xlu1 %v141_v10  ;;  %v2152_v41 = vunpack.c.l.bf16 %v2702_v38  ;;  %v2153_v42 = vunpack.c.h.bf16 %v2702_v38  ;;  %v2184_v46 = vunpack.c.l.bf16 %v2715_v43  ;;  %v2185_v47 = vunpack.c.h.bf16 %v2715_v43 }
   0xb   :  { %v2156_v51 = vunpack.c.l.bf16 %v2728_v48  ;;  %v2157_v52 = vunpack.c.h.bf16 %v2728_v48  ;;  %v2188_v56 = vunpack.c.l.bf16 %v2741_v53  ;;  %v2189_v57 = vunpack.c.h.bf16 %v2741_v53 }
   0xc   :  { %v114_v44 = vsel %vm89_vm0, %v2152_v41, 0.0  ;;  %v117_v45 = vsel %vm89_vm0, %v2153_v42, 0.0  ;;  %v162_v49 = vsel %vm89_vm0, %v2184_v46, 0.0  ;;  %v165_v50 = vsel %vm89_vm0, %v2185_v47, 0.0 }
   0xd   :  { %97 = vadd.xlane.f32.xlu0 %v96_v14  ;;  %v120_v54 = vsel %vm89_vm0, %v2156_v51, 0.0  ;;  %v123_v55 = vsel %vm89_vm0, %v2157_v52, 0.0  ;;  %v168_v59 = vsel %vm89_vm0, %v2188_v56, 0.0  ;;  %v171_v60 = vsel %vm89_vm0, %v2189_v57, 0.0  ;;  %v2780_v14 = vld [vmem:[%s3665_s0 + $0x38] sm:$0xff]  }
   0xe   :  { %100 = vadd.xlane.f32.xlu1 %v99_v15  ;;  %v2160_v61 = vunpack.c.l.bf16 %v2754_v58  ;;  %v2161_v62 = vunpack.c.h.bf16 %v2754_v58  ;;  %v2192_v9 = vunpack.c.l.bf16 %v2767_v63  ;;  %v2193_v10 = vunpack.c.h.bf16 %v2767_v63 }
  0x10   :  { %v126_v7 = vsel %vm89_vm0, %v2160_v61, 0.0  ;;  %v129_v8 = vsel %vm89_vm0, %v2161_v62, 0.0  ;;  %v174_v15 = vsel %vm89_vm0, %v2192_v9, 0.0 }
  0x11   :  { %145 = vadd.xlane.f32.xlu0 %v144_v19  ;;  %v177_v19 = vsel %vm89_vm0, %v2193_v10, 0.0 }
  0x12   :  { %148 = vadd.xlane.f32.xlu1 %v147_v20  ;;  %v2164_v20 = vunpack.c.l.bf16 %v2780_v14 }
  0x15   :  { %103 = vadd.xlane.f32.xlu0 %v102_v24  ;;  %v2165_v24 = vunpack.c.h.bf16 %v2780_v14 }
  0x16   :  { %106 = vadd.xlane.f32.xlu1 %v105_v25  ;;  %v2793_v25 = vld [vmem:[%s3665_s0 + $0x78] sm:$0xff]  }
  0x19   :  { %151 = vadd.xlane.f32.xlu0 %v150_v29  ;;  %v132_v29 = vsel %vm89_vm0, %v2164_v20, 0.0 }
  0x1a   :  { %154 = vadd.xlane.f32.xlu1 %v153_v30  ;;  %v135_v30 = vsel %vm89_vm0, %v2165_v24, 0.0 }
  0x1d   :  { %109 = vadd.xlane.f32.xlu0 %v108_v34  ;;  %v2196_v34 = vunpack.c.l.bf16 %v2793_v25 }
  0x1e   :  { %112 = vadd.xlane.f32.xlu1 %v111_v35  ;;  %v2197_v35 = vunpack.c.h.bf16 %v2793_v25 }
  0x21   :  { %157 = vadd.xlane.f32.xlu0 %v156_v39  ;;  %v180_v39 = vsel %vm89_vm0, %v2196_v34, 0.0 }
  0x22   :  { %160 = vadd.xlane.f32.xlu1 %v159_v40  ;;  %v183_v40 = vsel %vm89_vm0, %v2197_v35, 0.0 }
  0x25   :  { %115 = vadd.xlane.f32.xlu0 %v114_v44 }
  0x26   :  { %118 = vadd.xlane.f32.xlu1 %v117_v45 }
  0x29   :  { %163 = vadd.xlane.f32.xlu0 %v162_v49 }
  0x2a   :  { %166 = vadd.xlane.f32.xlu1 %v165_v50 }
  0x2d   :  { %121 = vadd.xlane.f32.xlu0 %v120_v54 }
  0x2e   :  { %124 = vadd.xlane.f32.xlu1 %v123_v55 }
  0x31   :  { %169 = vadd.xlane.f32.xlu0 %v168_v59 }
  0x32   :  { %172 = vadd.xlane.f32.xlu1 %v171_v60 }
  0x35   :  { %127 = vadd.xlane.f32.xlu0 %v126_v7 }
  0x36   :  { %130 = vadd.xlane.f32.xlu1 %v129_v8 }
  0x39   :  { %175 = vadd.xlane.f32.xlu0 %v174_v15 }
  0x3a   :  { %178 = vadd.xlane.f32.xlu1 %v177_v19 }
  0x3d   :  { %133 = vadd.xlane.f32.xlu0 %v132_v29 }
  0x3e   :  { %136 = vadd.xlane.f32.xlu1 %v135_v30 }
  0x41   :  { %181 = vadd.xlane.f32.xlu0 %v180_v39 }
  0x42   :  { %184 = vadd.xlane.f32.xlu1 %v183_v40 }
  0x8e   :  { %v92_v44 = vpop.xlane.xlu0 %91 }
  0x8f   :  { %v140_v45 = vpop.xlane.xlu1 %139  ;;  %v187_v49 = vmul.f32 0.015625, %v92_v44 }
  0x90   :  { %v203_v50 = vmul.f32 0.015625, %v140_v45 }
  0x91   :  { %v2811_v54 = vsub.f32 %v2136_v2, %v187_v49 }
  0x92   :  { %v2815_v55 = vsub.f32 %v2168_v3, %v203_v50  ;;  %v95_v59 = vpop.xlane.xlu0 %94 }
  0x93   :  { %v143_v60 = vpop.xlane.xlu1 %142  ;;  %v188_v7 = vmul.f32 0.015625, %v95_v59  ;;  %v251_v15 = vmul.f32 %v2811_v54, %v2811_v54 }
  0x94   :  { %v204_v8 = vmul.f32 0.015625, %v143_v60  ;;  %v267_v19 = vmul.f32 %v2815_v55, %v2815_v55 }
  0x95   :  { %v2823_v29 = vsub.f32 %v2137_v4, %v188_v7  ;;  %v283_v3 = vsel %vm89_vm0, %v251_v15, 0.0 }
  0x96   :  { %v2827_v2 = vsub.f32 %v2169_v5, %v204_v8  ;;  %284 = vadd.xlane.f32.xlu0 %v283_v3  ;;  %v98_v30 = vpop.xlane.xlu0 %97  ;;  %v331_v40 = vsel %vm89_vm0, %v267_v19, 0.0 }
  0x97   :  { %v101_v39 = vpop.xlane.xlu1 %100  ;;  %v189_v44 = vmul.f32 0.015625, %v98_v30  ;;  %v252_v49 = vmul.f32 %v2823_v29, %v2823_v29 }
  0x98   :  { %v190_v45 = vmul.f32 0.015625, %v101_v39  ;;  %v268_v0 = vmul.f32 %v2827_v2, %v2827_v2 }
  0x99   :  { %v2837_v1 = vsub.f32 %v2140_v11, %v189_v44  ;;  %v286_v5 = vsel %vm89_vm0, %v252_v49, 0.0 }
  0x9a   :  { %v2841_v4 = vsub.f32 %v2141_v12, %v190_v45  ;;  %332 = vadd.xlane.f32.xlu0 %v331_v40  ;;  %287 = vadd.xlane.f32.xlu1 %v286_v5  ;;  %v146_v50 = vpop.xlane.xlu0 %145  ;;  %v334_v60 = vsel %vm89_vm0, %v268_v0, 0.0 }
  0x9b   :  { %v149_v59 = vpop.xlane.xlu1 %148  ;;  %v205_v7 = vmul.f32 0.015625, %v146_v50  ;;  %v253_v15 = vmul.f32 %v2837_v1, %v2837_v1 }
  0x9c   :  { %v206_v8 = vmul.f32 0.015625, %v149_v59  ;;  %v254_v11 = vmul.f32 %v2841_v4, %v2841_v4 }
  0x9d   :  { %v2851_v6 = vsub.f32 %v2172_v16, %v205_v7  ;;  %v289_v19 = vsel %vm89_vm0, %v253_v15, 0.0 }
  0x9e   :  { %v2855_v12 = vsub.f32 %v2173_v17, %v206_v8  ;;  %335 = vadd.xlane.f32.xlu1 %v334_v60  ;;  %290 = vadd.xlane.f32.xlu0 %v289_v19  ;;  %v104_v3 = vpop.xlane.xlu0 %103  ;;  %v292_v39 = vsel %vm89_vm0, %v254_v11, 0.0 }
  0x9f   :  { %v107_v30 = vpop.xlane.xlu1 %106  ;;  %v191_v40 = vmul.f32 0.015625, %v104_v3  ;;  %v269_v45 = vmul.f32 %v2851_v6, %v2851_v6 }
  0xa0   :  { %v192_v44 = vmul.f32 0.015625, %v107_v30  ;;  %v270_v16 = vmul.f32 %v2855_v12, %v2855_v12 }
  0xa1   :  { %v2865_v13 = vsub.f32 %v2144_v21, %v191_v40  ;;  %v337_v49 = vsel %vm89_vm0, %v269_v45, 0.0 }
  0xa2   :  { %v2869_v17 = vsub.f32 %v2145_v22, %v192_v44  ;;  %293 = vadd.xlane.f32.xlu1 %v292_v39  ;;  %338 = vadd.xlane.f32.xlu0 %v337_v49  ;;  %v152_v0 = vpop.xlane.xlu0 %151  ;;  %v340_v50 = vsel %vm89_vm0, %v270_v16, 0.0 }
  0xa3   :  { %v155_v5 = vpop.xlane.xlu1 %154  ;;  %v207_v59 = vmul.f32 0.015625, %v152_v0  ;;  %v255_v7 = vmul.f32 %v2865_v13, %v2865_v13 }
  0xa4   :  { %v208_v60 = vmul.f32 0.015625, %v155_v5  ;;  %v256_v21 = vmul.f32 %v2869_v17, %v2869_v17 }
  0xa5   :  { %v2879_v18 = vsub.f32 %v2176_v26, %v207_v59  ;;  %v295_v8 = vsel %vm89_vm0, %v255_v7, 0.0 }
  0xa6   :  { %v2883_v22 = vsub.f32 %v2177_v27, %v208_v60  ;;  %341 = vadd.xlane.f32.xlu1 %v340_v50  ;;  %296 = vadd.xlane.f32.xlu0 %v295_v8  ;;  %v110_v15 = vpop.xlane.xlu0 %109  ;;  %v298_v19 = vsel %vm89_vm0, %v256_v21, 0.0 }
  0xa7   :  { %v113_v11 = vpop.xlane.xlu1 %112  ;;  %v193_v3 = vmul.f32 0.015625, %v110_v15  ;;  %v271_v39 = vmul.f32 %v2879_v18, %v2879_v18 }
  0xa8   :  { %v194_v30 = vmul.f32 0.015625, %v113_v11  ;;  %v272_v26 = vmul.f32 %v2883_v22, %v2883_v22 }
  0xa9   :  { %v2893_v23 = vsub.f32 %v2148_v31, %v193_v3  ;;  %v343_v40 = vsel %vm89_vm0, %v271_v39, 0.0 }
  0xaa   :  { %v2897_v27 = vsub.f32 %v2149_v32, %v194_v30  ;;  %299 = vadd.xlane.f32.xlu1 %v298_v19  ;;  %344 = vadd.xlane.f32.xlu0 %v343_v40  ;;  %v158_v44 = vpop.xlane.xlu0 %157  ;;  %v346_v16 = vsel %vm89_vm0, %v272_v26, 0.0 }
  0xab   :  { %v161_v45 = vpop.xlane.xlu1 %160  ;;  %v209_v49 = vmul.f32 0.015625, %v158_v44  ;;  %v257_v5 = vmul.f32 %v2893_v23, %v2893_v23 }
  0xac   :  { %v210_v0 = vmul.f32 0.015625, %v161_v45  ;;  %v258_v31 = vmul.f32 %v2897_v27, %v2897_v27 }
  0xad   :  { %v2907_v28 = vsub.f32 %v2180_v36, %v209_v49  ;;  %v301_v50 = vsel %vm89_vm0, %v257_v5, 0.0 }
  0xae   :  { %v2911_v32 = vsub.f32 %v2181_v37, %v210_v0  ;;  %347 = vadd.xlane.f32.xlu1 %v346_v16  ;;  %302 = vadd.xlane.f32.xlu0 %v301_v50  ;;  %v116_v59 = vpop.xlane.xlu0 %115  ;;  %v304_v7 = vsel %vm89_vm0, %v258_v31, 0.0  ;;  %v2222_v0 = vld [vmem:[%s3666_s3 + $0x34] ss:$8 sps:$4 sm:$0xff]  }
  0xaf   :  { %v119_v60 = vpop.xlane.xlu1 %118  ;;  %v195_v21 = vmul.f32 0.015625, %v116_v59  ;;  %v273_v15 = vmul.f32 %v2907_v28, %v2907_v28  ;;  %975 = vmatprep.subr.bf16.mxu0 %v2222_v0  ;;  %2213 = vmatprep.subr.bf16.mxu1 %v2222_v0 }
  0xb0   :  { %v196_v8 = vmul.f32 0.015625, %v119_v60  ;;  %v274_v36 = vmul.f32 %v2911_v32, %v2911_v32 }
  0xb1   :  { %v2921_v33 = vsub.f32 %v2152_v41, %v195_v21  ;;  %v349_v11 = vsel %vm89_vm0, %v273_v15, 0.0  ;;  %v2225_v15 = vld [vmem:[%s3666_s3 + $0x24] ss:$8 sps:$4 sm:$0xff]  }
  0xb2   :  { %v2925_v37 = vsub.f32 %v2153_v42, %v196_v8  ;;  %305 = vadd.xlane.f32.xlu1 %v304_v7  ;;  %350 = vadd.xlane.f32.xlu0 %v349_v11  ;;  %v164_v19 = vpop.xlane.xlu0 %163  ;;  %v352_v30 = vsel %vm89_vm0, %v274_v36, 0.0  ;;  %v2227_v11 = vld [vmem:[%s3666_s3 + $0x20] ss:$8 sps:$4 sm:$0xff]  }
  0xb3   :  { %v167_v3 = vpop.xlane.xlu1 %166  ;;  %v211_v39 = vmul.f32 0.015625, %v164_v19  ;;  %v259_v40 = vmul.f32 %v2921_v33, %v2921_v33 }
  0xb4   :  { %v212_v26 = vmul.f32 0.015625, %v167_v3  ;;  %v260_v41 = vmul.f32 %v2925_v37, %v2925_v37 }
  0xb5   :  { %v2935_v38 = vsub.f32 %v2184_v46, %v211_v39  ;;  %v307_v44 = vsel %vm89_vm0, %v259_v40, 0.0 }
  0xb6   :  { %v2939_v42 = vsub.f32 %v2185_v47, %v212_v26  ;;  %353 = vadd.xlane.f32.xlu1 %v352_v30  ;;  %308 = vadd.xlane.f32.xlu0 %v307_v44  ;;  %v122_v45 = vpop.xlane.xlu0 %121  ;;  %v310_v49 = vsel %vm89_vm0, %v260_v41, 0.0  ;;  %v2224_v47 = vld [vmem:[%s3666_s3 + $0x30] ss:$8 sps:$4 sm:$0xff]   ;;  %v2228_v41 = vld [vmem:[%s3666_s3 + $0x14] ss:$8 sps:$4 sm:$0xff]  }
  0xb7   :  { %v125_v16 = vpop.xlane.xlu1 %124  ;;  %v197_v5 = vmul.f32 0.015625, %v122_v45  ;;  %v275_v46 = vmul.f32 %v2935_v38, %v2935_v38  ;;  %976 = vmatpush1.bf16.msra.mxu0 %v2224_v47  ;;  %2217 = vmatpush1.bf16.msra.mxu1 %v2224_v47  ;;  %v2230_v45 = vld [vmem:[%s3666_s3 + $0x10] ss:$8 sps:$4 sm:$0xff]  }
  0xb8   :  { %v198_v31 = vmul.f32 0.015625, %v125_v16  ;;  %v276_v43 = vmul.f32 %v2939_v42, %v2939_v42  ;;  %977 = vmatprep.subr.bf16.mxu0 %v2225_v15  ;;  %2214 = vmatprep.subr.bf16.mxu1 %v2225_v15 }
  0xb9   :  { %v2955_v50 = vsub.f32 %v2156_v51, %v197_v5  ;;  %v355_v60 = vsel %vm89_vm0, %v275_v46, 0.0 }
  0xba   :  { %v2959_v59 = vsub.f32 %v2157_v52, %v198_v31  ;;  %311 = vadd.xlane.f32.xlu1 %v310_v49  ;;  %356 = vadd.xlane.f32.xlu0 %v355_v60  ;;  %v170_v7 = vpop.xlane.xlu0 %169  ;;  %v358_v8 = vsel %vm89_vm0, %v276_v43, 0.0  ;;  %v2231_v43 = vld [vmem:[%s3666_s3 + $0x4] ss:$8 sps:$4 sm:$0xff]   ;;  %v2233_v60 = vld [vmem:[%s3666_s3] ss:$8 sps:$4 sm:$0xff]  }
  0xbb   :  { %v173_v21 = vpop.xlane.xlu1 %172  ;;  %v213_v51 = vmul.f32 0.015625, %v170_v7  ;;  %v261_v48 = vmul.f32 %v2955_v50, %v2955_v50  ;;  %978 = vmatpush1.bf16.msra.mxu0 %v2227_v11  ;;  %2218 = vmatpush1.bf16.msra.mxu1 %v2227_v11 }
  0xbc   :  { %v214_v36 = vmul.f32 0.015625, %v173_v21  ;;  %v262_v52 = vmul.f32 %v2959_v59, %v2959_v59  ;;  %979 = vmatprep.subr.bf16.mxu0 %v2228_v41  ;;  %2215 = vmatprep.subr.bf16.mxu1 %v2228_v41 }
  0xbd   :  { %v2975_v19 = vsub.f32 %v2188_v56, %v213_v51  ;;  %v313_v30 = vsel %vm89_vm0, %v261_v48, 0.0 }
  0xbe   :  { %v2979_v3 = vsub.f32 %v2189_v57, %v214_v36  ;;  %359 = vadd.xlane.f32.xlu1 %v358_v8  ;;  %314 = vadd.xlane.f32.xlu0 %v313_v30  ;;  %v128_v39 = vpop.xlane.xlu0 %127  ;;  %v316_v40 = vsel %vm89_vm0, %v262_v52, 0.0 }
  0xbf   :  { %v131_v26 = vpop.xlane.xlu1 %130  ;;  %v199_v56 = vmul.f32 0.015625, %v128_v39  ;;  %v277_v53 = vmul.f32 %v2975_v19, %v2975_v19  ;;  %980 = vmatpush1.bf16.msra.mxu0 %v2230_v45  ;;  %2219 = vmatpush1.bf16.msra.mxu1 %v2230_v45 }
  0xc0   :  { %v200_v44 = vmul.f32 0.015625, %v131_v26  ;;  %v278_v57 = vmul.f32 %v2979_v3, %v2979_v3  ;;  %981 = vmatprep.subr.bf16.mxu0 %v2231_v43  ;;  %2216 = vmatprep.subr.bf16.mxu1 %v2231_v43 }
  0xc1   :  { %v2995_v16 = vsub.f32 %v2160_v61, %v199_v56  ;;  %v361_v0 = vsel %vm89_vm0, %v277_v53, 0.0 }
  0xc2   :  { %v2999_v49 = vsub.f32 %v2161_v62, %v200_v44  ;;  %317 = vadd.xlane.f32.xlu1 %v316_v40  ;;  %362 = vadd.xlane.f32.xlu0 %v361_v0  ;;  %v176_v5 = vpop.xlane.xlu0 %175  ;;  %v364_v46 = vsel %vm89_vm0, %v278_v57, 0.0 }
  0xc3   :  { %v179_v31 = vpop.xlane.xlu1 %178  ;;  %v215_v61 = vmul.f32 0.015625, %v176_v5  ;;  %v263_v58 = vmul.f32 %v2995_v16, %v2995_v16  ;;  %982 = vmatpush1.bf16.msra.mxu0 %v2233_v60  ;;  %2220 = vmatpush1.bf16.msra.mxu1 %v2233_v60 }
  0xc4   :  { %v216_v47 = vmul.f32 0.015625, %v179_v31  ;;  %v264_v62 = vmul.f32 %v2999_v49, %v2999_v49 }
  0xc5   :  { %v3015_v7 = vsub.f32 %v2192_v9, %v215_v61  ;;  %v319_v8 = vsel %vm89_vm0, %v263_v58, 0.0 }
  0xc6   :  { %v3019_v21 = vsub.f32 %v2193_v10, %v216_v47  ;;  %365 = vadd.xlane.f32.xlu1 %v364_v46  ;;  %320 = vadd.xlane.f32.xlu0 %v319_v8  ;;  %v134_v15 = vpop.xlane.xlu0 %133  ;;  %v322_v36 = vsel %vm89_vm0, %v264_v62, 0.0  ;;  %v2570_v10 = vmov 0  }
  0xc7   :  { %v137_v51 = vpop.xlane.xlu1 %136  ;;  %v201_v48 = vmul.f32 0.015625, %v134_v15  ;;  %v279_v9 = vmul.f32 %v3015_v7, %v3015_v7  ;;  %999 = vmatprep.mubr.bf16.mxu0 %v2570_v10  ;;  %1079 = vmatprep.mubr.bf16.mxu1 %v2570_v10 }
  0xc8   :  { %v202_v52 = vmul.f32 0.015625, %v137_v51  ;;  %v280_v63 = vmul.f32 %v3019_v21, %v3019_v21 }
  0xc9   :  { %v3031_v11 = vsub.f32 %v2164_v20, %v201_v48  ;;  %v367_v39 = vsel %vm89_vm0, %v279_v9, 0.0 }
  0xca   :  { %v3035_v30 = vsub.f32 %v2165_v24, %v202_v52  ;;  %323 = vadd.xlane.f32.xlu1 %v322_v36  ;;  %368 = vadd.xlane.f32.xlu0 %v367_v39  ;;  %v182_v26 = vpop.xlane.xlu0 %181  ;;  %v370_v41 = vsel %vm89_vm0, %v280_v63, 0.0 }
  0xcb   :  { %v185_v40 = vpop.xlane.xlu1 %184  ;;  %v217_v56 = vmul.f32 0.015625, %v182_v26  ;;  %v265_v53 = vmul.f32 %v3031_v11, %v3031_v11 }
  0xcc   :  { %v218_v44 = vmul.f32 0.015625, %v185_v40  ;;  %v266_v20 = vmul.f32 %v3035_v30, %v3035_v30 }
  0xcd   :  { %v3045_v14 = vsub.f32 %v2196_v34, %v217_v56  ;;  %v325_v57 = vsel %vm89_vm0, %v265_v53, 0.0 }
  0xce   :  { %v3049_v24 = vsub.f32 %v2197_v35, %v218_v44  ;;  %371 = vadd.xlane.f32.xlu1 %v370_v41  ;;  %326 = vadd.xlane.f32.xlu0 %v325_v57  ;;  %v328_v45 = vsel %vm89_vm0, %v266_v20, 0.0 }
  0xcf   :  { %v281_v0 = vmul.f32 %v3045_v14, %v3045_v14 }
  0xd0   :  { %v282_v5 = vmul.f32 %v3049_v24, %v3049_v24 }
  0xd1   :  { %v373_v31 = vsel %vm89_vm0, %v281_v0, 0.0 }
  0xd2   :  { %329 = vadd.xlane.f32.xlu1 %v328_v45  ;;  %374 = vadd.xlane.f32.xlu0 %v373_v31  ;;  %v376_v25 = vsel %vm89_vm0, %v282_v5, 0.0  ;;  %v3062_v45 = vld [vmem:[%s3667_s1] ss:$0 sm:$0xff] }
  0xd6   :  { %377 = vadd.xlane.f32.xlu1 %v376_v25  ;;  %v3068_v25 = vld [vmem:[%s3668_s2] ss:$0 sm:$0xff] }
 0x11f   :  { %v285_v34 = vpop.xlane.xlu0 %284 }
 0x120   :  { %v379_v35 = vmul.f32 0.015625, %v285_v34 }
 0x122   :  { %v411_v46 = vadd.f32 1e-05, %v379_v35 }
 0x123   :  { %v288_v43 = vpop.xlane.xlu1 %287  ;;  %v333_v61 = vpop.xlane.xlu0 %332 }
 0x124   :  { %2250 = vrsqrt.f32 %v411_v46  ;;  %v380_v47 = vmul.f32 0.015625, %v288_v43  ;;  %v395_v58 = vmul.f32 0.015625, %v333_v61 }
 0x126   :  { %v412_v62 = vadd.f32 1e-05, %v380_v47  ;;  %v427_v60 = vadd.f32 1e-05, %v395_v58 }
 0x127   :  { %v336_v8 = vpop.xlane.xlu1 %335  ;;  %v291_v15 = vpop.xlane.xlu0 %290 }
 0x128   :  { %2252 = vrsqrt.f32 %v412_v62  ;;  %v396_v51 = vmul.f32 0.015625, %v336_v8  ;;  %v381_v36 = vmul.f32 0.015625, %v291_v15 }
 0x129   :  { %2254 = vrsqrt.f32 %v427_v60 }
 0x12a   :  { %v428_v48 = vadd.f32 1e-05, %v396_v51  ;;  %v413_v52 = vadd.f32 1e-05, %v381_v36 }
 0x12b   :  { %v294_v9 = vpop.xlane.xlu1 %293  ;;  %v339_v63 = vpop.xlane.xlu0 %338 }
 0x12c   :  { %2256 = vrsqrt.f32 %v428_v48  ;;  %v382_v39 = vmul.f32 0.015625, %v294_v9  ;;  %v397_v26 = vmul.f32 0.015625, %v339_v63 }
 0x12d   :  { %2258 = vrsqrt.f32 %v413_v52 }
 0x12e   :  { %v414_v40 = vadd.f32 1e-05, %v382_v39  ;;  %v429_v41 = vadd.f32 1e-05, %v397_v26 }
 0x12f   :  { %v342_v56 = vpop.xlane.xlu1 %341  ;;  %v297_v44 = vpop.xlane.xlu0 %296 }
 0x130   :  { %2260 = vrsqrt.f32 %v414_v40  ;;  %v398_v53 = vmul.f32 0.015625, %v342_v56  ;;  %v383_v20 = vmul.f32 0.015625, %v297_v44 }
 0x131   :  { %v2251_v57 = vpop.eup %2250  ;;  %2262 = vrsqrt.f32 %v429_v41 }
 0x132   :  { %v475_v0 = vmul.f32 %v2251_v57, %v2811_v54  ;;  %v430_v5 = vadd.f32 1e-05, %v398_v53  ;;  %v415_v31 = vadd.f32 1e-05, %v383_v20 }
 0x133   :  { %v300_v34 = vpop.xlane.xlu1 %299  ;;  %v345_v35 = vpop.xlane.xlu0 %344 }
 0x134   :  { %v514_v46 = vmul.f32 %v3062_v45, %v475_v0  ;;  %2264 = vrsqrt.f32 %v430_v5  ;;  %v384_v43 = vmul.f32 0.015625, %v300_v34  ;;  %v399_v61 = vmul.f32 0.015625, %v345_v35 }
 0x135   :  { %v2253_v47 = vpop.eup %2252  ;;  %2266 = vrsqrt.f32 %v415_v31 }
 0x136   :  { %v2255_v58 = vpop.eup %2254  ;;  %v553_v62 = vadd.f32 %v3068_v25, %v514_v46  ;;  %v476_v54 = vmul.f32 %v2253_v47, %v2823_v29  ;;  %v416_v60 = vadd.f32 1e-05, %v384_v43  ;;  %v431_v8 = vadd.f32 1e-05, %v399_v61 }
 0x137   :  { %v491_v15 = vmul.f32 %v2255_v58, %v2815_v55  ;;  %v348_v51 = vpop.xlane.xlu1 %347  ;;  %v303_v36 = vpop.xlane.xlu0 %302 }
 0x138   :  { %v2070_v48 = vpack.c.bf16 %v553_v62, %v553_v62  ;;  %v515_v52 = vmul.f32 %v3062_v45, %v476_v54  ;;  %2268 = vrsqrt.f32 %v416_v60  ;;  %v400_v9 = vmul.f32 0.015625, %v348_v51 }
 0x139   :  { %v2257_v63 = vpop.eup %2256  ;;  %v530_v39 = vmul.f32 %v3062_v45, %v491_v15  ;;  %2270 = vrsqrt.f32 %v431_v8  ;;  %v385_v26 = vmul.f32 0.015625, %v303_v36 }
 0x13a   :  { %v2259_v40 = vpop.eup %2258  ;;  %714 = vst.msk [vmem:[#allocation2] sm:$0xf] %vm713_vm1, %v2070_v48  ;;  %v554_v29 = vadd.f32 %v3068_v25, %v515_v52  ;;  %v492_v41 = vmul.f32 %v2257_v63, %v2827_v2  ;;  %v432_v55 = vadd.f32 1e-05, %v400_v9 }
 0x13b   :  { %v569_v56 = vadd.f32 %v3068_v25, %v530_v39  ;;  %v477_v44 = vmul.f32 %v2259_v40, %v2837_v1  ;;  %v417_v53 = vadd.f32 1e-05, %v385_v26  ;;  %v306_v20 = vpop.xlane.xlu1 %305  ;;  %v351_v57 = vpop.xlane.xlu0 %350 }
 0x13c   :  { %v2071_v0 = vpack.c.bf16 %v554_v29, %v554_v29  ;;  %v531_v5 = vmul.f32 %v3062_v45, %v492_v41  ;;  %2272 = vrsqrt.f32 %v432_v55  ;;  %v386_v31 = vmul.f32 0.015625, %v306_v20 }
 0x13d   :  { %v2261_v34 = vpop.eup %2260  ;;  %v2086_v35 = vpack.c.bf16 %v569_v56, %v569_v56  ;;  %v516_v46 = vmul.f32 %v3062_v45, %v477_v44  ;;  %2274 = vrsqrt.f32 %v417_v53  ;;  %v401_v43 = vmul.f32 0.015625, %v351_v57 }
 0x13e   :  { %v2263_v2 = vpop.eup %2262  ;;  %715 = vst.msk [vmem:[#allocation2 + $0x4] sm:$0xf] %vm713_vm1, %v2071_v0  ;;  %v570_v61 = vadd.f32 %v3068_v25, %v531_v5  ;;  %v478_v1 = vmul.f32 %v2261_v34, %v2841_v4  ;;  %v418_v47 = vadd.f32 1e-05, %v386_v31 }
 0x13f   :  { %730 = vst.msk [vmem:[#allocation2 + $0x40] sm:$0xf] %vm713_vm1, %v2086_v35  ;;  %v555_v58 = vadd.f32 %v3068_v25, %v516_v46  ;;  %v493_v62 = vmul.f32 %v2263_v2, %v2851_v6  ;;  %v433_v54 = vadd.f32 1e-05, %v401_v43  ;;  %v354_v60 = vpop.xlane.xlu1 %353  ;;  %v309_v8 = vpop.xlane.xlu0 %308 }
 0x140   :  { %v2087_v15 = vpack.c.bf16 %v570_v61, %v570_v61  ;;  %v517_v51 = vmul.f32 %v3062_v45, %v478_v1  ;;  %2276 = vrsqrt.f32 %v418_v47  ;;  %v402_v36 = vmul.f32 0.015625, %v354_v60 }
 0x141   :  { %v2265_v48 = vpop.eup %2264  ;;  %v2072_v52 = vpack.c.bf16 %v555_v58, %v555_v58  ;;  %v532_v9 = vmul.f32 %v3062_v45, %v493_v62  ;;  %2278 = vrsqrt.f32 %v433_v54  ;;  %v387_v4 = vmul.f32 0.015625, %v309_v8 }
 0x142   :  { %v2267_v63 = vpop.eup %2266  ;;  %731 = vst.msk [vmem:[#allocation2 + $0x44] sm:$0xf] %vm713_vm1, %v2087_v15  ;;  %v556_v39 = vadd.f32 %v3068_v25, %v517_v51  ;;  %v494_v6 = vmul.f32 %v2265_v48, %v2855_v12  ;;  %v434_v26 = vadd.f32 1e-05, %v402_v36 }
 0x143   :  { %716 = vst.msk [vmem:[#allocation2 + $0x8] sm:$0xf] %vm713_vm1, %v2072_v52  ;;  %v571_v40 = vadd.f32 %v3068_v25, %v532_v9  ;;  %v479_v29 = vmul.f32 %v2267_v63, %v2865_v13  ;;  %v419_v41 = vadd.f32 1e-05, %v387_v4  ;;  %v312_v55 = vpop.xlane.xlu1 %311  ;;  %v357_v56 = vpop.xlane.xlu0 %356 }
 0x144   :  { %v2073_v44 = vpack.c.bf16 %v556_v39, %v556_v39  ;;  %v533_v53 = vmul.f32 %v3062_v45, %v494_v6  ;;  %2280 = vrsqrt.f32 %v434_v26  ;;  %v388_v20 = vmul.f32 0.015625, %v312_v55 }
 0x145   :  { %v2269_v57 = vpop.eup %2268  ;;  %v2088_v0 = vpack.c.bf16 %v571_v40, %v571_v40  ;;  %v518_v5 = vmul.f32 %v3062_v45, %v479_v29  ;;  %2282 = vrsqrt.f32 %v419_v41  ;;  %v403_v12 = vmul.f32 0.015625, %v357_v56  ;;  %v2234_v31 = vld [vmem:[#allocation2] sm:$0xff]  }
 0x146   :  { %v2271_v34 = vpop.eup %2270  ;;  %717 = vst.msk [vmem:[#allocation2 + $0xc] sm:$0xf] %vm713_vm1, %v2073_v44  ;;  %v572_v13 = vadd.f32 %v3068_v25, %v533_v53  ;;  %v480_v35 = vmul.f32 %v2269_v57, %v2869_v17  ;;  %v420_v46 = vadd.f32 1e-05, %v388_v20  ;;  %1958 = vmatmul.mubr.msk.bf16.vlgmr.msra.gmra.mxu0 %vm89_vm0, %v2234_v31 }
 0x147   :  { %732 = vst.msk [vmem:[#allocation2 + $0x48] sm:$0xf] %vm713_vm1, %v2088_v0  ;;  %v557_v43 = vadd.f32 %v3068_v25, %v518_v5  ;;  %v495_v2 = vmul.f32 %v2271_v34, %v2879_v18  ;;  %v435_v61 = vadd.f32 1e-05, %v403_v12  ;;  %v360_v1 = vpop.xlane.xlu1 %359  ;;  %v315_v47 = vpop.xlane.xlu0 %314  ;;  %1009 = vmatprep.mubr.bf16.mxu0 %v2570_v10 }
 0x148   :  { %v2089_v58 = vpack.c.bf16 %v572_v13, %v572_v13  ;;  %v519_v62 = vmul.f32 %v3062_v45, %v480_v35  ;;  %2284 = vrsqrt.f32 %v420_v46  ;;  %v404_v54 = vmul.f32 0.015625, %v360_v1 }
 0x149   :  { %v2273_v17 = vpop.eup %2272  ;;  %v2074_v60 = vpack.c.bf16 %v557_v43, %v557_v43  ;;  %v534_v8 = vmul.f32 %v3062_v45, %v495_v2  ;;  %2286 = vrsqrt.f32 %v435_v61  ;;  %v389_v15 = vmul.f32 0.015625, %v315_v47  ;;  %v2235_v51 = vld [vmem:[#allocation2 + $0x40] sm:$0xff]  }
 0x14a   :  { %v2275_v18 = vpop.eup %2274  ;;  %733 = vst.msk [vmem:[#allocation2 + $0x4c] sm:$0xf] %vm713_vm1, %v2089_v58  ;;  %v558_v36 = vadd.f32 %v3068_v25, %v519_v62  ;;  %v496_v48 = vmul.f32 %v2273_v17, %v2883_v22  ;;  %v436_v52 = vadd.f32 1e-05, %v404_v54  ;;  %1966 = vmatmul.mubr.msk.bf16.vlgmr.msra.gmra.mxu1 %vm89_vm0, %v2235_v51 }
 0x14b   :  { %718 = vst.msk [vmem:[#allocation2 + $0x10] sm:$0xf] %vm713_vm1, %v2074_v60  ;;  %v573_v9 = vadd.f32 %v3068_v25, %v534_v8  ;;  %v481_v4 = vmul.f32 %v2275_v18, %v2893_v23  ;;  %v421_v63 = vadd.f32 1e-05, %v389_v15  ;;  %v318_v39 = vpop.xlane.xlu1 %317  ;;  %v363_v6 = vpop.xlane.xlu0 %362  ;;  %1089 = vmatprep.mubr.bf16.mxu1 %v2570_v10 }
 0x14c   :  { %v2075_v26 = vpack.c.bf16 %v558_v36, %v558_v36  ;;  %v535_v40 = vmul.f32 %v3062_v45, %v496_v48  ;;  %2288 = vrsqrt.f32 %v436_v52  ;;  %v390_v29 = vmul.f32 0.015625, %v318_v39 }
 0x14d   :  { %v2277_v22 = vpop.eup %2276  ;;  %v2090_v41 = vpack.c.bf16 %v573_v9, %v573_v9  ;;  %v520_v55 = vmul.f32 %v3062_v45, %v481_v4  ;;  %2290 = vrsqrt.f32 %v421_v63  ;;  %v405_v56 = vmul.f32 0.015625, %v363_v6  ;;  %v2236_v44 = vld [vmem:[#allocation2 + $0x8] sm:$0xff]  }
 0x14e   :  { %v2279_v23 = vpop.eup %2278  ;;  %719 = vst.msk [vmem:[#allocation2 + $0x14] sm:$0xf] %vm713_vm1, %v2075_v26  ;;  %v574_v53 = vadd.f32 %v3068_v25, %v535_v40  ;;  %v482_v20 = vmul.f32 %v2277_v22, %v2897_v27  ;;  %v422_v57 = vadd.f32 1e-05, %v390_v29  ;;  %1959 = vmatmul.mubr.msk.bf16.gmra.mxu0 %vm89_vm0, %v2236_v44 }
 0x14f   :  { %734 = vst.msk [vmem:[#allocation2 + $0x50] sm:$0xf] %vm713_vm1, %v2090_v41  ;;  %v559_v0 = vadd.f32 %v3068_v25, %v520_v55  ;;  %v497_v5 = vmul.f32 %v2279_v23, %v2907_v28  ;;  %v437_v12 = vadd.f32 1e-05, %v405_v56  ;;  %v366_v31 = vpop.xlane.xlu1 %365  ;;  %v321_v34 = vpop.xlane.xlu0 %320  ;;  %1019 = vmatprep.mubr.bf16.mxu0 %v2570_v10 }
 0x150   :  { %v2091_v13 = vpack.c.bf16 %v574_v53, %v574_v53  ;;  %v521_v35 = vmul.f32 %v3062_v45, %v482_v20  ;;  %2292 = vrsqrt.f32 %v422_v57  ;;  %v406_v46 = vmul.f32 0.015625, %v366_v31 }
 0x151   :  { %v2281_v27 = vpop.eup %2280  ;;  %v2076_v43 = vpack.c.bf16 %v559_v0, %v559_v0  ;;  %v536_v2 = vmul.f32 %v3062_v45, %v497_v5  ;;  %2294 = vrsqrt.f32 %v437_v12  ;;  %v391_v61 = vmul.f32 0.015625, %v321_v34  ;;  %v2237_v1 = vld [vmem:[#allocation2 + $0x48] sm:$0xff]  }
 0x152   :  { %v2283_v28 = vpop.eup %2282  ;;  %735 = vst.msk [vmem:[#allocation2 + $0x54] sm:$0xf] %vm713_vm1, %v2091_v13  ;;  %v560_v47 = vadd.f32 %v3068_v25, %v521_v35  ;;  %v498_v58 = vmul.f32 %v2281_v27, %v2911_v32  ;;  %v438_v62 = vadd.f32 1e-05, %v406_v46  ;;  %1967 = vmatmul.mubr.msk.bf16.gmra.mxu1 %vm89_vm0, %v2237_v1 }
 0x153   :  { %720 = vst.msk [vmem:[#allocation2 + $0x18] sm:$0xf] %vm713_vm1, %v2076_v43  ;;  %v575_v54 = vadd.f32 %v3068_v25, %v536_v2  ;;  %v483_v17 = vmul.f32 %v2283_v28, %v2921_v33  ;;  %v423_v60 = vadd.f32 1e-05, %v391_v61  ;;  %v324_v8 = vpop.xlane.xlu1 %323  ;;  %v369_v15 = vpop.xlane.xlu0 %368  ;;  %1099 = vmatprep.mubr.bf16.mxu1 %v2570_v10 }
 0x154   :  { %v2077_v51 = vpack.c.bf16 %v560_v47, %v560_v47  ;;  %v537_v18 = vmul.f32 %v3062_v45, %v498_v58  ;;  %2296 = vrsqrt.f32 %v438_v62  ;;  %v392_v36 = vmul.f32 0.015625, %v324_v8 }
 0x155   :  { %v2285_v32 = vpop.eup %2284  ;;  %v2092_v48 = vpack.c.bf16 %v575_v54, %v575_v54  ;;  %v522_v52 = vmul.f32 %v3062_v45, %v483_v17  ;;  %2298 = vrsqrt.f32 %v423_v60  ;;  %v407_v9 = vmul.f32 0.015625, %v369_v15  ;;  %v2238_v4 = vld [vmem:[#allocation2 + $0x10] sm:$0xff]  }
 0x156   :  { %v2287_v33 = vpop.eup %2286  ;;  %721 = vst.msk [vmem:[#allocation2 + $0x1c] sm:$0xf] %vm713_vm1, %v2077_v51  ;;  %v576_v63 = vadd.f32 %v3068_v25, %v537_v18  ;;  %v484_v39 = vmul.f32 %v2285_v32, %v2925_v37  ;;  %v424_v6 = vadd.f32 1e-05, %v392_v36  ;;  %1960 = vmatmul.mubr.msk.bf16.gmra.mxu0 %vm89_vm0, %v2238_v4 }
 0x157   :  { %736 = vst.msk [vmem:[#allocation2 + $0x58] sm:$0xf] %vm713_vm1, %v2092_v48  ;;  %v561_v26 = vadd.f32 %v3068_v25, %v522_v52  ;;  %v499_v40 = vmul.f32 %v2287_v33, %v2935_v38  ;;  %v439_v29 = vadd.f32 1e-05, %v407_v9  ;;  %v372_v22 = vpop.xlane.xlu1 %371  ;;  %v327_v41 = vpop.xlane.xlu0 %326  ;;  %1029 = vmatprep.mubr.bf16.mxu0 %v2570_v10 }
 0x158   :  { %v2093_v55 = vpack.c.bf16 %v576_v63, %v576_v63  ;;  %v523_v56 = vmul.f32 %v3062_v45, %v484_v39  ;;  %2300 = vrsqrt.f32 %v424_v6  ;;  %v408_v44 = vmul.f32 0.015625, %v372_v22 }
 0x159   :  { %v2289_v37 = vpop.eup %2288  ;;  %v2078_v23 = vpack.c.bf16 %v561_v26, %v561_v26  ;;  %v538_v53 = vmul.f32 %v3062_v45, %v499_v40  ;;  %2302 = vrsqrt.f32 %v439_v29  ;;  %v393_v20 = vmul.f32 0.015625, %v327_v41  ;;  %v2239_v57 = vld [vmem:[#allocation2 + $0x50] sm:$0xff]  }
 0x15a   :  { %v2291_v38 = vpop.eup %2290  ;;  %737 = vst.msk [vmem:[#allocation2 + $0x5c] sm:$0xf] %vm713_vm1, %v2093_v55  ;;  %v562_v0 = vadd.f32 %v3068_v25, %v523_v56  ;;  %v500_v5 = vmul.f32 %v2289_v37, %v2939_v42  ;;  %v440_v12 = vadd.f32 1e-05, %v408_v44  ;;  %1968 = vmatmul.mubr.msk.bf16.gmra.mxu1 %vm89_vm0, %v2239_v57 }
 0x15b   :  { %722 = vst.msk [vmem:[#allocation2 + $0x20] sm:$0xf] %vm713_vm1, %v2078_v23  ;;  %v577_v31 = vadd.f32 %v3068_v25, %v538_v53  ;;  %v485_v34 = vmul.f32 %v2291_v38, %v2955_v50  ;;  %v425_v13 = vadd.f32 1e-05, %v393_v20  ;;  %v330_v35 = vpop.xlane.xlu1 %329  ;;  %v375_v46 = vpop.xlane.xlu0 %374  ;;  %1109 = vmatprep.mubr.bf16.mxu1 %v2570_v10 }
 0x15c   :  { %v2079_v27 = vpack.c.bf16 %v562_v0, %v562_v0  ;;  %v539_v43 = vmul.f32 %v3062_v45, %v500_v5  ;;  %2304 = vrsqrt.f32 %v440_v12  ;;  %v394_v2 = vmul.f32 0.015625, %v330_v35 }
 0x15d   :  { %v2293_v42 = vpop.eup %2292  ;;  %v2094_v61 = vpack.c.bf16 %v577_v31, %v577_v31  ;;  %v524_v1 = vmul.f32 %v3062_v45, %v485_v34  ;;  %2306 = vrsqrt.f32 %v425_v13  ;;  %v409_v28 = vmul.f32 0.015625, %v375_v46  ;;  %v2240_v47 = vld [vmem:[#allocation2 + $0x18] sm:$0xff]  }
 0x15e   :  { %v2295_v50 = vpop.eup %2294  ;;  %723 = vst.msk [vmem:[#allocation2 + $0x24] sm:$0xf] %vm713_vm1, %v2079_v27  ;;  %v578_v58 = vadd.f32 %v3068_v25, %v539_v43  ;;  %v486_v62 = vmul.f32 %v2293_v42, %v2959_v59  ;;  %v426_v54 = vadd.f32 1e-05, %v394_v2  ;;  %1961 = vmatmul.mubr.msk.bf16.gmra.mxu0 %vm89_vm0, %v2240_v47 }
 0x15f   :  { %738 = vst.msk [vmem:[#allocation2 + $0x60] sm:$0xf] %vm713_vm1, %v2094_v61  ;;  %v563_v17 = vadd.f32 %v3068_v25, %v524_v1  ;;  %v501_v60 = vmul.f32 %v2295_v50, %v2975_v19  ;;  %v441_v8 = vadd.f32 1e-05, %v409_v28  ;;  %v378_v15 = vpop.xlane.xlu1 %377  ;;  %1039 = vmatprep.mubr.bf16.mxu0 %v2570_v10 }
 0x160   :  { %v2095_v51 = vpack.c.bf16 %v578_v58, %v578_v58  ;;  %v525_v18 = vmul.f32 %v3062_v45, %v486_v62  ;;  %2308 = vrsqrt.f32 %v426_v54  ;;  %v410_v36 = vmul.f32 0.015625, %v378_v15 }
 0x161   :  { %v2297_v32 = vpop.eup %2296  ;;  %v2080_v59 = vpack.c.bf16 %v563_v17, %v563_v17  ;;  %v540_v48 = vmul.f32 %v3062_v45, %v501_v60  ;;  %2310 = vrsqrt.f32 %v441_v8  ;;  %v2241_v52 = vld [vmem:[#allocation2 + $0x58] sm:$0xff]  }
 0x162   :  { %v2299_v9 = vpop.eup %2298  ;;  %739 = vst.msk [vmem:[#allocation2 + $0x64] sm:$0xf] %vm713_vm1, %v2095_v51  ;;  %v564_v19 = vadd.f32 %v3068_v25, %v525_v18  ;;  %v502_v4 = vmul.f32 %v2297_v32, %v2979_v3  ;;  %v442_v33 = vadd.f32 1e-05, %v410_v36  ;;  %1969 = vmatmul.mubr.msk.bf16.gmra.mxu1 %vm89_vm0, %v2241_v52 }
 0x163   :  { %724 = vst.msk [vmem:[#allocation2 + $0x28] sm:$0xf] %vm713_vm1, %v2080_v59  ;;  %v579_v63 = vadd.f32 %v3068_v25, %v540_v48  ;;  %v487_v39 = vmul.f32 %v2299_v9, %v2995_v16  ;;  %1119 = vmatprep.mubr.bf16.mxu1 %v2570_v10  ;;  %v786_v59 = vld [vmem:[%s3669_s4] sm:$0x3] }
 0x164   :  { %v2081_v6 = vpack.c.bf16 %v564_v19, %v564_v19  ;;  %v541_v26 = vmul.f32 %v3062_v45, %v502_v4  ;;  %2312 = vrsqrt.f32 %v442_v33 }
 0x165   :  { %v2301_v40 = vpop.eup %2300  ;;  %v2096_v29 = vpack.c.bf16 %v579_v63, %v579_v63  ;;  %v526_v22 = vmul.f32 %v3062_v45, %v487_v39  ;;  %v2242_v3 = vld [vmem:[#allocation2 + $0x20] sm:$0xff]  }
 0x166   :  { %v2303_v41 = vpop.eup %2302  ;;  %725 = vst.msk [vmem:[#allocation2 + $0x2c] sm:$0xf] %vm713_vm1, %v2081_v6  ;;  %v580_v55 = vadd.f32 %v3068_v25, %v541_v26  ;;  %v488_v16 = vmul.f32 %v2301_v40, %v2999_v49  ;;  %1962 = vmatmul.mubr.msk.bf16.gmra.mxu0 %vm89_vm0, %v2242_v3 }
 0x167   :  { %740 = vst.msk [vmem:[#allocation2 + $0x68] sm:$0xf] %vm713_vm1, %v2096_v29  ;;  %v565_v56 = vadd.f32 %v3068_v25, %v526_v22  ;;  %v503_v44 = vmul.f32 %v2303_v41, %v3015_v7  ;;  %1049 = vmatprep.mubr.bf16.mxu0 %v2570_v10 }
 0x168   :  { %v2097_v37 = vpack.c.bf16 %v580_v55, %v580_v55  ;;  %v527_v23 = vmul.f32 %v3062_v45, %v488_v16 }
 0x169   :  { %v2305_v53 = vpop.eup %2304  ;;  %v2082_v20 = vpack.c.bf16 %v565_v56, %v565_v56  ;;  %v542_v57 = vmul.f32 %v3062_v45, %v503_v44  ;;  %v2243_v38 = vld [vmem:[#allocation2 + $0x60] sm:$0xff]  }
 0x16a   :  { %v2307_v0 = vpop.eup %2306  ;;  %741 = vst.msk [vmem:[#allocation2 + $0x6c] sm:$0xf] %vm713_vm1, %v2097_v37  ;;  %v566_v49 = vadd.f32 %v3068_v25, %v527_v23  ;;  %v504_v5 = vmul.f32 %v2305_v53, %v3019_v21  ;;  %1970 = vmatmul.mubr.msk.bf16.gmra.mxu1 %vm89_vm0, %v2243_v38 }
 0x16b   :  { %726 = vst.msk [vmem:[#allocation2 + $0x30] sm:$0xf] %vm713_vm1, %v2082_v20  ;;  %v581_v7 = vadd.f32 %v3068_v25, %v542_v57  ;;  %v489_v12 = vmul.f32 %v2307_v0, %v3031_v11  ;;  %1129 = vmatprep.mubr.bf16.mxu1 %v2570_v10 }
 0x16c   :  { %v2083_v31 = vpack.c.bf16 %v566_v49, %v566_v49  ;;  %v543_v34 = vmul.f32 %v3062_v45, %v504_v5 }
 0x16d   :  { %v2309_v13 = vpop.eup %2308  ;;  %v2098_v35 = vpack.c.bf16 %v581_v7, %v581_v7  ;;  %v528_v46 = vmul.f32 %v3062_v45, %v489_v12  ;;  %v2244_v27 = vld [vmem:[#allocation2 + $0x28] sm:$0xff]  }
 0x16e   :  { %v2311_v43 = vpop.eup %2310  ;;  %727 = vst.msk [vmem:[#allocation2 + $0x34] sm:$0xf] %vm713_vm1, %v2083_v31  ;;  %v582_v21 = vadd.f32 %v3068_v25, %v543_v34  ;;  %v490_v2 = vmul.f32 %v2309_v13, %v3035_v30  ;;  %1963 = vmatmul.mubr.msk.bf16.gmra.mxu0 %vm89_vm0, %v2244_v27 }
 0x16f   :  { %742 = vst.msk [vmem:[#allocation2 + $0x70] sm:$0xf] %vm713_vm1, %v2098_v35  ;;  %v567_v11 = vadd.f32 %v3068_v25, %v528_v46  ;;  %v505_v42 = vmul.f32 %v2311_v43, %v3045_v14  ;;  %1059 = vmatprep.mubr.bf16.mxu0 %v2570_v10 }
 0x170   :  { %v2099_v61 = vpack.c.bf16 %v582_v21, %v582_v21  ;;  %v529_v1 = vmul.f32 %v3062_v45, %v490_v2 }
 0x171   :  { %v2313_v28 = vpop.eup %2312  ;;  %v2084_v47 = vpack.c.bf16 %v567_v11, %v567_v11  ;;  %v544_v50 = vmul.f32 %v3062_v45, %v505_v42  ;;  %v2245_v58 = vld [vmem:[#allocation2 + $0x68] sm:$0xff]  }
 0x172   :  { %743 = vst.msk [vmem:[#allocation2 + $0x74] sm:$0xf] %vm713_vm1, %v2099_v61  ;;  %v568_v30 = vadd.f32 %v3068_v25, %v529_v1  ;;  %v506_v62 = vmul.f32 %v2313_v28, %v3049_v24  ;;  %1971 = vmatmul.mubr.msk.bf16.gmra.mxu1 %vm89_vm0, %v2245_v58 }
 0x173   :  { %728 = vst.msk [vmem:[#allocation2 + $0x38] sm:$0xf] %vm713_vm1, %v2084_v47  ;;  %v583_v14 = vadd.f32 %v3068_v25, %v544_v50  ;;  %1139 = vmatprep.mubr.bf16.mxu1 %v2570_v10 }
 0x174   :  { %v2085_v54 = vpack.c.bf16 %v568_v30, %v568_v30  ;;  %v545_v17 = vmul.f32 %v3062_v45, %v506_v62 }
 0x175   :  { %v2100_v60 = vpack.c.bf16 %v583_v14, %v583_v14  ;;  %v2246_v8 = vld [vmem:[#allocation2 + $0x30] sm:$0xff]  }
 0x176   :  { %729 = vst.msk [vmem:[#allocation2 + $0x3c] sm:$0xf] %vm713_vm1, %v2085_v54  ;;  %v584_v15 = vadd.f32 %v3068_v25, %v545_v17  ;;  %1964 = vmatmul.mubr.msk.bf16.gmra.mxu0 %vm89_vm0, %v2246_v8  ;;  %v788_v25 = vlaneseq }
 0x177   :  { %744 = vst.msk [vmem:[#allocation2 + $0x78] sm:$0xf] %vm713_vm1, %v2100_v60  ;;  %1069 = vmatprep.mubr.bf16.mxu0 %v2570_v10 }
 0x178   :  { %v2101_v24 = vpack.c.bf16 %v584_v15, %v584_v15  ;;  %v789_v36 = vshrl.u32 %v788_v25, 7 }
 0x179   :  { %v2247_v51 = vld [vmem:[#allocation2 + $0x70] sm:$0xff]  }
 0x17a   :  { %745 = vst.msk [vmem:[#allocation2 + $0x7c] sm:$0xf] %vm713_vm1, %v2101_v24  ;;  %1972 = vmatmul.mubr.msk.bf16.gmra.mxu1 %vm89_vm0, %v2247_v51  ;;  %v790_v32 = vsub.s32 0, %v789_v36  ;;  %v794_v48 = vsub.s32 1, %v789_v36 }
 0x17b   :  { %1149 = vmatprep.mubr.bf16.mxu1 %v2570_v10 }
 0x17c   :  { %v3230_v52 = vrot.slane %v786_v59, %v790_v32  ;;  %v3232_v9 = vrot.slane %v786_v59, %v794_v48 }
 0x17d   :  { %v2248_v45 = vld [vmem:[#allocation2 + $0x38] sm:$0xff]  }
 0x17e   :  { %1965 = vmatmul.mubr.msk.bf16.gmra.mxu0 %vm89_vm0, %v2248_v45 }
 0x181   :  { %v2249_v18 = vld [vmem:[#allocation2 + $0x78] sm:$0xff]  }
 0x182   :  { %1973 = vmatmul.mubr.msk.bf16.gmra.mxu1 %vm89_vm0, %v2249_v18 }
 0x206   :  { %v1001_v19 = vpop.f32.mrf.mxu0 }
 0x207   :  { %v3235_v10 = vadd.f32 %v1001_v19, %v3230_v52 }
 0x208   :  { %v1003_v4 = vpop.f32.mrf.mxu0 }
 0x209   :  { %v1974_v33 = vmul.f32 -1.702, %v3235_v10  ;;  %v3239_v63 = vadd.f32 %v1003_v4, %v3232_v9 }
 0x20a   :  { %v1005_v39 = vpop.f32.mrf.mxu0  ;;  %v1081_v6 = vpop.f32.mrf.mxu1 }
 0x20b   :  { %v1288_v26 = vmul.f32 1.442695, %v1974_v33  ;;  %v1975_v40 = vmul.f32 -1.702, %v3239_v63  ;;  %v3243_v29 = vadd.f32 %v1005_v39, %v3230_v52  ;;  %v3246_v22 = vadd.f32 %v1081_v6, %v3230_v52 }
 0x20c   :  { %v1007_v3 = vpop.f32.mrf.mxu0  ;;  %v1083_v41 = vpop.f32.mrf.mxu1 }
 0x20d   :  { %2314 = vpow2.f32 %v1288_v26  ;;  %v1290_v55 = vmul.f32 1.442695, %v1975_v40  ;;  %v1976_v16 = vmul.f32 -1.702, %v3243_v29  ;;  %v2006_v56 = vmul.f32 -1.702, %v3246_v22 }
 0x20e   :  { %v3251_v44 = vadd.f32 %v1007_v3, %v3232_v9  ;;  %v3254_v37 = vadd.f32 %v1083_v41, %v3232_v9  ;;  %v1011_v23 = vpop.f32.mrf.mxu0  ;;  %v1085_v53 = vpop.f32.mrf.mxu1 }
 0x20f   :  { %2316 = vpow2.f32 %v1290_v55  ;;  %v1292_v20 = vmul.f32 1.442695, %v1976_v16  ;;  %v1352_v57 = vmul.f32 1.442695, %v2006_v56  ;;  %v3257_v38 = vadd.f32 %v1011_v23, %v3230_v52 }
 0x210   :  { %v1977_v0 = vmul.f32 -1.702, %v3251_v44  ;;  %v2007_v49 = vmul.f32 -1.702, %v3254_v37  ;;  %v3262_v5 = vadd.f32 %v1085_v53, %v3230_v52  ;;  %v1013_v7 = vpop.f32.mrf.mxu0  ;;  %v1087_v12 = vpop.f32.mrf.mxu1 }
 0x211   :  { %2318 = vpow2.f32 %v1292_v20  ;;  %v1978_v31 = vmul.f32 -1.702, %v3257_v38  ;;  %v3266_v34 = vadd.f32 %v1013_v7, %v3232_v9  ;;  %v3269_v13 = vadd.f32 %v1087_v12, %v3232_v9 }
 0x212   :  { %2320 = vpow2.f32 %v1352_v57  ;;  %v1294_v35 = vmul.f32 1.442695, %v1977_v0  ;;  %v1354_v46 = vmul.f32 1.442695, %v2007_v49  ;;  %v2008_v27 = vmul.f32 -1.702, %v3262_v5  ;;  %v1015_v43 = vpop.f32.mrf.mxu0  ;;  %v1091_v21 = vpop.f32.mrf.mxu1 }
 0x213   :  { %v1296_v2 = vmul.f32 1.442695, %v1978_v31  ;;  %v1979_v11 = vmul.f32 -1.702, %v3266_v34  ;;  %v2009_v42 = vmul.f32 -1.702, %v3269_v13  ;;  %v3275_v61 = vadd.f32 %v1015_v43, %v3230_v52 }
 0x214   :  { %2322 = vpow2.f32 %v1294_v35  ;;  %v1356_v1 = vmul.f32 1.442695, %v2008_v27  ;;  %v3278_v28 = vadd.f32 %v1091_v21, %v3230_v52  ;;  %v1017_v47 = vpop.f32.mrf.mxu0  ;;  %v1093_v50 = vpop.f32.mrf.mxu1 }
 0x215   :  { %2324 = vpow2.f32 %v1354_v46  ;;  %v1298_v58 = vmul.f32 1.442695, %v1979_v11  ;;  %v1358_v30 = vmul.f32 1.442695, %v2009_v42  ;;  %v1980_v62 = vmul.f32 -1.702, %v3275_v61 }
 0x216   :  { %2326 = vpow2.f32 %v1296_v2  ;;  %v2010_v14 = vmul.f32 -1.702, %v3278_v28  ;;  %v3283_v54 = vadd.f32 %v1017_v47, %v3232_v9  ;;  %v3286_v17 = vadd.f32 %v1093_v50, %v3232_v9  ;;  %v1021_v60 = vpop.f32.mrf.mxu0  ;;  %v1095_v8 = vpop.f32.mrf.mxu1 }
 0x217   :  { %2328 = vpow2.f32 %v1356_v1  ;;  %v1300_v15 = vmul.f32 1.442695, %v1980_v62  ;;  %v3289_v24 = vadd.f32 %v1021_v60, %v3230_v52  ;;  %v3292_v51 = vadd.f32 %v1095_v8, %v3230_v52 }
 0x218   :  { %2330 = vpow2.f32 %v1298_v58  ;;  %v1360_v45 = vmul.f32 1.442695, %v2010_v14  ;;  %v1981_v18 = vmul.f32 -1.702, %v3283_v54  ;;  %v2011_v25 = vmul.f32 -1.702, %v3286_v17  ;;  %v1023_v36 = vpop.f32.mrf.mxu0  ;;  %v1097_v32 = vpop.f32.mrf.mxu1 }
 0x219   :  { %2332 = vpow2.f32 %v1358_v30  ;;  %v1982_v59 = vmul.f32 -1.702, %v3289_v24  ;;  %v2012_v26 = vmul.f32 -1.702, %v3292_v51  ;;  %v3299_v41 = vadd.f32 %v1023_v36, %v3232_v9 }
 0x21a   :  { %v2315_v48 = vpop.eup %2314  ;;  %2334 = vpow2.f32 %v1300_v15  ;;  %v1302_v19 = vmul.f32 1.442695, %v1981_v18  ;;  %v1362_v4 = vmul.f32 1.442695, %v2011_v25  ;;  %v1025_v33 = vpop.f32.mrf.mxu0  ;;  %v3303_v12 = vadd.f32 %v1097_v32, %v3232_v9 }
 0x21b   :  { %v1101_v39 = vpop.f32.mrf.mxu1  ;;  %v1416_v6 = vadd.f32 1.0, %v2315_v48  ;;  %2336 = vpow2.f32 %v1360_v45  ;;  %v1304_v3 = vmul.f32 1.442695, %v1982_v59  ;;  %v1364_v57 = vmul.f32 1.442695, %v2012_v26 }
 0x21c   :  { %v2317_v40 = vpop.eup %2316  ;;  %2338 = vpow2.f32 %v1302_v19  ;;  %v1027_v55 = vpop.f32.mrf.mxu0  ;;  %v1983_v7 = vmul.f32 -1.702, %v3299_v41  ;;  %v3306_v46 = vadd.f32 %v1025_v33, %v3230_v52  ;;  %v3309_v27 = vadd.f32 %v1101_v39, %v3230_v52 }
 0x21d   :  { %v1103_v16 = vpop.f32.mrf.mxu1  ;;  %2340 = vrcp.f32 %v1416_v6  ;;  %v1417_v56 = vadd.f32 1.0, %v2317_v40  ;;  %v3312_v2 = vadd.f32 %v1027_v55, %v3232_v9  ;;  %v2013_v30 = vmul.f32 -1.702, %v3303_v12 }
 0x21e   :  { %v2319_v23 = vpop.eup %2318  ;;  %2342 = vpow2.f32 %v1362_v4  ;;  %v1031_v31 = vpop.f32.mrf.mxu0  ;;  %v1306_v58 = vmul.f32 1.442695, %v1983_v7  ;;  %v1984_v8 = vmul.f32 -1.702, %v3306_v46  ;;  %v2014_v15 = vmul.f32 -1.702, %v3309_v27 }
 0x21f   :  { %v2321_v53 = vpop.eup %2320  ;;  %2344 = vrcp.f32 %v1417_v56  ;;  %v1418_v20 = vadd.f32 1.0, %v2319_v23  ;;  %v1105_v0 = vpop.f32.mrf.mxu1  ;;  %v1985_v25 = vmul.f32 -1.702, %v3312_v2  ;;  %v3319_v36 = vadd.f32 %v1103_v16, %v3232_v9 }
 0x220   :  { %v1448_v49 = vadd.f32 1.0, %v2321_v53  ;;  %2346 = vpow2.f32 %v1304_v3  ;;  %v1033_v62 = vpop.f32.mrf.mxu0  ;;  %v3322_v48 = vadd.f32 %v1031_v31, %v3230_v52  ;;  %v3325_v19 = vadd.f32 %v1105_v0, %v3230_v52 }
 0x221   :  { %v2323_v35 = vpop.eup %2322  ;;  %2348 = vrcp.f32 %v1418_v20  ;;  %v1107_v1 = vpop.f32.mrf.mxu1  ;;  %v1366_v6 = vmul.f32 1.442695, %v2013_v30  ;;  %v3328_v26 = vadd.f32 %v1033_v62, %v3232_v9  ;;  %v1308_v16 = vmul.f32 1.442695, %v1984_v8 }
 0x222   :  { %v2325_v43 = vpop.eup %2324  ;;  %2350 = vrcp.f32 %v1448_v49  ;;  %v1419_v21 = vadd.f32 1.0, %v2323_v35  ;;  %v1035_v40 = vpop.f32.mrf.mxu0  ;;  %v1368_v56 = vmul.f32 1.442695, %v2014_v15  ;;  %v2015_v20 = vmul.f32 -1.702, %v3319_v36 }
 0x223   :  { %v2327_v11 = vpop.eup %2326  ;;  %v1449_v42 = vadd.f32 1.0, %v2325_v43  ;;  %2352 = vpow2.f32 %v1364_v57  ;;  %v1111_v4 = vpop.f32.mrf.mxu1  ;;  %v3332_v57 = vadd.f32 %v1107_v1, %v3232_v9  ;;  %v1310_v49 = vmul.f32 1.442695, %v1985_v25 }
 0x224   :  { %v2329_v47 = vpop.eup %2328  ;;  %2354 = vrcp.f32 %v1419_v21  ;;  %v1420_v50 = vadd.f32 1.0, %v2327_v11  ;;  %v1986_v7 = vmul.f32 -1.702, %v3322_v48  ;;  %v2016_v31 = vmul.f32 -1.702, %v3325_v19 }
 0x225   :  { %v2331_v14 = vpop.eup %2330  ;;  %2356 = vrcp.f32 %v1449_v42  ;;  %v1450_v60 = vadd.f32 1.0, %v2329_v47  ;;  %v1113_v35 = vpop.f32.mrf.mxu1  ;;  %v1987_v11 = vmul.f32 -1.702, %v3328_v26  ;;  %v3338_v42 = vadd.f32 %v1035_v40, %v3230_v52 }
 0x226   :  { %v2333_v45 = vpop.eup %2332  ;;  %2358 = vrcp.f32 %v1420_v50  ;;  %v1421_v18 = vadd.f32 1.0, %v2331_v14  ;;  %v1037_v47 = vpop.f32.mrf.mxu0  ;;  %v3343_v62 = vadd.f32 %v1111_v4, %v3230_v52  ;;  %v1370_v8 = vmul.f32 1.442695, %v2015_v20 }
 0x227   :  { %v2335_v32 = vpop.eup %2334  ;;  %2360 = vrcp.f32 %v1450_v60  ;;  %v1451_v59 = vadd.f32 1.0, %v2333_v45  ;;  %v2017_v15 = vmul.f32 -1.702, %v3332_v57  ;;  %v1312_v25 = vmul.f32 1.442695, %v1986_v7 }
 0x228   :  { %v2337_v33 = vpop.eup %2336  ;;  %2362 = vrcp.f32 %v1421_v18  ;;  %v1422_v39 = vadd.f32 1.0, %v2335_v32  ;;  %v1372_v32 = vmul.f32 1.442695, %v2016_v31  ;;  %v1041_v4 = vpop.f32.mrf.mxu0 }
 0x229   :  { %v2339_v3 = vpop.eup %2338  ;;  %2364 = vrcp.f32 %v1451_v59  ;;  %v1452_v55 = vadd.f32 1.0, %v2337_v33  ;;  %v1115_v59 = vpop.f32.mrf.mxu1  ;;  %v1374_v20 = vmul.f32 1.442695, %v2017_v15 }
 0x22a   :  { %v2341_v23 = vpop.eup %2340  ;;  %2366 = vrcp.f32 %v1422_v39  ;;  %v1423_v53 = vadd.f32 1.0, %v2339_v3  ;;  %v3355_v3 = vadd.f32 %v1113_v35, %v3232_v9 }
 0x22b   :  { %v2343_v0 = vpop.eup %2342  ;;  %2368 = vrcp.f32 %v1452_v55  ;;  %v1608_v1 = vmul.f32 %v2341_v23, %v3235_v10  ;;  %v1314_v10 = vmul.f32 1.442695, %v1987_v11 }
 0x22c   :  { %v2345_v43 = vpop.eup %2344  ;;  %2370 = vrcp.f32 %v1423_v53  ;;  %v1453_v21 = vadd.f32 1.0, %v2343_v0 }
 0x22d   :  { %v2347_v50 = vpop.eup %2346  ;;  %v1609_v30 = vmul.f32 %v2345_v43, %v3239_v63  ;;  %2372 = vpow2.f32 %v1306_v58  ;;  %v1988_v63 = vmul.f32 -1.702, %v3338_v42  ;;  %v3348_v58 = vadd.f32 %v1037_v47, %v3232_v9  ;;  %v1117_v43 = vpop.f32.mrf.mxu1 }
 0x22e   :  { %v2349_v14 = vpop.eup %2348  ;;  %2374 = vrcp.f32 %v1453_v21  ;;  %v1424_v60 = vadd.f32 1.0, %v2347_v50  ;;  %v1043_v47 = vpop.f32.mrf.mxu0 }
 0x22f   :  { %v2351_v45 = vpop.eup %2350  ;;  %v2102_v18 = vpack.c.bf16 %v1609_v30, %v1608_v1  ;;  %2376 = vpow2.f32 %v1366_v6  ;;  %v2018_v6 = vmul.f32 -1.702, %v3343_v62  ;;  %v1610_v23 = vmul.f32 %v2349_v14, %v3243_v29 }
 0x230   :  { %v2353_v33 = vpop.eup %2352  ;;  %2378 = vrcp.f32 %v1424_v60  ;;  %v1640_v7 = vmul.f32 %v2351_v45, %v3246_v22  ;;  %v1316_v11 = vmul.f32 1.442695, %v1988_v63  ;;  %v1989_v29 = vmul.f32 -1.702, %v3348_v58  ;;  %v1121_v45 = vpop.f32.mrf.mxu1 }
 0x231   :  { %v2355_v39 = vpop.eup %2354  ;;  %1864 = vst [vmem:[%s3670_s5] sm:$0xff] %v2102_v18  ;;  %v1454_v40 = vadd.f32 1.0, %v2353_v33  ;;  %2380 = vpow2.f32 %v1308_v16  ;;  %v3362_v16 = vadd.f32 %v1041_v4, %v3230_v52  ;;  %v1376_v50 = vmul.f32 1.442695, %v2018_v6 }
 0x232   :  { %v2357_v55 = vpop.eup %2356  ;;  %v1611_v53 = vmul.f32 %v2355_v39, %v3251_v44  ;;  %2382 = vpow2.f32 %v1368_v56  ;;  %v2019_v22 = vmul.f32 -1.702, %v3355_v3  ;;  %v3390_v6 = vadd.f32 %v1043_v47, %v3232_v9 }
 0x233   :  { %v2359_v0 = vpop.eup %2358  ;;  %v1641_v31 = vmul.f32 %v2357_v55, %v3254_v37  ;;  %2384 = vrcp.f32 %v1454_v40  ;;  %v1990_v15 = vmul.f32 -1.702, %v3362_v16  ;;  %v1123_v55 = vpop.f32.mrf.mxu1  ;;  %v3406_v47 = vadd.f32 %v1121_v45, %v3230_v52 }
 0x234   :  { %v2361_v21 = vpop.eup %2360  ;;  %v2103_v35 = vpack.c.bf16 %v1611_v53, %v1610_v23  ;;  %2386 = vpow2.f32 %v1310_v49  ;;  %v1612_v37 = vmul.f32 %v2359_v0, %v3257_v38  ;;  %v3372_v49 = vadd.f32 %v1115_v59, %v3230_v52 }
 0x235   :  { %v2363_v44 = vpop.eup %2362  ;;  %v2118_v56 = vpack.c.bf16 %v1641_v31, %v1640_v7  ;;  %2388 = vpow2.f32 %v1370_v8  ;;  %v1642_v60 = vmul.f32 %v2361_v21, %v3262_v5  ;;  %v1378_v63 = vmul.f32 1.442695, %v2019_v22 }
 0x236   :  { %v2365_v1 = vpop.eup %2364  ;;  %1865 = vst [vmem:[%s3670_s5 + $0x8] sm:$0xff] %v2103_v35  ;;  %v1613_v30 = vmul.f32 %v2363_v44, %v3266_v34  ;;  %2390 = vpow2.f32 %v1312_v25  ;;  %v1318_v34 = vmul.f32 1.442695, %v1989_v29  ;;  %v1045_v25 = vpop.f32.mrf.mxu0  ;;  %v1320_v40 = vmul.f32 1.442695, %v1990_v15 }
 0x237   :  { %v2367_v14 = vpop.eup %2366  ;;  %1880 = vst [vmem:[%s3670_s5 + $0x80] sm:$0xff] %v2118_v56  ;;  %v1643_v8 = vmul.f32 %v2365_v1, %v3269_v13  ;;  %2392 = vpow2.f32 %v1372_v32  ;;  %v2020_v32 = vmul.f32 -1.702, %v3372_v49  ;;  %v3400_v35 = vadd.f32 %v1117_v43, %v3232_v9  ;;  %v1125_v44 = vpop.f32.mrf.mxu1 }
 0x238   :  { %v2369_v38 = vpop.eup %2368  ;;  %v2104_v18 = vpack.c.bf16 %v1613_v30, %v1612_v37  ;;  %2394 = vpow2.f32 %v1314_v10  ;;  %v1614_v5 = vmul.f32 %v2367_v14, %v3275_v61  ;;  %v1991_v43 = vmul.f32 -1.702, %v3390_v6 }
 0x239   :  { %v2371_v59 = vpop.eup %2370  ;;  %v2119_v33 = vpack.c.bf16 %v1643_v8, %v1642_v60  ;;  %2396 = vpow2.f32 %v1374_v20  ;;  %v1644_v61 = vmul.f32 %v2369_v38, %v3278_v28  ;;  %v1047_v20 = vpop.f32.mrf.mxu0  ;;  %v3403_v28 = vadd.f32 %v1045_v25, %v3230_v52 }
 0x23a   :  { %v2373_v4 = vpop.eup %2372  ;;  %1866 = vst [vmem:[%s3670_s5 + $0x10] sm:$0xff] %v2104_v18  ;;  %v1615_v13 = vmul.f32 %v2371_v59, %v3283_v54  ;;  %2398 = vpow2.f32 %v1316_v11  ;;  %v1380_v29 = vmul.f32 1.442695, %v2020_v32  ;;  %v3413_v22 = vadd.f32 %v1047_v20, %v3232_v9  ;;  %v1127_v18 = vpop.f32.mrf.mxu1 }
 0x23b   :  { %v2375_v39 = vpop.eup %2374  ;;  %1881 = vst [vmem:[%s3670_s5 + $0x88] sm:$0xff] %v2119_v33  ;;  %v1425_v10 = vadd.f32 1.0, %v2373_v4  ;;  %2400 = vpow2.f32 %v1376_v50  ;;  %v1051_v1 = vpop.f32.mrf.mxu0  ;;  %v2021_v60 = vmul.f32 -1.702, %v3400_v35  ;;  %v1992_v8 = vmul.f32 -1.702, %v3403_v28 }
 0x23c   :  { %v2377_v23 = vpop.eup %2376  ;;  %v2105_v53 = vpack.c.bf16 %v1615_v13, %v1614_v5  ;;  %v1645_v54 = vmul.f32 %v2375_v39, %v3286_v17  ;;  %2402 = vpow2.f32 %v1318_v34  ;;  %v2022_v38 = vmul.f32 -1.702, %v3406_v47 }
 0x23d   :  { %v3394_v0 = vpop.eup %2378  ;;  %2404 = vrcp.f32 %v1425_v10  ;;  %v1455_v7 = vadd.f32 1.0, %v2377_v23  ;;  %v1322_v59 = vmul.f32 1.442695, %v1991_v43  ;;  %v1993_v33 = vmul.f32 -1.702, %v3413_v22 }
 0x23e   :  { %v2381_v31 = vpop.eup %2380  ;;  %1867 = vst [vmem:[%s3670_s5 + $0x18] sm:$0xff] %v2105_v53  ;;  %v2120_v21 = vpack.c.bf16 %v1645_v54, %v1644_v61  ;;  %2406 = vpow2.f32 %v1378_v63  ;;  %v1053_v63 = vpop.f32.mrf.mxu0  ;;  %v3420_v13 = vadd.f32 %v1123_v55, %v3232_v9  ;;  %v3423_v32 = vadd.f32 %v1051_v1, %v3230_v52 }
 0x23f   :  { %v2383_v17 = vpop.eup %2382  ;;  %2408 = vrcp.f32 %v1455_v7  ;;  %v1426_v11 = vadd.f32 1.0, %v2381_v31  ;;  %v1324_v23 = vmul.f32 1.442695, %v1992_v8  ;;  %v3425_v54 = vmul.f32 1.442695, %v2022_v38  ;;  %v1131_v7 = vpop.f32.mrf.mxu1 }
 0x240   :  { %v2385_v56 = vpop.eup %2384  ;;  %1882 = vst [vmem:[%s3670_s5 + $0x90] sm:$0xff] %v2120_v21  ;;  %v1456_v50 = vadd.f32 1.0, %v2383_v17  ;;  %2410 = vpow2.f32 %v1320_v40  ;;  %v1382_v40 = vmul.f32 1.442695, %v2021_v60  ;;  %v3428_v20 = vadd.f32 %v1125_v44, %v3230_v52 }
 0x241   :  { %v2387_v37 = vpop.eup %2386  ;;  %2412 = vrcp.f32 %v1426_v11  ;;  %v3430_v21 = vmul.f32 1.442695, %v1993_v33  ;;  %v3433_v17 = vadd.f32 %v1053_v63, %v3232_v9  ;;  %v1055_v11 = vpop.f32.mrf.mxu0  ;;  %v2023_v43 = vmul.f32 -1.702, %v3420_v13 }
 0x242   :  { %v2389_v30 = vpop.eup %2388  ;;  %2414 = vrcp.f32 %v1456_v50  ;;  %v1427_v14 = vadd.f32 1.0, %v2387_v37  ;;  %v1994_v1 = vmul.f32 -1.702, %v3423_v32  ;;  %v1616_v44 = vmul.f32 %v3394_v0, %v3289_v24  ;;  %v1133_v38 = vpop.f32.mrf.mxu1 }
 0x243   :  { %v2391_v15 = vpop.eup %2390  ;;  %v1457_v45 = vadd.f32 1.0, %v2389_v30  ;;  %2416 = vpow2.f32 %v1380_v29  ;;  %v1646_v8 = vmul.f32 %v2385_v56, %v3292_v51  ;;  %v1995_v33 = vmul.f32 -1.702, %v3433_v17  ;;  %v1057_v0 = vpop.f32.mrf.mxu0 }
 0x244   :  { %v2393_v34 = vpop.eup %2392  ;;  %2418 = vrcp.f32 %v1427_v14  ;;  %v1428_v25 = vadd.f32 1.0, %v2391_v15  ;;  %v3440_v14 = vadd.f32 %v1127_v18, %v3232_v9  ;;  %v3447_v24 = vadd.f32 %v1055_v11, %v3230_v52 }
 0x245   :  { %v2395_v4 = vpop.eup %2394  ;;  %2420 = vrcp.f32 %v1457_v45  ;;  %v1458_v5 = vadd.f32 1.0, %v2393_v34  ;;  %v2024_v45 = vmul.f32 -1.702, %v3428_v20  ;;  %v3451_v51 = vadd.f32 %v1131_v7, %v3230_v52 }
 0x246   :  { %v2397_v39 = vpop.eup %2396  ;;  %2422 = vrcp.f32 %v1428_v25  ;;  %v1429_v10 = vadd.f32 1.0, %v2395_v4  ;;  %v1330_v7 = vmul.f32 1.442695, %v1995_v33  ;;  %v3459_v11 = vadd.f32 %v1057_v0, %v3232_v9 }
 0x247   :  { %v2399_v61 = vpop.eup %2398  ;;  %2424 = vrcp.f32 %v1458_v5  ;;  %v1459_v53 = vadd.f32 1.0, %v2397_v39  ;;  %v1386_v5 = vmul.f32 1.442695, %v2023_v43  ;;  %v2025_v39 = vmul.f32 -1.702, %v3440_v14 }
 0x248   :  { %v2401_v31 = vpop.eup %2400  ;;  %2426 = vrcp.f32 %v1429_v10  ;;  %v1430_v55 = vadd.f32 1.0, %v2399_v61 }
 0x249   :  { %v2403_v29 = vpop.eup %2402  ;;  %2428 = vrcp.f32 %v1459_v53  ;;  %v1460_v50 = vadd.f32 1.0, %v2401_v31  ;;  %v1328_v53 = vmul.f32 1.442695, %v1994_v1  ;;  %v1388_v31 = vmul.f32 1.442695, %v2024_v45 }
 0x24a   :  { %v2405_v37 = vpop.eup %2404  ;;  %2430 = vrcp.f32 %v1430_v55  ;;  %v1431_v30 = vadd.f32 1.0, %v2403_v29  ;;  %v1996_v55 = vmul.f32 -1.702, %v3447_v24  ;;  %v1061_v29 = vpop.f32.mrf.mxu0  ;;  %v3466_v1 = vadd.f32 %v1133_v38, %v3232_v9 }
 0x24b   :  { %v2407_v60 = vpop.eup %2406  ;;  %v1617_v15 = vmul.f32 %v2405_v37, %v3299_v41  ;;  %2432 = vrcp.f32 %v1460_v50 }
 0x24c   :  { %v2409_v34 = vpop.eup %2408  ;;  %2434 = vrcp.f32 %v1431_v30  ;;  %v1461_v25 = vadd.f32 1.0, %v2407_v60  ;;  %v1390_v60 = vmul.f32 1.442695, %v2025_v39  ;;  %v1063_v33 = vpop.f32.mrf.mxu0 }
 0x24d   :  { %v2411_v18 = vpop.eup %2410  ;;  %v2106_v63 = vpack.c.bf16 %v1617_v15, %v1616_v44  ;;  %v1647_v4 = vmul.f32 %v2409_v34, %v3303_v12  ;;  %2436 = vpow2.f32 %v1322_v59  ;;  %v1135_v12 = vpop.f32.mrf.mxu1 }
 0x24e   :  { %v2413_v41 = vpop.eup %2412  ;;  %2438 = vrcp.f32 %v1461_v25  ;;  %v1432_v56 = vadd.f32 1.0, %v2411_v18 }
 0x24f   :  { %v2415_v10 = vpop.eup %2414  ;;  %1868 = vst [vmem:[%s3670_s5 + $0x20] sm:$0xff] %v2106_v63  ;;  %v2121_v61 = vpack.c.bf16 %v1647_v4, %v1646_v8  ;;  %2440 = vpow2.f32 %v1382_v40  ;;  %v2026_v40 = vmul.f32 -1.702, %v3451_v51  ;;  %v1618_v44 = vmul.f32 %v2413_v41, %v3306_v46  ;;  %v1137_v34 = vpop.f32.mrf.mxu1 }
 0x250   :  { %v2417_v59 = vpop.eup %2416  ;;  %2442 = vrcp.f32 %v1432_v56  ;;  %v1648_v15 = vmul.f32 %v2415_v10, %v3309_v27  ;;  %v1332_v46 = vmul.f32 1.442695, %v1996_v55  ;;  %v2027_v27 = vmul.f32 -1.702, %v3466_v1 }
 0x251   :  { %v2419_v50 = vpop.eup %2418  ;;  %1883 = vst [vmem:[%s3670_s5 + $0x98] sm:$0xff] %v2121_v61  ;;  %v1462_v43 = vadd.f32 1.0, %v2417_v59  ;;  %2444 = vpow2.f32 %v1324_v23  ;;  %v3474_v23 = vadd.f32 %v1061_v29, %v3230_v52  ;;  %v1392_v18 = vmul.f32 1.442695, %v2026_v40  ;;  %v1141_v10 = vpop.f32.mrf.mxu1 }
 0x252   :  { %v2421_v37 = vpop.eup %2420  ;;  %v1619_v30 = vmul.f32 %v2419_v50, %v3312_v2  ;;  %2446 = vpow2.f32 %v3425_v54  ;;  %v1997_v2 = vmul.f32 -1.702, %v3459_v11  ;;  %v1394_v55 = vmul.f32 1.442695, %v2027_v27 }
 0x253   :  { %v2423_v8 = vpop.eup %2422  ;;  %v1649_v45 = vmul.f32 %v2421_v37, %v3319_v36  ;;  %2448 = vrcp.f32 %v1462_v43  ;;  %v1998_v39 = vmul.f32 -1.702, %v3474_v23  ;;  %v3503_v40 = vadd.f32 %v1063_v33, %v3232_v9  ;;  %v1143_v37 = vpop.f32.mrf.mxu1 }
 0x254   :  { %v2425_v38 = vpop.eup %2424  ;;  %v2107_v25 = vpack.c.bf16 %v1619_v30, %v1618_v44  ;;  %2450 = vpow2.f32 %v3430_v21  ;;  %v1620_v63 = vmul.f32 %v2423_v8, %v3322_v48  ;;  %v3485_v21 = vadd.f32 %v1135_v12, %v3230_v52 }
 0x255   :  { %v2427_v54 = vpop.eup %2426  ;;  %v2122_v0 = vpack.c.bf16 %v1649_v45, %v1648_v15  ;;  %2452 = vpow2.f32 %v1386_v5  ;;  %v1650_v56 = vmul.f32 %v2425_v38, %v3325_v19  ;;  %v1336_v43 = vmul.f32 1.442695, %v1998_v39 }
 0x256   :  { %v2429_v36 = vpop.eup %2428  ;;  %1869 = vst [vmem:[%s3670_s5 + $0x28] sm:$0xff] %v2107_v25  ;;  %v1621_v4 = vmul.f32 %v2427_v54, %v3328_v26  ;;  %2454 = vpow2.f32 %v1328_v53  ;;  %v1334_v26 = vmul.f32 1.442695, %v1997_v2  ;;  %v1065_v53 = vpop.f32.mrf.mxu0  ;;  %v1999_v2 = vmul.f32 -1.702, %v3503_v40 }
 0x257   :  { %v2431_v41 = vpop.eup %2430  ;;  %1884 = vst [vmem:[%s3670_s5 + $0xa0] sm:$0xff] %v2122_v0  ;;  %v1651_v5 = vmul.f32 %v2429_v36, %v3332_v57  ;;  %2456 = vpow2.f32 %v1388_v31  ;;  %v2028_v31 = vmul.f32 -1.702, %v3485_v21  ;;  %v3517_v33 = vadd.f32 %v1065_v53, %v3230_v52  ;;  %v1145_v54 = vpop.f32.mrf.mxu1 }
 0x258   :  { %v2433_v48 = vpop.eup %2432  ;;  %v2108_v61 = vpack.c.bf16 %v1621_v4, %v1620_v63  ;;  %2458 = vpow2.f32 %v1330_v7  ;;  %v1622_v19 = vmul.f32 %v2431_v41, %v3338_v42 }
 0x259   :  { %v2435_v12 = vpop.eup %2434  ;;  %v2123_v59 = vpack.c.bf16 %v1651_v5, %v1650_v56  ;;  %2460 = vpow2.f32 %v1390_v60  ;;  %v1652_v42 = vmul.f32 %v2433_v48, %v3343_v62  ;;  %v1067_v60 = vpop.f32.mrf.mxu0  ;;  %v1396_v25 = vmul.f32 1.442695, %v2028_v31 }
 0x25a   :  { %v2437_v29 = vpop.eup %2436  ;;  %1870 = vst [vmem:[%s3670_s5 + $0x30] sm:$0xff] %v2108_v61  ;;  %v1623_v57 = vmul.f32 %v2435_v12, %v3348_v58  ;;  %2462 = vpow2.f32 %v1332_v46  ;;  %v3513_v46 = vadd.f32 %v1137_v34, %v3232_v9  ;;  %v3525_v34 = vadd.f32 %v1141_v10, %v3230_v52 }
 0x25b   :  { %v2439_v50 = vpop.eup %2438  ;;  %1885 = vst [vmem:[%s3670_s5 + $0xa8] sm:$0xff] %v2123_v59  ;;  %v1433_v7 = vadd.f32 1.0, %v2437_v29  ;;  %2464 = vpow2.f32 %v1392_v18  ;;  %v1071_v27 = vpop.f32.mrf.mxu0  ;;  %v3528_v63 = vadd.f32 %v1067_v60, %v3232_v9  ;;  %v1338_v48 = vmul.f32 1.442695, %v1999_v2 }
 0x25c   :  { %v2441_v44 = vpop.eup %2440  ;;  %v2109_v30 = vpack.c.bf16 %v1623_v57, %v1622_v19  ;;  %v1653_v58 = vmul.f32 %v2439_v50, %v3355_v3  ;;  %2466 = vpow2.f32 %v1334_v26  ;;  %v2029_v56 = vmul.f32 -1.702, %v3513_v46  ;;  %v1147_v26 = vpop.f32.mrf.mxu1 }
 0x25d   :  { %v3507_v8 = vpop.eup %2442  ;;  %2468 = vrcp.f32 %v1433_v7  ;;  %v1463_v15 = vadd.f32 1.0, %v2441_v44  ;;  %v2000_v61 = vmul.f32 -1.702, %v3517_v33  ;;  %v2030_v12 = vmul.f32 -1.702, %v3525_v34 }
 0x25e   :  { %v2445_v45 = vpop.eup %2444  ;;  %1871 = vst [vmem:[%s3670_s5 + $0x38] sm:$0xff] %v2109_v30  ;;  %v2124_v38 = vpack.c.bf16 %v1653_v58, %v1652_v42  ;;  %2470 = vpow2.f32 %v1394_v55  ;;  %v3534_v59 = vadd.f32 %v1143_v37, %v3232_v9  ;;  %v1073_v55 = vpop.f32.mrf.mxu0  ;;  %v2001_v57 = vmul.f32 -1.702, %v3528_v63 }
 0x25f   :  { %v2447_v62 = vpop.eup %2446  ;;  %2472 = vrcp.f32 %v1463_v15  ;;  %v1434_v3 = vadd.f32 1.0, %v2445_v45  ;;  %v3538_v31 = vadd.f32 %v1071_v27, %v3230_v52  ;;  %v3541_v44 = vadd.f32 %v1145_v54, %v3230_v52  ;;  %v1151_v60 = vpop.f32.mrf.mxu1 }
 0x260   :  { %v3519_v0 = vpop.eup %2448  ;;  %1886 = vst [vmem:[%s3670_s5 + $0xb0] sm:$0xff] %v2124_v38  ;;  %v1464_v18 = vadd.f32 1.0, %v2447_v62  ;;  %2474 = vpow2.f32 %v1336_v43  ;;  %v1398_v43 = vmul.f32 1.442695, %v2029_v56  ;;  %v1340_v30 = vmul.f32 1.442695, %v2000_v61 }
 0x261   :  { %v2451_v36 = vpop.eup %2450  ;;  %2476 = vrcp.f32 %v1434_v3  ;;  %v3544_v58 = vadd.f32 %v1073_v55, %v3232_v9  ;;  %v1400_v38 = vmul.f32 1.442695, %v2030_v12  ;;  %v1342_v2 = vmul.f32 1.442695, %v2001_v57 }
 0x262   :  { %v2453_v4 = vpop.eup %2452  ;;  %2478 = vrcp.f32 %v1464_v18  ;;  %v1435_v41 = vadd.f32 1.0, %v2451_v36  ;;  %v2002_v54 = vmul.f32 -1.702, %v3538_v31  ;;  %v1075_v18 = vpop.f32.mrf.mxu0 }
 0x263   :  { %v2455_v5 = vpop.eup %2454  ;;  %v1465_v39 = vadd.f32 1.0, %v2453_v4  ;;  %2480 = vpow2.f32 %v1396_v25  ;;  %v2031_v25 = vmul.f32 -1.702, %v3534_v59  ;;  %v2032_v4 = vmul.f32 -1.702, %v3541_v44 }
 0x264   :  { %v2457_v10 = vpop.eup %2456  ;;  %2482 = vrcp.f32 %v1435_v41  ;;  %v1436_v53 = vadd.f32 1.0, %v2455_v5  ;;  %v3550_v41 = vadd.f32 %v1147_v26, %v3232_v9  ;;  %v1624_v5 = vmul.f32 %v3507_v8, %v3362_v16  ;;  %v1077_v8 = vpop.f32.mrf.mxu0 }
 0x265   :  { %v2459_v29 = vpop.eup %2458  ;;  %2484 = vrcp.f32 %v1465_v39  ;;  %v1466_v19 = vadd.f32 1.0, %v2457_v10  ;;  %v2003_v61 = vmul.f32 -1.702, %v3544_v58  ;;  %v1153_v10 = vpop.f32.mrf.mxu1  ;;  %v3557_v55 = vadd.f32 %v1075_v18, %v3230_v52 }
 0x266   :  { %v2461_v50 = vpop.eup %2460  ;;  %2486 = vrcp.f32 %v1436_v53  ;;  %v1437_v7 = vadd.f32 1.0, %v2459_v29  ;;  %v3560_v29 = vadd.f32 %v1151_v60, %v3230_v52 }
 0x267   :  { %v2463_v42 = vpop.eup %2462  ;;  %2488 = vrcp.f32 %v1466_v19  ;;  %v1467_v37 = vadd.f32 1.0, %v2461_v50  ;;  %v1654_v19 = vmul.f32 %v3519_v0, %v3372_v49  ;;  %v1404_v49 = vmul.f32 1.442695, %v2032_v4  ;;  %v1155_v0 = vpop.f32.mrf.mxu1 }
 0x268   :  { %v2465_v15 = vpop.eup %2464  ;;  %2490 = vrcp.f32 %v1437_v7  ;;  %v1438_v45 = vadd.f32 1.0, %v2463_v42  ;;  %v1402_v7 = vmul.f32 1.442695, %v2031_v25  ;;  %v2033_v42 = vmul.f32 -1.702, %v3550_v41 }
 0x269   :  { %v2467_v62 = vpop.eup %2466  ;;  %2492 = vrcp.f32 %v1467_v37  ;;  %v1468_v3 = vadd.f32 1.0, %v2465_v15  ;;  %v1344_v15 = vmul.f32 1.442695, %v2002_v54  ;;  %v3578_v54 = vadd.f32 %v1153_v10, %v3232_v9 }
 0x26a   :  { %v2469_v27 = vpop.eup %2468  ;;  %2494 = vrcp.f32 %v1438_v45  ;;  %v1439_v36 = vadd.f32 1.0, %v2467_v62  ;;  %v3571_v62 = vadd.f32 %v1077_v8, %v3232_v9  ;;  %v1406_v4 = vmul.f32 1.442695, %v2033_v42 }
 0x26b   :  { %v2471_v56 = vpop.eup %2470  ;;  %v1625_v39 = vmul.f32 %v2469_v27, %v3390_v6  ;;  %2496 = vrcp.f32 %v1468_v3 }
 0x26c   :  { %v2473_v53 = vpop.eup %2472  ;;  %2498 = vrcp.f32 %v1439_v36  ;;  %v1469_v12 = vadd.f32 1.0, %v2471_v56 }
 0x26d   :  { %v2475_v26 = vpop.eup %2474  ;;  %v2110_v16 = vpack.c.bf16 %v1625_v39, %v1624_v5  ;;  %v1655_v6 = vmul.f32 %v2473_v53, %v3400_v35  ;;  %2500 = vpow2.f32 %v1338_v48  ;;  %v1346_v35 = vmul.f32 1.442695, %v2003_v61  ;;  %v1157_v61 = vpop.f32.mrf.mxu1 }
 0x26e   :  { %v2477_v57 = vpop.eup %2476  ;;  %2502 = vrcp.f32 %v1469_v12  ;;  %v1440_v50 = vadd.f32 1.0, %v2475_v26  ;;  %v2004_v48 = vmul.f32 -1.702, %v3557_v55 }
 0x26f   :  { %v2479_v37 = vpop.eup %2478  ;;  %1872 = vst [vmem:[%s3670_s5 + $0x40] sm:$0xff] %v2110_v16  ;;  %v2125_v60 = vpack.c.bf16 %v1655_v6, %v1654_v19  ;;  %2504 = vpow2.f32 %v1398_v43  ;;  %v2034_v43 = vmul.f32 -1.702, %v3560_v29  ;;  %v1626_v27 = vmul.f32 %v2477_v57, %v3403_v28 }
 0x270   :  { %v2481_v45 = vpop.eup %2480  ;;  %2506 = vrcp.f32 %v1440_v50  ;;  %v1656_v5 = vmul.f32 %v2479_v37, %v3406_v47  ;;  %v1348_v12 = vmul.f32 1.442695, %v2004_v48  ;;  %v2005_v28 = vmul.f32 -1.702, %v3571_v62 }
 0x271   :  { %v2483_v25 = vpop.eup %2482  ;;  %1887 = vst [vmem:[%s3670_s5 + $0xb8] sm:$0xff] %v2125_v60  ;;  %v1470_v3 = vadd.f32 1.0, %v2481_v45  ;;  %2508 = vpow2.f32 %v1340_v30  ;;  %v3585_v30 = vadd.f32 %v1155_v0, %v3230_v52  ;;  %v2035_v19 = vmul.f32 -1.702, %v3578_v54 }
 0x272   :  { %v2485_v18 = vpop.eup %2484  ;;  %v1627_v36 = vmul.f32 %v2483_v25, %v3413_v22  ;;  %2510 = vpow2.f32 %v1400_v38  ;;  %v1408_v38 = vmul.f32 1.442695, %v2034_v43 }
 0x273   :  { %v2487_v56 = vpop.eup %2486  ;;  %v1657_v39 = vmul.f32 %v2485_v18, %v3420_v13  ;;  %2512 = vrcp.f32 %v1470_v3  ;;  %v2036_v57 = vmul.f32 -1.702, %v3585_v30 }
 0x274   :  { %v2489_v53 = vpop.eup %2488  ;;  %v2111_v10 = vpack.c.bf16 %v1627_v36, %v1626_v27  ;;  %2514 = vpow2.f32 %v1342_v2  ;;  %v1628_v52 = vmul.f32 %v2487_v56, %v3423_v32  ;;  %v3595_v2 = vadd.f32 %v1157_v61, %v3232_v9 }
 0x275   :  { %v2491_v26 = vpop.eup %2490  ;;  %v2126_v22 = vpack.c.bf16 %v1657_v39, %v1656_v5  ;;  %2516 = vpow2.f32 %v1402_v7  ;;  %v1658_v6 = vmul.f32 %v2489_v53, %v3428_v20 }
 0x276   :  { %v2493_v47 = vpop.eup %2492  ;;  %1873 = vst [vmem:[%s3670_s5 + $0x48] sm:$0xff] %v2111_v10  ;;  %v1629_v13 = vmul.f32 %v2491_v26, %v3433_v17  ;;  %2518 = vpow2.f32 %v1344_v15  ;;  %v1350_v17 = vmul.f32 1.442695, %v2005_v28  ;;  %v2037_v0 = vmul.f32 -1.702, %v3595_v2 }
 0x277   :  { %v2495_v16 = vpop.eup %2494  ;;  %1888 = vst [vmem:[%s3670_s5 + $0xc0] sm:$0xff] %v2126_v22  ;;  %v1659_v8 = vmul.f32 %v2493_v47, %v3440_v14  ;;  %2520 = vpow2.f32 %v1404_v49  ;;  %v1410_v14 = vmul.f32 1.442695, %v2035_v19  ;;  %v1412_v49 = vmul.f32 1.442695, %v2036_v57 }
 0x278   :  { %v2497_v50 = vpop.eup %2496  ;;  %v2112_v32 = vpack.c.bf16 %v1629_v13, %v1628_v52  ;;  %2522 = vpow2.f32 %v1346_v35  ;;  %v1630_v37 = vmul.f32 %v2495_v16, %v3447_v24  ;;  %v1414_v36 = vmul.f32 1.442695, %v2037_v0 }
 0x279   :  { %v2499_v7 = vpop.eup %2498  ;;  %v2127_v42 = vpack.c.bf16 %v1659_v8, %v1658_v6  ;;  %2524 = vpow2.f32 %v1406_v4  ;;  %v1660_v35 = vmul.f32 %v2497_v50, %v3451_v51 }
 0x27a   :  { %v2501_v9 = vpop.eup %2500  ;;  %1874 = vst [vmem:[%s3670_s5 + $0x50] sm:$0xff] %v2112_v32  ;;  %v1631_v20 = vmul.f32 %v2499_v7, %v3459_v11  ;;  %2526 = vpow2.f32 %v1348_v12 }
 0x27b   :  { %v2503_v60 = vpop.eup %2502  ;;  %1889 = vst [vmem:[%s3670_s5 + $0xc8] sm:$0xff] %v2127_v42  ;;  %v1441_v15 = vadd.f32 1.0, %v2501_v9  ;;  %2528 = vpow2.f32 %v1408_v38 }
 0x27c   :  { %v2505_v45 = vpop.eup %2504  ;;  %v2113_v48 = vpack.c.bf16 %v1631_v20, %v1630_v37  ;;  %v1661_v24 = vmul.f32 %v2503_v60, %v3466_v1  ;;  %2530 = vpow2.f32 %v1350_v17 }
 0x27d   :  { %v2507_v11 = vpop.eup %2506  ;;  %2532 = vrcp.f32 %v1441_v15  ;;  %v1471_v25 = vadd.f32 1.0, %v2505_v45 }
 0x27e   :  { %v2509_v3 = vpop.eup %2508  ;;  %1875 = vst [vmem:[%s3670_s5 + $0x58] sm:$0xff] %v2113_v48  ;;  %v2128_v43 = vpack.c.bf16 %v1661_v24, %v1660_v35  ;;  %2534 = vpow2.f32 %v1410_v14  ;;  %v1632_v50 = vmul.f32 %v2507_v11, %v3474_v23 }
 0x27f   :  { %v2511_v18 = vpop.eup %2510  ;;  %2536 = vrcp.f32 %v1471_v25  ;;  %v1442_v27 = vadd.f32 1.0, %v2509_v3 }
 0x280   :  { %v2513_v4 = vpop.eup %2512  ;;  %1890 = vst [vmem:[%s3670_s5 + $0xd0] sm:$0xff] %v2128_v43  ;;  %v1472_v51 = vadd.f32 1.0, %v2511_v18  ;;  %2538 = vpow2.f32 %v1412_v49 }
 0x281   :  { %v2515_v1 = vpop.eup %2514  ;;  %2540 = vrcp.f32 %v1442_v27  ;;  %v1662_v9 = vmul.f32 %v2513_v4, %v3485_v21 }
 0x282   :  { %v2517_v56 = vpop.eup %2516  ;;  %2542 = vrcp.f32 %v1472_v51  ;;  %v1443_v5 = vadd.f32 1.0, %v2515_v1 }
 0x283   :  { %v2519_v39 = vpop.eup %2518  ;;  %v1473_v61 = vadd.f32 1.0, %v2517_v56  ;;  %2544 = vpow2.f32 %v1414_v36 }
 0x284   :  { %v2521_v53 = vpop.eup %2520  ;;  %2546 = vrcp.f32 %v1443_v5  ;;  %v1444_v10 = vadd.f32 1.0, %v2519_v39 }
 0x285   :  { %v2523_v12 = vpop.eup %2522  ;;  %2548 = vrcp.f32 %v1473_v61  ;;  %v1474_v28 = vadd.f32 1.0, %v2521_v53 }
 0x286   :  { %v2525_v26 = vpop.eup %2524  ;;  %2550 = vrcp.f32 %v1444_v10  ;;  %v1445_v22 = vadd.f32 1.0, %v2523_v12 }
 0x287   :  { %v2527_v38 = vpop.eup %2526  ;;  %2552 = vrcp.f32 %v1474_v28  ;;  %v1475_v19 = vadd.f32 1.0, %v2525_v26 }
 0x288   :  { %v2529_v47 = vpop.eup %2528  ;;  %2554 = vrcp.f32 %v1445_v22  ;;  %v1446_v52 = vadd.f32 1.0, %v2527_v38 }
 0x289   :  { %v2531_v13 = vpop.eup %2530  ;;  %2556 = vrcp.f32 %v1475_v19  ;;  %v1476_v16 = vadd.f32 1.0, %v2529_v47 }
 0x28a   :  { %v2533_v6 = vpop.eup %2532  ;;  %2558 = vrcp.f32 %v1446_v52  ;;  %v1447_v8 = vadd.f32 1.0, %v2531_v13 }
 0x28b   :  { %v2535_v57 = vpop.eup %2534  ;;  %v1633_v32 = vmul.f32 %v2533_v6, %v3503_v40  ;;  %2560 = vrcp.f32 %v1476_v16 }
 0x28c   :  { %v2537_v17 = vpop.eup %2536  ;;  %2562 = vrcp.f32 %v1447_v8  ;;  %v1477_v7 = vadd.f32 1.0, %v2535_v57 }
 0x28d   :  { %v2539_v42 = vpop.eup %2538  ;;  %v2114_v37 = vpack.c.bf16 %v1633_v32, %v1632_v50  ;;  %v1663_v20 = vmul.f32 %v2537_v17, %v3513_v46 }
 0x28e   :  { %v2541_v14 = vpop.eup %2540  ;;  %2564 = vrcp.f32 %v1477_v7  ;;  %v1478_v60 = vadd.f32 1.0, %v2539_v42 }
 0x28f   :  { %v2543_v15 = vpop.eup %2542  ;;  %1876 = vst [vmem:[%s3670_s5 + $0x60] sm:$0xff] %v2114_v37  ;;  %v2129_v23 = vpack.c.bf16 %v1663_v20, %v1662_v9  ;;  %v1634_v46 = vmul.f32 %v2541_v14, %v3517_v33 }
 0x290   :  { %v2545_v40 = vpop.eup %2544  ;;  %2566 = vrcp.f32 %v1478_v60  ;;  %v1664_v48 = vmul.f32 %v2543_v15, %v3525_v34 }
 0x291   :  { %v2547_v49 = vpop.eup %2546  ;;  %1891 = vst [vmem:[%s3670_s5 + $0xd8] sm:$0xff] %v2129_v23  ;;  %v1479_v21 = vadd.f32 1.0, %v2545_v40 }
 0x292   :  { %v2549_v0 = vpop.eup %2548  ;;  %v1635_v45 = vmul.f32 %v2547_v49, %v3528_v63 }
 0x293   :  { %v2551_v35 = vpop.eup %2550  ;;  %v1665_v24 = vmul.f32 %v2549_v0, %v3534_v59  ;;  %2568 = vrcp.f32 %v1479_v21 }
 0x294   :  { %v2553_v11 = vpop.eup %2552  ;;  %v2115_v25 = vpack.c.bf16 %v1635_v45, %v1634_v46  ;;  %v1636_v27 = vmul.f32 %v2551_v35, %v3538_v31 }
 0x295   :  { %v2555_v3 = vpop.eup %2554  ;;  %v2130_v43 = vpack.c.bf16 %v1665_v24, %v1664_v48  ;;  %v1666_v34 = vmul.f32 %v2553_v11, %v3541_v44 }
 0x296   :  { %v2557_v18 = vpop.eup %2556  ;;  %1877 = vst [vmem:[%s3670_s5 + $0x68] sm:$0xff] %v2115_v25  ;;  %v1637_v33 = vmul.f32 %v2555_v3, %v3544_v58 }
 0x297   :  { %v2559_v63 = vpop.eup %2558  ;;  %1892 = vst [vmem:[%s3670_s5 + $0xe0] sm:$0xff] %v2130_v43  ;;  %v1667_v59 = vmul.f32 %v2557_v18, %v3550_v41 }
 0x298   :  { %v2561_v36 = vpop.eup %2560  ;;  %v2116_v4 = vpack.c.bf16 %v1637_v33, %v1636_v27  ;;  %v1638_v31 = vmul.f32 %v2559_v63, %v3557_v55 }
 0x299   :  { %v2563_v51 = vpop.eup %2562  ;;  %v2131_v1 = vpack.c.bf16 %v1667_v59, %v1666_v34  ;;  %v1668_v44 = vmul.f32 %v2561_v36, %v3560_v29 }
 0x29a   :  { %1878 = vst [vmem:[%s3670_s5 + $0x70] sm:$0xff] %v2116_v4  ;;  %v1639_v58 = vmul.f32 %v2563_v51, %v3571_v62 }
 0x29b   :  { %v2565_v56 = vpop.eup %2564  ;;  %1893 = vst [vmem:[%s3670_s5 + $0xe8] sm:$0xff] %v2131_v1 }
 0x29c   :  { %v2117_v41 = vpack.c.bf16 %v1639_v58, %v1638_v31  ;;  %v1669_v5 = vmul.f32 %v2565_v56, %v3578_v54 }
 0x29d   :  { %v2567_v39 = vpop.eup %2566 }
 0x29e   :  { %1879 = vst [vmem:[%s3670_s5 + $0x78] sm:$0xff] %v2117_v41  ;;  %v2132_v61 = vpack.c.bf16 %v1669_v5, %v1668_v44  ;;  %v1670_v55 = vmul.f32 %v2567_v39, %v3585_v30 }
 0x2a0   :  { %v2569_v53 = vpop.eup %2568  ;;  %1894 = vst [vmem:[%s3670_s5 + $0xf0] sm:$0xff] %v2132_v61 }
 0x2a1   :  { %v1671_v62 = vmul.f32 %v2569_v53, %v3595_v2 }
 0x2a3   :  { %v2133_v10 = vpack.c.bf16 %v1671_v62, %v1670_v55 }
 0x2a5   :  { %1895 = vst [vmem:[%s3670_s5 + $0xf8] sm:$0xff] %v2133_v10 }

// kernel: _lambda_.37
= control target key start
LH: loop header
LB: loop body
LE: loop exit
PB: predicated region body
PF: predicated region fallthrough
CT: control target
= control target key end

     0   :  { %vm27_vm0 = vcmask 517120   ;;  %v184_v9 = vmov 0.0   ;;  %vm185_vm1 = vmmov 0   ;;  %vm59_vm2 = vcmask 516096   ;;  %s246_s0 = inlined_call_operand.vmem [shape: bf16[2,64], index: 0, kind: input, shape index: {}]   ;;  %s247_s3 = inlined_call_operand.vmem [shape: bf16[64,64], index: 3, kind: input, shape index: {}]   ;;  %s248_s1 = inlined_call_operand.vmem [shape: f32[1,64], index: 1, kind: input, shape index: {}]   ;;  %s249_s2 = inlined_call_operand.vmem [shape: f32[1,64], index: 2, kind: input, shape index: {}]   ;;  %s250_s4 = inlined_call_operand.vmem [shape: f32[1,64], index: 4, kind: input, shape index: {}]   ;;  %s251_s5 = inlined_call_operand.vmem [shape: f32[2,64], index: 5, kind: output, shape index: {}]  }
   0x1   :  { %v25_v0 = vld [vmem:[%s246_s0] sm:$0x1]  ;;  %v178_v8 = vld [vmem:[%s247_s3 + $0x18] sm:$0xff]   ;;  %164 = vmatprep.subr.bf16.mxu0 %v184_v9  ;;  %v179_v10 = vld [vmem:[%s247_s3 + $0x10] sm:$0xff]   ;;  %172 = vmatprep.mubr.msk.bf16.mxu0 %vm185_vm1, %v184_v9  ;;  %vm101_vm3 = vcmask 523264  }
   0x2   :  { %v26_v1 = vunpack.c.l.bf16 %v25_v0  ;;  %165 = vmatpush3.bf16.msra.mxu0 %v178_v8  ;;  %v180_v11 = vld [vmem:[%s247_s3 + $0x8] sm:$0xff]   ;;  %v181_v12 = vld [vmem:[%s247_s3] sm:$0xff]  }
   0x3   :  { %166 = vmatprep.subr.bf16.mxu0 %v184_v9  ;;  %v151_v17 = vld [vmem:[%s248_s1] ss:$0 sm:$0xff] }
   0x4   :  { %v28_v2 = vsel %vm27_vm0, %v26_v1, 0.0  ;;  %v152_v19 = vld [vmem:[%s249_s2] ss:$0 sm:$0xff] }
   0x5   :  { %29 = vadd.xlane.f32.xlu0 %v28_v2  ;;  %v153_v24 = vld [vmem:[%s250_s4] ss:$0 sm:$0xff] }
   0x6   :  { %167 = vmatpush3.bf16.msra.mxu0 %v179_v10 }
   0x7   :  { %168 = vmatprep.subr.bf16.mxu0 %v184_v9 }
   0xa   :  { %169 = vmatpush3.bf16.msra.mxu0 %v180_v11 }
   0xb   :  { %170 = vmatprep.subr.bf16.mxu0 %v184_v9 }
   0xe   :  { %171 = vmatpush3.bf16.msra.mxu0 %v181_v12 }
  0x8e   :  { %v30_v3 = vpop.xlane.xlu0 %29 }
  0x8f   :  { %v32_v4 = vmul.f32 0.015625, %v30_v3 }
  0x91   :  { %v33_v5 = vsub.f32 %v26_v1, %v32_v4 }
  0x93   :  { %v34_v6 = vmul.f32 %v33_v5, %v33_v5 }
  0x95   :  { %v35_v7 = vsel %vm27_vm0, %v34_v6, 0.0 }
  0x96   :  { %36 = vadd.xlane.f32.xlu0 %v35_v7 }
 0x11f   :  { %v37_v13 = vpop.xlane.xlu0 %36 }
 0x120   :  { %v38_v14 = vmul.f32 0.015625, %v37_v13 }
 0x122   :  { %v39_v15 = vadd.f32 1e-05, %v38_v14 }
 0x124   :  { %182 = vrsqrt.f32 %v39_v15 }
 0x131   :  { %v183_v16 = vpop.eup %182 }
 0x132   :  { %v41_v18 = vmul.f32 %v183_v16, %v33_v5 }
 0x134   :  { %v49_v20 = vmul.f32 %v151_v17, %v41_v18 }
 0x136   :  { %v57_v21 = vadd.f32 %v152_v19, %v49_v20 }
 0x138   :  { %v58_v22 = vpack.c.bf16 %v57_v21, %v57_v21 }
 0x13a   :  { %60 = vst.msk [vmem:[#allocation2] sm:$0x1] %vm59_vm2, %v58_v22 }
 0x141   :  { %v61_v23 = vld [vmem:[#allocation2] sm:$0x1] }
 0x142   :  { %173 = vmatmul.mubr.msk.bf16.vlgmr.msra.gmra.mxu0 %vm101_vm3, %v61_v23 }
 0x202   :  { %v139_v25 = vpop.f32.mrf.mxu0 }
 0x203   :  { %v140_v26 = vadd.f32 %v153_v24, %v139_v25 }
 0x204   :  { %v174_v27 = vpop.f32.mrf.mxu0 }
 0x205   :  { %146 = vst.msk [vmem:[%s251_s5] sm:$0x3] %vm27_vm0, %v140_v26 }
 0x206   :  { %v142_v28 = vpop.f32.mrf.mxu0 }
 0x208   :  { %v175_v29 = vpop.f32.mrf.mxu0 }

// kernel: _lambda_.31
= control target key start
LH: loop header
LB: loop body
LE: loop exit
PB: predicated region body
PF: predicated region fallthrough
CT: control target
= control target key end

     0   :  { %vm22_vm0 = vcmask 523264   ;;  %v1353_v48 = vmov 0.0   ;;  %vm931_vm1 = vcmask 519168   ;;  %s1844_s1 = inlined_call_operand.vmem [shape: bf16[256,64], index: 1, kind: input, shape index: {}]   ;;  %s1845_s0 = inlined_call_operand.vmem [shape: bf16[256,256], index: 0, kind: input, shape index: {}]   ;;  %s1846_s3 = inlined_call_operand.vmem [shape: bf16[256,64], index: 3, kind: input, shape index: {}]   ;;  %s1847_s2 = inlined_call_operand.vmem [shape: f32[1,64], index: 2, kind: input, shape index: {}]   ;;  %s1848_s4 = inlined_call_operand.vmem [shape: bf16[256,64], index: 4, kind: output, shape index: {}]  }
   0x1   :  { %v1289_v0 = vld [vmem:[%s1844_s1 + $0x78] sm:$0xff]   ;;  %v1291_v2 = vld [vmem:[%s1844_s1 + $0x70] sm:$0xff]   ;;  %v1293_v4 = vld [vmem:[%s1844_s1 + $0x68] sm:$0xff]   ;;  %23 = vst.msk [vmem:[#allocation2] sm:$0xff] %vm22_vm0, %v1353_v48 }
   0x2   :  { %v1290_v1 = vld [vmem:[%s1844_s1 + $0x38] sm:$0xff]   ;;  %1160 = vmatprep.subr.bf16.mxu0 %v1289_v0  ;;  %1272 = vmatprep.subr.bf16.mxu1 %v1289_v0  ;;  %v1292_v3 = vld [vmem:[%s1844_s1 + $0x30] sm:$0xff]   ;;  %v1294_v5 = vld [vmem:[%s1844_s1 + $0x28] sm:$0xff]   ;;  %24 = vst.msk [vmem:[#allocation2 + $0x8] sm:$0xff] %vm22_vm0, %v1353_v48 }
   0x3   :  { %1161 = vmatpush3.bf16.msra.mxu0 %v1290_v1  ;;  %1280 = vmatpush3.bf16.msra.mxu1 %v1290_v1  ;;  %v1295_v6 = vld [vmem:[%s1844_s1 + $0x60] sm:$0xff]   ;;  %v1297_v8 = vld [vmem:[%s1844_s1 + $0x58] sm:$0xff]   ;;  %v1299_v10 = vld [vmem:[%s1844_s1 + $0x50] sm:$0xff]   ;;  %25 = vst.msk [vmem:[#allocation2 + $0x10] sm:$0xff] %vm22_vm0, %v1353_v48 }
   0x4   :  { %1162 = vmatprep.subr.bf16.mxu0 %v1291_v2  ;;  %1273 = vmatprep.subr.bf16.mxu1 %v1291_v2  ;;  %v1296_v7 = vld [vmem:[%s1844_s1 + $0x20] sm:$0xff]   ;;  %v1298_v9 = vld [vmem:[%s1844_s1 + $0x18] sm:$0xff]   ;;  %v1300_v13 = vld [vmem:[%s1844_s1 + $0x10] sm:$0xff]   ;;  %26 = vst.msk [vmem:[#allocation2 + $0x18] sm:$0xff] %vm22_vm0, %v1353_v48 }
   0x5   :  { %v1307_v11 = vld [vmem:[%s1845_s0 + $0x4] ss:$8 sps:$4 sm:$0xff]   ;;  %v1305_v18 = vld [vmem:[%s1845_s0] ss:$8 sps:$4 sm:$0xff]   ;;  %v1311_v20 = vld [vmem:[%s1845_s0 + $0x14] ss:$8 sps:$4 sm:$0xff]  }
   0x6   :  { %v1310_v12 = vld [vmem:[%s1845_s0 + $0x84] ss:$8 sps:$4 sm:$0xff]   ;;  %439 = vmatprep.mubr.bf16.mxu0 %v1307_v11  ;;  %v1308_v19 = vld [vmem:[%s1845_s0 + $0x80] ss:$8 sps:$4 sm:$0xff]   ;;  %v1313_v21 = vld [vmem:[%s1845_s0 + $0x94] ss:$8 sps:$4 sm:$0xff]  }
   0x7   :  { %1163 = vmatpush3.bf16.msra.mxu0 %v1292_v3  ;;  %1281 = vmatpush3.bf16.msra.mxu1 %v1292_v3  ;;  %v1301_v14 = vld [vmem:[%s1844_s1 + $0x48] sm:$0xff]   ;;  %v1303_v16 = vld [vmem:[%s1844_s1 + $0x40] sm:$0xff]   ;;  %v1315_v22 = vld [vmem:[%s1845_s0 + $0x10] ss:$8 sps:$4 sm:$0xff]   ;;  %27 = vst.msk [vmem:[#allocation2 + $0x20] sm:$0xff] %vm22_vm0, %v1353_v48 }
   0x8   :  { %1164 = vmatprep.subr.bf16.mxu0 %v1293_v4  ;;  %1274 = vmatprep.subr.bf16.mxu1 %v1293_v4  ;;  %v1302_v15 = vld [vmem:[%s1844_s1 + $0x8] sm:$0xff]   ;;  %v1304_v17 = vld [vmem:[%s1844_s1] sm:$0xff]   ;;  %v1316_v23 = vld [vmem:[%s1845_s0 + $0x90] ss:$8 sps:$4 sm:$0xff]   ;;  %28 = vst.msk [vmem:[#allocation2 + $0x28] sm:$0xff] %vm22_vm0, %v1353_v48 }
   0x9   :  { %503 = vmatprep.mubr.bf16.mxu1 %v1310_v12  ;;  %v1317_v24 = vld [vmem:[%s1845_s0 + $0x24] ss:$8 sps:$4 sm:$0xff]   ;;  %v1321_v26 = vld [vmem:[%s1845_s0 + $0x20] ss:$8 sps:$4 sm:$0xff]   ;;  %v1323_v28 = vld [vmem:[%s1845_s0 + $0x34] ss:$8 sps:$4 sm:$0xff]  }
   0xa   :  { %v1319_v25 = vld [vmem:[%s1845_s0 + $0xa4] ss:$8 sps:$4 sm:$0xff]   ;;  %v1322_v27 = vld [vmem:[%s1845_s0 + $0xa0] ss:$8 sps:$4 sm:$0xff]   ;;  %v1325_v29 = vld [vmem:[%s1845_s0 + $0xb4] ss:$8 sps:$4 sm:$0xff]  }
   0xb   :  { %1165 = vmatpush3.bf16.msra.mxu0 %v1294_v5  ;;  %1282 = vmatpush3.bf16.msra.mxu1 %v1294_v5  ;;  %v1327_v30 = vld [vmem:[%s1845_s0 + $0x30] ss:$8 sps:$4 sm:$0xff]   ;;  %v1329_v32 = vld [vmem:[%s1845_s0 + $0x44] ss:$8 sps:$4 sm:$0xff]   ;;  %v1333_v34 = vld [vmem:[%s1845_s0 + $0x40] ss:$8 sps:$4 sm:$0xff]  }
   0xc   :  { %1166 = vmatprep.subr.bf16.mxu0 %v1295_v6  ;;  %1275 = vmatprep.subr.bf16.mxu1 %v1295_v6  ;;  %v1328_v31 = vld [vmem:[%s1845_s0 + $0xb0] ss:$8 sps:$4 sm:$0xff]   ;;  %v1331_v33 = vld [vmem:[%s1845_s0 + $0xc4] ss:$8 sps:$4 sm:$0xff]   ;;  %v1334_v35 = vld [vmem:[%s1845_s0 + $0xc0] ss:$8 sps:$4 sm:$0xff]  }
   0xd   :  { %v1335_v36 = vld [vmem:[%s1845_s0 + $0x54] ss:$8 sps:$4 sm:$0xff]   ;;  %v1339_v38 = vld [vmem:[%s1845_s0 + $0x50] ss:$8 sps:$4 sm:$0xff]   ;;  %v1341_v40 = vld [vmem:[%s1845_s0 + $0x64] ss:$8 sps:$4 sm:$0xff]  }
   0xe   :  { %v1337_v37 = vld [vmem:[%s1845_s0 + $0xd4] ss:$8 sps:$4 sm:$0xff]   ;;  %v1340_v39 = vld [vmem:[%s1845_s0 + $0xd0] ss:$8 sps:$4 sm:$0xff]   ;;  %v1343_v41 = vld [vmem:[%s1845_s0 + $0xe4] ss:$8 sps:$4 sm:$0xff]  }
   0xf   :  { %1167 = vmatpush3.bf16.msra.mxu0 %v1296_v7  ;;  %1283 = vmatpush3.bf16.msra.mxu1 %v1296_v7  ;;  %v1345_v42 = vld [vmem:[%s1845_s0 + $0x60] ss:$8 sps:$4 sm:$0xff]   ;;  %v1347_v44 = vld [vmem:[%s1845_s0 + $0x74] ss:$8 sps:$4 sm:$0xff]   ;;  %v1351_v46 = vld [vmem:[%s1845_s0 + $0x70] ss:$8 sps:$4 sm:$0xff]  }
  0x10   :  { %1168 = vmatprep.subr.bf16.mxu0 %v1297_v8  ;;  %1276 = vmatprep.subr.bf16.mxu1 %v1297_v8  ;;  %v1346_v43 = vld [vmem:[%s1845_s0 + $0xe0] ss:$8 sps:$4 sm:$0xff]   ;;  %v1349_v45 = vld [vmem:[%s1845_s0 + $0xf4] ss:$8 sps:$4 sm:$0xff]   ;;  %v1352_v47 = vld [vmem:[%s1845_s0 + $0xf0] ss:$8 sps:$4 sm:$0xff]  }
  0x11   :  { %29 = vst.msk [vmem:[#allocation2 + $0x30] sm:$0xff] %vm22_vm0, %v1353_v48  ;;  %30 = vst.msk [vmem:[#allocation2 + $0x38] sm:$0xff] %vm22_vm0, %v1353_v48  ;;  %v55_v51 = vld [vmem:[#allocation2] sm:$0xff]  ;;  %v56_v61 = vld [vmem:[#allocation2 + $0x8] sm:$0xff] }
  0x12   :  { %31 = vst.msk [vmem:[#allocation2 + $0x40] sm:$0xff] %vm22_vm0, %v1353_v48  ;;  %32 = vst.msk [vmem:[#allocation2 + $0x48] sm:$0xff] %vm22_vm0, %v1353_v48  ;;  %v57_v7 = vld [vmem:[#allocation2 + $0x10] sm:$0xff]  ;;  %v1082_v8 = vld [vmem:[%s1846_s3] sm:$0xff]  }
  0x13   :  { %1169 = vmatpush3.bf16.msra.mxu0 %v1298_v9  ;;  %1284 = vmatpush3.bf16.msra.mxu1 %v1298_v9  ;;  %33 = vst.msk [vmem:[#allocation2 + $0x50] sm:$0xff] %vm22_vm0, %v1353_v48  ;;  %34 = vst.msk [vmem:[#allocation2 + $0x58] sm:$0xff] %vm22_vm0, %v1353_v48  ;;  %v1152_v9 = vld [vmem:[%s1846_s3 + $0x40] sm:$0xff]  }
  0x14   :  { %1170 = vmatprep.subr.bf16.mxu0 %v1299_v10  ;;  %1277 = vmatprep.subr.bf16.mxu1 %v1299_v10  ;;  %35 = vst.msk [vmem:[#allocation2 + $0x60] sm:$0xff] %vm22_vm0, %v1353_v48  ;;  %36 = vst.msk [vmem:[#allocation2 + $0x68] sm:$0xff] %vm22_vm0, %v1353_v48 }
  0x15   :  { %37 = vst.msk [vmem:[#allocation2 + $0x70] sm:$0xff] %vm22_vm0, %v1353_v48  ;;  %38 = vst.msk [vmem:[#allocation2 + $0x78] sm:$0xff] %vm22_vm0, %v1353_v48 }
  0x16   :  { %39 = vst.msk [vmem:[#allocation2 + $0x80] sm:$0xff] %vm22_vm0, %v1353_v48  ;;  %40 = vst.msk [vmem:[#allocation2 + $0x88] sm:$0xff] %vm22_vm0, %v1353_v48 }
  0x17   :  { %1171 = vmatpush3.bf16.msra.mxu0 %v1300_v13  ;;  %1285 = vmatpush3.bf16.msra.mxu1 %v1300_v13  ;;  %41 = vst.msk [vmem:[#allocation2 + $0x90] sm:$0xff] %vm22_vm0, %v1353_v48  ;;  %42 = vst.msk [vmem:[#allocation2 + $0x98] sm:$0xff] %vm22_vm0, %v1353_v48 }
  0x18   :  { %1172 = vmatprep.subr.bf16.mxu0 %v1301_v14  ;;  %1278 = vmatprep.subr.bf16.mxu1 %v1301_v14  ;;  %43 = vst.msk [vmem:[#allocation2 + $0xa0] sm:$0xff] %vm22_vm0, %v1353_v48  ;;  %44 = vst.msk [vmem:[#allocation2 + $0xa8] sm:$0xff] %vm22_vm0, %v1353_v48 }
  0x19   :  { %45 = vst.msk [vmem:[#allocation2 + $0xb0] sm:$0xff] %vm22_vm0, %v1353_v48  ;;  %46 = vst.msk [vmem:[#allocation2 + $0xb8] sm:$0xff] %vm22_vm0, %v1353_v48 }
  0x1a   :  { %47 = vst.msk [vmem:[#allocation2 + $0xc0] sm:$0xff] %vm22_vm0, %v1353_v48  ;;  %48 = vst.msk [vmem:[#allocation2 + $0xc8] sm:$0xff] %vm22_vm0, %v1353_v48 }
  0x1b   :  { %1173 = vmatpush3.bf16.msra.mxu0 %v1302_v15  ;;  %1286 = vmatpush3.bf16.msra.mxu1 %v1302_v15  ;;  %49 = vst.msk [vmem:[#allocation2 + $0xd0] sm:$0xff] %vm22_vm0, %v1353_v48  ;;  %50 = vst.msk [vmem:[#allocation2 + $0xd8] sm:$0xff] %vm22_vm0, %v1353_v48  ;;  %v1568_v15 = vld [vmem:[%s1847_s2] ss:$0 sm:$0xff] }
  0x1c   :  { %1174 = vmatprep.subr.bf16.mxu0 %v1303_v16  ;;  %1279 = vmatprep.subr.bf16.mxu1 %v1303_v16  ;;  %51 = vst.msk [vmem:[#allocation2 + $0xe0] sm:$0xff] %vm22_vm0, %v1353_v48  ;;  %52 = vst.msk [vmem:[#allocation2 + $0xe8] sm:$0xff] %vm22_vm0, %v1353_v48 }
  0x1d   :  { %53 = vst.msk [vmem:[#allocation2 + $0xf0] sm:$0xff] %vm22_vm0, %v1353_v48  ;;  %54 = vst.msk [vmem:[#allocation2 + $0xf8] sm:$0xff] %vm22_vm0, %v1353_v48  ;;  %v71_v53 = vld [vmem:[#allocation2 + $0x80] sm:$0xff]  ;;  %v72_v63 = vld [vmem:[#allocation2 + $0x88] sm:$0xff] }
  0x1e   :  { %v73_v11 = vld [vmem:[#allocation2 + $0x90] sm:$0xff] }
  0x1f   :  { %1175 = vmatpush3.bf16.msra.mxu0 %v1304_v17  ;;  %1287 = vmatpush3.bf16.msra.mxu1 %v1304_v17 }
  0x22   :  { %440 = vmatmul.mubr.bf16.vlgmr.msra.gmra.mxu0 %v1305_v18  ;;  %504 = vmatmul.mubr.bf16.vlgmr.msra.gmra.mxu1 %v1308_v19  ;;  %v1083_v18 = vunpack.c.l.bf16 %v1082_v8  ;;  %v1115_v19 = vunpack.c.l.bf16 %v1152_v9 }
  0x23   :  { %447 = vmatprep.mubr.bf16.mxu0 %v1311_v20  ;;  %511 = vmatprep.mubr.bf16.mxu1 %v1313_v21 }
  0x2a   :  { %448 = vmatmul.mubr.bf16.gmra.mxu0 %v1315_v22  ;;  %512 = vmatmul.mubr.bf16.gmra.mxu1 %v1316_v23  ;;  %v58_v22 = vld [vmem:[#allocation2 + $0x18] sm:$0xff] }
  0x2b   :  { %455 = vmatprep.mubr.bf16.mxu0 %v1317_v24  ;;  %519 = vmatprep.mubr.bf16.mxu1 %v1319_v25 }
  0x32   :  { %456 = vmatmul.mubr.bf16.gmra.mxu0 %v1321_v26  ;;  %520 = vmatmul.mubr.bf16.gmra.mxu1 %v1322_v27  ;;  %v74_v26 = vld [vmem:[#allocation2 + $0x98] sm:$0xff] }
  0x33   :  { %463 = vmatprep.mubr.bf16.mxu0 %v1323_v28  ;;  %527 = vmatprep.mubr.bf16.mxu1 %v1325_v29 }
  0x3a   :  { %464 = vmatmul.mubr.bf16.gmra.mxu0 %v1327_v30  ;;  %528 = vmatmul.mubr.bf16.gmra.mxu1 %v1328_v31 }
  0x3b   :  { %471 = vmatprep.mubr.bf16.mxu0 %v1329_v32  ;;  %535 = vmatprep.mubr.bf16.mxu1 %v1331_v33  ;;  %v1084_v32 = vunpack.c.h.bf16 %v1082_v8  ;;  %v1116_v33 = vunpack.c.h.bf16 %v1152_v9 }
  0x42   :  { %472 = vmatmul.mubr.bf16.gmra.mxu0 %v1333_v34  ;;  %536 = vmatmul.mubr.bf16.gmra.mxu1 %v1334_v35 }
  0x43   :  { %479 = vmatprep.mubr.bf16.mxu0 %v1335_v36  ;;  %543 = vmatprep.mubr.bf16.mxu1 %v1337_v37 }
  0x4a   :  { %480 = vmatmul.mubr.bf16.gmra.mxu0 %v1339_v38  ;;  %544 = vmatmul.mubr.bf16.gmra.mxu1 %v1340_v39  ;;  %v1577_v38 = vld [vmem:[%s1846_s3 + $0x8] sm:$0xff]  }
  0x4b   :  { %487 = vmatprep.mubr.bf16.mxu0 %v1341_v40  ;;  %551 = vmatprep.mubr.bf16.mxu1 %v1343_v41 }
  0x52   :  { %488 = vmatmul.mubr.bf16.gmra.mxu0 %v1345_v42  ;;  %552 = vmatmul.mubr.bf16.gmra.mxu1 %v1346_v43  ;;  %v1582_v43 = vld [vmem:[%s1846_s3 + $0x48] sm:$0xff]  }
  0x53   :  { %495 = vmatprep.mubr.bf16.mxu0 %v1347_v44  ;;  %559 = vmatprep.mubr.bf16.mxu1 %v1349_v45 }
  0x5a   :  { %496 = vmatmul.mubr.bf16.gmra.mxu0 %v1351_v46  ;;  %560 = vmatmul.mubr.bf16.gmra.mxu1 %v1352_v47 }
  0xe2   :  { %v1176_v49 = vpop.f32.mrf.mxu0  ;;  %v1224_v50 = vpop.f32.mrf.mxu1 }
  0xe4   :  { %v1177_v52 = vpop.f32.mrf.mxu0  ;;  %v1225_v54 = vpop.f32.mrf.mxu1 }
  0xe5   :  { %v1178_v55 = vadd.f32 %v1177_v52, %v1176_v49  ;;  %v1226_v56 = vadd.f32 %v1225_v54, %v1224_v50  ;;  %v59_v50 = vld [vmem:[#allocation2 + $0x20] sm:$0xff] }
  0xe6   :  { %v1179_v57 = vpop.f32.mrf.mxu0  ;;  %v1227_v58 = vpop.f32.mrf.mxu1 }
  0xe7   :  { %v568_v59 = vadd.f32 %v1178_v55, %v55_v51  ;;  %v584_v60 = vadd.f32 %v1226_v56, %v71_v53  ;;  %v75_v51 = vld [vmem:[#allocation2 + $0xa0] sm:$0xff] }
  0xe8   :  { %v1180_v62 = vpop.f32.mrf.mxu0  ;;  %v1228_v0 = vpop.f32.mrf.mxu1 }
  0xe9   :  { %601 = vst.msk [vmem:[#allocation2] sm:$0xff] %vm22_vm0, %v568_v59  ;;  %617 = vst.msk [vmem:[#allocation2 + $0x80] sm:$0xff] %vm22_vm0, %v584_v60  ;;  %v1181_v1 = vadd.f32 %v1180_v62, %v1179_v57  ;;  %v1229_v2 = vadd.f32 %v1228_v0, %v1227_v58  ;;  %v1087_v58 = vunpack.c.l.bf16 %v1577_v38  ;;  %v1119_v59 = vunpack.c.l.bf16 %v1582_v43 }
  0xea   :  { %v1182_v3 = vpop.f32.mrf.mxu0  ;;  %v1230_v4 = vpop.f32.mrf.mxu1 }
  0xeb   :  { %v569_v5 = vadd.f32 %v1181_v1, %v56_v61  ;;  %v585_v6 = vadd.f32 %v1229_v2, %v72_v63 }
  0xec   :  { %v1183_v10 = vpop.f32.mrf.mxu0  ;;  %v1231_v12 = vpop.f32.mrf.mxu1 }
  0xed   :  { %602 = vst.msk [vmem:[#allocation2 + $0x8] sm:$0xff] %vm22_vm0, %v569_v5  ;;  %618 = vst.msk [vmem:[#allocation2 + $0x88] sm:$0xff] %vm22_vm0, %v585_v6  ;;  %v1184_v13 = vadd.f32 %v1183_v10, %v1182_v3  ;;  %v1232_v14 = vadd.f32 %v1231_v12, %v1230_v4  ;;  %v60_v6 = vld [vmem:[#allocation2 + $0x28] sm:$0xff] }
  0xee   :  { %v1185_v16 = vpop.f32.mrf.mxu0  ;;  %v1233_v17 = vpop.f32.mrf.mxu1 }
  0xef   :  { %v570_v20 = vadd.f32 %v1184_v13, %v57_v7  ;;  %v586_v21 = vadd.f32 %v1232_v14, %v73_v11  ;;  %v76_v7 = vld [vmem:[#allocation2 + $0xa8] sm:$0xff]  ;;  %v1088_v14 = vunpack.c.h.bf16 %v1577_v38 }
  0xf0   :  { %v636_v23 = vld [vmem:[#allocation2] sm:$0xff]  ;;  %v1186_v25 = vpop.f32.mrf.mxu0  ;;  %v1234_v27 = vpop.f32.mrf.mxu1 }
  0xf1   :  { %v652_v24 = vld [vmem:[#allocation2 + $0x80] sm:$0xff]  ;;  %v675_v28 = vadd.f32 %v1568_v15, %v636_v23  ;;  %603 = vst.msk [vmem:[#allocation2 + $0x10] sm:$0xff] %vm22_vm0, %v570_v20  ;;  %619 = vst.msk [vmem:[#allocation2 + $0x90] sm:$0xff] %vm22_vm0, %v586_v21  ;;  %v1187_v30 = vadd.f32 %v1186_v25, %v1185_v16  ;;  %v1235_v31 = vadd.f32 %v1234_v27, %v1233_v17  ;;  %v1120_v16 = vunpack.c.h.bf16 %v1582_v43  ;;  %v61_v21 = vld [vmem:[#allocation2 + $0x30] sm:$0xff] }
  0xf2   :  { %v691_v29 = vadd.f32 %v1568_v15, %v652_v24  ;;  %v1188_v34 = vpop.f32.mrf.mxu0  ;;  %v1236_v35 = vpop.f32.mrf.mxu1  ;;  %v78_v43 = vld [vmem:[#allocation2 + $0xb8] sm:$0xff] }
  0xf3   :  { %v771_v36 = vadd.f32 %v1083_v18, %v675_v28  ;;  %v571_v39 = vadd.f32 %v1187_v30, %v58_v22  ;;  %v587_v40 = vadd.f32 %v1235_v31, %v74_v26  ;;  %v1617_v28 = vld [vmem:[%s1846_s3 + $0x10] sm:$0xff]  }
  0xf4   :  { %v787_v37 = vadd.f32 %v1115_v19, %v691_v29  ;;  %v637_v41 = vld [vmem:[#allocation2 + $0x8] sm:$0xff]  ;;  %v1189_v44 = vpop.f32.mrf.mxu0  ;;  %v1237_v45 = vpop.f32.mrf.mxu1  ;;  %v1622_v29 = vld [vmem:[%s1846_s3 + $0x50] sm:$0xff]  }
  0xf5   :  { %v653_v42 = vld [vmem:[#allocation2 + $0x88] sm:$0xff]  ;;  %v1049_v46 = vpack.c.bf16 %v771_v36, %v771_v36  ;;  %v676_v48 = vadd.f32 %v1568_v15, %v637_v41  ;;  %604 = vst.msk [vmem:[#allocation2 + $0x18] sm:$0xff] %vm22_vm0, %v571_v39  ;;  %620 = vst.msk [vmem:[#allocation2 + $0x98] sm:$0xff] %vm22_vm0, %v587_v40  ;;  %v1190_v52 = vadd.f32 %v1189_v44, %v1188_v34  ;;  %v77_v30 = vld [vmem:[#allocation2 + $0xb0] sm:$0xff]  ;;  %v1123_v38 = vunpack.c.l.bf16 %v1622_v29 }
  0xf6   :  { %v1065_v47 = vpack.c.bf16 %v787_v37, %v787_v37  ;;  %v692_v49 = vadd.f32 %v1568_v15, %v653_v42  ;;  %v1238_v53 = vadd.f32 %v1237_v45, %v1236_v35  ;;  %v1191_v54 = vpop.f32.mrf.mxu0  ;;  %v1239_v55 = vpop.f32.mrf.mxu1  ;;  %v1091_v37 = vunpack.c.l.bf16 %v1617_v28  ;;  %v62_v41 = vld [vmem:[#allocation2 + $0x38] sm:$0xff] }
  0xf7   :  { %932 = vst.msk [vmem:[%s1848_s4] sm:$0xf] %vm931_vm1, %v1049_v46  ;;  %v772_v56 = vadd.f32 %v1084_v32, %v676_v48  ;;  %v572_v62 = vadd.f32 %v1190_v52, %v59_v50 }
  0xf8   :  { %948 = vst.msk [vmem:[%s1848_s4 + $0x40] sm:$0xf] %vm931_vm1, %v1065_v47  ;;  %v788_v57 = vadd.f32 %v1116_v33, %v692_v49  ;;  %v638_v60 = vld [vmem:[#allocation2 + $0x10] sm:$0xff]  ;;  %v588_v63 = vadd.f32 %v1238_v53, %v75_v51  ;;  %v1192_v0 = vpop.f32.mrf.mxu0  ;;  %v1240_v1 = vpop.f32.mrf.mxu1 }
  0xf9   :  { %v654_v61 = vld [vmem:[#allocation2 + $0x90] sm:$0xff]  ;;  %v1050_v2 = vpack.c.bf16 %v772_v56, %v772_v56  ;;  %v677_v4 = vadd.f32 %v1568_v15, %v638_v60  ;;  %605 = vst.msk [vmem:[#allocation2 + $0x20] sm:$0xff] %vm22_vm0, %v572_v62  ;;  %v1193_v8 = vadd.f32 %v1192_v0, %v1191_v54  ;;  %v1241_v9 = vadd.f32 %v1240_v1, %v1239_v55  ;;  %v63_v62 = vld [vmem:[#allocation2 + $0x40] sm:$0xff] }
  0xfa   :  { %v1066_v3 = vpack.c.bf16 %v788_v57, %v788_v57  ;;  %v693_v5 = vadd.f32 %v1568_v15, %v654_v61  ;;  %621 = vst.msk [vmem:[#allocation2 + $0xa0] sm:$0xff] %vm22_vm0, %v588_v63  ;;  %v1194_v10 = vpop.f32.mrf.mxu0  ;;  %v1242_v11 = vpop.f32.mrf.mxu1  ;;  %v1124_v60 = vunpack.c.h.bf16 %v1622_v29  ;;  %v1653_v61 = vld [vmem:[%s1846_s3 + $0x18] sm:$0xff]   ;;  %v79_v0 = vld [vmem:[#allocation2 + $0xc0] sm:$0xff] }
  0xfb   :  { %933 = vst.msk [vmem:[%s1848_s4 + $0x4] sm:$0xf] %vm931_vm1, %v1050_v2  ;;  %v773_v12 = vadd.f32 %v1087_v58, %v677_v4  ;;  %v573_v19 = vadd.f32 %v1193_v8, %v60_v6  ;;  %v589_v20 = vadd.f32 %v1241_v9, %v76_v7  ;;  %v1658_v4 = vld [vmem:[%s1846_s3 + $0x58] sm:$0xff]  }
  0xfc   :  { %949 = vst.msk [vmem:[%s1848_s4 + $0x44] sm:$0xf] %vm931_vm1, %v1066_v3  ;;  %v789_v13 = vadd.f32 %v1119_v59, %v693_v5  ;;  %v639_v17 = vld [vmem:[#allocation2 + $0x18] sm:$0xff]  ;;  %v1195_v22 = vpop.f32.mrf.mxu0  ;;  %v1243_v23 = vpop.f32.mrf.mxu1  ;;  %v1092_v59 = vunpack.c.h.bf16 %v1617_v28 }
  0xfd   :  { %v655_v18 = vld [vmem:[#allocation2 + $0x98] sm:$0xff]  ;;  %v1051_v24 = vpack.c.bf16 %v773_v12, %v773_v12  ;;  %v678_v26 = vadd.f32 %v1568_v15, %v639_v17  ;;  %606 = vst.msk [vmem:[#allocation2 + $0x28] sm:$0xff] %vm22_vm0, %v573_v19  ;;  %622 = vst.msk [vmem:[#allocation2 + $0xa8] sm:$0xff] %vm22_vm0, %v589_v20  ;;  %v1196_v31 = vadd.f32 %v1195_v22, %v1194_v10  ;;  %v1127_v19 = vunpack.c.l.bf16 %v1658_v4  ;;  %v64_v20 = vld [vmem:[#allocation2 + $0x48] sm:$0xff] }
  0xfe   :  { %v1067_v25 = vpack.c.bf16 %v789_v13, %v789_v13  ;;  %v694_v27 = vadd.f32 %v1568_v15, %v655_v18  ;;  %v1244_v32 = vadd.f32 %v1243_v23, %v1242_v11  ;;  %v1197_v33 = vpop.f32.mrf.mxu0  ;;  %v1245_v34 = vpop.f32.mrf.mxu1  ;;  %v1095_v18 = vunpack.c.l.bf16 %v1653_v61  ;;  %v80_v22 = vld [vmem:[#allocation2 + $0xc8] sm:$0xff] }
  0xff   :  { %934 = vst.msk [vmem:[%s1848_s4 + $0x8] sm:$0xf] %vm931_vm1, %v1051_v24  ;;  %v774_v35 = vadd.f32 %v1088_v14, %v678_v26  ;;  %v574_v39 = vadd.f32 %v1196_v31, %v61_v21 }
 0x100   :  { %950 = vst.msk [vmem:[%s1848_s4 + $0x48] sm:$0xf] %vm931_vm1, %v1067_v25  ;;  %v790_v36 = vadd.f32 %v1120_v16, %v694_v27  ;;  %v590_v40 = vadd.f32 %v1244_v32, %v77_v30  ;;  %v1198_v42 = vpop.f32.mrf.mxu0  ;;  %v1246_v44 = vpop.f32.mrf.mxu1  ;;  %v640_v47 = vld [vmem:[#allocation2 + $0x20] sm:$0xff] }
 0x101   :  { %v1052_v45 = vpack.c.bf16 %v774_v35, %v774_v35  ;;  %v656_v48 = vld [vmem:[#allocation2 + $0xa0] sm:$0xff]  ;;  %v1199_v49 = vadd.f32 %v1198_v42, %v1197_v33  ;;  %v1247_v50 = vadd.f32 %v1246_v44, %v1245_v34  ;;  %v679_v51 = vadd.f32 %v1568_v15, %v640_v47  ;;  %607 = vst.msk [vmem:[#allocation2 + $0x30] sm:$0xff] %vm22_vm0, %v574_v39 }
 0x102   :  { %v1068_v46 = vpack.c.bf16 %v790_v36, %v790_v36  ;;  %v695_v52 = vadd.f32 %v1568_v15, %v656_v48  ;;  %623 = vst.msk [vmem:[#allocation2 + $0xb0] sm:$0xff] %vm22_vm0, %v590_v40  ;;  %v1200_v53 = vpop.f32.mrf.mxu0  ;;  %v1248_v54 = vpop.f32.mrf.mxu1  ;;  %v1096_v34 = vunpack.c.h.bf16 %v1653_v61  ;;  %v1128_v35 = vunpack.c.h.bf16 %v1658_v4  ;;  %v1683_v36 = vld [vmem:[%s1846_s3 + $0x20] sm:$0xff]   ;;  %v65_v40 = vld [vmem:[#allocation2 + $0x50] sm:$0xff] }
 0x103   :  { %935 = vst.msk [vmem:[%s1848_s4 + $0xc] sm:$0xf] %vm931_vm1, %v1052_v45  ;;  %v575_v55 = vadd.f32 %v1199_v49, %v62_v41  ;;  %v591_v56 = vadd.f32 %v1247_v50, %v78_v43  ;;  %v775_v57 = vadd.f32 %v1091_v37, %v679_v51  ;;  %v1688_v37 = vld [vmem:[%s1846_s3 + $0x60] sm:$0xff]  }
 0x104   :  { %951 = vst.msk [vmem:[%s1848_s4 + $0x4c] sm:$0xf] %vm931_vm1, %v1068_v46  ;;  %v791_v58 = vadd.f32 %v1123_v38, %v695_v52  ;;  %v1201_v63 = vpop.f32.mrf.mxu0  ;;  %v1249_v1 = vpop.f32.mrf.mxu1  ;;  %v641_v2 = vld [vmem:[#allocation2 + $0x28] sm:$0xff]  ;;  %v81_v46 = vld [vmem:[#allocation2 + $0xd0] sm:$0xff] }
 0x105   :  { %v657_v3 = vld [vmem:[#allocation2 + $0xa8] sm:$0xff]  ;;  %608 = vst.msk [vmem:[#allocation2 + $0x38] sm:$0xff] %vm22_vm0, %v575_v55  ;;  %624 = vst.msk [vmem:[#allocation2 + $0xb8] sm:$0xff] %vm22_vm0, %v591_v56  ;;  %v1202_v5 = vadd.f32 %v1201_v63, %v1200_v53  ;;  %v1250_v6 = vadd.f32 %v1249_v1, %v1248_v54  ;;  %v1053_v7 = vpack.c.bf16 %v775_v57, %v775_v57  ;;  %v1099_v54 = vunpack.c.l.bf16 %v1683_v36 }
 0x106   :  { %v1069_v8 = vpack.c.bf16 %v791_v58, %v791_v58  ;;  %v680_v9 = vadd.f32 %v1568_v15, %v641_v2  ;;  %v696_v10 = vadd.f32 %v1568_v15, %v657_v3  ;;  %v1203_v11 = vpop.f32.mrf.mxu0  ;;  %v1251_v12 = vpop.f32.mrf.mxu1  ;;  %v1131_v55 = vunpack.c.l.bf16 %v1688_v37 }
 0x107   :  { %v576_v13 = vadd.f32 %v1202_v5, %v63_v62  ;;  %v592_v14 = vadd.f32 %v1250_v6, %v79_v0  ;;  %936 = vst.msk [vmem:[%s1848_s4 + $0x10] sm:$0xf] %vm931_vm1, %v1053_v7  ;;  %v66_v6 = vld [vmem:[#allocation2 + $0x58] sm:$0xff] }
 0x108   :  { %952 = vst.msk [vmem:[%s1848_s4 + $0x50] sm:$0xf] %vm931_vm1, %v1069_v8  ;;  %v776_v16 = vadd.f32 %v1092_v59, %v680_v9  ;;  %v792_v17 = vadd.f32 %v1124_v60, %v696_v10  ;;  %v1204_v21 = vpop.f32.mrf.mxu0  ;;  %v1252_v23 = vpop.f32.mrf.mxu1  ;;  %v642_v24 = vld [vmem:[#allocation2 + $0x30] sm:$0xff]  ;;  %v82_v7 = vld [vmem:[#allocation2 + $0xd8] sm:$0xff] }
 0x109   :  { %v658_v25 = vld [vmem:[#allocation2 + $0xb0] sm:$0xff]  ;;  %609 = vst.msk [vmem:[#allocation2 + $0x40] sm:$0xff] %vm22_vm0, %v576_v13  ;;  %625 = vst.msk [vmem:[#allocation2 + $0xc0] sm:$0xff] %vm22_vm0, %v592_v14  ;;  %v1205_v26 = vadd.f32 %v1204_v21, %v1203_v11  ;;  %v1253_v27 = vadd.f32 %v1252_v23, %v1251_v12  ;;  %v681_v30 = vadd.f32 %v1568_v15, %v642_v24  ;;  %v1100_v14 = vunpack.c.h.bf16 %v1683_v36 }
 0x10a   :  { %v1054_v28 = vpack.c.bf16 %v776_v16, %v776_v16  ;;  %v1070_v29 = vpack.c.bf16 %v792_v17, %v792_v17  ;;  %v697_v31 = vadd.f32 %v1568_v15, %v658_v25  ;;  %v1206_v32 = vpop.f32.mrf.mxu0  ;;  %v1254_v33 = vpop.f32.mrf.mxu1  ;;  %v1132_v16 = vunpack.c.h.bf16 %v1688_v37  ;;  %v1729_v17 = vld [vmem:[%s1846_s3 + $0x28] sm:$0xff]  }
 0x10b   :  { %v577_v38 = vadd.f32 %v1205_v26, %v64_v20  ;;  %v593_v39 = vadd.f32 %v1253_v27, %v80_v22  ;;  %v777_v41 = vadd.f32 %v1095_v18, %v681_v30  ;;  %v1734_v20 = vld [vmem:[%s1846_s3 + $0x68] sm:$0xff]   ;;  %v83_v30 = vld [vmem:[#allocation2 + $0xe0] sm:$0xff]  ;;  %v1103_v37 = vunpack.c.l.bf16 %v1729_v17 }
 0x10c   :  { %937 = vst.msk [vmem:[%s1848_s4 + $0x14] sm:$0xf] %vm931_vm1, %v1054_v28  ;;  %953 = vst.msk [vmem:[%s1848_s4 + $0x54] sm:$0xf] %vm931_vm1, %v1070_v29  ;;  %v793_v42 = vadd.f32 %v1127_v19, %v697_v31  ;;  %v643_v43 = vld [vmem:[#allocation2 + $0x38] sm:$0xff]  ;;  %v1207_v45 = vpop.f32.mrf.mxu0  ;;  %v1255_v47 = vpop.f32.mrf.mxu1  ;;  %v67_v29 = vld [vmem:[#allocation2 + $0x60] sm:$0xff] }
 0x10d   :  { %v659_v44 = vld [vmem:[#allocation2 + $0xb8] sm:$0xff]  ;;  %v682_v48 = vadd.f32 %v1568_v15, %v643_v43  ;;  %610 = vst.msk [vmem:[#allocation2 + $0x48] sm:$0xff] %vm22_vm0, %v577_v38  ;;  %626 = vst.msk [vmem:[#allocation2 + $0xc8] sm:$0xff] %vm22_vm0, %v593_v39  ;;  %v1208_v50 = vadd.f32 %v1207_v45, %v1206_v32  ;;  %v1256_v51 = vadd.f32 %v1255_v47, %v1254_v33  ;;  %v1135_v38 = vunpack.c.l.bf16 %v1734_v20 }
 0x10e   :  { %v698_v49 = vadd.f32 %v1568_v15, %v659_v44  ;;  %v1055_v52 = vpack.c.bf16 %v777_v41, %v777_v41  ;;  %v1071_v53 = vpack.c.bf16 %v793_v42, %v793_v42  ;;  %v1209_v56 = vpop.f32.mrf.mxu0  ;;  %v1257_v57 = vpop.f32.mrf.mxu1 }
 0x10f   :  { %v778_v58 = vadd.f32 %v1096_v34, %v682_v48  ;;  %v578_v60 = vadd.f32 %v1208_v50, %v65_v40  ;;  %v594_v61 = vadd.f32 %v1256_v51, %v81_v46  ;;  %v84_v50 = vld [vmem:[#allocation2 + $0xe8] sm:$0xff] }
 0x110   :  { %v794_v59 = vadd.f32 %v1128_v35, %v698_v49  ;;  %938 = vst.msk [vmem:[%s1848_s4 + $0x18] sm:$0xf] %vm931_vm1, %v1055_v52  ;;  %954 = vst.msk [vmem:[%s1848_s4 + $0x58] sm:$0xf] %vm931_vm1, %v1071_v53  ;;  %v644_v62 = vld [vmem:[#allocation2 + $0x40] sm:$0xff]  ;;  %v1210_v0 = vpop.f32.mrf.mxu0  ;;  %v1258_v1 = vpop.f32.mrf.mxu1  ;;  %v68_v49 = vld [vmem:[#allocation2 + $0x68] sm:$0xff] }
 0x111   :  { %v660_v63 = vld [vmem:[#allocation2 + $0xc0] sm:$0xff]  ;;  %v1056_v2 = vpack.c.bf16 %v778_v58, %v778_v58  ;;  %v683_v4 = vadd.f32 %v1568_v15, %v644_v62  ;;  %611 = vst.msk [vmem:[#allocation2 + $0x50] sm:$0xff] %vm22_vm0, %v578_v60  ;;  %627 = vst.msk [vmem:[#allocation2 + $0xd0] sm:$0xff] %vm22_vm0, %v594_v61  ;;  %v1211_v8 = vadd.f32 %v1210_v0, %v1209_v56  ;;  %v1136_v58 = vunpack.c.h.bf16 %v1734_v20  ;;  %v69_v62 = vld [vmem:[#allocation2 + $0x70] sm:$0xff] }
 0x112   :  { %v1072_v3 = vpack.c.bf16 %v794_v59, %v794_v59  ;;  %v699_v5 = vadd.f32 %v1568_v15, %v660_v63  ;;  %v1259_v9 = vadd.f32 %v1258_v1, %v1257_v57  ;;  %v1212_v10 = vpop.f32.mrf.mxu0  ;;  %v1260_v11 = vpop.f32.mrf.mxu1  ;;  %v1104_v57 = vunpack.c.h.bf16 %v1729_v17  ;;  %v1767_v59 = vld [vmem:[%s1846_s3 + $0x30] sm:$0xff]   ;;  %v70_v20 = vld [vmem:[#allocation2 + $0x78] sm:$0xff] }
 0x113   :  { %939 = vst.msk [vmem:[%s1848_s4 + $0x1c] sm:$0xf] %vm931_vm1, %v1056_v2  ;;  %v779_v12 = vadd.f32 %v1099_v54, %v683_v4  ;;  %v579_v21 = vadd.f32 %v1211_v8, %v66_v6  ;;  %v85_v0 = vld [vmem:[#allocation2 + $0xf0] sm:$0xff] }
 0x114   :  { %955 = vst.msk [vmem:[%s1848_s4 + $0x5c] sm:$0xf] %vm931_vm1, %v1072_v3  ;;  %v795_v13 = vadd.f32 %v1131_v55, %v699_v5  ;;  %v645_v18 = vld [vmem:[#allocation2 + $0x48] sm:$0xff]  ;;  %v595_v22 = vadd.f32 %v1259_v9, %v82_v7  ;;  %v1213_v23 = vpop.f32.mrf.mxu0  ;;  %v1261_v24 = vpop.f32.mrf.mxu1  ;;  %v1158_v6 = vld [vmem:[%s1846_s3 + $0x70] sm:$0xff]  }
 0x115   :  { %v661_v19 = vld [vmem:[#allocation2 + $0xc8] sm:$0xff]  ;;  %v1057_v25 = vpack.c.bf16 %v779_v12, %v779_v12  ;;  %v684_v27 = vadd.f32 %v1568_v15, %v645_v18  ;;  %612 = vst.msk [vmem:[#allocation2 + $0x58] sm:$0xff] %vm22_vm0, %v579_v21  ;;  %v1214_v31 = vadd.f32 %v1213_v23, %v1212_v10  ;;  %v1262_v32 = vadd.f32 %v1261_v24, %v1260_v11 }
 0x116   :  { %v1073_v26 = vpack.c.bf16 %v795_v13, %v795_v13  ;;  %v700_v28 = vadd.f32 %v1568_v15, %v661_v19  ;;  %628 = vst.msk [vmem:[#allocation2 + $0xd8] sm:$0xff] %vm22_vm0, %v595_v22  ;;  %v1215_v33 = vpop.f32.mrf.mxu0  ;;  %v1263_v34 = vpop.f32.mrf.mxu1  ;;  %v1107_v18 = vunpack.c.l.bf16 %v1767_v59  ;;  %v1139_v19 = vunpack.c.l.bf16 %v1158_v6  ;;  %v86_v22 = vld [vmem:[#allocation2 + $0xf8] sm:$0xff] }
 0x117   :  { %940 = vst.msk [vmem:[%s1848_s4 + $0x20] sm:$0xf] %vm931_vm1, %v1057_v25  ;;  %v780_v35 = vadd.f32 %v1100_v14, %v684_v27  ;;  %v580_v41 = vadd.f32 %v1214_v31, %v67_v29  ;;  %v596_v42 = vadd.f32 %v1262_v32, %v83_v30 }
 0x118   :  { %956 = vst.msk [vmem:[%s1848_s4 + $0x60] sm:$0xf] %vm931_vm1, %v1073_v26  ;;  %v796_v36 = vadd.f32 %v1132_v16, %v700_v28  ;;  %v646_v39 = vld [vmem:[#allocation2 + $0x50] sm:$0xff]  ;;  %v1216_v43 = vpop.f32.mrf.mxu0  ;;  %v1264_v44 = vpop.f32.mrf.mxu1 }
 0x119   :  { %v662_v40 = vld [vmem:[#allocation2 + $0xd0] sm:$0xff]  ;;  %v1058_v45 = vpack.c.bf16 %v780_v35, %v780_v35  ;;  %v685_v47 = vadd.f32 %v1568_v15, %v646_v39  ;;  %613 = vst.msk [vmem:[#allocation2 + $0x60] sm:$0xff] %vm22_vm0, %v580_v41  ;;  %629 = vst.msk [vmem:[#allocation2 + $0xe0] sm:$0xff] %vm22_vm0, %v596_v42  ;;  %v1217_v51 = vadd.f32 %v1216_v43, %v1215_v33  ;;  %v1159_v39 = vld [vmem:[%s1846_s3 + $0x78] sm:$0xff]  }
 0x11a   :  { %v1074_v46 = vpack.c.bf16 %v796_v36, %v796_v36  ;;  %v701_v48 = vadd.f32 %v1568_v15, %v662_v40  ;;  %v1265_v52 = vadd.f32 %v1264_v44, %v1263_v34  ;;  %v1218_v53 = vpop.f32.mrf.mxu0  ;;  %v1266_v54 = vpop.f32.mrf.mxu1  ;;  %v1108_v36 = vunpack.c.h.bf16 %v1767_v59 }
 0x11b   :  { %941 = vst.msk [vmem:[%s1848_s4 + $0x24] sm:$0xf] %vm931_vm1, %v1058_v45  ;;  %v781_v55 = vadd.f32 %v1103_v37, %v685_v47  ;;  %v581_v60 = vadd.f32 %v1217_v51, %v68_v49  ;;  %v1140_v37 = vunpack.c.h.bf16 %v1158_v6  ;;  %v1143_v47 = vunpack.c.l.bf16 %v1159_v39 }
 0x11c   :  { %957 = vst.msk [vmem:[%s1848_s4 + $0x64] sm:$0xf] %vm931_vm1, %v1074_v46  ;;  %v797_v56 = vadd.f32 %v1135_v38, %v701_v48  ;;  %v597_v61 = vadd.f32 %v1265_v52, %v84_v50  ;;  %v1219_v63 = vpop.f32.mrf.mxu0  ;;  %v1267_v1 = vpop.f32.mrf.mxu1  ;;  %v647_v4 = vld [vmem:[#allocation2 + $0x58] sm:$0xff]  ;;  %v1144_v59 = vunpack.c.h.bf16 %v1159_v39 }
 0x11d   :  { %v1059_v2 = vpack.c.bf16 %v781_v55, %v781_v55  ;;  %v663_v5 = vld [vmem:[#allocation2 + $0xd8] sm:$0xff]  ;;  %v1220_v7 = vadd.f32 %v1219_v63, %v1218_v53  ;;  %v1268_v8 = vadd.f32 %v1267_v1, %v1266_v54  ;;  %v686_v9 = vadd.f32 %v1568_v15, %v647_v4  ;;  %614 = vst.msk [vmem:[#allocation2 + $0x68] sm:$0xff] %vm22_vm0, %v581_v60 }
 0x11e   :  { %v1075_v3 = vpack.c.bf16 %v797_v56, %v797_v56  ;;  %v702_v10 = vadd.f32 %v1568_v15, %v663_v5  ;;  %630 = vst.msk [vmem:[#allocation2 + $0xe8] sm:$0xff] %vm22_vm0, %v597_v61  ;;  %v1221_v11 = vpop.f32.mrf.mxu0  ;;  %v1269_v12 = vpop.f32.mrf.mxu1  ;;  %v1151_v38 = vld [vmem:[%s1846_s3 + $0x38] sm:$0xff]  }
 0x11f   :  { %942 = vst.msk [vmem:[%s1848_s4 + $0x28] sm:$0xf] %vm931_vm1, %v1059_v2  ;;  %v582_v13 = vadd.f32 %v1220_v7, %v69_v62  ;;  %v598_v14 = vadd.f32 %v1268_v8, %v85_v0  ;;  %v782_v16 = vadd.f32 %v1104_v57, %v686_v9  ;;  %v1111_v46 = vunpack.c.l.bf16 %v1151_v38 }
 0x120   :  { %958 = vst.msk [vmem:[%s1848_s4 + $0x68] sm:$0xf] %vm931_vm1, %v1075_v3  ;;  %v798_v17 = vadd.f32 %v1136_v58, %v702_v10  ;;  %v1222_v21 = vpop.f32.mrf.mxu0  ;;  %v1270_v23 = vpop.f32.mrf.mxu1  ;;  %v648_v24 = vld [vmem:[#allocation2 + $0x60] sm:$0xff]  ;;  %v1112_v58 = vunpack.c.h.bf16 %v1151_v38 }
 0x121   :  { %v664_v25 = vld [vmem:[#allocation2 + $0xe0] sm:$0xff]  ;;  %615 = vst.msk [vmem:[#allocation2 + $0x70] sm:$0xff] %vm22_vm0, %v582_v13  ;;  %631 = vst.msk [vmem:[#allocation2 + $0xf0] sm:$0xff] %vm22_vm0, %v598_v14  ;;  %v1223_v26 = vadd.f32 %v1222_v21, %v1221_v11  ;;  %v1271_v27 = vadd.f32 %v1270_v23, %v1269_v12  ;;  %v1060_v28 = vpack.c.bf16 %v782_v16, %v782_v16 }
 0x122   :  { %v1076_v29 = vpack.c.bf16 %v798_v17, %v798_v17  ;;  %v687_v30 = vadd.f32 %v1568_v15, %v648_v24  ;;  %v703_v31 = vadd.f32 %v1568_v15, %v664_v25 }
 0x123   :  { %v583_v32 = vadd.f32 %v1223_v26, %v70_v20  ;;  %v599_v33 = vadd.f32 %v1271_v27, %v86_v22  ;;  %943 = vst.msk [vmem:[%s1848_s4 + $0x2c] sm:$0xf] %vm931_vm1, %v1060_v28 }
 0x124   :  { %959 = vst.msk [vmem:[%s1848_s4 + $0x6c] sm:$0xf] %vm931_vm1, %v1076_v29  ;;  %v783_v34 = vadd.f32 %v1107_v18, %v687_v30  ;;  %v799_v35 = vadd.f32 %v1139_v19, %v703_v31  ;;  %v649_v40 = vld [vmem:[#allocation2 + $0x68] sm:$0xff] }
 0x125   :  { %v665_v41 = vld [vmem:[#allocation2 + $0xe8] sm:$0xff]  ;;  %616 = vst.msk [vmem:[#allocation2 + $0x78] sm:$0xff] %vm22_vm0, %v583_v32  ;;  %632 = vst.msk [vmem:[#allocation2 + $0xf8] sm:$0xff] %vm22_vm0, %v599_v33  ;;  %v688_v44 = vadd.f32 %v1568_v15, %v649_v40 }
 0x126   :  { %v1061_v42 = vpack.c.bf16 %v783_v34, %v783_v34  ;;  %v1077_v43 = vpack.c.bf16 %v799_v35, %v799_v35  ;;  %v704_v45 = vadd.f32 %v1568_v15, %v665_v41 }
 0x127   :  { %v784_v48 = vadd.f32 %v1108_v36, %v688_v44 }
 0x128   :  { %944 = vst.msk [vmem:[%s1848_s4 + $0x30] sm:$0xf] %vm931_vm1, %v1061_v42  ;;  %960 = vst.msk [vmem:[%s1848_s4 + $0x70] sm:$0xf] %vm931_vm1, %v1077_v43  ;;  %v800_v49 = vadd.f32 %v1140_v37, %v704_v45  ;;  %v650_v50 = vld [vmem:[#allocation2 + $0x70] sm:$0xff] }
 0x129   :  { %v666_v51 = vld [vmem:[#allocation2 + $0xf0] sm:$0xff]  ;;  %v689_v52 = vadd.f32 %v1568_v15, %v650_v50  ;;  %v1062_v54 = vpack.c.bf16 %v784_v48, %v784_v48 }
 0x12a   :  { %v705_v53 = vadd.f32 %v1568_v15, %v666_v51  ;;  %v1078_v55 = vpack.c.bf16 %v800_v49, %v800_v49 }
 0x12b   :  { %v785_v56 = vadd.f32 %v1111_v46, %v689_v52  ;;  %945 = vst.msk [vmem:[%s1848_s4 + $0x34] sm:$0xf] %vm931_vm1, %v1062_v54 }
 0x12c   :  { %v801_v57 = vadd.f32 %v1143_v47, %v705_v53  ;;  %961 = vst.msk [vmem:[%s1848_s4 + $0x74] sm:$0xf] %vm931_vm1, %v1078_v55  ;;  %v651_v60 = vld [vmem:[#allocation2 + $0x78] sm:$0xff] }
 0x12d   :  { %v667_v61 = vld [vmem:[#allocation2 + $0xf8] sm:$0xff]  ;;  %v1063_v62 = vpack.c.bf16 %v785_v56, %v785_v56  ;;  %v690_v0 = vadd.f32 %v1568_v15, %v651_v60 }
 0x12e   :  { %v1079_v63 = vpack.c.bf16 %v801_v57, %v801_v57  ;;  %v706_v1 = vadd.f32 %v1568_v15, %v667_v61 }
 0x12f   :  { %946 = vst.msk [vmem:[%s1848_s4 + $0x38] sm:$0xf] %vm931_vm1, %v1063_v62  ;;  %v786_v2 = vadd.f32 %v1112_v58, %v690_v0 }
 0x130   :  { %962 = vst.msk [vmem:[%s1848_s4 + $0x78] sm:$0xf] %vm931_vm1, %v1079_v63  ;;  %v802_v3 = vadd.f32 %v1144_v59, %v706_v1 }
 0x131   :  { %v1064_v4 = vpack.c.bf16 %v786_v2, %v786_v2 }
 0x132   :  { %v1080_v5 = vpack.c.bf16 %v802_v3, %v802_v3 }
 0x133   :  { %947 = vst.msk [vmem:[%s1848_s4 + $0x3c] sm:$0xf] %vm931_vm1, %v1064_v4 }
 0x134   :  { %963 = vst.msk [vmem:[%s1848_s4 + $0x7c] sm:$0xf] %vm931_vm1, %v1080_v5 }

// kernel: _lambda_.49
= control target key start
LH: loop header
LB: loop body
LE: loop exit
PB: predicated region body
PF: predicated region fallthrough
CT: control target
= control target key end

     0   :  { %vm18_vm0 = vcmask 517120   ;;  %v133_v6 = vmov 0.0   ;;  %vm134_vm1 = vmmov 0   ;;  %vm32_vm2 = vcmask 523264   ;;  %s167_s2 = inlined_call_operand.vmem [shape: f32[2,64], index: 2, kind: input, shape index: {}]   ;;  %s168_s1 = inlined_call_operand.vmem [shape: f32[2,64], index: 1, kind: input, shape index: {}]   ;;  %s169_s0 = inlined_call_operand.<no memory space> [shape: f32[1], index: 0, kind: input, shape index: {}]   ;;  %s170_s3 = inlined_call_operand.vmem [shape: f32[2,2], index: 3, kind: output, shape index: {}]  }
   0x1   :  { %v16_v0 = vld [vmem:[%s167_s2] sm:$0x3]  ;;  %122 = vmatprep.subr.mxu0 %v133_v6  ;;  %124 = vmatprep.mubr.msk.f32.mxu0 %vm134_vm1, %v133_v6  ;;  %v110_v15 = vstv %s169_s0  ;;  %vm112_vm3 = vcmask 9216  }
   0x2   :  { %v15_v1 = vld [vmem:[%s168_s1] sm:$0x3]  ;;  %v25_v2 = vmul.f32 %v16_v0, %v16_v0 }
   0x3   :  { %v17_v3 = vmul.f32 %v15_v1, %v15_v1 }
   0x4   :  { %v26_v4 = vsel %vm18_vm0, %v25_v2, 0.0 }
   0x5   :  { %27 = vadd.xlane.f32.xlu0 %v26_v4  ;;  %v19_v5 = vsel %vm18_vm0, %v17_v3, 0.0 }
   0x9   :  { %20 = vadd.xlane.f32.xlu0 %v19_v5 }
  0x8e   :  { %v28_v7 = vpop.xlane.xlu0 %27 }
  0x8f   :  { %v29_v8 = vadd.f32 1e-12, %v28_v7 }
  0x91   :  { %129 = vrsqrt.f32 %v29_v8 }
  0x92   :  { %v21_v9 = vpop.xlane.xlu0 %20 }
  0x93   :  { %v22_v10 = vadd.f32 1e-12, %v21_v9 }
  0x95   :  { %131 = vrsqrt.f32 %v22_v10 }
  0x9e   :  { %v130_v11 = vpop.eup %129 }
  0x9f   :  { %v31_v12 = vmul.f32 %v130_v11, %v16_v0 }
  0xa1   :  { %123 = vmatpush3.xpose.msk.msra.mxu0 %vm32_vm2, %v31_v12 }
  0xa2   :  { %v132_v13 = vpop.eup %131 }
  0xa3   :  { %v24_v14 = vmul.f32 %v132_v13, %v15_v1 }
  0xa5   :  { %125 = vmatmul.mubr.msk.f32.vlgmr.msra.gmra.mxu0 %vm32_vm2, %v24_v14 }
 0x165   :  { %v105_v16 = vpop.f32.mrf.mxu0 }
 0x166   :  { %v111_v17 = vmul.f32 %v110_v15, %v105_v16 }
 0x167   :  { %v126_v18 = vpop.f32.mrf.mxu0 }
 0x168   :  { %113 = vst.msk [vmem:[%s170_s3] sm:$0x3] %vm112_vm3, %v111_v17 }

// kernel: _lambda_.39
= control target key start
LH: loop header
LB: loop body
LE: loop exit
PB: predicated region body
PF: predicated region fallthrough
CT: control target
= control target key end

     0   :  { %s2612_s6 = smov 0   ;;  %s2614_s7 = smov 0   ;;  %s3371_s0 = inlined_call_operand.vmem [shape: bf16[3,2,128,64], index: 0, kind: input, shape index: {}]   ;;  %s3372_s1 = inlined_call_operand.vmem [shape: bf16[2,128,64], index: 1, kind: output, shape index: {}]  }
   0x1   :  { %s2616_s8 = smov 0   ;;  %s2618_s9 = smov 0  }
   0x2   :  { %s2620_s10 = smov 0  }
   0x3 LB: > { %s23_s11 = sadd.s32 1, %s2594_s9  ;;  %p39_p1 = scmp.ne.s32.totalorder %s2586_s7, %s2582_s6  ;;  %s2598_s10 = sphi %s2620_s10, %s11_s10   ;;  %s2594_s9 = sphi %s2618_s9, %s3443_s9   ;;  %s2590_s8 = sphi %s2616_s8, %s3442_s8   ;;  %s2586_s7 = sphi %s2614_s7, %s3441_s7   ;;  %s2582_s6 = sphi %s2612_s6, %s3440_s6  }
   0x4   : > { %p25_p0 = scmp.ge.s32.totalorder %s23_s11, 2  ;;  %p40_p2 = scmp.eq.s32.totalorder %s2598_s10, 0 }
   0x5   : > { %s32_s13 = sadd.s32 1, %s2586_s7  ;;  %p1930_p5 = scmp.ge.s32.totalorder %s2598_s10, 2 }
   0x6   : > { %s3445_s11 = smov (%p25_p0, %s23_s11), 0  ;;  %p41_p3 = por %p40_p2, %p39_p1 }
   0x7   : > { %s27_s12 = ssub.s32 %s2594_s9, %s3445_s11  ;;  %93 = sbr.rel (%p1930_p5) target bundleno = 29 (0x1d), region = 16 }
   0x8   : > { %p30_p4 = scmp.eq.s32.totalorder %s27_s12, 0 }
   0xa   : > { %s2647_s14 = scalar_select %p30_p4, %s2586_s7, %s32_s13  }
   0xc   : > { %96 = sbr.rel (!%p41_p3) target bundleno = 29 (0x1d), region = 20  ;;  %s98_s15 = sand.u32 (%p41_p3), 1, %s2586_s7  }
   0xd   : > { %s2098_s16 = sshll.u32 (%p41_p3), %s2594_s9, 6  ;;  %s2340_s17 = smul.u32 (%p41_p3), 192, %s98_s15 }
   0xe   : > { %s2655_s20 = scalar_lea.vmem (%p41_p3), %s3371_s0, %s2098_s16 }
   0xf   : > { %v121_v0 = vld [vmem:[%s2655_s20] sm:$0xff] (%p41_p3)   ;;  %v125_v1 = vld [vmem:[%s2655_s20 + $0x8] sm:$0xff] (%p41_p3)   ;;  %v129_v2 = vld [vmem:[%s2655_s20 + $0x10] sm:$0xff] (%p41_p3)   ;;  %s2663_s21 = scalar_lea.vmem (%p41_p3), [#allocation2], %s2340_s17 }
  0x10   : > { %v133_v3 = vld [vmem:[%s2655_s20 + $0x18] sm:$0xff] (%p41_p3)   ;;  %v137_v4 = vld [vmem:[%s2655_s20 + $0x20] sm:$0xff] (%p41_p3)   ;;  %v141_v5 = vld [vmem:[%s2655_s20 + $0x28] sm:$0xff] (%p41_p3)   ;;  %122 = vst [vmem:[%s2663_s21] sm:$0xff] (%p41_p3), %v121_v0  }
  0x11   : > { %126 = vst [vmem:[%s2663_s21 + $0x8] sm:$0xff] %v125_v1   ;;  %130 = vst [vmem:[%s2663_s21 + $0x10] sm:$0xff] %v129_v2   ;;  %v145_v6 = vld [vmem:[%s2655_s20 + $0x30] sm:$0xff]   ;;  %v149_v7 = vld [vmem:[%s2655_s20 + $0x38] sm:$0xff]  }
  0x12   : > { %134 = vst [vmem:[%s2663_s21 + $0x18] sm:$0xff] %v133_v3   ;;  %138 = vst [vmem:[%s2663_s21 + $0x20] sm:$0xff] %v137_v4   ;;  %v153_v8 = vld [vmem:[%s2655_s20 + $0x80] sm:$0xff]   ;;  %v157_v9 = vld [vmem:[%s2655_s20 + $0x88] sm:$0xff]  }
  0x13   : > { %142 = vst [vmem:[%s2663_s21 + $0x28] sm:$0xff] %v141_v5   ;;  %146 = vst [vmem:[%s2663_s21 + $0x30] sm:$0xff] %v145_v6   ;;  %v161_v10 = vld [vmem:[%s2655_s20 + $0x90] sm:$0xff]   ;;  %v165_v11 = vld [vmem:[%s2655_s20 + $0x98] sm:$0xff]  }
  0x14   : > { %150 = vst [vmem:[%s2663_s21 + $0x38] sm:$0xff] %v149_v7   ;;  %154 = vst [vmem:[%s2663_s21 + $0x40] sm:$0xff] %v153_v8   ;;  %v169_v12 = vld [vmem:[%s2655_s20 + $0xa0] sm:$0xff]   ;;  %v173_v13 = vld [vmem:[%s2655_s20 + $0xa8] sm:$0xff]  }
  0x15   : > { %158 = vst [vmem:[%s2663_s21 + $0x48] sm:$0xff] %v157_v9   ;;  %162 = vst [vmem:[%s2663_s21 + $0x50] sm:$0xff] %v161_v10   ;;  %v177_v14 = vld [vmem:[%s2655_s20 + $0xb0] sm:$0xff]   ;;  %v181_v15 = vld [vmem:[%s2655_s20 + $0xb8] sm:$0xff]  }
  0x16   : > { %166 = vst [vmem:[%s2663_s21 + $0x58] sm:$0xff] %v165_v11   ;;  %170 = vst [vmem:[%s2663_s21 + $0x60] sm:$0xff] %v169_v12   ;;  %v185_v16 = vld [vmem:[%s2655_s20 + $0x100] sm:$0xff]   ;;  %v189_v17 = vld [vmem:[%s2655_s20 + $0x108] sm:$0xff]  }
  0x17   : > { %174 = vst [vmem:[%s2663_s21 + $0x68] sm:$0xff] %v173_v13   ;;  %178 = vst [vmem:[%s2663_s21 + $0x70] sm:$0xff] %v177_v14   ;;  %v193_v18 = vld [vmem:[%s2655_s20 + $0x110] sm:$0xff]   ;;  %v197_v19 = vld [vmem:[%s2655_s20 + $0x118] sm:$0xff]  }
  0x18   : > { %182 = vst [vmem:[%s2663_s21 + $0x78] sm:$0xff] %v181_v15   ;;  %186 = vst [vmem:[%s2663_s21 + $0x80] sm:$0xff] %v185_v16   ;;  %v201_v20 = vld [vmem:[%s2655_s20 + $0x120] sm:$0xff]   ;;  %v205_v21 = vld [vmem:[%s2655_s20 + $0x128] sm:$0xff]  }
  0x19   : > { %190 = vst [vmem:[%s2663_s21 + $0x88] sm:$0xff] %v189_v17   ;;  %194 = vst [vmem:[%s2663_s21 + $0x90] sm:$0xff] %v193_v18   ;;  %v209_v22 = vld [vmem:[%s2655_s20 + $0x130] sm:$0xff]   ;;  %v213_v23 = vld [vmem:[%s2655_s20 + $0x138] sm:$0xff]  }
  0x1a   : > { %198 = vst [vmem:[%s2663_s21 + $0x98] sm:$0xff] %v197_v19   ;;  %202 = vst [vmem:[%s2663_s21 + $0xa0] sm:$0xff] %v201_v20  }
  0x1b   : > { %206 = vst [vmem:[%s2663_s21 + $0xa8] sm:$0xff] %v205_v21   ;;  %210 = vst [vmem:[%s2663_s21 + $0xb0] sm:$0xff] %v209_v22  }
  0x1c   : > { %214 = vst [vmem:[%s2663_s21 + $0xb8] sm:$0xff] %v213_v23  }
  0x1d PF: > { %p1933_p6 = scmp.ge.s32.totalorder %s2598_s10, 1  ;;  %p335_p7 = scmp.lt.s32.totalorder %s2598_s10, 3 }
  0x1f   : > { %p336_p8 = pnand %p1933_p6, %p335_p7 }
  0x20   : > { %s342_s22 = sand.u32 (!%p336_p8), 1, %s2582_s6   ;;  %s2600_s25 = smov (!%p336_p8), 96  }
  0x21   : > { %339 = sbr.rel (%p336_p8) target bundleno = 1623 (0x657), region = 61  ;;  %p364_p9 = scmp.lt.s32.totalorder (!%p336_p8), %s2590_s8, 1 }
  0x22   : > { %s2341_s23 = smul.u32 (!%p336_p8), 192, %s342_s22  ;;  %s2601_s30 = smov (!%p336_p8), 32  }
  0x24   : > { %s2710_s24 = scalar_lea.vmem (!%p336_p8), [#allocation2], %s2341_s23 }
  0x26   : > { %vm3373_vm0 = vcmask 261120   ;;  %v2384_v24 = vld [vmem:[%s2710_s24 + $0x78] sm:$0xff]   ;;  %v2385_v25 = vld [vmem:[%s2710_s24 + $0x70] sm:$0xff]   ;;  %v2386_v27 = vld [vmem:[%s2710_s24 + $0x68] sm:$0xff]   ;;  %v373_v59 = vlaneseq  ;;  %s3447_s8 = smov (!%p364_p9, %s2590_s8), 1 }
  0x27   : > { %2324 = vmatprep.subr.msk.bf16.mxu0 %vm3373_vm0, %v2384_v24  ;;  %v602_v26 = vsel %vm3373_vm0, %v2384_v24, 0  ;;  %v599_v28 = vsel %vm3373_vm0, %v2385_v25, 0  ;;  %v2392_v29 = vld [vmem:[%s2710_s24] sm:$0xff]   ;;  %v2388_v31 = vld [vmem:[%s2710_s24 + $0x58] sm:$0xff]   ;;  %v596_v32 = vsel %vm3373_vm0, %v2386_v27, 0  ;;  %v2400_v34 = vld [vmem:[%s2710_s24 + $0x70] sm:$0xff]  }
  0x28   : > { %2197 = vmatpush3.bf16.xpose.msra.mxu0 %v602_v26  ;;  %2212 = vmatprep.mubr.msk.bf16.mxu0 %vm3373_vm0, %v2392_v29  ;;  %v2387_v30 = vld [vmem:[%s2710_s24 + $0x60] sm:$0xff]   ;;  %v590_v35 = vsel %vm3373_vm0, %v2388_v31, 0  ;;  %v2401_v36 = vld [vmem:[%s2710_s24 + $0x78] sm:$0xff]   ;;  %v2389_v37 = vld [vmem:[%s2710_s24 + $0x50] sm:$0xff]   ;;  %v2768_v60 = vshrl.u32 %v373_v59, 7  ;;  %v2770_v61 = vand.u32 127, %v373_v59 }
  0x29   : > { %2325 = vmatprep.subr.msk.bf16.mxu0 %vm3373_vm0, %v2385_v25  ;;  %v593_v33 = vsel %vm3373_vm0, %v2387_v30, 0  ;;  %1251 = vrot.lane.b32.xlu1 %v2400_v34, %s2600_s25  ;;  %v587_v38 = vsel %vm3373_vm0, %v2389_v37, 0  ;;  %v2390_v39 = vld [vmem:[%s2710_s24 + $0x48] sm:$0xff]   ;;  %v2391_v41 = vld [vmem:[%s2710_s24 + $0x40] sm:$0xff]   ;;  %v2394_v44 = vld [vmem:[%s2710_s24 + $0x10] sm:$0xff]   ;;  %v3409_v59 = vmov 0 }
  0x2a   : > { %1253 = vrot.lane.b32.xlu0 %v2401_v36, %s2600_s25  ;;  %v584_v40 = vsel %vm3373_vm0, %v2390_v39, 0  ;;  %v581_v42 = vsel %vm3373_vm0, %v2391_v41, 0  ;;  %v2393_v43 = vld [vmem:[%s2710_s24 + $0x8] sm:$0xff]   ;;  %v2395_v45 = vld [vmem:[%s2710_s24 + $0x18] sm:$0xff]   ;;  %v2396_v46 = vld [vmem:[%s2710_s24 + $0x20] sm:$0xff]   ;;  %v379_v62 = vadd.s32 16, %v2768_v60  ;;  %vm393_vm3 = vcmp.le.s32.totalorder %v2770_v61, %v2768_v60 }
  0x2b   : > { %v2397_v47 = vld [vmem:[%s2710_s24 + $0x28] sm:$0xff]   ;;  %v2398_v48 = vld [vmem:[%s2710_s24 + $0x30] sm:$0xff]   ;;  %v2399_v49 = vld [vmem:[%s2710_s24 + $0x38] sm:$0xff]   ;;  %vm375_vm1 = vcmp.lt.s32.totalorder %v2770_v61, 8  ;;  %v380_v63 = vadd.s32 24, %v2768_v60  ;;  %v378_v0 = vadd.s32 8, %v2768_v60 }
  0x2c   : > { %v2403_v50 = vld [vmem:[%s2710_s24 + $0xb8] sm:$0xff]   ;;  %v2404_v51 = vld [vmem:[%s2710_s24 + $0xb0] sm:$0xff]   ;;  %v2405_v52 = vld [vmem:[%s2710_s24 + $0xa8] sm:$0xff]   ;;  %vm395_vm2 = vcmp.le.s32.totalorder %v2770_v61, %v379_v62  ;;  %v383_v2 = vadd.s32 48, %v2768_v60  ;;  %v384_v8 = vadd.s32 56, %v2768_v60  ;;  %v381_v10 = vadd.s32 32, %v2768_v60 }
  0x2d   : > { %2228 = vmatprep.subr.bf16.mxu1 %v2403_v50  ;;  %v2406_v53 = vld [vmem:[%s2710_s24 + $0xa0] sm:$0xff]   ;;  %v2407_v54 = vld [vmem:[%s2710_s24 + $0x98] sm:$0xff]   ;;  %v2408_v55 = vld [vmem:[%s2710_s24 + $0x90] sm:$0xff]   ;;  %vm396_vm5 = vcmp.le.s32.totalorder %v2770_v61, %v380_v63  ;;  %vm394_vm7 = vcmp.le.s32.totalorder %v2770_v61, %v378_v0  ;;  %v382_v14 = vadd.s32 40, %v2768_v60  ;;  %v387_v18 = vadd.s32 80, %v2768_v60  ;;  %s2099_s26 = sshll.u32 %s3447_s8, 6 }
  0x2e   : > { %2229 = vmatpush3.bf16.msra.mxu1 %v2403_v50  ;;  %v2409_v56 = vld [vmem:[%s2710_s24 + $0x88] sm:$0xff]   ;;  %v2410_v57 = vld [vmem:[%s2710_s24 + $0x80] sm:$0xff]   ;;  %vm2781_vm4 = vmand %vm375_vm1, %vm395_vm2  ;;  %vm399_vm9 = vcmp.le.s32.totalorder %v2770_v61, %v383_v2  ;;  %vm400_vm12 = vcmp.le.s32.totalorder %v2770_v61, %v384_v8  ;;  %vm397_vm13 = vcmp.le.s32.totalorder %v2770_v61, %v381_v10  ;;  %v388_v24 = vadd.s32 88, %v2768_v60  ;;  %s3132_s29 = scalar_lea.vmem %s3372_s1, %s2099_s26 }
  0x2f   : > { %2230 = vmatprep.subr.bf16.mxu1 %v2404_v51  ;;  %vm2789_vm6 = vmand %vm375_vm1, %vm393_vm3  ;;  %vm398_vm15 = vcmp.le.s32.totalorder %v2770_v61, %v382_v14  ;;  %vm403_vm3 = vcmp.le.s32.totalorder %v2770_v61, %v387_v18  ;;  %v385_v25 = vadd.s32 64, %v2768_v60  ;;  %v391_v34 = vadd.s32 112, %v2768_v60 }
  0x30   : > { %2199 = vmatpush3.bf16.xpose.msra.mxu0 %v599_v28  ;;  %vm2801_vm8 = vmand %vm375_vm1, %vm396_vm5  ;;  %v3411_v0 = vmov 0 }
  0x31   : > { %2326 = vmatprep.subr.msk.bf16.mxu0 %vm3373_vm0, %v2386_v27  ;;  %vm2815_vm10 = vmand %vm375_vm1, %vm394_vm7 }
  0x32   : > { %2231 = vmatpush3.bf16.msra.mxu1 %v2404_v51  ;;  %vm2827_vm11 = vmand %vm375_vm1, %vm399_vm9  ;;  %vm404_vm9 = vcmp.le.s32.totalorder %v2770_v61, %v388_v24  ;;  %v3407_v51 = vmov 0 }
  0x33   : > { %2232 = vmatprep.subr.bf16.mxu1 %v2405_v52  ;;  %vm2845_vm14 = vmand %vm375_vm1, %vm400_vm12  ;;  %vm401_vm12 = vcmp.le.s32.totalorder %v2770_v61, %v385_v25 }
  0x34   : > { %vm2852_vm2 = vmand %vm375_vm1, %vm397_vm13 }
  0x35   : > { %vm2862_vm5 = vmand %vm375_vm1, %vm398_vm15 }
  0x36   : > { %2233 = vmatpush3.bf16.msra.mxu1 %v2405_v52  ;;  %vm2878_vm7 = vmand %vm375_vm1, %vm403_vm3 }
  0x37   : > { %2234 = vmatprep.subr.bf16.mxu1 %v2406_v53  ;;  %vm2896_vm13 = vmand %vm375_vm1, %vm404_vm9 }
  0x38   : > { %2201 = vmatpush3.bf16.xpose.msra.mxu0 %v596_v32  ;;  %vm2904_vm3 = vmand %vm375_vm1, %vm401_vm12 }
  0x39   : > { %2327 = vmatprep.subr.msk.bf16.mxu0 %vm3373_vm0, %v2387_v30  ;;  %v386_v30 = vadd.s32 72, %v2768_v60 }
  0x3a   : > { %2235 = vmatpush3.bf16.msra.mxu1 %v2406_v53  ;;  %v2402_v53 = vld [vmem:[%s2710_s24 + $0x60] sm:$0xff]  }
  0x3b   : > { %2236 = vmatprep.subr.bf16.mxu1 %v2407_v54  ;;  %vm402_vm15 = vcmp.le.s32.totalorder %v2770_v61, %v386_v30  ;;  %v2412_v30 = vld [vmem:[%s2710_s24 + $0x50] sm:$0xff]  }
  0x3c   : > { %vm2913_vm9 = vmand %vm375_vm1, %vm402_vm15 }
  0x3e   : > { %2237 = vmatpush3.bf16.msra.mxu1 %v2407_v54  ;;  %v2411_v54 = vld [vmem:[%s2710_s24 + $0x68] sm:$0xff]  }
  0x3f   : > { %2238 = vmatprep.subr.bf16.mxu1 %v2408_v55 }
  0x40   : > { %2203 = vmatpush3.bf16.xpose.msra.mxu0 %v593_v33 }
  0x41   : > { %2328 = vmatprep.subr.msk.bf16.mxu0 %vm3373_vm0, %v2388_v31 }
  0x42   : > { %2239 = vmatpush3.bf16.msra.mxu1 %v2408_v55  ;;  %v392_v55 = vadd.s32 120, %v2768_v60 }
  0x43   : > { %2240 = vmatprep.subr.bf16.mxu1 %v2409_v56 }
  0x46   : > { %2241 = vmatpush3.bf16.msra.mxu1 %v2409_v56  ;;  %v390_v56 = vadd.s32 104, %v2768_v60 }
  0x47   : > { %2242 = vmatprep.subr.bf16.mxu1 %v2410_v57 }
  0x48   : > { %2205 = vmatpush3.bf16.xpose.msra.mxu0 %v590_v35 }
  0x49   : > { %2329 = vmatprep.subr.msk.bf16.mxu0 %vm3373_vm0, %v2389_v37  ;;  %v3399_v37 = vmov 0 }
  0x4a   : > { %2243 = vmatpush3.bf16.msra.mxu1 %v2410_v57  ;;  %v3400_v37 = vsel %vm2896_vm13, 4294967295, %v3399_v37 }
  0x50   : > { %2207 = vmatpush3.bf16.xpose.msra.mxu0 %v587_v38 }
  0x51   : > { %2330 = vmatprep.subr.msk.bf16.mxu0 %vm3373_vm0, %v2390_v39  ;;  %v3401_v39 = vmov 0 }
  0x52   : > { %v3402_v39 = vsel %vm2904_vm3, 4294967295, %v3401_v39 }
  0x58   : > { %2209 = vmatpush3.bf16.xpose.msra.mxu0 %v584_v40  ;;  %v389_v40 = vadd.s32 96, %v2768_v60 }
  0x59   : > { %2331 = vmatprep.subr.msk.bf16.mxu0 %vm3373_vm0, %v2391_v41 }
  0x5a   : > { %vm405_vm15 = vcmp.le.s32.totalorder %v2770_v61, %v389_v40 }
  0x60   : > { %2211 = vmatpush3.bf16.xpose.msra.mxu0 %v581_v42  ;;  %v3403_v42 = vmov 0 }
  0x61   : > { %v3404_v42 = vsel %vm2913_vm9, 4294967295, %v3403_v42 }
  0x67   : > { %2213 = vmatmul.mubr.msk.bf16.vlgmr.msra.gmra.mxu0 %vm3373_vm0, %v2393_v43 }
  0x68   : > { %2216 = vmatprep.mubr.msk.bf16.mxu0 %vm3373_vm0, %v2394_v44 }
  0x6f   : > { %2217 = vmatmul.mubr.msk.bf16.gmra.mxu0 %vm3373_vm0, %v2395_v45 }
  0x70   : > { %2220 = vmatprep.mubr.msk.bf16.mxu0 %vm3373_vm0, %v2396_v46  ;;  %v3405_v46 = vmov 0 }
  0x77   : > { %2221 = vmatmul.mubr.msk.bf16.gmra.mxu0 %vm3373_vm0, %v2397_v47 }
  0x78   : > { %2224 = vmatprep.mubr.msk.bf16.mxu0 %vm3373_vm0, %v2398_v48 }
  0x7f   : > { %2225 = vmatmul.mubr.msk.bf16.gmra.mxu0 %vm3373_vm0, %v2399_v49 }
  0x9b   : > { %v2985_v2 = vpop.permute.xlu1 %1251 }
  0x9c   : > { %v2764_v58 = vpop.permute.xlu0 %1253 }
  0x9d   : > { %2332 = vmatprep.subr.msk.bf16.mxu1 %vm3373_vm0, %v2764_v58  ;;  %vm407_vm0 = vcmp.le.s32.totalorder %v2770_v61, %v391_v34 }
  0x9e   : > { %vm2928_vm12 = vmand %vm375_vm1, %vm407_vm0 }
  0x9f   : > { %v3406_v46 = vsel %vm2928_vm12, 4294967295, %v3405_v46  ;;  %vm2945_vm0 = vmand %vm375_vm1, %vm405_vm15  ;;  %vm408_vm15 = vcmp.le.s32.totalorder %v2770_v61, %v392_v55 }
  0xa0   : > { %v3408_v51 = vsel %vm2945_vm0, 4294967295, %v3407_v51 }
 0x127   : > { %v2214_v3 = vpop.f32.mrf.mxu0 }
 0x128   : > { %v2795_v5 = vsel %vm2781_vm4, %v2214_v3, -1e+30 }
 0x129   : > { %721 = vmax.xlane.f32.xlu1 %v2795_v5  ;;  %v638_v6 = vpop.f32.mrf.mxu0 }
 0x12a   : > { %v2808_v9 = vsel %vm2789_vm6, %v638_v6, -1e+30 }
 0x12b   : > { %717 = vmax.xlane.f32.xlu0 %v2808_v9  ;;  %v2215_v11 = vpop.f32.mrf.mxu0 }
 0x12c   : > { %v2821_v13 = vsel %vm2801_vm8, %v2215_v11, -1e+30 }
 0x12d   : > { %723 = vmax.xlane.f32.xlu1 %v2821_v13  ;;  %v641_v15 = vpop.f32.mrf.mxu0 }
 0x12e   : > { %v2834_v17 = vsel %vm2815_vm10, %v641_v15, -1e+30 }
 0x12f   : > { %719 = vmax.xlane.f32.xlu0 %v2834_v17  ;;  %v2218_v19 = vpop.f32.mrf.mxu0 }
 0x130   : > { %v2841_v20 = vsel %vm2827_vm11, %v2218_v19, -1e+30 }
 0x131   : > { %v654_v22 = vpop.f32.mrf.mxu0 }
 0x132   : > { %v2872_v29 = vsel %vm2852_vm2, %v654_v22, -1e+30 }
 0x133   : > { %729 = vmax.xlane.f32.xlu0 %v2841_v20  ;;  %v2219_v26 = vpop.f32.mrf.mxu0 }
 0x134   : > { %v2868_v28 = vsel %vm2845_vm14, %v2219_v26, -1e+30 }
 0x135   : > { %731 = vmax.xlane.f32.xlu1 %v2868_v28  ;;  %v657_v31 = vpop.f32.mrf.mxu0 }
 0x136   : > { %v2885_v33 = vsel %vm2862_vm5, %v657_v31, -1e+30  ;;  %v2413_v31 = vld [vmem:[%s2710_s24 + $0x58] sm:$0xff]  }
 0x137   : > { %725 = vmax.xlane.f32.xlu0 %v2872_v29  ;;  %v2222_v35 = vpop.f32.mrf.mxu0 }
 0x138   : > { %v2892_v36 = vsel %vm2878_vm7, %v2222_v35, -1e+30 }
 0x139   : > { %727 = vmax.xlane.f32.xlu1 %v2885_v33  ;;  %v670_v38 = vpop.f32.mrf.mxu0 }
 0x13a   : > { %v2923_v44 = vsel %vm2904_vm3, %v670_v38, -1e+30 }
 0x13b   : > { %737 = vmax.xlane.f32.xlu0 %v2892_v36  ;;  %v2223_v41 = vpop.f32.mrf.mxu0 }
 0x13c   : > { %v2919_v43 = vsel %vm2896_vm13, %v2223_v41, -1e+30 }
 0x13d   : > { %739 = vmax.xlane.f32.xlu1 %v2919_v43  ;;  %v673_v45 = vpop.f32.mrf.mxu0 }
 0x13e   : > { %v2934_v47 = vsel %vm2913_vm9, %v673_v45, -1e+30 }
 0x13f   : > { %733 = vmax.xlane.f32.xlu0 %v2923_v44  ;;  %v2226_v48 = vpop.f32.mrf.mxu0 }
 0x140   : > { %v2940_v49 = vsel %vm2928_vm12, %v2226_v48, -1e+30  ;;  %vm2964_vm12 = vmand %vm375_vm1, %vm408_vm15 }
 0x141   : > { %735 = vmax.xlane.f32.xlu1 %v2934_v47  ;;  %v686_v50 = vpop.f32.mrf.mxu0  ;;  %v3410_v59 = vsel %vm2964_vm12, 4294967295, %v3409_v59 }
 0x142   : > { %v2952_v52 = vsel %vm2945_vm0, %v686_v50, -1e+30  ;;  %vm406_vm0 = vcmp.le.s32.totalorder %v2770_v61, %v390_v56 }
 0x143   : > { %745 = vmax.xlane.f32.xlu0 %v2940_v49  ;;  %v2227_v57 = vpop.f32.mrf.mxu0  ;;  %vm2975_vm9 = vmand %vm375_vm1, %vm406_vm0  ;;  %vm3413_vm1 = vcmask 261120  }
 0x144   : > { %v2971_v62 = vsel %vm2964_vm12, %v2227_v57, -1e+30  ;;  %v3412_v0 = vsel %vm2975_vm9, 4294967295, %v3411_v0  ;;  %vm3414_vm0 = vmmov %vm3413_vm1 }
 0x145   : > { %v689_v63 = vpop.f32.mrf.mxu0  ;;  %vm3415_vm15 = vmmov %vm3414_vm0 }
 0x146   : > { %v2982_v60 = vsel %vm2975_vm9, %v689_v63, -1e+30  ;;  %vm3416_vm9 = vmmov %vm3414_vm0 }
 0x147   : > { %741 = vmax.xlane.f32.xlu0 %v2952_v52  ;;  %vm3417_vm12 = vmmov %vm3414_vm0 }
 0x148   : > { %vm3418_vm3 = vmmov %vm3414_vm0 }
 0x149   : > { %vm3419_vm13 = vmmov %vm3414_vm0 }
 0x152   : > { %1247 = vrot.lane.b32.xlu1 %v2402_v53, %s2600_s25 }
 0x15d   : > { %1249 = vrot.lane.b32.xlu0 %v2411_v54, %s2600_s25 }
 0x176   : > { %747 = vmax.xlane.f32.xlu1 %v2971_v62 }
 0x17a   : > { %743 = vmax.xlane.f32.xlu1 %v2982_v60 }
 0x1b2   : > { %v722_v3 = vpop.xlane.xlu1 %721 }
 0x1b3   : > { %v751_v6 = vsub.f32 %v2795_v5, %v722_v3 }
 0x1b4   : > { %v718_v8 = vpop.xlane.xlu0 %717 }
 0x1b5   : > { %v769_v10 = vmul.f32 1.442695, %v751_v6  ;;  %v749_v61 = vsub.f32 %v2808_v9, %v718_v8 }
 0x1b6   : > { %v724_v11 = vpop.xlane.xlu1 %723 }
 0x1b7   : > { %2432 = vpow2.f32 %v769_v10  ;;  %v765_v14 = vmul.f32 1.442695, %v749_v61  ;;  %v752_v15 = vsub.f32 %v2821_v13, %v724_v11 }
 0x1b8   : > { %v720_v18 = vpop.xlane.xlu0 %719 }
 0x1b9   : > { %v771_v19 = vmul.f32 1.442695, %v752_v15  ;;  %v750_v22 = vsub.f32 %v2834_v17, %v720_v18  ;;  %2434 = vpow2.f32 %v765_v14 }
 0x1bb   : > { %2436 = vpow2.f32 %v771_v19  ;;  %v767_v24 = vmul.f32 1.442695, %v750_v22 }
 0x1bc   : > { %v730_v17 = vpop.xlane.xlu0 %729 }
 0x1bd   : > { %2438 = vpow2.f32 %v767_v24  ;;  %v755_v40 = vsub.f32 %v2841_v20, %v730_v17 }
 0x1be   : > { %v732_v35 = vpop.xlane.xlu1 %731 }
 0x1bf   : > { %v777_v50 = vmul.f32 1.442695, %v755_v40  ;;  %v756_v54 = vsub.f32 %v2868_v28, %v732_v35 }
 0x1c0   : > { %v726_v26 = vpop.xlane.xlu0 %725 }
 0x1c1   : > { %v753_v45 = vsub.f32 %v2872_v29, %v726_v26  ;;  %2440 = vpow2.f32 %v777_v50  ;;  %v779_v6 = vmul.f32 1.442695, %v756_v54  ;;  %v2416_v50 = vld [vmem:[%s2710_s24] sm:$0xff]   ;;  %v2418_v54 = vld [vmem:[%s2710_s24 + $0x10] sm:$0xff]  }
 0x1c2   : > { %v728_v41 = vpop.xlane.xlu1 %727 }
 0x1c3   : > { %v754_v53 = vsub.f32 %v2885_v33, %v728_v41  ;;  %v773_v55 = vmul.f32 1.442695, %v753_v45  ;;  %v2414_v45 = vld [vmem:[%s2710_s24 + $0x48] sm:$0xff]  }
 0x1c4   : > { %v2991_v5 = vpop.eup %2432  ;;  %v738_v34 = vpop.xlane.xlu0 %737 }
 0x1c5   : > { %801 = vadd.xlane.f32.xlu0 %v2991_v5  ;;  %v775_v57 = vmul.f32 1.442695, %v754_v53  ;;  %2442 = vpow2.f32 %v773_v55  ;;  %v759_v20 = vsub.f32 %v2892_v36, %v738_v34  ;;  %v2417_v53 = vld [vmem:[%s2710_s24 + $0x8] sm:$0xff]   ;;  %v2419_v55 = vld [vmem:[%s2710_s24 + $0x18] sm:$0xff]  }
 0x1c6   : > { %v2994_v9 = vpop.eup %2434  ;;  %v740_v56 = vpop.xlane.xlu1 %739 }
 0x1c7   : > { %2444 = vpow2.f32 %v775_v57  ;;  %v785_v33 = vmul.f32 1.442695, %v759_v20  ;;  %v760_v11 = vsub.f32 %v2919_v43, %v740_v56  ;;  %v2420_v56 = vld [vmem:[%s2710_s24 + $0x20] sm:$0xff]   ;;  %v2421_v57 = vld [vmem:[%s2710_s24 + $0x28] sm:$0xff]  }
 0x1c8   : > { %v2996_v25 = vpop.eup %2436  ;;  %v734_v38 = vpop.xlane.xlu0 %733  ;;  %2446 = vpow2.f32 %v779_v6 }
 0x1c9   : > { %797 = vadd.xlane.f32.xlu0 %v2994_v9  ;;  %803 = vadd.xlane.f32.xlu1 %v2996_v25  ;;  %v757_v28 = vsub.f32 %v2923_v44, %v734_v38  ;;  %v787_v36 = vmul.f32 1.442695, %v760_v11 }
 0x1ca   : > { %v3000_v13 = vpop.eup %2438  ;;  %v736_v10 = vpop.xlane.xlu1 %735 }
 0x1cb   : > { %v781_v14 = vmul.f32 1.442695, %v757_v28  ;;  %v758_v44 = vsub.f32 %v2934_v47, %v736_v10 }
 0x1cc   : > { %v746_v48 = vpop.xlane.xlu0 %745 }
 0x1cd   : > { %799 = vadd.xlane.f32.xlu1 %v3000_v13  ;;  %v763_v63 = vsub.f32 %v2940_v49, %v746_v48  ;;  %v783_v26 = vmul.f32 1.442695, %v758_v44  ;;  %v2415_v48 = vld [vmem:[%s2710_s24 + $0x40] sm:$0xff]  }
 0x1ce   : > { %v3016_v49 = vpop.permute.xlu1 %1247  ;;  %v3018_v15 = vpop.eup %2440 }
 0x1cf   : > { %v793_v8 = vmul.f32 1.442695, %v763_v63  ;;  %v2422_v63 = vld [vmem:[%s2710_s24 + $0x30] sm:$0xff]  }
 0x1d0   : > { %v742_v3 = vpop.xlane.xlu0 %741 }
 0x1d1   : > { %v761_v29 = vsub.f32 %v2952_v52, %v742_v3  ;;  %2448 = vpow2.f32 %v793_v8  ;;  %v2423_v3 = vld [vmem:[%s2710_s24 + $0x38] sm:$0xff]  }
 0x1d2   : > { %2450 = vpow2.f32 %v785_v33  ;;  %v3021_v18 = vpop.eup %2442 }
 0x1d3   : > { %v789_v61 = vmul.f32 1.442695, %v761_v29 }
 0x1d4   : > { %v3025_v22 = vpop.eup %2444  ;;  %v1250_v6 = vpop.permute.xlu0 %1249 }
 0x1d5   : > { %2452 = vpow2.f32 %v789_v61  ;;  %v3029_v17 = vpop.eup %2446 }
 0x1d6   : > { %2454 = vpow2.f32 %v781_v14 }
 0x1d7   : > { %2456 = vpow2.f32 %v787_v36 }
 0x1de   : > { %1243 = vrot.lane.b32.xlu1 %v2412_v30, %s2600_s25 }
 0x1df   : > { %1245 = vrot.lane.b32.xlu0 %v2413_v31, %s2600_s25  ;;  %v3032_v31 = vpop.eup %2448 }
 0x1e0   : > { %v3036_v47 = vpop.eup %2450 }
 0x1e2   : > { %v3038_v34 = vpop.eup %2452 }
 0x1fe   : > { %809 = vadd.xlane.f32.xlu0 %v3018_v15 }
 0x1ff   : > { %v748_v52 = vpop.xlane.xlu1 %747 }
 0x200   : > { %v764_v19 = vsub.f32 %v2971_v62, %v748_v52 }
 0x202   : > { %v795_v43 = vmul.f32 1.442695, %v764_v19  ;;  %807 = vadd.xlane.f32.xlu0 %v3025_v22  ;;  %805 = vadd.xlane.f32.xlu1 %v3021_v18 }
 0x203   : > { %v744_v24 = vpop.xlane.xlu1 %743 }
 0x204   : > { %2458 = vpow2.f32 %v795_v43  ;;  %v762_v30 = vsub.f32 %v2982_v60, %v744_v24  ;;  %v3042_v60 = vpop.eup %2454  ;;  %v1301_v24 = vsel %vm3413_vm1, %v2764_v58, 0  ;;  %vm3420_vm1 = vmmov %vm3414_vm0 }
 0x205   : > { %2460 = vpow2.f32 %v783_v26  ;;  %v3045_v35 = vpop.eup %2456 }
 0x206   : > { %825 = vadd.xlane.f32.xlu0 %v3032_v31  ;;  %811 = vadd.xlane.f32.xlu1 %v3029_v17  ;;  %v791_v62 = vmul.f32 1.442695, %v762_v30 }
 0x208   : > { %2462 = vpow2.f32 %v791_v62 }
 0x20a   : > { %821 = vadd.xlane.f32.xlu0 %v3038_v34  ;;  %817 = vadd.xlane.f32.xlu1 %v3036_v47 }
 0x20e   : > { %813 = vadd.xlane.f32.xlu1 %v3042_v60 }
 0x211   : > { %v3047_v38 = vpop.eup %2458 }
 0x212   : > { %827 = vadd.xlane.f32.xlu0 %v3047_v38  ;;  %819 = vadd.xlane.f32.xlu1 %v3045_v35  ;;  %v3051_v40 = vpop.eup %2460 }
 0x215   : > { %v3054_v41 = vpop.eup %2462 }
 0x216   : > { %815 = vadd.xlane.f32.xlu1 %v3051_v40 }
 0x21a   : > { %823 = vadd.xlane.f32.xlu1 %v3054_v41 }
 0x228   : > { %1241 = vrot.lane.b32.xlu0 %v2414_v45, %s2600_s25 }
 0x22b   : > { %1239 = vrot.lane.b32.xlu1 %v2415_v48, %s2600_s25 }
 0x22c   : > { %1183 = vrot.lane.b32.xlu0 %v2416_v50, %s2600_s25 }
 0x22f   : > { %1185 = vrot.lane.b32.xlu1 %v2417_v53, %s2600_s25 }
 0x230   : > { %1187 = vrot.lane.b32.xlu0 %v2418_v54, %s2600_s25 }
 0x233   : > { %1189 = vrot.lane.b32.xlu1 %v2419_v55, %s2600_s25 }
 0x234   : > { %1191 = vrot.lane.b32.xlu0 %v2420_v56, %s2600_s25 }
 0x237   : > { %1193 = vrot.lane.b32.xlu1 %v2421_v57, %s2600_s25 }
 0x238   : > { %1195 = vrot.lane.b32.xlu0 %v2422_v63, %s2600_s25 }
 0x23b   : > { %1197 = vrot.lane.b32.xlu1 %v2423_v3, %s2600_s25 }
 0x24e   : > { %v802_v20 = vpop.xlane.xlu0 %801 }
 0x252   : > { %v798_v8 = vpop.xlane.xlu0 %797  ;;  %v804_v29 = vpop.xlane.xlu1 %803 }
 0x253   : > { %2464 = vrcp.f32 %v804_v29 }
 0x254   : > { %2466 = vrcp.f32 %v798_v8 }
 0x255   : > { %2468 = vrcp.f32 %v802_v20 }
 0x256   : > { %v800_v10 = vpop.xlane.xlu1 %799  ;;  %v1246_v58 = vpop.permute.xlu0 %1245 }
 0x257   : > { %2470 = vrcp.f32 %v800_v10 }
 0x260   : > { %v2465_v33 = vpop.eup %2464 }
 0x261   : > { %v2467_v28 = vpop.eup %2466  ;;  %v848_v14 = vmul.f32 %v2465_v33, %v2996_v25  ;;  %v1298_v25 = vsel %vm3415_vm15, %v2985_v2, 0  ;;  %vm3425_vm15 = vmmov %vm3414_vm0 }
 0x262   : > { %v2469_v61 = vpop.eup %2468  ;;  %v845_v36 = vmul.f32 %v2467_v28, %v2994_v9  ;;  %v1295_v9 = vsel %vm3417_vm12, %v1250_v6, 0  ;;  %vm3424_vm12 = vmmov %vm3414_vm0 }
 0x263   : > { %v847_v44 = vmul.f32 %v2469_v61, %v2991_v5  ;;  %v1292_v5 = vsel %vm3419_vm13, %v3016_v49, 0  ;;  %vm3422_vm13 = vmmov %vm3414_vm0 }
 0x264   : > { %v2471_v11 = vpop.eup %2470 }
 0x265   : > { %v846_v52 = vmul.f32 %v2471_v11, %v3000_v13  ;;  %v862_v43 = vpack.c.bf16 %v848_v14, %v847_v44  ;;  %v1244_v13 = vpop.permute.xlu1 %1243 }
 0x267   : > { %v861_v19 = vpack.c.bf16 %v846_v52, %v845_v36 }
 0x269   : > { %2244 = vmatprep.mubr.bf16.mxu1 %v861_v19 }
 0x26a   : > { %2245 = vmatmul.mubr.bf16.vlgmr.msra.gmra.mxu1 %v862_v43 }
 0x26b   : > { %2261 = vmatpush3.bf16.xpose.msra.mxu1 %v1301_v24 }
 0x26c   : > { %2333 = vmatprep.subr.msk.bf16.mxu1 %vm3414_vm0, %v2985_v2  ;;  %v1289_v2 = vsel %vm3414_vm0, %v1246_v58, 0 }
 0x273   : > { %2263 = vmatpush3.bf16.xpose.msra.mxu1 %v1298_v25 }
 0x274   : > { %2334 = vmatprep.subr.msk.bf16.mxu1 %vm3416_vm9, %v1250_v6  ;;  %vm3421_vm9 = vmmov %vm3414_vm0 }
 0x27b   : > { %2265 = vmatpush3.bf16.xpose.msra.mxu1 %v1295_v9 }
 0x27c   : > { %2335 = vmatprep.subr.msk.bf16.mxu1 %vm3418_vm3, %v3016_v49  ;;  %v1286_v49 = vsel %vm3422_vm13, %v1244_v13, 0  ;;  %vm3423_vm3 = vmmov %vm3414_vm0 }
 0x27d   : > { %vm3428_vm13 = vmmov %vm3414_vm0 }
 0x283   : > { %2267 = vmatpush3.bf16.xpose.msra.mxu1 %v1292_v5 }
 0x284   : > { %2336 = vmatprep.subr.msk.bf16.mxu1 %vm3420_vm1, %v1246_v58  ;;  %vm3426_vm1 = vmmov %vm3414_vm0 }
 0x287   : > { %v810_v26 = vpop.xlane.xlu0 %809 }
 0x28b   : > { %2269 = vmatpush3.bf16.xpose.msra.mxu1 %v1289_v2  ;;  %v808_v30 = vpop.xlane.xlu0 %807  ;;  %v806_v62 = vpop.xlane.xlu1 %805 }
 0x28c   : > { %2472 = vrcp.f32 %v808_v30  ;;  %2337 = vmatprep.subr.msk.bf16.mxu1 %vm3421_vm9, %v1244_v13  ;;  %vm3427_vm9 = vmmov %vm3414_vm0 }
 0x28d   : > { %2474 = vrcp.f32 %v806_v62  ;;  %v2424_v62 = vld [vmem:[%s2710_s24 + $0xb8] sm:$0xff]  }
 0x28e   : > { %2476 = vrcp.f32 %v810_v26  ;;  %1622 = vrot.lane.b32.xlu0 %v2424_v62, %s2600_s25 }
 0x28f   : > { %v812_v45 = vpop.xlane.xlu1 %811  ;;  %v826_v48 = vpop.xlane.xlu0 %825 }
 0x290   : > { %2478 = vrcp.f32 %v812_v45  ;;  %v2425_v45 = vld [vmem:[%s2710_s24 + $0xb0] sm:$0xff]  }
 0x291   : > { %1620 = vrot.lane.b32.xlu1 %v2425_v45, %s2600_s25 }
 0x293   : > { %2271 = vmatpush3.bf16.xpose.msra.mxu1 %v1286_v49  ;;  %v818_v50 = vpop.xlane.xlu1 %817  ;;  %v822_v53 = vpop.xlane.xlu0 %821 }
 0x297   : > { %v814_v54 = vpop.xlane.xlu1 %813 }
 0x299   : > { %v2473_v55 = vpop.eup %2472 }
 0x29a   : > { %v2475_v56 = vpop.eup %2474  ;;  %v850_v57 = vmul.f32 %v2473_v55, %v3025_v22  ;;  %v2426_v55 = vld [vmem:[%s2710_s24 + $0xa8] sm:$0xff]  }
 0x29b   : > { %v828_v63 = vpop.xlane.xlu0 %827  ;;  %v820_v3 = vpop.xlane.xlu1 %819  ;;  %v849_v6 = vmul.f32 %v2475_v56, %v3021_v18  ;;  %1618 = vrot.lane.b32.xlu0 %v2426_v55, %s2600_s25 }
 0x29c   : > { %v2477_v20 = vpop.eup %2476  ;;  %2480 = vrcp.f32 %v820_v3 }
 0x29d   : > { %v863_v8 = vpack.c.bf16 %v850_v57, %v849_v6  ;;  %v2479_v29 = vpop.eup %2478  ;;  %2482 = vrcp.f32 %v814_v54  ;;  %v851_v33 = vmul.f32 %v2477_v20, %v3018_v15 }
 0x29e   : > { %2484 = vrcp.f32 %v818_v50  ;;  %v852_v28 = vmul.f32 %v2479_v29, %v3029_v17 }
 0x29f   : > { %2248 = vmatprep.mubr.bf16.mxu1 %v863_v8  ;;  %v816_v10 = vpop.xlane.xlu1 %815  ;;  %v1242_v61 = vpop.permute.xlu0 %1241 }
 0x2a0   : > { %2486 = vrcp.f32 %v816_v10  ;;  %v1283_v22 = vsel %vm3423_vm3, %v1242_v61, 0  ;;  %2338 = vmatprep.subr.msk.bf16.mxu1 %vm3424_vm12, %v1242_v61  ;;  %v864_v11 = vpack.c.bf16 %v852_v28, %v851_v33  ;;  %vm3429_vm3 = vmmov %vm3414_vm0 }
 0x2a1   : > { %2273 = vmatpush3.bf16.xpose.msra.mxu1 %v1283_v22  ;;  %2488 = vrcp.f32 %v822_v53  ;;  %vm3430_vm12 = vmmov %vm3414_vm0 }
 0x2a2   : > { %2249 = vmatmul.mubr.bf16.gmra.mxu1 %v864_v11 }
 0x2a3   : > { %v824_v18 = vpop.xlane.xlu1 %823  ;;  %v1184_v49 = vpop.permute.xlu0 %1183 }
 0x2a4   : > { %2490 = vrcp.f32 %v824_v18 }
 0x2a5   : > { %2492 = vrcp.f32 %v828_v63 }
 0x2a6   : > { %2494 = vrcp.f32 %v826_v48 }
 0x2a7   : > { %v1240_v14 = vpop.permute.xlu1 %1239 }
 0x2a8   : > { %v1280_v36 = vsel %vm3425_vm15, %v1240_v14, 0  ;;  %2339 = vmatprep.subr.msk.bf16.mxu1 %vm3426_vm1, %v1240_v14  ;;  %vm3431_vm15 = vmmov %vm3414_vm0 }
 0x2a9   : > { %2275 = vmatpush3.bf16.xpose.msra.mxu1 %v1280_v36  ;;  %v2481_v15 = vpop.eup %2480  ;;  %vm3432_vm1 = vmmov %vm3414_vm0 }
 0x2aa   : > { %v2483_v17 = vpop.eup %2482  ;;  %v856_v19 = vmul.f32 %v2481_v15, %v3045_v35 }
 0x2ab   : > { %v2485_v52 = vpop.eup %2484  ;;  %v853_v43 = vmul.f32 %v2483_v17, %v3042_v60 }
 0x2ac   : > { %v855_v9 = vmul.f32 %v2485_v52, %v3036_v47 }
 0x2ad   : > { %v2487_v44 = vpop.eup %2486 }
 0x2ae   : > { %v854_v24 = vmul.f32 %v2487_v44, %v3051_v40  ;;  %v2489_v25 = vpop.eup %2488  ;;  %v866_v13 = vpack.c.bf16 %v856_v19, %v855_v9 }
 0x2af   : > { %v857_v2 = vmul.f32 %v2489_v25, %v3038_v34  ;;  %v1186_v34 = vpop.permute.xlu1 %1185 }
 0x2b0   : > { %v865_v5 = vpack.c.bf16 %v854_v24, %v853_v43 }
 0x2b1   : > { %v2491_v58 = vpop.eup %2490 }
 0x2b2   : > { %v2493_v26 = vpop.eup %2492  ;;  %2252 = vmatprep.mubr.bf16.mxu1 %v865_v5  ;;  %v858_v30 = vmul.f32 %v2491_v58, %v3054_v41  ;;  %v1188_v41 = vpop.permute.xlu0 %1187 }
 0x2b3   : > { %2253 = vmatmul.mubr.bf16.gmra.mxu1 %v866_v13  ;;  %v2495_v35 = vpop.eup %2494  ;;  %v860_v60 = vmul.f32 %v2493_v26, %v3047_v38  ;;  %v1190_v38 = vpop.permute.xlu1 %1189 }
 0x2b4   : > { %v867_v48 = vpack.c.bf16 %v858_v30, %v857_v2  ;;  %v859_v47 = vmul.f32 %v2495_v35, %v3032_v31 }
 0x2b6   : > { %2256 = vmatprep.mubr.bf16.mxu1 %v867_v48  ;;  %v868_v40 = vpack.c.bf16 %v860_v60, %v859_v47  ;;  %v1192_v50 = vpop.permute.xlu0 %1191 }
 0x2b7   : > { %v1194_v31 = vpop.permute.xlu1 %1193 }
 0x2ba   : > { %v1196_v53 = vpop.permute.xlu0 %1195 }
 0x2bb   : > { %2257 = vmatmul.mubr.bf16.gmra.mxu1 %v868_v40  ;;  %v1198_v54 = vpop.permute.xlu1 %1197 }
 0x2bc   : > { %2276 = vmatprep.mubr.msk.bf16.mxu1 %vm3414_vm0, %v1184_v49 }
 0x2c3   : > { %2277 = vmatmul.mubr.msk.bf16.vlgmr.msra.gmra.mxu1 %vm3427_vm9, %v1186_v34  ;;  %vm1078_vm9 = vcmask 257024  }
 0x2c4   : > { %2280 = vmatprep.mubr.msk.bf16.mxu1 %vm3428_vm13, %v1188_v41 }
 0x2cb   : > { %2281 = vmatmul.mubr.msk.bf16.gmra.mxu1 %vm3429_vm3, %v1190_v38 }
 0x2cc   : > { %2284 = vmatprep.mubr.msk.bf16.mxu1 %vm3430_vm12, %v1192_v50 }
 0x2d3   : > { %2285 = vmatmul.mubr.msk.bf16.gmra.mxu1 %vm3431_vm15, %v1194_v31 }
 0x2d4   : > { %2288 = vmatprep.mubr.msk.bf16.mxu1 %vm3432_vm1, %v1196_v53 }
 0x2db   : > { %2289 = vmatmul.mubr.msk.bf16.gmra.mxu1 %vm3414_vm0, %v1198_v54 }
 0x300   : > { %v1623_v10 = vpop.permute.xlu0 %1622 }
 0x301   : > { %2292 = vmatprep.subr.bf16.mxu0 %v1623_v10 }
 0x302   : > { %2293 = vmatpush3.bf16.msra.mxu0 %v1623_v10 }
 0x303   : > { %v1621_v33 = vpop.permute.xlu1 %1620 }
 0x304   : > { %2294 = vmatprep.subr.bf16.mxu0 %v1621_v33 }
 0x306   : > { %2295 = vmatpush3.bf16.msra.mxu0 %v1621_v33 }
 0x30d   : > { %v1619_v28 = vpop.permute.xlu0 %1618 }
 0x30e   : > { %2296 = vmatprep.subr.bf16.mxu0 %v1619_v28 }
 0x30f   : > { %2297 = vmatpush3.bf16.msra.mxu0 %v1619_v28 }
 0x32a   : > { %v2246_v56 = vpop.f32.mrf.mxu1 }
 0x32b   : > { %v2102_v57 = vpack.c.bf16 %v2246_v56, %v2246_v56 }
 0x32c   : > { %v951_v63 = vpop.f32.mrf.mxu1 }
 0x32d   : > { %1081 = vst.msk [vmem:[%s3132_s29 + $0x8] sm:$0xf] %vm1078_vm9, %v2102_v57  ;;  %v2100_v3 = vpack.c.bf16 %v951_v63, %v951_v63 }
 0x32e   : > { %v2247_v6 = vpop.f32.mrf.mxu1 }
 0x32f   : > { %1079 = vst.msk [vmem:[%s3132_s29] sm:$0xf] %vm1078_vm9, %v2100_v3  ;;  %v2103_v20 = vpack.c.bf16 %v2247_v6, %v2247_v6  ;;  %v2428_v6 = vld [vmem:[%s2710_s24 + $0xa0] sm:$0xff]  }
 0x330   : > { %v954_v8 = vpop.f32.mrf.mxu1 }
 0x331   : > { %1082 = vst.msk [vmem:[%s3132_s29 + $0xc] sm:$0xf] %vm1078_vm9, %v2103_v20  ;;  %v2101_v29 = vpack.c.bf16 %v954_v8, %v954_v8 }
 0x333   : > { %1080 = vst.msk [vmem:[%s3132_s29 + $0x4] sm:$0xf] %vm1078_vm9, %v2101_v29  ;;  %v2429_v29 = vld [vmem:[%s2710_s24 + $0x90] sm:$0xff]  }
 0x362   : > { %v2250_v61 = vpop.f32.mrf.mxu1 }
 0x363   : > { %v2106_v22 = vpack.c.bf16 %v2250_v61, %v2250_v61 }
 0x364   : > { %v967_v11 = vpop.f32.mrf.mxu1 }
 0x365   : > { %1085 = vst.msk [vmem:[%s3132_s29 + $0x18] sm:$0xf] %vm1078_vm9, %v2106_v22  ;;  %v2104_v18 = vpack.c.bf16 %v967_v11, %v967_v11 }
 0x366   : > { %v2251_v14 = vpop.f32.mrf.mxu1 }
 0x367   : > { %1083 = vst.msk [vmem:[%s3132_s29 + $0x10] sm:$0xf] %vm1078_vm9, %v2104_v18  ;;  %v2107_v36 = vpack.c.bf16 %v2251_v14, %v2251_v14 }
 0x368   : > { %v970_v15 = vpop.f32.mrf.mxu1 }
 0x369   : > { %1086 = vst.msk [vmem:[%s3132_s29 + $0x1c] sm:$0xf] %vm1078_vm9, %v2107_v36  ;;  %v2105_v17 = vpack.c.bf16 %v970_v15, %v970_v15 }
 0x36b   : > { %1084 = vst.msk [vmem:[%s3132_s29 + $0x14] sm:$0xf] %vm1078_vm9, %v2105_v17 }
 0x373   : > { %v2254_v52 = vpop.f32.mrf.mxu1 }
 0x374   : > { %v2110_v44 = vpack.c.bf16 %v2254_v52, %v2254_v52 }
 0x375   : > { %v983_v19 = vpop.f32.mrf.mxu1 }
 0x376   : > { %1089 = vst.msk [vmem:[%s3132_s29 + $0x28] sm:$0xf] %vm1078_vm9, %v2110_v44  ;;  %v2108_v43 = vpack.c.bf16 %v983_v19, %v983_v19 }
 0x377   : > { %v2255_v24 = vpop.f32.mrf.mxu1 }
 0x378   : > { %1087 = vst.msk [vmem:[%s3132_s29 + $0x20] sm:$0xf] %vm1078_vm9, %v2108_v43  ;;  %v2111_v25 = vpack.c.bf16 %v2255_v24, %v2255_v24 }
 0x379   : > { %v986_v9 = vpop.f32.mrf.mxu1 }
 0x37a   : > { %1090 = vst.msk [vmem:[%s3132_s29 + $0x2c] sm:$0xf] %vm1078_vm9, %v2111_v25  ;;  %v2109_v5 = vpack.c.bf16 %v986_v9, %v986_v9 }
 0x37b   : > { %v2258_v58 = vpop.f32.mrf.mxu1 }
 0x37c   : > { %1088 = vst.msk [vmem:[%s3132_s29 + $0x24] sm:$0xf] %vm1078_vm9, %v2109_v5  ;;  %v2114_v13 = vpack.c.bf16 %v2258_v58, %v2258_v58 }
 0x37d   : > { %v999_v26 = vpop.f32.mrf.mxu1 }
 0x37e   : > { %1093 = vst.msk [vmem:[%s3132_s29 + $0x38] sm:$0xf] %vm1078_vm9, %v2114_v13  ;;  %v2112_v2 = vpack.c.bf16 %v999_v26, %v999_v26 }
 0x37f   : > { %v2259_v30 = vpop.f32.mrf.mxu1 }
 0x380   : > { %1091 = vst.msk [vmem:[%s3132_s29 + $0x30] sm:$0xf] %vm1078_vm9, %v2112_v2  ;;  %v2115_v62 = vpack.c.bf16 %v2259_v30, %v2259_v30 }
 0x381   : > { %v1002_v45 = vpop.f32.mrf.mxu1 }
 0x382   : > { %1094 = vst.msk [vmem:[%s3132_s29 + $0x3c] sm:$0xf] %vm1078_vm9, %v2115_v62  ;;  %v2113_v35 = vpack.c.bf16 %v1002_v45, %v1002_v45 }
 0x383   : > { %v2278_v48 = vpop.f32.mrf.mxu1 }
 0x384   : > { %1092 = vst.msk [vmem:[%s3132_s29 + $0x34] sm:$0xf] %vm1078_vm9, %v2113_v35  ;;  %v1402_v60 = vsel %vm2781_vm4, %v2278_v48, -1e+30  ;;  %vm3433_vm4 = vnez %v3400_v37 }
 0x385   : > { %1420 = vmax.xlane.f32.xlu0 %v1402_v60  ;;  %v1337_v47 = vpop.f32.mrf.mxu1 }
 0x386   : > { %v1400_v49 = vsel %vm2789_vm6, %v1337_v47, -1e+30  ;;  %vm3434_vm6 = vnez %v3402_v39 }
 0x387   : > { %v2279_v40 = vpop.f32.mrf.mxu1 }
 0x388   : > { %v1403_v50 = vsel %vm2801_vm8, %v2279_v40, -1e+30  ;;  %vm3435_vm8 = vnez %v3404_v42  ;;  %v2427_v42 = vld [vmem:[%s2710_s24 + $0x98] sm:$0xff]  }
 0x389   : > { %1416 = vmax.xlane.f32.xlu0 %v1400_v49  ;;  %v1340_v34 = vpop.f32.mrf.mxu1 }
 0x38a   : > { %v1401_v41 = vsel %vm2815_vm10, %v1340_v34, -1e+30  ;;  %vm3436_vm10 = vnez %v3406_v46 }
 0x38b   : > { %1418 = vmax.xlane.f32.xlu1 %v1401_v41  ;;  %v2282_v38 = vpop.f32.mrf.mxu1 }
 0x38c   : > { %v1406_v1 = vsel %vm2827_vm11, %v2282_v38, -1e+30  ;;  %vm3437_vm11 = vnez %v3408_v51 }
 0x38d   : > { %1422 = vmax.xlane.f32.xlu0 %v1403_v50  ;;  %v1353_v31 = vpop.f32.mrf.mxu1 }
 0x38e   : > { %v1404_v55 = vsel %vm2852_vm2, %v1353_v31, -1e+30  ;;  %vm3439_vm2 = vnez %v3412_v0 }
 0x38f   : > { %v2283_v53 = vpop.f32.mrf.mxu1 }
 0x390   : > { %v3178_v4 = vsel %vm2845_vm14, %v2283_v53, -1e+30  ;;  %vm3438_vm14 = vnez %v3410_v59 }
 0x391   : > { %1428 = vmax.xlane.f32.xlu0 %v1406_v1  ;;  %1430 = vmax.xlane.f32.xlu1 %v3178_v4  ;;  %v1356_v12 = vpop.f32.mrf.mxu1 }
 0x392   : > { %v1405_v7 = vsel %vm2862_vm5, %v1356_v12, -1e+30  ;;  %vm1825_vm5 = vcmask 519424  }
 0x393   : > { %v2286_v54 = vpop.f32.mrf.mxu1 }
 0x394   : > { %v3187_v56 = vsel %vm2878_vm7, %v2286_v54, -1e+30 }
 0x395   : > { %1424 = vmax.xlane.f32.xlu0 %v1404_v55  ;;  %1426 = vmax.xlane.f32.xlu1 %v1405_v7  ;;  %v1369_v16 = vpop.f32.mrf.mxu1 }
 0x396   : > { %v3197_v63 = vsel %vm3434_vm6, %v1369_v16, -1e+30 }
 0x397   : > { %v2287_v21 = vpop.f32.mrf.mxu1 }
 0x398   : > { %v3191_v57 = vsel %vm3433_vm4, %v2287_v21, -1e+30 }
 0x399   : > { %1436 = vmax.xlane.f32.xlu0 %v3187_v56  ;;  %1438 = vmax.xlane.f32.xlu1 %v3191_v57  ;;  %v1372_v23 = vpop.f32.mrf.mxu1 }
 0x39a   : > { %v3201_v32 = vsel %vm3435_vm8, %v1372_v23, -1e+30 }
 0x39b   : > { %v2290_v27 = vpop.f32.mrf.mxu1 }
 0x39c   : > { %v3207_v37 = vsel %vm3436_vm10, %v2290_v27, -1e+30 }
 0x39d   : > { %1432 = vmax.xlane.f32.xlu0 %v3197_v63  ;;  %1434 = vmax.xlane.f32.xlu1 %v3201_v32  ;;  %v1385_v3 = vpop.f32.mrf.mxu1 }
 0x39e   : > { %v3212_v39 = vsel %vm3437_vm11, %v1385_v3, -1e+30 }
 0x39f   : > { %v2291_v20 = vpop.f32.mrf.mxu1 }
 0x3a0   : > { %v3221_v46 = vsel %vm3438_vm14, %v2291_v20, -1e+30  ;;  %v2430_v20 = vld [vmem:[%s2710_s24 + $0x88] sm:$0xff]  }
 0x3a1   : > { %1444 = vmax.xlane.f32.xlu0 %v3207_v37  ;;  %v1388_v8 = vpop.f32.mrf.mxu1 }
 0x3a2   : > { %v3226_v51 = vsel %vm3439_vm2, %v1388_v8, -1e+30 }
 0x3a5   : > { %1440 = vmax.xlane.f32.xlu0 %v3212_v39 }
 0x3ae   : > { %1614 = vrot.lane.b32.xlu1 %v2427_v42, %s2600_s25 }
 0x3bb   : > { %1616 = vrot.lane.b32.xlu0 %v2428_v6, %s2600_s25  ;;  %v2431_v6 = vld [vmem:[%s2710_s24 + $0x80] sm:$0xff]  }
 0x3d2   : > { %1446 = vmax.xlane.f32.xlu1 %v3221_v46 }
 0x3d6   : > { %1442 = vmax.xlane.f32.xlu1 %v3226_v51 }
 0x3e7   : > { %1612 = vrot.lane.b32.xlu1 %v2429_v29, %s2600_s25 }
 0x40e   : > { %v1421_v10 = vpop.xlane.xlu0 %1420 }
 0x40f   : > { %v1450_v33 = vsub.f32 %v1402_v60, %v1421_v10 }
 0x411   : > { %v1468_v28 = vmul.f32 1.442695, %v1450_v33 }
 0x412   : > { %v1417_v61 = vpop.xlane.xlu0 %1416 }
 0x413   : > { %2496 = vpow2.f32 %v1468_v28  ;;  %v1448_v59 = vsub.f32 %v1400_v49, %v1417_v61 }
 0x414   : > { %v1419_v22 = vpop.xlane.xlu1 %1418 }
 0x415   : > { %v1464_v11 = vmul.f32 1.442695, %v1448_v59  ;;  %v1449_v18 = vsub.f32 %v1401_v41, %v1419_v22 }
 0x416   : > { %v1423_v14 = vpop.xlane.xlu0 %1422 }
 0x417   : > { %2498 = vpow2.f32 %v1464_v11  ;;  %v1451_v36 = vsub.f32 %v1403_v50, %v1423_v14  ;;  %v1466_v15 = vmul.f32 1.442695, %v1449_v18 }
 0x419   : > { %v1470_v0 = vmul.f32 1.442695, %v1451_v36 }
 0x41a   : > { %v1429_v17 = vpop.xlane.xlu0 %1428  ;;  %v1431_v52 = vpop.xlane.xlu1 %1430 }
 0x41b   : > { %2500 = vpow2.f32 %v1470_v0  ;;  %v1454_v44 = vsub.f32 %v1406_v1, %v1429_v17  ;;  %v1455_v25 = vsub.f32 %v3178_v4, %v1431_v52 }
 0x41c   : > { %2502 = vpow2.f32 %v1466_v15 }
 0x41d   : > { %v1476_v19 = vmul.f32 1.442695, %v1454_v44  ;;  %v1478_v62 = vmul.f32 1.442695, %v1455_v25 }
 0x41e   : > { %v1425_v43 = vpop.xlane.xlu0 %1424  ;;  %v1427_v24 = vpop.xlane.xlu1 %1426 }
 0x41f   : > { %2504 = vpow2.f32 %v1476_v19  ;;  %v1452_v9 = vsub.f32 %v1404_v55, %v1425_v43  ;;  %v1453_v5 = vsub.f32 %v1405_v7, %v1427_v24 }
 0x420   : > { %v3232_v58 = vpop.eup %2496 }
 0x421   : > { %v1472_v13 = vmul.f32 1.442695, %v1452_v9  ;;  %v1474_v26 = vmul.f32 1.442695, %v1453_v5  ;;  %1500 = vadd.xlane.f32.xlu1 %v3232_v58 }
 0x422   : > { %v1437_v2 = vpop.xlane.xlu0 %1436  ;;  %v1439_v30 = vpop.xlane.xlu1 %1438 }
 0x423   : > { %2506 = vpow2.f32 %v1472_v13  ;;  %v1458_v45 = vsub.f32 %v3187_v56, %v1437_v2  ;;  %v1459_v60 = vsub.f32 %v3191_v57, %v1439_v30 }
 0x424   : > { %v3236_v35 = vpop.eup %2498  ;;  %2508 = vpow2.f32 %v1474_v26 }
 0x425   : > { %1496 = vadd.xlane.f32.xlu1 %v3236_v35  ;;  %v1484_v48 = vmul.f32 1.442695, %v1458_v45  ;;  %2510 = vpow2.f32 %v1478_v62  ;;  %v1486_v38 = vmul.f32 1.442695, %v1459_v60 }
 0x426   : > { %v1433_v47 = vpop.xlane.xlu0 %1432  ;;  %v1435_v49 = vpop.xlane.xlu1 %1434 }
 0x427   : > { %v1456_v40 = vsub.f32 %v3197_v63, %v1433_v47  ;;  %2512 = vpow2.f32 %v1484_v48  ;;  %v1457_v50 = vsub.f32 %v3201_v32, %v1435_v49 }
 0x428   : > { %v3241_v34 = vpop.eup %2500 }
 0x429   : > { %v1480_v41 = vmul.f32 1.442695, %v1456_v40  ;;  %1502 = vadd.xlane.f32.xlu1 %v3241_v34  ;;  %v3245_v1 = vpop.eup %2502  ;;  %v1482_v54 = vmul.f32 1.442695, %v1457_v50 }
 0x42a   : > { %v1445_v31 = vpop.xlane.xlu0 %1444  ;;  %v1615_v27 = vpop.permute.xlu1 %1614 }
 0x42b   : > { %2514 = vpow2.f32 %v1480_v41  ;;  %v1462_v53 = vsub.f32 %v3207_v37, %v1445_v31 }
 0x42c   : > { %v3248_v4 = vpop.eup %2504  ;;  %2516 = vpow2.f32 %v1486_v38 }
 0x42d   : > { %v1492_v12 = vmul.f32 1.442695, %v1462_v53  ;;  %1508 = vadd.xlane.f32.xlu0 %v3248_v4  ;;  %1498 = vadd.xlane.f32.xlu1 %v3245_v1 }
 0x42e   : > { %v1441_v55 = vpop.xlane.xlu0 %1440 }
 0x42f   : > { %2518 = vpow2.f32 %v1492_v12  ;;  %v1460_v7 = vsub.f32 %v3212_v39, %v1441_v55 }
 0x430   : > { %v3253_v16 = vpop.eup %2506  ;;  %2520 = vpow2.f32 %v1482_v54 }
 0x431   : > { %v3255_v56 = vpop.eup %2508  ;;  %v1488_v21 = vmul.f32 1.442695, %v1460_v7  ;;  %1504 = vadd.xlane.f32.xlu0 %v3253_v16 }
 0x432   : > { %1506 = vadd.xlane.f32.xlu1 %v3255_v56  ;;  %v1617_v57 = vpop.permute.xlu0 %1616  ;;  %v3259_v23 = vpop.eup %2510 }
 0x433   : > { %2522 = vpow2.f32 %v1488_v21  ;;  %2298 = vmatprep.subr.bf16.mxu0 %v1617_v57 }
 0x434   : > { %2299 = vmatpush3.bf16.msra.mxu0 %v1617_v57  ;;  %v3262_v63 = vpop.eup %2512 }
 0x435   : > { %1510 = vadd.xlane.f32.xlu0 %v3259_v23  ;;  %2300 = vmatprep.subr.bf16.mxu0 %v1615_v27 }
 0x438   : > { %v3264_v32 = vpop.eup %2514  ;;  %2301 = vmatpush3.bf16.msra.mxu0 %v1615_v27 }
 0x439   : > { %1516 = vadd.xlane.f32.xlu0 %v3262_v63  ;;  %1512 = vadd.xlane.f32.xlu1 %v3264_v32  ;;  %v3268_v37 = vpop.eup %2516 }
 0x43c   : > { %v3270_v3 = vpop.eup %2518 }
 0x43d   : > { %1524 = vadd.xlane.f32.xlu1 %v3270_v3  ;;  %1518 = vadd.xlane.f32.xlu0 %v3268_v37  ;;  %v3274_v39 = vpop.eup %2520 }
 0x440   : > { %v3276_v42 = vpop.eup %2522 }
 0x441   : > { %1520 = vadd.xlane.f32.xlu1 %v3276_v42  ;;  %1514 = vadd.xlane.f32.xlu0 %v3274_v39 }
 0x452   : > { %1608 = vrot.lane.b32.xlu1 %v2431_v6, %s2600_s25 }
 0x457   : > { %1610 = vrot.lane.b32.xlu0 %v2430_v20, %s2600_s25 }
 0x45b   : > { %v1447_v8 = vpop.xlane.xlu1 %1446 }
 0x45c   : > { %v1463_v28 = vsub.f32 %v3221_v46, %v1447_v8 }
 0x45e   : > { %v1494_v59 = vmul.f32 1.442695, %v1463_v28 }
 0x45f   : > { %v1443_v29 = vpop.xlane.xlu1 %1442 }
 0x460   : > { %v1461_v10 = vsub.f32 %v3226_v51, %v1443_v29 }
 0x462   : > { %v1490_v61 = vmul.f32 1.442695, %v1461_v10 }
 0x463   : > { %v1613_v33 = vpop.permute.xlu1 %1612 }
 0x464   : > { %2302 = vmatprep.subr.bf16.mxu0 %v1613_v33  ;;  %2524 = vpow2.f32 %v1490_v61 }
 0x465   : > { %2303 = vmatpush3.bf16.msra.mxu0 %v1613_v33  ;;  %2526 = vpow2.f32 %v1494_v59 }
 0x471   : > { %v3286_v22 = vpop.eup %2524 }
 0x472   : > { %v3289_v11 = vpop.eup %2526 }
 0x476   : > { %1522 = vadd.xlane.f32.xlu0 %v3286_v22 }
 0x47a   : > { %1526 = vadd.xlane.f32.xlu0 %v3289_v11 }
 0x4aa   : > { %v1501_v18 = vpop.xlane.xlu1 %1500 }
 0x4ae   : > { %v1497_v14 = vpop.xlane.xlu1 %1496 }
 0x4af   : > { %2528 = vrcp.f32 %v1497_v14 }
 0x4b2   : > { %v1503_v51 = vpop.xlane.xlu1 %1502 }
 0x4b6   : > { %v1509_v36 = vpop.xlane.xlu0 %1508  ;;  %v1499_v46 = vpop.xlane.xlu1 %1498 }
 0x4b7   : > { %2530 = vrcp.f32 %v1499_v46 }
 0x4b8   : > { %2532 = vrcp.f32 %v1503_v51 }
 0x4ba   : > { %v1505_v0 = vpop.xlane.xlu0 %1504 }
 0x4bb   : > { %v1507_v15 = vpop.xlane.xlu1 %1506  ;;  %2534 = vrcp.f32 %v1505_v0 }
 0x4bc   : > { %2536 = vrcp.f32 %v1507_v15  ;;  %v2529_v19 = vpop.eup %2528 }
 0x4bd   : > { %2538 = vrcp.f32 %v1501_v18  ;;  %v1544_v9 = vmul.f32 %v2529_v19, %v3236_v35 }
 0x4be   : > { %v1511_v17 = vpop.xlane.xlu0 %1510 }
 0x4bf   : > { %2540 = vrcp.f32 %v1511_v17 }
 0x4c0   : > { %2542 = vrcp.f32 %v1509_v36 }
 0x4c2   : > { %v1517_v52 = vpop.xlane.xlu0 %1516  ;;  %v1513_v44 = vpop.xlane.xlu1 %1512 }
 0x4c4   : > { %v2531_v43 = vpop.eup %2530 }
 0x4c5   : > { %v1545_v5 = vmul.f32 %v2531_v43, %v3245_v1  ;;  %v2533_v30 = vpop.eup %2532 }
 0x4c6   : > { %v1519_v24 = vpop.xlane.xlu0 %1518  ;;  %v1525_v25 = vpop.xlane.xlu1 %1524  ;;  %v1547_v35 = vmul.f32 %v2533_v30, %v3241_v34 }
 0x4c7   : > { %v1560_v13 = vpack.c.bf16 %v1545_v5, %v1544_v9 }
 0x4c8   : > { %v2535_v62 = vpop.eup %2534 }
 0x4c9   : > { %2308 = vmatprep.mubr.bf16.mxu0 %v1560_v13  ;;  %v2537_v60 = vpop.eup %2536  ;;  %v1548_v40 = vmul.f32 %v2535_v62, %v3253_v16 }
 0x4ca   : > { %v1515_v26 = vpop.xlane.xlu0 %1514  ;;  %v1521_v2 = vpop.xlane.xlu1 %1520  ;;  %v1549_v49 = vmul.f32 %v2537_v60, %v3255_v56 }
 0x4cb   : > { %2544 = vrcp.f32 %v1515_v26  ;;  %v2539_v47 = vpop.eup %2538 }
 0x4cc   : > { %2546 = vrcp.f32 %v1513_v44  ;;  %v1546_v41 = vmul.f32 %v2539_v47, %v3232_v58  ;;  %v2541_v50 = vpop.eup %2540  ;;  %v1562_v31 = vpack.c.bf16 %v1549_v49, %v1548_v40 }
 0x4cd   : > { %2548 = vrcp.f32 %v1519_v24  ;;  %v2543_v1 = vpop.eup %2542  ;;  %v1551_v54 = vmul.f32 %v2541_v50, %v3259_v23 }
 0x4ce   : > { %v1611_v45 = vpop.permute.xlu0 %1610  ;;  %v1609_v48 = vpop.permute.xlu1 %1608  ;;  %2550 = vrcp.f32 %v1517_v52  ;;  %v1561_v38 = vpack.c.bf16 %v1547_v35, %v1546_v41  ;;  %v1550_v55 = vmul.f32 %v2543_v1, %v3248_v4 }
 0x4cf   : > { %2304 = vmatprep.subr.bf16.mxu0 %v1611_v45  ;;  %2552 = vrcp.f32 %v1521_v2 }
 0x4d0   : > { %2305 = vmatpush3.bf16.msra.mxu0 %v1611_v45  ;;  %v1563_v16 = vpack.c.bf16 %v1551_v54, %v1550_v55 }
 0x4d1   : > { %2306 = vmatprep.subr.bf16.mxu0 %v1609_v48 }
 0x4d4   : > { %2307 = vmatpush3.bf16.msra.mxu0 %v1609_v48 }
 0x4d7   : > { %2309 = vmatmul.mubr.bf16.vlgmr.msra.gmra.mxu0 %v1561_v38 }
 0x4d8   : > { %v2545_v53 = vpop.eup %2544  ;;  %2312 = vmatprep.mubr.bf16.mxu0 %v1562_v31 }
 0x4d9   : > { %v2547_v12 = vpop.eup %2546  ;;  %v1553_v34 = vmul.f32 %v2545_v53, %v3274_v39 }
 0x4da   : > { %v1552_v7 = vmul.f32 %v2547_v12, %v3264_v32  ;;  %v2549_v56 = vpop.eup %2548 }
 0x4db   : > { %v2551_v21 = vpop.eup %2550  ;;  %v1555_v57 = vmul.f32 %v2549_v56, %v3268_v37 }
 0x4dc   : > { %v1564_v58 = vpack.c.bf16 %v1553_v34, %v1552_v7  ;;  %v1554_v27 = vmul.f32 %v2551_v21, %v3262_v63  ;;  %v2553_v4 = vpop.eup %2552 }
 0x4dd   : > { %v1556_v20 = vmul.f32 %v2553_v4, %v3276_v42 }
 0x4de   : > { %v1565_v6 = vpack.c.bf16 %v1555_v57, %v1554_v27 }
 0x4df   : > { %2313 = vmatmul.mubr.bf16.gmra.mxu0 %v1563_v16 }
 0x4e0   : > { %2316 = vmatprep.mubr.bf16.mxu0 %v1564_v58 }
 0x4e7   : > { %2317 = vmatmul.mubr.bf16.gmra.mxu0 %v1565_v6 }
 0x4ff   : > { %v1523_v23 = vpop.xlane.xlu0 %1522 }
 0x500   : > { %2554 = vrcp.f32 %v1523_v23 }
 0x501   : > { %2556 = vrcp.f32 %v1525_v25 }
 0x503   : > { %v1527_v39 = vpop.xlane.xlu0 %1526 }
 0x504   : > { %2558 = vrcp.f32 %v1527_v39 }
 0x50d   : > { %v2555_v32 = vpop.eup %2554 }
 0x50e   : > { %v1557_v8 = vmul.f32 %v2555_v32, %v3286_v22  ;;  %v2557_v29 = vpop.eup %2556 }
 0x50f   : > { %v1558_v63 = vmul.f32 %v2557_v29, %v3270_v3 }
 0x510   : > { %v1566_v10 = vpack.c.bf16 %v1557_v8, %v1556_v20 }
 0x511   : > { %v2559_v33 = vpop.eup %2558 }
 0x512   : > { %2320 = vmatprep.mubr.bf16.mxu0 %v1566_v10  ;;  %v1559_v37 = vmul.f32 %v2559_v33, %v3289_v11 }
 0x514   : > { %v1567_v28 = vpack.c.bf16 %v1559_v37, %v1558_v63 }
 0x516   : > { %2321 = vmatmul.mubr.bf16.gmra.mxu0 %v1567_v28 }
 0x597   : > { %v2310_v61 = vpop.f32.mrf.mxu0 }
 0x598   : > { %v2118_v59 = vpack.c.bf16 %v2310_v61, %v2310_v61 }
 0x599   : > { %v1666_v18 = vpop.f32.mrf.mxu0 }
 0x59a   : > { %v2116_v14 = vpack.c.bf16 %v1666_v18, %v1666_v18  ;;  %1781 = vrot.lane.b32.xlu1 %v2118_v59, %s2601_s30 }
 0x59b   : > { %v2311_v42 = vpop.f32.mrf.mxu0 }
 0x59c   : > { %v2119_v51 = vpack.c.bf16 %v2311_v42, %v2311_v42  ;;  %1777 = vrot.lane.b32.xlu0 %v2116_v14, %s2601_s30 }
 0x59d   : > { %v1669_v22 = vpop.f32.mrf.mxu0 }
 0x59e   : > { %1783 = vrot.lane.b32.xlu1 %v2119_v51, %s2601_s30  ;;  %v2117_v3 = vpack.c.bf16 %v1669_v22, %v1669_v22 }
 0x59f   : > { %v2314_v36 = vpop.f32.mrf.mxu0 }
 0x5a0   : > { %v2122_v46 = vpack.c.bf16 %v2314_v36, %v2314_v36 }
 0x5a1   : > { %v1682_v11 = vpop.f32.mrf.mxu0 }
 0x5a2   : > { %1779 = vrot.lane.b32.xlu1 %v2117_v3, %s2601_s30  ;;  %1789 = vrot.lane.b32.xlu0 %v2122_v46, %s2601_s30  ;;  %v2120_v15 = vpack.c.bf16 %v1682_v11, %v1682_v11 }
 0x5a3   : > { %v2315_v0 = vpop.f32.mrf.mxu0 }
 0x5a4   : > { %v2123_v17 = vpack.c.bf16 %v2315_v0, %v2315_v0 }
 0x5a5   : > { %v1685_v52 = vpop.f32.mrf.mxu0 }
 0x5a6   : > { %1785 = vrot.lane.b32.xlu0 %v2120_v15, %s2601_s30  ;;  %1791 = vrot.lane.b32.xlu1 %v2123_v17, %s2601_s30  ;;  %v2121_v19 = vpack.c.bf16 %v1685_v52, %v1685_v52 }
 0x5a7   : > { %v2318_v44 = vpop.f32.mrf.mxu0 }
 0x5a8   : > { %v2126_v43 = vpack.c.bf16 %v2318_v44, %v2318_v44 }
 0x5a9   : > { %v1698_v24 = vpop.f32.mrf.mxu0 }
 0x5aa   : > { %1787 = vrot.lane.b32.xlu1 %v2121_v19, %s2601_s30  ;;  %1797 = vrot.lane.b32.xlu0 %v2126_v43, %s2601_s30  ;;  %v2124_v9 = vpack.c.bf16 %v1698_v24, %v1698_v24 }
 0x5ab   : > { %v2319_v25 = vpop.f32.mrf.mxu0 }
 0x5ac   : > { %v2127_v5 = vpack.c.bf16 %v2319_v25, %v2319_v25 }
 0x5ad   : > { %v1701_v13 = vpop.f32.mrf.mxu0 }
 0x5ae   : > { %1793 = vrot.lane.b32.xlu0 %v2124_v9, %s2601_s30  ;;  %1799 = vrot.lane.b32.xlu1 %v2127_v5, %s2601_s30  ;;  %v2125_v26 = vpack.c.bf16 %v1701_v13, %v1701_v13 }
 0x5b2   : > { %1795 = vrot.lane.b32.xlu1 %v2125_v26, %s2601_s30 }
 0x5d6   : > { %v2322_v2 = vpop.f32.mrf.mxu0 }
 0x5d7   : > { %v2130_v60 = vpack.c.bf16 %v2322_v2, %v2322_v2 }
 0x5d8   : > { %v1714_v30 = vpop.f32.mrf.mxu0 }
 0x5d9   : > { %v2128_v62 = vpack.c.bf16 %v1714_v30, %v1714_v30 }
 0x5da   : > { %v2323_v45 = vpop.f32.mrf.mxu0 }
 0x5db   : > { %1801 = vrot.lane.b32.xlu0 %v2128_v62, %s2601_s30  ;;  %v2131_v35 = vpack.c.bf16 %v2323_v45, %v2323_v45 }
 0x5dc   : > { %v1717_v48 = vpop.f32.mrf.mxu0 }
 0x5dd   : > { %v2129_v47 = vpack.c.bf16 %v1717_v48, %v1717_v48 }
 0x5df   : > { %1805 = vrot.lane.b32.xlu0 %v2130_v60, %s2601_s30  ;;  %1803 = vrot.lane.b32.xlu1 %v2129_v47, %s2601_s30 }
 0x5e3   : > { %1807 = vrot.lane.b32.xlu1 %v2131_v35, %s2601_s30 }
 0x60c   : > { %v1782_v40 = vpop.permute.xlu1 %1781 }
 0x60d   : > { %1828 = vst.msk [vmem:[%s3132_s29 + $0x8] sm:$0xf] %vm1825_vm5, %v1782_v40 }
 0x60e   : > { %v1778_v49 = vpop.permute.xlu0 %1777 }
 0x60f   : > { %1826 = vst.msk [vmem:[%s3132_s29] sm:$0xf] %vm1825_vm5, %v1778_v49 }
 0x610   : > { %v1784_v41 = vpop.permute.xlu1 %1783 }
 0x611   : > { %1829 = vst.msk [vmem:[%s3132_s29 + $0xc] sm:$0xf] %vm1825_vm5, %v1784_v41 }
 0x614   : > { %v1780_v38 = vpop.permute.xlu1 %1779  ;;  %v1790_v50 = vpop.permute.xlu0 %1789 }
 0x615   : > { %1827 = vst.msk [vmem:[%s3132_s29 + $0x4] sm:$0xf] %vm1825_vm5, %v1780_v38  ;;  %1832 = vst.msk [vmem:[%s3132_s29 + $0x18] sm:$0xf] %vm1825_vm5, %v1790_v50 }
 0x618   : > { %v1786_v31 = vpop.permute.xlu0 %1785  ;;  %v1792_v1 = vpop.permute.xlu1 %1791 }
 0x619   : > { %1830 = vst.msk [vmem:[%s3132_s29 + $0x10] sm:$0xf] %vm1825_vm5, %v1786_v31  ;;  %1833 = vst.msk [vmem:[%s3132_s29 + $0x1c] sm:$0xf] %vm1825_vm5, %v1792_v1 }
 0x61c   : > { %v1788_v53 = vpop.permute.xlu1 %1787  ;;  %v1798_v12 = vpop.permute.xlu0 %1797 }
 0x61d   : > { %1831 = vst.msk [vmem:[%s3132_s29 + $0x14] sm:$0xf] %vm1825_vm5, %v1788_v53  ;;  %1836 = vst.msk [vmem:[%s3132_s29 + $0x28] sm:$0xf] %vm1825_vm5, %v1798_v12 }
 0x620   : > { %v1794_v54 = vpop.permute.xlu0 %1793  ;;  %v1800_v34 = vpop.permute.xlu1 %1799 }
 0x621   : > { %1834 = vst.msk [vmem:[%s3132_s29 + $0x20] sm:$0xf] %vm1825_vm5, %v1794_v54  ;;  %1837 = vst.msk [vmem:[%s3132_s29 + $0x2c] sm:$0xf] %vm1825_vm5, %v1800_v34 }
 0x624   : > { %v1796_v55 = vpop.permute.xlu1 %1795 }
 0x625   : > { %1835 = vst.msk [vmem:[%s3132_s29 + $0x24] sm:$0xf] %vm1825_vm5, %v1796_v55 }
 0x64d   : > { %v1802_v7 = vpop.permute.xlu0 %1801 }
 0x64e   : > { %1838 = vst.msk [vmem:[%s3132_s29 + $0x30] sm:$0xf] %vm1825_vm5, %v1802_v7 }
 0x651   : > { %v1806_v16 = vpop.permute.xlu0 %1805  ;;  %v1804_v56 = vpop.permute.xlu1 %1803 }
 0x652   : > { %1840 = vst.msk [vmem:[%s3132_s29 + $0x38] sm:$0xf] %vm1825_vm5, %v1806_v16  ;;  %1839 = vst.msk [vmem:[%s3132_s29 + $0x34] sm:$0xf] %vm1825_vm5, %v1804_v56 }
 0x655   : > { %v1808_v58 = vpop.permute.xlu1 %1807 }
 0x656   : > { %1841 = vst.msk [vmem:[%s3132_s29 + $0x3c] sm:$0xf] %vm1825_vm5, %v1808_v58 }
 0x657 PF: > { %s11_s10 = sadd.s32 1, %s2598_s10   ;;  %s3440_s6 = smov %s2586_s7 }
 0x658   : > { %p8_p10 = scmp.ge.s32.totalorder %s11_s10, 4   ;;  %s3441_s7 = smov %s2647_s14 }
 0x659   : > { %s3442_s8 = smov %s2594_s9  ;;  %s3443_s9 = smov %s3445_s11 }
 0x65a   :  { %10 = sbr.rel (!%p8_p10) target bundleno = 3 (0x3), region = 102 }

</bundles_post_ra>
